<compile_context>
chip_gen: v5e
topology: v5e:2x2
jax: 0.10.0
libtpu: 0.0.40
codegen_flags: <defaults>
</compile_context>

<pallas_src>
import math

import jax
import jax.numpy as jnp
from jax.experimental import pallas as pl
from jax.experimental.pallas import tpu as pltpu

KSIZE = 7
PAD = 3
LN_EPS = 1e-6
_INV_SQRT2 = 1.0 / math.sqrt(2.0)


# ---------------------------------------------------------------------------
# in-kernel helper
# ---------------------------------------------------------------------------
def _gelu_exact(x):
    # matches torch.nn.GELU() (erf form, approximate='none')
    return 0.5 * x * (1.0 + jax.lax.erf(x * _INV_SQRT2))


# ---------------------------------------------------------------------------
# fused Predictor kernel (one grid step per batch element, everything in VMEM)
# ---------------------------------------------------------------------------
def _make_predictor_kernel(n_stages, H, W, cm):
    Lc = W * cm

    def kernel(x_ref, bt_ref, mavg_ref, pshift_ref,
               tbot_ref, resw_ref, resb_ref, tblk_ref,
               lnw_ref, lnb_ref, pw1_ref, pw1b_ref, pw2_ref, pw2b_ref, gam_ref,
               out_ref):
        f32 = jnp.float32
        mavg = mavg_ref[...]                       # (Lc, Lc) group-mean matrix
        btv = bt_ref[0].astype(f32)                # (n_stages, Lc) time-emb + conv bias
        xv = x_ref[0].astype(f32)                  # (H, W*dim) lane-packed input

        def ln_mlp(v, s):
            # LayerNorm over the cm channels of each pixel (packed in lane groups),
            # pointwise MLP and layer-scale — all as lane-dense matmuls / VPU ops.
            mu = jnp.dot(v, mavg, preferred_element_type=f32)
            d = v - mu
            var = jnp.dot(d * d, mavg, preferred_element_type=f32)
            xn = d * jax.lax.rsqrt(var + LN_EPS)
            xn = xn * lnw_ref[s] + lnb_ref[s]
            h = jnp.dot(xn, pw1_ref[s], preferred_element_type=f32) + pw1b_ref[s]
            h = _gelu_exact(h)
            o = jnp.dot(h, pw2_ref[s], preferred_element_type=f32) + pw2b_ref[s]
            return o * gam_ref[s]

        def stencil_conv(v, tref, base):
            # 7x7 conv (grouped/depthwise folded into T): sum_dy (P_dy @ v) @ T_dy.
            # P_dy handles the row shift + zero row padding, T_dy handles the
            # column shift + zero column padding + per-channel weights.
            acc = jnp.zeros((H, Lc), f32)
            for dy in range(KSIZE):
                shifted = jnp.dot(pshift_ref[dy], v, preferred_element_type=f32)
                acc = acc + jnp.dot(shifted, tref[base + dy],
                                    preferred_element_type=f32)
            return acc

        # ---- stage 0: ConvNeXt_bottle (1x1-conv residual) ----
        conv = stencil_conv(xv, tbot_ref, 0) + btv[0:1, :]
        res = jnp.dot(xv, resw_ref[...], preferred_element_type=f32) + resb_ref[...]
        z = res + ln_mlp(conv, 0)

        # ---- stages 1..n_stages-1: ConvNeXt_block (identity residual) ----
        for s in range(1, n_stages):
            conv = stencil_conv(z, tblk_ref, (s - 1) * KSIZE) + btv[s:s + 1, :]
            z = z + ln_mlp(conv, s)

        out_ref[0] = z.astype(out_ref.dtype)       # dense 128-lane store

    return kernel


# ---------------------------------------------------------------------------
# wrapper: layout packing + weight expansion (kron(I_W, A)) + one pallas_call
# ---------------------------------------------------------------------------
def _tile_w(vec, W):
    v = jnp.asarray(vec, jnp.float32).reshape(-1)
    return jnp.tile(v, W).reshape(1, -1)           # lane w*C + c  ->  v[c]


def _conv_T_depthwise(dw_w, W, cm):
    # dw_w: (7, 7, cm) depthwise weights -> (7, W*cm, W*cm) transfer matrices
    Ts = []
    for dy in range(KSIZE):
        T = jnp.zeros((W * cm, W * cm), jnp.float32)
        for dx in range(KSIZE):
            E = jnp.eye(W, k=PAD - dx, dtype=jnp.float32)     # column shift + pad
            T = T + jnp.kron(E, jnp.diag(dw_w[dy, dx, :]))
        Ts.append(T)
    return jnp.stack(Ts, axis=0)


def _conv_T_grouped(dw_w0, dw_w1, W, dim, cm):
    # grouped conv (2 input channels per output channel) -> (7, W*dim, W*cm)
    eye_cm = jnp.eye(cm, dtype=jnp.float32)
    Ts = []
    for dy in range(KSIZE):
        T = jnp.zeros((W * dim, W * cm), jnp.float32)
        for dx in range(KSIZE):
            E = jnp.eye(W, k=PAD - dx, dtype=jnp.float32)
            A0 = dw_w0[dy, dx, :][:, None] * eye_cm           # input channel 2g
            A1 = dw_w1[dy, dx, :][:, None] * eye_cm           # input channel 2g+1
            A = jnp.stack([A0, A1], axis=1).reshape(dim, cm)  # row index = 2g+o
            T = T + jnp.kron(E, A)
        Ts.append(T)
    return jnp.stack(Ts, axis=0)


def _const_spec(a):
    nd = a.ndim
    return pl.BlockSpec(a.shape, lambda b, _nd=nd: (0,) * _nd)


def _batch_spec(a):
    nd = a.ndim
    return pl.BlockSpec((1,) + a.shape[1:],
                        lambda b, _nd=nd: (b,) + (0,) * (_nd - 1))


def predictor_forward(x, time_emb, params, n_t):
    """x: (B, T, C, H, W), time_emb: (B, T*C) -> (B, T//2, C, H, W)."""
    B, T, C, H, W = x.shape
    dim = T * C
    cm = dim // 2
    Lc = W * cm
    n_reg = max(n_t - 1, 0)          # mirrors `for i in range(1, N_T)` in the reference
    n_stages = 1 + n_reg

    # layout plumbing: NCHW -> lane-packed (B, H, W*dim), lane = w*dim + c_in
    x_packed = jnp.transpose(x.reshape(B, dim, H, W), (0, 2, 3, 1)).reshape(B, H, W * dim)

    pb = params['bottle']
    used_blocks = [params['blocks'][i] for i in range(n_reg)]
    stages = [pb] + used_blocks

    eyeW = jnp.eye(W, dtype=jnp.float32)

    # row-shift matrices (handle dy offset + zero row padding)
    pshift = jnp.stack([jnp.eye(H, k=dy - PAD, dtype=jnp.float32)
                        for dy in range(KSIZE)], axis=0)                 # (7, H, H)

    # expanded (lane-packed) weights
    mavg = jnp.kron(eyeW, jnp.full((cm, cm), 1.0 / cm, jnp.float32))     # (Lc, Lc)
    tbot = _conv_T_grouped(pb['dw_w0'], pb['dw_w1'], W, dim, cm)         # (7, W*dim, Lc)
    resw = jnp.kron(eyeW, pb['res_w'].astype(jnp.float32))               # (W*dim, Lc)
    resb = _tile_w(pb['res_b'], W)                                       # (1, Lc)
    if n_reg > 0:
        tblk = jnp.concatenate(
            [_conv_T_depthwise(blk['dw_w'], W, cm) for blk in used_blocks], axis=0)
    else:
        tblk = jnp.zeros((KSIZE, Lc, Lc), jnp.float32)                   # unused dummy

    lnw = jnp.stack([_tile_w(st['ln_w'], W) for st in stages])           # (S, 1, Lc)
    lnb = jnp.stack([_tile_w(st['ln_b'], W) for st in stages])
    gam = jnp.stack([_tile_w(st['gamma'], W) for st in stages])
    pw1 = jnp.stack([jnp.kron(eyeW, st['pw1_w'].astype(jnp.float32)) for st in stages])
    pw1b = jnp.stack([_tile_w(st['pw1_b'], W) for st in stages])
    pw2 = jnp.stack([jnp.kron(eyeW, st['pw2_w'].astype(jnp.float32)) for st in stages])
    pw2b = jnp.stack([_tile_w(st['pw2_b'], W) for st in stages])

    # hoisted time-embedding projection (+ conv bias), tiled over W: (B, S, Lc)
    temb_g = jax.nn.gelu(time_emb.astype(jnp.float32), approximate=False)
    bt = jnp.stack(
        [jnp.tile(temb_g @ st['mlp_w'] + st['mlp_b'] + st['dw_b'], (1, W))
         for st in stages], axis=1)

    kernel = _make_predictor_kernel(n_stages, H, W, cm)

    arrays = [x_packed, bt, mavg, pshift, tbot, resw, resb, tblk,
              lnw, lnb, pw1, pw1b, pw2, pw2b, gam]
    in_specs = ([_batch_spec(x_packed), _batch_spec(bt)]
                + [_const_spec(a) for a in arrays[2:]])

    out = pl.pallas_call(
        kernel,
        out_shape=jax.ShapeDtypeStruct((B, H, Lc), x.dtype),
        grid_spec=pltpu.PrefetchScalarGridSpec(
            num_scalar_prefetch=0,
            grid=(B,),
            in_specs=in_specs,
            out_specs=pl.BlockSpec((1, H, Lc), lambda b: (b, 0, 0))),
        compiler_params=pltpu.CompilerParams(
            dimension_semantics=("parallel",),
            vmem_limit_bytes=48 * 1024 * 1024),
    )(*arrays)

    # unpack lanes: (B, H, W*cm) -> (B, T//2, C, H, W)
    out_nchw = jnp.transpose(out.reshape(B, H, W, cm), (0, 3, 1, 2))
    return out_nchw.reshape(B, T // 2, C, H, W)


# ---------------------------------------------------------------------------
# deterministic parameter init (synthetic; shapes follow the module __init__)
# ---------------------------------------------------------------------------
class _KeyGen:
    def __init__(self, key):
        self._key = key

    def __call__(self):
        self._key, sub = jax.random.split(self._key)
        return sub


def _common_params(kg, dim, cm, hid):
    return dict(
        dw_b=jnp.zeros((1, cm), jnp.float32),
        mlp_w=0.02 * jax.random.normal(kg(), (dim, cm), jnp.float32),
        mlp_b=jnp.zeros((1, cm), jnp.float32),
        ln_w=jnp.ones((1, cm), jnp.float32),
        ln_b=jnp.zeros((1, cm), jnp.float32),
        pw1_w=0.02 * jax.random.normal(kg(), (cm, hid), jnp.float32),
        pw1_b=jnp.zeros((1, hid), jnp.float32),
        pw2_w=0.02 * jax.random.normal(kg(), (hid, cm), jnp.float32),
        pw2_b=jnp.zeros((1, cm), jnp.float32),
        gamma=1e-6 * jnp.ones((1, cm), jnp.float32),   # layer_scale_init_value
    )


def init_params(key, channel_in, n_t):
    dim = channel_in
    cm = dim // 2
    hid = 4 * dim
    kg = _KeyGen(key)

    bottle = _common_params(kg, dim, cm, hid)
    bottle.update(
        dw_w0=0.05 * jax.random.normal(kg(), (KSIZE, KSIZE, cm), jnp.float32),
        dw_w1=0.05 * jax.random.normal(kg(), (KSIZE, KSIZE, cm), jnp.float32),
        res_w=0.02 * jax.random.normal(kg(), (dim, cm), jnp.float32),
        res_b=jnp.zeros((1, cm), jnp.float32),
    )

    blocks = []
    for _ in range(n_t):   # N_T blocks constructed, as in __init__ (last one unused)
        blk = _common_params(kg, dim, cm, hid)
        blk.update(dw_w=0.05 * jax.random.normal(kg(), (KSIZE, KSIZE, cm),
                                                 jnp.float32))
        blocks.append(blk)

    return dict(bottle=bottle, blocks=blocks)


# ---------------------------------------------------------------------------
if __name__ == "__main__":
    B, T, C, H, W = 2, 4, 4, 16, 16
    N_T = 3
    channel_in = T * C          # 16
    channel_hid = 32            # unused by forward (as in the reference)

    key = jax.random.PRNGKey(0)
    kx, kt, kp = jax.random.split(key, 3)
    x = jax.random.normal(kx, (B, T, C, H, W), dtype=jnp.float32)
    time_emb = jax.random.normal(kt, (B, channel_in), dtype=jnp.float32)
    params = init_params(kp, channel_in, N_T)

    fwd = jax.jit(predictor_forward, static_argnums=(3,))
    y = fwd(x, time_emb, params, N_T)
    y = jax.block_until_ready(y)
    assert y.shape == (B, T // 2, C, H, W), y.shape
    assert bool(jnp.all(jnp.isfinite(y)))
    print("KERNEL_OK")
</pallas_src>

<mosaic_0001>
module attributes {stable_mosaic.version = 11 : i64} {
  func.func @kernel(%arg0: i32, %arg1: memref<1x16x256xf32, #tpu.memory_space<vmem>>, %arg2: memref<1x3x128xf32, #tpu.memory_space<vmem>>, %arg3: memref<128x128xf32, #tpu.memory_space<vmem>>, %arg4: memref<7x16x16xf32, #tpu.memory_space<vmem>>, %arg5: memref<7x256x128xf32, #tpu.memory_space<vmem>>, %arg6: memref<256x128xf32, #tpu.memory_space<vmem>>, %arg7: memref<1x128xf32, #tpu.memory_space<vmem>>, %arg8: memref<14x128x128xf32, #tpu.memory_space<vmem>>, %arg9: memref<3x1x128xf32, #tpu.memory_space<vmem>>, %arg10: memref<3x1x128xf32, #tpu.memory_space<vmem>>, %arg11: memref<3x128x1024xf32, #tpu.memory_space<vmem>>, %arg12: memref<3x1x1024xf32, #tpu.memory_space<vmem>>, %arg13: memref<3x1024x128xf32, #tpu.memory_space<vmem>>, %arg14: memref<3x1x128xf32, #tpu.memory_space<vmem>>, %arg15: memref<3x1x128xf32, #tpu.memory_space<vmem>>, %arg16: memref<1x16x128xf32, #tpu.memory_space<vmem>>) attributes {dimension_semantics = [#tpu.dimension_semantics<parallel>], iteration_bounds = array<i64: 2>, scalar_prefetch = 0 : i64, scratch_operands = 0 : i64, tpu.core_type = #tpu.core_type<tc>, window_params = [{transform_indices = @transform_0, window_bounds = array<i64: 1, 16, 256>}, {transform_indices = @transform_1, window_bounds = array<i64: 1, 3, 128>}, {pipeline_mode = #tpu.pipeline_mode<synchronous>, transform_indices = @transform_2, window_bounds = array<i64: 128, 128>}, {pipeline_mode = #tpu.pipeline_mode<synchronous>, transform_indices = @transform_3, window_bounds = array<i64: 7, 16, 16>}, {pipeline_mode = #tpu.pipeline_mode<synchronous>, transform_indices = @transform_4, window_bounds = array<i64: 7, 256, 128>}, {pipeline_mode = #tpu.pipeline_mode<synchronous>, transform_indices = @transform_5, window_bounds = array<i64: 256, 128>}, {pipeline_mode = #tpu.pipeline_mode<synchronous>, transform_indices = @transform_6, window_bounds = array<i64: 1, 128>}, {pipeline_mode = #tpu.pipeline_mode<synchronous>, transform_indices = @transform_7, window_bounds = array<i64: 14, 128, 128>}, {pipeline_mode = #tpu.pipeline_mode<synchronous>, transform_indices = @transform_8, window_bounds = array<i64: 3, 1, 128>}, {pipeline_mode = #tpu.pipeline_mode<synchronous>, transform_indices = @transform_9, window_bounds = array<i64: 3, 1, 128>}, {pipeline_mode = #tpu.pipeline_mode<synchronous>, transform_indices = @transform_10, window_bounds = array<i64: 3, 128, 1024>}, {pipeline_mode = #tpu.pipeline_mode<synchronous>, transform_indices = @transform_11, window_bounds = array<i64: 3, 1, 1024>}, {pipeline_mode = #tpu.pipeline_mode<synchronous>, transform_indices = @transform_12, window_bounds = array<i64: 3, 1024, 128>}, {pipeline_mode = #tpu.pipeline_mode<synchronous>, transform_indices = @transform_13, window_bounds = array<i64: 3, 1, 128>}, {pipeline_mode = #tpu.pipeline_mode<synchronous>, transform_indices = @transform_14, window_bounds = array<i64: 3, 1, 128>}, {transform_indices = @transform_15, window_bounds = array<i64: 1, 16, 128>}]} {
    %c0 = arith.constant 0 : index
    %c0_0 = arith.constant 0 : index
    %0 = vector.load %arg3[%c0, %c0_0] : memref<128x128xf32, #tpu.memory_space<vmem>>, vector<128x128xf32>
    %c0_1 = arith.constant 0 : index
    %c0_2 = arith.constant 0 : index
    %c0_3 = arith.constant 0 : index
    %1 = vector.load %arg2[%c0_1, %c0_2, %c0_3] : memref<1x3x128xf32, #tpu.memory_space<vmem>>, vector<1x3x128xf32>
    %2 = vector.shape_cast %1 : vector<1x3x128xf32> to vector<3x128xf32>
    %c0_4 = arith.constant 0 : index
    %c0_5 = arith.constant 0 : index
    %c0_6 = arith.constant 0 : index
    %3 = vector.load %arg1[%c0_4, %c0_5, %c0_6] : memref<1x16x256xf32, #tpu.memory_space<vmem>>, vector<1x16x256xf32>
    %4 = vector.shape_cast %3 : vector<1x16x256xf32> to vector<16x256xf32>
    %cst = arith.constant 0.000000e+00 : f32
    %5 = vector.broadcast %cst : f32 to vector<16x128xf32>
    %c0_7 = arith.constant 0 : index
    %c0_8 = arith.constant 0 : index
    %c0_9 = arith.constant 0 : index
    %6 = vector.load %arg4[%c0_7, %c0_8, %c0_9] : memref<7x16x16xf32, #tpu.memory_space<vmem>>, vector<1x16x16xf32>
    %7 = vector.shape_cast %6 : vector<1x16x16xf32> to vector<16x16xf32>
    %cst_10 = arith.constant dense<0.000000e+00> : vector<16x256xf32>
    %8 = tpu.matmul %7, %4, %cst_10 {dimension_numbers = #tpu.dot_dimension_numbers<[1], [0], [0], [1], [0, 0, 1, 1], [], []>} : vector<16x16xf32>, vector<16x256xf32>, vector<16x256xf32> -> vector<16x256xf32>
    %c0_11 = arith.constant 0 : index
    %c0_12 = arith.constant 0 : index
    %c0_13 = arith.constant 0 : index
    %9 = vector.load %arg5[%c0_11, %c0_12, %c0_13] : memref<7x256x128xf32, #tpu.memory_space<vmem>>, vector<1x256x128xf32>
    %10 = vector.shape_cast %9 : vector<1x256x128xf32> to vector<256x128xf32>
    %cst_14 = arith.constant dense<0.000000e+00> : vector<16x128xf32>
    %11 = tpu.matmul %8, %10, %cst_14 {dimension_numbers = #tpu.dot_dimension_numbers<[1], [0], [0], [1], [0, 0, 1, 1], [], []>} : vector<16x256xf32>, vector<256x128xf32>, vector<16x128xf32> -> vector<16x128xf32>
    %12 = arith.addf %5, %11 : vector<16x128xf32>
    %c1 = arith.constant 1 : index
    %c0_15 = arith.constant 0 : index
    %c0_16 = arith.constant 0 : index
    %13 = vector.load %arg4[%c1, %c0_15, %c0_16] : memref<7x16x16xf32, #tpu.memory_space<vmem>>, vector<1x16x16xf32>
    %14 = vector.shape_cast %13 : vector<1x16x16xf32> to vector<16x16xf32>
    %cst_17 = arith.constant dense<0.000000e+00> : vector<16x256xf32>
    %15 = tpu.matmul %14, %4, %cst_17 {dimension_numbers = #tpu.dot_dimension_numbers<[1], [0], [0], [1], [0, 0, 1, 1], [], []>} : vector<16x16xf32>, vector<16x256xf32>, vector<16x256xf32> -> vector<16x256xf32>
    %c1_18 = arith.constant 1 : index
    %c0_19 = arith.constant 0 : index
    %c0_20 = arith.constant 0 : index
    %16 = vector.load %arg5[%c1_18, %c0_19, %c0_20] : memref<7x256x128xf32, #tpu.memory_space<vmem>>, vector<1x256x128xf32>
    %17 = vector.shape_cast %16 : vector<1x256x128xf32> to vector<256x128xf32>
    %cst_21 = arith.constant dense<0.000000e+00> : vector<16x128xf32>
    %18 = tpu.matmul %15, %17, %cst_21 {dimension_numbers = #tpu.dot_dimension_numbers<[1], [0], [0], [1], [0, 0, 1, 1], [], []>} : vector<16x256xf32>, vector<256x128xf32>, vector<16x128xf32> -> vector<16x128xf32>
    %19 = arith.addf %12, %18 : vector<16x128xf32>
    %c2 = arith.constant 2 : index
    %c0_22 = arith.constant 0 : index
    %c0_23 = arith.constant 0 : index
    %20 = vector.load %arg4[%c2, %c0_22, %c0_23] : memref<7x16x16xf32, #tpu.memory_space<vmem>>, vector<1x16x16xf32>
    %21 = vector.shape_cast %20 : vector<1x16x16xf32> to vector<16x16xf32>
    %cst_24 = arith.constant dense<0.000000e+00> : vector<16x256xf32>
    %22 = tpu.matmul %21, %4, %cst_24 {dimension_numbers = #tpu.dot_dimension_numbers<[1], [0], [0], [1], [0, 0, 1, 1], [], []>} : vector<16x16xf32>, vector<16x256xf32>, vector<16x256xf32> -> vector<16x256xf32>
    %c2_25 = arith.constant 2 : index
    %c0_26 = arith.constant 0 : index
    %c0_27 = arith.constant 0 : index
    %23 = vector.load %arg5[%c2_25, %c0_26, %c0_27] : memref<7x256x128xf32, #tpu.memory_space<vmem>>, vector<1x256x128xf32>
    %24 = vector.shape_cast %23 : vector<1x256x128xf32> to vector<256x128xf32>
    %cst_28 = arith.constant dense<0.000000e+00> : vector<16x128xf32>
    %25 = tpu.matmul %22, %24, %cst_28 {dimension_numbers = #tpu.dot_dimension_numbers<[1], [0], [0], [1], [0, 0, 1, 1], [], []>} : vector<16x256xf32>, vector<256x128xf32>, vector<16x128xf32> -> vector<16x128xf32>
    %26 = arith.addf %19, %25 : vector<16x128xf32>
    %c3 = arith.constant 3 : index
    %c0_29 = arith.constant 0 : index
    %c0_30 = arith.constant 0 : index
    %27 = vector.load %arg4[%c3, %c0_29, %c0_30] : memref<7x16x16xf32, #tpu.memory_space<vmem>>, vector<1x16x16xf32>
    %28 = vector.shape_cast %27 : vector<1x16x16xf32> to vector<16x16xf32>
    %cst_31 = arith.constant dense<0.000000e+00> : vector<16x256xf32>
    %29 = tpu.matmul %28, %4, %cst_31 {dimension_numbers = #tpu.dot_dimension_numbers<[1], [0], [0], [1], [0, 0, 1, 1], [], []>} : vector<16x16xf32>, vector<16x256xf32>, vector<16x256xf32> -> vector<16x256xf32>
    %c3_32 = arith.constant 3 : index
    %c0_33 = arith.constant 0 : index
    %c0_34 = arith.constant 0 : index
    %30 = vector.load %arg5[%c3_32, %c0_33, %c0_34] : memref<7x256x128xf32, #tpu.memory_space<vmem>>, vector<1x256x128xf32>
    %31 = vector.shape_cast %30 : vector<1x256x128xf32> to vector<256x128xf32>
    %cst_35 = arith.constant dense<0.000000e+00> : vector<16x128xf32>
    %32 = tpu.matmul %29, %31, %cst_35 {dimension_numbers = #tpu.dot_dimension_numbers<[1], [0], [0], [1], [0, 0, 1, 1], [], []>} : vector<16x256xf32>, vector<256x128xf32>, vector<16x128xf32> -> vector<16x128xf32>
    %33 = arith.addf %26, %32 : vector<16x128xf32>
    %c4 = arith.constant 4 : index
    %c0_36 = arith.constant 0 : index
    %c0_37 = arith.constant 0 : index
    %34 = vector.load %arg4[%c4, %c0_36, %c0_37] : memref<7x16x16xf32, #tpu.memory_space<vmem>>, vector<1x16x16xf32>
    %35 = vector.shape_cast %34 : vector<1x16x16xf32> to vector<16x16xf32>
    %cst_38 = arith.constant dense<0.000000e+00> : vector<16x256xf32>
    %36 = tpu.matmul %35, %4, %cst_38 {dimension_numbers = #tpu.dot_dimension_numbers<[1], [0], [0], [1], [0, 0, 1, 1], [], []>} : vector<16x16xf32>, vector<16x256xf32>, vector<16x256xf32> -> vector<16x256xf32>
    %c4_39 = arith.constant 4 : index
    %c0_40 = arith.constant 0 : index
    %c0_41 = arith.constant 0 : index
    %37 = vector.load %arg5[%c4_39, %c0_40, %c0_41] : memref<7x256x128xf32, #tpu.memory_space<vmem>>, vector<1x256x128xf32>
    %38 = vector.shape_cast %37 : vector<1x256x128xf32> to vector<256x128xf32>
    %cst_42 = arith.constant dense<0.000000e+00> : vector<16x128xf32>
    %39 = tpu.matmul %36, %38, %cst_42 {dimension_numbers = #tpu.dot_dimension_numbers<[1], [0], [0], [1], [0, 0, 1, 1], [], []>} : vector<16x256xf32>, vector<256x128xf32>, vector<16x128xf32> -> vector<16x128xf32>
    %40 = arith.addf %33, %39 : vector<16x128xf32>
    %c5 = arith.constant 5 : index
    %c0_43 = arith.constant 0 : index
    %c0_44 = arith.constant 0 : index
    %41 = vector.load %arg4[%c5, %c0_43, %c0_44] : memref<7x16x16xf32, #tpu.memory_space<vmem>>, vector<1x16x16xf32>
    %42 = vector.shape_cast %41 : vector<1x16x16xf32> to vector<16x16xf32>
    %cst_45 = arith.constant dense<0.000000e+00> : vector<16x256xf32>
    %43 = tpu.matmul %42, %4, %cst_45 {dimension_numbers = #tpu.dot_dimension_numbers<[1], [0], [0], [1], [0, 0, 1, 1], [], []>} : vector<16x16xf32>, vector<16x256xf32>, vector<16x256xf32> -> vector<16x256xf32>
    %c5_46 = arith.constant 5 : index
    %c0_47 = arith.constant 0 : index
    %c0_48 = arith.constant 0 : index
    %44 = vector.load %arg5[%c5_46, %c0_47, %c0_48] : memref<7x256x128xf32, #tpu.memory_space<vmem>>, vector<1x256x128xf32>
    %45 = vector.shape_cast %44 : vector<1x256x128xf32> to vector<256x128xf32>
    %cst_49 = arith.constant dense<0.000000e+00> : vector<16x128xf32>
    %46 = tpu.matmul %43, %45, %cst_49 {dimension_numbers = #tpu.dot_dimension_numbers<[1], [0], [0], [1], [0, 0, 1, 1], [], []>} : vector<16x256xf32>, vector<256x128xf32>, vector<16x128xf32> -> vector<16x128xf32>
    %47 = arith.addf %40, %46 : vector<16x128xf32>
    %c6 = arith.constant 6 : index
    %c0_50 = arith.constant 0 : index
    %c0_51 = arith.constant 0 : index
    %48 = vector.load %arg4[%c6, %c0_50, %c0_51] : memref<7x16x16xf32, #tpu.memory_space<vmem>>, vector<1x16x16xf32>
    %49 = vector.shape_cast %48 : vector<1x16x16xf32> to vector<16x16xf32>
    %cst_52 = arith.constant dense<0.000000e+00> : vector<16x256xf32>
    %50 = tpu.matmul %49, %4, %cst_52 {dimension_numbers = #tpu.dot_dimension_numbers<[1], [0], [0], [1], [0, 0, 1, 1], [], []>} : vector<16x16xf32>, vector<16x256xf32>, vector<16x256xf32> -> vector<16x256xf32>
    %c6_53 = arith.constant 6 : index
    %c0_54 = arith.constant 0 : index
    %c0_55 = arith.constant 0 : index
    %51 = vector.load %arg5[%c6_53, %c0_54, %c0_55] : memref<7x256x128xf32, #tpu.memory_space<vmem>>, vector<1x256x128xf32>
    %52 = vector.shape_cast %51 : vector<1x256x128xf32> to vector<256x128xf32>
    %cst_56 = arith.constant dense<0.000000e+00> : vector<16x128xf32>
    %53 = tpu.matmul %50, %52, %cst_56 {dimension_numbers = #tpu.dot_dimension_numbers<[1], [0], [0], [1], [0, 0, 1, 1], [], []>} : vector<16x256xf32>, vector<256x128xf32>, vector<16x128xf32> -> vector<16x128xf32>
    %54 = arith.addf %47, %53 : vector<16x128xf32>
    %55 = vector.extract_strided_slice %2 {offsets = [0, 0], sizes = [1, 128], strides = [1, 1]} : vector<3x128xf32> to vector<1x128xf32>
    %56 = vector.broadcast %55 : vector<1x128xf32> to vector<16x128xf32>
    %57 = arith.addf %54, %56 : vector<16x128xf32>
    %c0_57 = arith.constant 0 : index
    %c0_58 = arith.constant 0 : index
    %58 = vector.load %arg6[%c0_57, %c0_58] : memref<256x128xf32, #tpu.memory_space<vmem>>, vector<256x128xf32>
    %cst_59 = arith.constant dense<0.000000e+00> : vector<16x128xf32>
    %59 = tpu.matmul %4, %58, %cst_59 {dimension_numbers = #tpu.dot_dimension_numbers<[1], [0], [0], [1], [0, 0, 1, 1], [], []>} : vector<16x256xf32>, vector<256x128xf32>, vector<16x128xf32> -> vector<16x128xf32>
    %c0_60 = arith.constant 0 : index
    %c0_61 = arith.constant 0 : index
    %60 = vector.load %arg7[%c0_60, %c0_61] : memref<1x128xf32, #tpu.memory_space<vmem>>, vector<1x128xf32>
    %61 = vector.broadcast %60 : vector<1x128xf32> to vector<16x128xf32>
    %62 = arith.addf %59, %61 : vector<16x128xf32>
    %cst_62 = arith.constant dense<0.000000e+00> : vector<16x128xf32>
    %63 = tpu.matmul %57, %0, %cst_62 {dimension_numbers = #tpu.dot_dimension_numbers<[1], [0], [0], [1], [0, 0, 1, 1], [], []>} : vector<16x128xf32>, vector<128x128xf32>, vector<16x128xf32> -> vector<16x128xf32>
    %64 = arith.subf %57, %63 : vector<16x128xf32>
    %65 = arith.mulf %64, %64 : vector<16x128xf32>
    %cst_63 = arith.constant dense<0.000000e+00> : vector<16x128xf32>
    %66 = tpu.matmul %65, %0, %cst_63 {dimension_numbers = #tpu.dot_dimension_numbers<[1], [0], [0], [1], [0, 0, 1, 1], [], []>} : vector<16x128xf32>, vector<128x128xf32>, vector<16x128xf32> -> vector<16x128xf32>
    %cst_64 = arith.constant 9.99999997E-7 : f32
    %67 = vector.broadcast %cst_64 : f32 to vector<16x128xf32>
    %68 = arith.addf %66, %67 : vector<16x128xf32>
    %69 = math.rsqrt %68 : vector<16x128xf32>
    %70 = arith.mulf %64, %69 : vector<16x128xf32>
    %c0_65 = arith.constant 0 : index
    %c0_66 = arith.constant 0 : index
    %c0_67 = arith.constant 0 : index
    %71 = vector.load %arg9[%c0_65, %c0_66, %c0_67] : memref<3x1x128xf32, #tpu.memory_space<vmem>>, vector<1x1x128xf32>
    %72 = vector.shape_cast %71 : vector<1x1x128xf32> to vector<1x128xf32>
    %73 = vector.broadcast %72 : vector<1x128xf32> to vector<16x128xf32>
    %74 = arith.mulf %70, %73 : vector<16x128xf32>
    %c0_68 = arith.constant 0 : index
    %c0_69 = arith.constant 0 : index
    %c0_70 = arith.constant 0 : index
    %75 = vector.load %arg10[%c0_68, %c0_69, %c0_70] : memref<3x1x128xf32, #tpu.memory_space<vmem>>, vector<1x1x128xf32>
    %76 = vector.shape_cast %75 : vector<1x1x128xf32> to vector<1x128xf32>
    %77 = vector.broadcast %76 : vector<1x128xf32> to vector<16x128xf32>
    %78 = arith.addf %74, %77 : vector<16x128xf32>
    %c0_71 = arith.constant 0 : index
    %c0_72 = arith.constant 0 : index
    %c0_73 = arith.constant 0 : index
    %79 = vector.load %arg11[%c0_71, %c0_72, %c0_73] : memref<3x128x1024xf32, #tpu.memory_space<vmem>>, vector<1x128x1024xf32>
    %80 = vector.shape_cast %79 : vector<1x128x1024xf32> to vector<128x1024xf32>
    %cst_74 = arith.constant dense<0.000000e+00> : vector<16x1024xf32>
    %81 = tpu.matmul %78, %80, %cst_74 {dimension_numbers = #tpu.dot_dimension_numbers<[1], [0], [0], [1], [0, 0, 1, 1], [], []>} : vector<16x128xf32>, vector<128x1024xf32>, vector<16x1024xf32> -> vector<16x1024xf32>
    %c0_75 = arith.constant 0 : index
    %c0_76 = arith.constant 0 : index
    %c0_77 = arith.constant 0 : index
    %82 = vector.load %arg12[%c0_75, %c0_76, %c0_77] : memref<3x1x1024xf32, #tpu.memory_space<vmem>>, vector<1x1x1024xf32>
    %83 = vector.shape_cast %82 : vector<1x1x1024xf32> to vector<1x1024xf32>
    %84 = vector.broadcast %83 : vector<1x1024xf32> to vector<16x1024xf32>
    %85 = arith.addf %81, %84 : vector<16x1024xf32>
    %cst_78 = arith.constant 5.000000e-01 : f32
    %86 = vector.broadcast %cst_78 : f32 to vector<16x1024xf32>
    %87 = arith.mulf %86, %85 : vector<16x1024xf32>
    %cst_79 = arith.constant 0.707106769 : f32
    %88 = vector.broadcast %cst_79 : f32 to vector<16x1024xf32>
    %89 = arith.mulf %85, %88 : vector<16x1024xf32>
    %90 = math.erf %89 : vector<16x1024xf32>
    %cst_80 = arith.constant 1.000000e+00 : f32
    %91 = vector.broadcast %cst_80 : f32 to vector<16x1024xf32>
    %92 = arith.addf %91, %90 : vector<16x1024xf32>
    %93 = arith.mulf %87, %92 : vector<16x1024xf32>
    %c0_81 = arith.constant 0 : index
    %c0_82 = arith.constant 0 : index
    %c0_83 = arith.constant 0 : index
    %94 = vector.load %arg13[%c0_81, %c0_82, %c0_83] : memref<3x1024x128xf32, #tpu.memory_space<vmem>>, vector<1x1024x128xf32>
    %95 = vector.shape_cast %94 : vector<1x1024x128xf32> to vector<1024x128xf32>
    %cst_84 = arith.constant dense<0.000000e+00> : vector<16x128xf32>
    %96 = tpu.matmul %93, %95, %cst_84 {dimension_numbers = #tpu.dot_dimension_numbers<[1], [0], [0], [1], [0, 0, 1, 1], [], []>} : vector<16x1024xf32>, vector<1024x128xf32>, vector<16x128xf32> -> vector<16x128xf32>
    %c0_85 = arith.constant 0 : index
    %c0_86 = arith.constant 0 : index
    %c0_87 = arith.constant 0 : index
    %97 = vector.load %arg14[%c0_85, %c0_86, %c0_87] : memref<3x1x128xf32, #tpu.memory_space<vmem>>, vector<1x1x128xf32>
    %98 = vector.shape_cast %97 : vector<1x1x128xf32> to vector<1x128xf32>
    %99 = vector.broadcast %98 : vector<1x128xf32> to vector<16x128xf32>
    %100 = arith.addf %96, %99 : vector<16x128xf32>
    %c0_88 = arith.constant 0 : index
    %c0_89 = arith.constant 0 : index
    %c0_90 = arith.constant 0 : index
    %101 = vector.load %arg15[%c0_88, %c0_89, %c0_90] : memref<3x1x128xf32, #tpu.memory_space<vmem>>, vector<1x1x128xf32>
    %102 = vector.shape_cast %101 : vector<1x1x128xf32> to vector<1x128xf32>
    %103 = vector.broadcast %102 : vector<1x128xf32> to vector<16x128xf32>
    %104 = arith.mulf %100, %103 : vector<16x128xf32>
    %105 = arith.addf %62, %104 : vector<16x128xf32>
    %cst_91 = arith.constant 0.000000e+00 : f32
    %106 = vector.broadcast %cst_91 : f32 to vector<16x128xf32>
    %c0_92 = arith.constant 0 : index
    %c0_93 = arith.constant 0 : index
    %c0_94 = arith.constant 0 : index
    %107 = vector.load %arg4[%c0_92, %c0_93, %c0_94] : memref<7x16x16xf32, #tpu.memory_space<vmem>>, vector<1x16x16xf32>
    %108 = vector.shape_cast %107 : vector<1x16x16xf32> to vector<16x16xf32>
    %cst_95 = arith.constant dense<0.000000e+00> : vector<16x128xf32>
    %109 = tpu.matmul %108, %105, %cst_95 {dimension_numbers = #tpu.dot_dimension_numbers<[1], [0], [0], [1], [0, 0, 1, 1], [], []>} : vector<16x16xf32>, vector<16x128xf32>, vector<16x128xf32> -> vector<16x128xf32>
    %c0_96 = arith.constant 0 : index
    %c0_97 = arith.constant 0 : index
    %c0_98 = arith.constant 0 : index
    %110 = vector.load %arg8[%c0_96, %c0_97, %c0_98] : memref<14x128x128xf32, #tpu.memory_space<vmem>>, vector<1x128x128xf32>
    %111 = vector.shape_cast %110 : vector<1x128x128xf32> to vector<128x128xf32>
    %cst_99 = arith.constant dense<0.000000e+00> : vector<16x128xf32>
    %112 = tpu.matmul %109, %111, %cst_99 {dimension_numbers = #tpu.dot_dimension_numbers<[1], [0], [0], [1], [0, 0, 1, 1], [], []>} : vector<16x128xf32>, vector<128x128xf32>, vector<16x128xf32> -> vector<16x128xf32>
    %113 = arith.addf %106, %112 : vector<16x128xf32>
    %c1_100 = arith.constant 1 : index
    %c0_101 = arith.constant 0 : index
    %c0_102 = arith.constant 0 : index
    %114 = vector.load %arg4[%c1_100, %c0_101, %c0_102] : memref<7x16x16xf32, #tpu.memory_space<vmem>>, vector<1x16x16xf32>
    %115 = vector.shape_cast %114 : vector<1x16x16xf32> to vector<16x16xf32>
    %cst_103 = arith.constant dense<0.000000e+00> : vector<16x128xf32>
    %116 = tpu.matmul %115, %105, %cst_103 {dimension_numbers = #tpu.dot_dimension_numbers<[1], [0], [0], [1], [0, 0, 1, 1], [], []>} : vector<16x16xf32>, vector<16x128xf32>, vector<16x128xf32> -> vector<16x128xf32>
    %c1_104 = arith.constant 1 : index
    %c0_105 = arith.constant 0 : index
    %c0_106 = arith.constant 0 : index
    %117 = vector.load %arg8[%c1_104, %c0_105, %c0_106] : memref<14x128x128xf32, #tpu.memory_space<vmem>>, vector<1x128x128xf32>
    %118 = vector.shape_cast %117 : vector<1x128x128xf32> to vector<128x128xf32>
    %cst_107 = arith.constant dense<0.000000e+00> : vector<16x128xf32>
    %119 = tpu.matmul %116, %118, %cst_107 {dimension_numbers = #tpu.dot_dimension_numbers<[1], [0], [0], [1], [0, 0, 1, 1], [], []>} : vector<16x128xf32>, vector<128x128xf32>, vector<16x128xf32> -> vector<16x128xf32>
    %120 = arith.addf %113, %119 : vector<16x128xf32>
    %c2_108 = arith.constant 2 : index
    %c0_109 = arith.constant 0 : index
    %c0_110 = arith.constant 0 : index
    %121 = vector.load %arg4[%c2_108, %c0_109, %c0_110] : memref<7x16x16xf32, #tpu.memory_space<vmem>>, vector<1x16x16xf32>
    %122 = vector.shape_cast %121 : vector<1x16x16xf32> to vector<16x16xf32>
    %cst_111 = arith.constant dense<0.000000e+00> : vector<16x128xf32>
    %123 = tpu.matmul %122, %105, %cst_111 {dimension_numbers = #tpu.dot_dimension_numbers<[1], [0], [0], [1], [0, 0, 1, 1], [], []>} : vector<16x16xf32>, vector<16x128xf32>, vector<16x128xf32> -> vector<16x128xf32>
    %c2_112 = arith.constant 2 : index
    %c0_113 = arith.constant 0 : index
    %c0_114 = arith.constant 0 : index
    %124 = vector.load %arg8[%c2_112, %c0_113, %c0_114] : memref<14x128x128xf32, #tpu.memory_space<vmem>>, vector<1x128x128xf32>
    %125 = vector.shape_cast %124 : vector<1x128x128xf32> to vector<128x128xf32>
    %cst_115 = arith.constant dense<0.000000e+00> : vector<16x128xf32>
    %126 = tpu.matmul %123, %125, %cst_115 {dimension_numbers = #tpu.dot_dimension_numbers<[1], [0], [0], [1], [0, 0, 1, 1], [], []>} : vector<16x128xf32>, vector<128x128xf32>, vector<16x128xf32> -> vector<16x128xf32>
    %127 = arith.addf %120, %126 : vector<16x128xf32>
    %c3_116 = arith.constant 3 : index
    %c0_117 = arith.constant 0 : index
    %c0_118 = arith.constant 0 : index
    %128 = vector.load %arg4[%c3_116, %c0_117, %c0_118] : memref<7x16x16xf32, #tpu.memory_space<vmem>>, vector<1x16x16xf32>
    %129 = vector.shape_cast %128 : vector<1x16x16xf32> to vector<16x16xf32>
    %cst_119 = arith.constant dense<0.000000e+00> : vector<16x128xf32>
    %130 = tpu.matmul %129, %105, %cst_119 {dimension_numbers = #tpu.dot_dimension_numbers<[1], [0], [0], [1], [0, 0, 1, 1], [], []>} : vector<16x16xf32>, vector<16x128xf32>, vector<16x128xf32> -> vector<16x128xf32>
    %c3_120 = arith.constant 3 : index
    %c0_121 = arith.constant 0 : index
    %c0_122 = arith.constant 0 : index
    %131 = vector.load %arg8[%c3_120, %c0_121, %c0_122] : memref<14x128x128xf32, #tpu.memory_space<vmem>>, vector<1x128x128xf32>
    %132 = vector.shape_cast %131 : vector<1x128x128xf32> to vector<128x128xf32>
    %cst_123 = arith.constant dense<0.000000e+00> : vector<16x128xf32>
    %133 = tpu.matmul %130, %132, %cst_123 {dimension_numbers = #tpu.dot_dimension_numbers<[1], [0], [0], [1], [0, 0, 1, 1], [], []>} : vector<16x128xf32>, vector<128x128xf32>, vector<16x128xf32> -> vector<16x128xf32>
    %134 = arith.addf %127, %133 : vector<16x128xf32>
    %c4_124 = arith.constant 4 : index
    %c0_125 = arith.constant 0 : index
    %c0_126 = arith.constant 0 : index
    %135 = vector.load %arg4[%c4_124, %c0_125, %c0_126] : memref<7x16x16xf32, #tpu.memory_space<vmem>>, vector<1x16x16xf32>
    %136 = vector.shape_cast %135 : vector<1x16x16xf32> to vector<16x16xf32>
    %cst_127 = arith.constant dense<0.000000e+00> : vector<16x128xf32>
    %137 = tpu.matmul %136, %105, %cst_127 {dimension_numbers = #tpu.dot_dimension_numbers<[1], [0], [0], [1], [0, 0, 1, 1], [], []>} : vector<16x16xf32>, vector<16x128xf32>, vector<16x128xf32> -> vector<16x128xf32>
    %c4_128 = arith.constant 4 : index
    %c0_129 = arith.constant 0 : index
    %c0_130 = arith.constant 0 : index
    %138 = vector.load %arg8[%c4_128, %c0_129, %c0_130] : memref<14x128x128xf32, #tpu.memory_space<vmem>>, vector<1x128x128xf32>
    %139 = vector.shape_cast %138 : vector<1x128x128xf32> to vector<128x128xf32>
    %cst_131 = arith.constant dense<0.000000e+00> : vector<16x128xf32>
    %140 = tpu.matmul %137, %139, %cst_131 {dimension_numbers = #tpu.dot_dimension_numbers<[1], [0], [0], [1], [0, 0, 1, 1], [], []>} : vector<16x128xf32>, vector<128x128xf32>, vector<16x128xf32> -> vector<16x128xf32>
    %141 = arith.addf %134, %140 : vector<16x128xf32>
    %c5_132 = arith.constant 5 : index
    %c0_133 = arith.constant 0 : index
    %c0_134 = arith.constant 0 : index
    %142 = vector.load %arg4[%c5_132, %c0_133, %c0_134] : memref<7x16x16xf32, #tpu.memory_space<vmem>>, vector<1x16x16xf32>
    %143 = vector.shape_cast %142 : vector<1x16x16xf32> to vector<16x16xf32>
    %cst_135 = arith.constant dense<0.000000e+00> : vector<16x128xf32>
    %144 = tpu.matmul %143, %105, %cst_135 {dimension_numbers = #tpu.dot_dimension_numbers<[1], [0], [0], [1], [0, 0, 1, 1], [], []>} : vector<16x16xf32>, vector<16x128xf32>, vector<16x128xf32> -> vector<16x128xf32>
    %c5_136 = arith.constant 5 : index
    %c0_137 = arith.constant 0 : index
    %c0_138 = arith.constant 0 : index
    %145 = vector.load %arg8[%c5_136, %c0_137, %c0_138] : memref<14x128x128xf32, #tpu.memory_space<vmem>>, vector<1x128x128xf32>
    %146 = vector.shape_cast %145 : vector<1x128x128xf32> to vector<128x128xf32>
    %cst_139 = arith.constant dense<0.000000e+00> : vector<16x128xf32>
    %147 = tpu.matmul %144, %146, %cst_139 {dimension_numbers = #tpu.dot_dimension_numbers<[1], [0], [0], [1], [0, 0, 1, 1], [], []>} : vector<16x128xf32>, vector<128x128xf32>, vector<16x128xf32> -> vector<16x128xf32>
    %148 = arith.addf %141, %147 : vector<16x128xf32>
    %c6_140 = arith.constant 6 : index
    %c0_141 = arith.constant 0 : index
    %c0_142 = arith.constant 0 : index
    %149 = vector.load %arg4[%c6_140, %c0_141, %c0_142] : memref<7x16x16xf32, #tpu.memory_space<vmem>>, vector<1x16x16xf32>
    %150 = vector.shape_cast %149 : vector<1x16x16xf32> to vector<16x16xf32>
    %cst_143 = arith.constant dense<0.000000e+00> : vector<16x128xf32>
    %151 = tpu.matmul %150, %105, %cst_143 {dimension_numbers = #tpu.dot_dimension_numbers<[1], [0], [0], [1], [0, 0, 1, 1], [], []>} : vector<16x16xf32>, vector<16x128xf32>, vector<16x128xf32> -> vector<16x128xf32>
    %c6_144 = arith.constant 6 : index
    %c0_145 = arith.constant 0 : index
    %c0_146 = arith.constant 0 : index
    %152 = vector.load %arg8[%c6_144, %c0_145, %c0_146] : memref<14x128x128xf32, #tpu.memory_space<vmem>>, vector<1x128x128xf32>
    %153 = vector.shape_cast %152 : vector<1x128x128xf32> to vector<128x128xf32>
    %cst_147 = arith.constant dense<0.000000e+00> : vector<16x128xf32>
    %154 = tpu.matmul %151, %153, %cst_147 {dimension_numbers = #tpu.dot_dimension_numbers<[1], [0], [0], [1], [0, 0, 1, 1], [], []>} : vector<16x128xf32>, vector<128x128xf32>, vector<16x128xf32> -> vector<16x128xf32>
    %155 = arith.addf %148, %154 : vector<16x128xf32>
    %156 = vector.extract_strided_slice %2 {offsets = [1, 0], sizes = [1, 128], strides = [1, 1]} : vector<3x128xf32> to vector<1x128xf32>
    %157 = vector.broadcast %156 : vector<1x128xf32> to vector<16x128xf32>
    %158 = arith.addf %155, %157 : vector<16x128xf32>
    %cst_148 = arith.constant dense<0.000000e+00> : vector<16x128xf32>
    %159 = tpu.matmul %158, %0, %cst_148 {dimension_numbers = #tpu.dot_dimension_numbers<[1], [0], [0], [1], [0, 0, 1, 1], [], []>} : vector<16x128xf32>, vector<128x128xf32>, vector<16x128xf32> -> vector<16x128xf32>
    %160 = arith.subf %158, %159 : vector<16x128xf32>
    %161 = arith.mulf %160, %160 : vector<16x128xf32>
    %cst_149 = arith.constant dense<0.000000e+00> : vector<16x128xf32>
    %162 = tpu.matmul %161, %0, %cst_149 {dimension_numbers = #tpu.dot_dimension_numbers<[1], [0], [0], [1], [0, 0, 1, 1], [], []>} : vector<16x128xf32>, vector<128x128xf32>, vector<16x128xf32> -> vector<16x128xf32>
    %cst_150 = arith.constant 9.99999997E-7 : f32
    %163 = vector.broadcast %cst_150 : f32 to vector<16x128xf32>
    %164 = arith.addf %162, %163 : vector<16x128xf32>
    %165 = math.rsqrt %164 : vector<16x128xf32>
    %166 = arith.mulf %160, %165 : vector<16x128xf32>
    %c1_151 = arith.constant 1 : index
    %c0_152 = arith.constant 0 : index
    %c0_153 = arith.constant 0 : index
    %167 = vector.load %arg9[%c1_151, %c0_152, %c0_153] : memref<3x1x128xf32, #tpu.memory_space<vmem>>, vector<1x1x128xf32>
    %168 = vector.shape_cast %167 : vector<1x1x128xf32> to vector<1x128xf32>
    %169 = vector.broadcast %168 : vector<1x128xf32> to vector<16x128xf32>
    %170 = arith.mulf %166, %169 : vector<16x128xf32>
    %c1_154 = arith.constant 1 : index
    %c0_155 = arith.constant 0 : index
    %c0_156 = arith.constant 0 : index
    %171 = vector.load %arg10[%c1_154, %c0_155, %c0_156] : memref<3x1x128xf32, #tpu.memory_space<vmem>>, vector<1x1x128xf32>
    %172 = vector.shape_cast %171 : vector<1x1x128xf32> to vector<1x128xf32>
    %173 = vector.broadcast %172 : vector<1x128xf32> to vector<16x128xf32>
    %174 = arith.addf %170, %173 : vector<16x128xf32>
    %c1_157 = arith.constant 1 : index
    %c0_158 = arith.constant 0 : index
    %c0_159 = arith.constant 0 : index
    %175 = vector.load %arg11[%c1_157, %c0_158, %c0_159] : memref<3x128x1024xf32, #tpu.memory_space<vmem>>, vector<1x128x1024xf32>
    %176 = vector.shape_cast %175 : vector<1x128x1024xf32> to vector<128x1024xf32>
    %cst_160 = arith.constant dense<0.000000e+00> : vector<16x1024xf32>
    %177 = tpu.matmul %174, %176, %cst_160 {dimension_numbers = #tpu.dot_dimension_numbers<[1], [0], [0], [1], [0, 0, 1, 1], [], []>} : vector<16x128xf32>, vector<128x1024xf32>, vector<16x1024xf32> -> vector<16x1024xf32>
    %c1_161 = arith.constant 1 : index
    %c0_162 = arith.constant 0 : index
    %c0_163 = arith.constant 0 : index
    %178 = vector.load %arg12[%c1_161, %c0_162, %c0_163] : memref<3x1x1024xf32, #tpu.memory_space<vmem>>, vector<1x1x1024xf32>
    %179 = vector.shape_cast %178 : vector<1x1x1024xf32> to vector<1x1024xf32>
    %180 = vector.broadcast %179 : vector<1x1024xf32> to vector<16x1024xf32>
    %181 = arith.addf %177, %180 : vector<16x1024xf32>
    %cst_164 = arith.constant 5.000000e-01 : f32
    %182 = vector.broadcast %cst_164 : f32 to vector<16x1024xf32>
    %183 = arith.mulf %182, %181 : vector<16x1024xf32>
    %cst_165 = arith.constant 0.707106769 : f32
    %184 = vector.broadcast %cst_165 : f32 to vector<16x1024xf32>
    %185 = arith.mulf %181, %184 : vector<16x1024xf32>
    %186 = math.erf %185 : vector<16x1024xf32>
    %cst_166 = arith.constant 1.000000e+00 : f32
    %187 = vector.broadcast %cst_166 : f32 to vector<16x1024xf32>
    %188 = arith.addf %187, %186 : vector<16x1024xf32>
    %189 = arith.mulf %183, %188 : vector<16x1024xf32>
    %c1_167 = arith.constant 1 : index
    %c0_168 = arith.constant 0 : index
    %c0_169 = arith.constant 0 : index
    %190 = vector.load %arg13[%c1_167, %c0_168, %c0_169] : memref<3x1024x128xf32, #tpu.memory_space<vmem>>, vector<1x1024x128xf32>
    %191 = vector.shape_cast %190 : vector<1x1024x128xf32> to vector<1024x128xf32>
    %cst_170 = arith.constant dense<0.000000e+00> : vector<16x128xf32>
    %192 = tpu.matmul %189, %191, %cst_170 {dimension_numbers = #tpu.dot_dimension_numbers<[1], [0], [0], [1], [0, 0, 1, 1], [], []>} : vector<16x1024xf32>, vector<1024x128xf32>, vector<16x128xf32> -> vector<16x128xf32>
    %c1_171 = arith.constant 1 : index
    %c0_172 = arith.constant 0 : index
    %c0_173 = arith.constant 0 : index
    %193 = vector.load %arg14[%c1_171, %c0_172, %c0_173] : memref<3x1x128xf32, #tpu.memory_space<vmem>>, vector<1x1x128xf32>
    %194 = vector.shape_cast %193 : vector<1x1x128xf32> to vector<1x128xf32>
    %195 = vector.broadcast %194 : vector<1x128xf32> to vector<16x128xf32>
    %196 = arith.addf %192, %195 : vector<16x128xf32>
    %c1_174 = arith.constant 1 : index
    %c0_175 = arith.constant 0 : index
    %c0_176 = arith.constant 0 : index
    %197 = vector.load %arg15[%c1_174, %c0_175, %c0_176] : memref<3x1x128xf32, #tpu.memory_space<vmem>>, vector<1x1x128xf32>
    %198 = vector.shape_cast %197 : vector<1x1x128xf32> to vector<1x128xf32>
    %199 = vector.broadcast %198 : vector<1x128xf32> to vector<16x128xf32>
    %200 = arith.mulf %196, %199 : vector<16x128xf32>
    %201 = arith.addf %105, %200 : vector<16x128xf32>
    %cst_177 = arith.constant 0.000000e+00 : f32
    %202 = vector.broadcast %cst_177 : f32 to vector<16x128xf32>
    %c0_178 = arith.constant 0 : index
    %c0_179 = arith.constant 0 : index
    %c0_180 = arith.constant 0 : index
    %203 = vector.load %arg4[%c0_178, %c0_179, %c0_180] : memref<7x16x16xf32, #tpu.memory_space<vmem>>, vector<1x16x16xf32>
    %204 = vector.shape_cast %203 : vector<1x16x16xf32> to vector<16x16xf32>
    %cst_181 = arith.constant dense<0.000000e+00> : vector<16x128xf32>
    %205 = tpu.matmul %204, %201, %cst_181 {dimension_numbers = #tpu.dot_dimension_numbers<[1], [0], [0], [1], [0, 0, 1, 1], [], []>} : vector<16x16xf32>, vector<16x128xf32>, vector<16x128xf32> -> vector<16x128xf32>
    %c7 = arith.constant 7 : index
    %c0_182 = arith.constant 0 : index
    %c0_183 = arith.constant 0 : index
    %206 = vector.load %arg8[%c7, %c0_182, %c0_183] : memref<14x128x128xf32, #tpu.memory_space<vmem>>, vector<1x128x128xf32>
    %207 = vector.shape_cast %206 : vector<1x128x128xf32> to vector<128x128xf32>
    %cst_184 = arith.constant dense<0.000000e+00> : vector<16x128xf32>
    %208 = tpu.matmul %205, %207, %cst_184 {dimension_numbers = #tpu.dot_dimension_numbers<[1], [0], [0], [1], [0, 0, 1, 1], [], []>} : vector<16x128xf32>, vector<128x128xf32>, vector<16x128xf32> -> vector<16x128xf32>
    %209 = arith.addf %202, %208 : vector<16x128xf32>
    %c1_185 = arith.constant 1 : index
    %c0_186 = arith.constant 0 : index
    %c0_187 = arith.constant 0 : index
    %210 = vector.load %arg4[%c1_185, %c0_186, %c0_187] : memref<7x16x16xf32, #tpu.memory_space<vmem>>, vector<1x16x16xf32>
    %211 = vector.shape_cast %210 : vector<1x16x16xf32> to vector<16x16xf32>
    %cst_188 = arith.constant dense<0.000000e+00> : vector<16x128xf32>
    %212 = tpu.matmul %211, %201, %cst_188 {dimension_numbers = #tpu.dot_dimension_numbers<[1], [0], [0], [1], [0, 0, 1, 1], [], []>} : vector<16x16xf32>, vector<16x128xf32>, vector<16x128xf32> -> vector<16x128xf32>
    %c8 = arith.constant 8 : index
    %c0_189 = arith.constant 0 : index
    %c0_190 = arith.constant 0 : index
    %213 = vector.load %arg8[%c8, %c0_189, %c0_190] : memref<14x128x128xf32, #tpu.memory_space<vmem>>, vector<1x128x128xf32>
    %214 = vector.shape_cast %213 : vector<1x128x128xf32> to vector<128x128xf32>
    %cst_191 = arith.constant dense<0.000000e+00> : vector<16x128xf32>
    %215 = tpu.matmul %212, %214, %cst_191 {dimension_numbers = #tpu.dot_dimension_numbers<[1], [0], [0], [1], [0, 0, 1, 1], [], []>} : vector<16x128xf32>, vector<128x128xf32>, vector<16x128xf32> -> vector<16x128xf32>
    %216 = arith.addf %209, %215 : vector<16x128xf32>
    %c2_192 = arith.constant 2 : index
    %c0_193 = arith.constant 0 : index
    %c0_194 = arith.constant 0 : index
    %217 = vector.load %arg4[%c2_192, %c0_193, %c0_194] : memref<7x16x16xf32, #tpu.memory_space<vmem>>, vector<1x16x16xf32>
    %218 = vector.shape_cast %217 : vector<1x16x16xf32> to vector<16x16xf32>
    %cst_195 = arith.constant dense<0.000000e+00> : vector<16x128xf32>
    %219 = tpu.matmul %218, %201, %cst_195 {dimension_numbers = #tpu.dot_dimension_numbers<[1], [0], [0], [1], [0, 0, 1, 1], [], []>} : vector<16x16xf32>, vector<16x128xf32>, vector<16x128xf32> -> vector<16x128xf32>
    %c9 = arith.constant 9 : index
    %c0_196 = arith.constant 0 : index
    %c0_197 = arith.constant 0 : index
    %220 = vector.load %arg8[%c9, %c0_196, %c0_197] : memref<14x128x128xf32, #tpu.memory_space<vmem>>, vector<1x128x128xf32>
    %221 = vector.shape_cast %220 : vector<1x128x128xf32> to vector<128x128xf32>
    %cst_198 = arith.constant dense<0.000000e+00> : vector<16x128xf32>
    %222 = tpu.matmul %219, %221, %cst_198 {dimension_numbers = #tpu.dot_dimension_numbers<[1], [0], [0], [1], [0, 0, 1, 1], [], []>} : vector<16x128xf32>, vector<128x128xf32>, vector<16x128xf32> -> vector<16x128xf32>
    %223 = arith.addf %216, %222 : vector<16x128xf32>
    %c3_199 = arith.constant 3 : index
    %c0_200 = arith.constant 0 : index
    %c0_201 = arith.constant 0 : index
    %224 = vector.load %arg4[%c3_199, %c0_200, %c0_201] : memref<7x16x16xf32, #tpu.memory_space<vmem>>, vector<1x16x16xf32>
    %225 = vector.shape_cast %224 : vector<1x16x16xf32> to vector<16x16xf32>
    %cst_202 = arith.constant dense<0.000000e+00> : vector<16x128xf32>
    %226 = tpu.matmul %225, %201, %cst_202 {dimension_numbers = #tpu.dot_dimension_numbers<[1], [0], [0], [1], [0, 0, 1, 1], [], []>} : vector<16x16xf32>, vector<16x128xf32>, vector<16x128xf32> -> vector<16x128xf32>
    %c10 = arith.constant 10 : index
    %c0_203 = arith.constant 0 : index
    %c0_204 = arith.constant 0 : index
    %227 = vector.load %arg8[%c10, %c0_203, %c0_204] : memref<14x128x128xf32, #tpu.memory_space<vmem>>, vector<1x128x128xf32>
    %228 = vector.shape_cast %227 : vector<1x128x128xf32> to vector<128x128xf32>
    %cst_205 = arith.constant dense<0.000000e+00> : vector<16x128xf32>
    %229 = tpu.matmul %226, %228, %cst_205 {dimension_numbers = #tpu.dot_dimension_numbers<[1], [0], [0], [1], [0, 0, 1, 1], [], []>} : vector<16x128xf32>, vector<128x128xf32>, vector<16x128xf32> -> vector<16x128xf32>
    %230 = arith.addf %223, %229 : vector<16x128xf32>
    %c4_206 = arith.constant 4 : index
    %c0_207 = arith.constant 0 : index
    %c0_208 = arith.constant 0 : index
    %231 = vector.load %arg4[%c4_206, %c0_207, %c0_208] : memref<7x16x16xf32, #tpu.memory_space<vmem>>, vector<1x16x16xf32>
    %232 = vector.shape_cast %231 : vector<1x16x16xf32> to vector<16x16xf32>
    %cst_209 = arith.constant dense<0.000000e+00> : vector<16x128xf32>
    %233 = tpu.matmul %232, %201, %cst_209 {dimension_numbers = #tpu.dot_dimension_numbers<[1], [0], [0], [1], [0, 0, 1, 1], [], []>} : vector<16x16xf32>, vector<16x128xf32>, vector<16x128xf32> -> vector<16x128xf32>
    %c11 = arith.constant 11 : index
    %c0_210 = arith.constant 0 : index
    %c0_211 = arith.constant 0 : index
    %234 = vector.load %arg8[%c11, %c0_210, %c0_211] : memref<14x128x128xf32, #tpu.memory_space<vmem>>, vector<1x128x128xf32>
    %235 = vector.shape_cast %234 : vector<1x128x128xf32> to vector<128x128xf32>
    %cst_212 = arith.constant dense<0.000000e+00> : vector<16x128xf32>
    %236 = tpu.matmul %233, %235, %cst_212 {dimension_numbers = #tpu.dot_dimension_numbers<[1], [0], [0], [1], [0, 0, 1, 1], [], []>} : vector<16x128xf32>, vector<128x128xf32>, vector<16x128xf32> -> vector<16x128xf32>
    %237 = arith.addf %230, %236 : vector<16x128xf32>
    %c5_213 = arith.constant 5 : index
    %c0_214 = arith.constant 0 : index
    %c0_215 = arith.constant 0 : index
    %238 = vector.load %arg4[%c5_213, %c0_214, %c0_215] : memref<7x16x16xf32, #tpu.memory_space<vmem>>, vector<1x16x16xf32>
    %239 = vector.shape_cast %238 : vector<1x16x16xf32> to vector<16x16xf32>
    %cst_216 = arith.constant dense<0.000000e+00> : vector<16x128xf32>
    %240 = tpu.matmul %239, %201, %cst_216 {dimension_numbers = #tpu.dot_dimension_numbers<[1], [0], [0], [1], [0, 0, 1, 1], [], []>} : vector<16x16xf32>, vector<16x128xf32>, vector<16x128xf32> -> vector<16x128xf32>
    %c12 = arith.constant 12 : index
    %c0_217 = arith.constant 0 : index
    %c0_218 = arith.constant 0 : index
    %241 = vector.load %arg8[%c12, %c0_217, %c0_218] : memref<14x128x128xf32, #tpu.memory_space<vmem>>, vector<1x128x128xf32>
    %242 = vector.shape_cast %241 : vector<1x128x128xf32> to vector<128x128xf32>
    %cst_219 = arith.constant dense<0.000000e+00> : vector<16x128xf32>
    %243 = tpu.matmul %240, %242, %cst_219 {dimension_numbers = #tpu.dot_dimension_numbers<[1], [0], [0], [1], [0, 0, 1, 1], [], []>} : vector<16x128xf32>, vector<128x128xf32>, vector<16x128xf32> -> vector<16x128xf32>
    %244 = arith.addf %237, %243 : vector<16x128xf32>
    %c6_220 = arith.constant 6 : index
    %c0_221 = arith.constant 0 : index
    %c0_222 = arith.constant 0 : index
    %245 = vector.load %arg4[%c6_220, %c0_221, %c0_222] : memref<7x16x16xf32, #tpu.memory_space<vmem>>, vector<1x16x16xf32>
    %246 = vector.shape_cast %245 : vector<1x16x16xf32> to vector<16x16xf32>
    %cst_223 = arith.constant dense<0.000000e+00> : vector<16x128xf32>
    %247 = tpu.matmul %246, %201, %cst_223 {dimension_numbers = #tpu.dot_dimension_numbers<[1], [0], [0], [1], [0, 0, 1, 1], [], []>} : vector<16x16xf32>, vector<16x128xf32>, vector<16x128xf32> -> vector<16x128xf32>
    %c13 = arith.constant 13 : index
    %c0_224 = arith.constant 0 : index
    %c0_225 = arith.constant 0 : index
    %248 = vector.load %arg8[%c13, %c0_224, %c0_225] : memref<14x128x128xf32, #tpu.memory_space<vmem>>, vector<1x128x128xf32>
    %249 = vector.shape_cast %248 : vector<1x128x128xf32> to vector<128x128xf32>
    %cst_226 = arith.constant dense<0.000000e+00> : vector<16x128xf32>
    %250 = tpu.matmul %247, %249, %cst_226 {dimension_numbers = #tpu.dot_dimension_numbers<[1], [0], [0], [1], [0, 0, 1, 1], [], []>} : vector<16x128xf32>, vector<128x128xf32>, vector<16x128xf32> -> vector<16x128xf32>
    %251 = arith.addf %244, %250 : vector<16x128xf32>
    %252 = vector.extract_strided_slice %2 {offsets = [2, 0], sizes = [1, 128], strides = [1, 1]} : vector<3x128xf32> to vector<1x128xf32>
    %253 = vector.broadcast %252 : vector<1x128xf32> to vector<16x128xf32>
    %254 = arith.addf %251, %253 : vector<16x128xf32>
    %cst_227 = arith.constant dense<0.000000e+00> : vector<16x128xf32>
    %255 = tpu.matmul %254, %0, %cst_227 {dimension_numbers = #tpu.dot_dimension_numbers<[1], [0], [0], [1], [0, 0, 1, 1], [], []>} : vector<16x128xf32>, vector<128x128xf32>, vector<16x128xf32> -> vector<16x128xf32>
    %256 = arith.subf %254, %255 : vector<16x128xf32>
    %257 = arith.mulf %256, %256 : vector<16x128xf32>
    %cst_228 = arith.constant dense<0.000000e+00> : vector<16x128xf32>
    %258 = tpu.matmul %257, %0, %cst_228 {dimension_numbers = #tpu.dot_dimension_numbers<[1], [0], [0], [1], [0, 0, 1, 1], [], []>} : vector<16x128xf32>, vector<128x128xf32>, vector<16x128xf32> -> vector<16x128xf32>
    %cst_229 = arith.constant 9.99999997E-7 : f32
    %259 = vector.broadcast %cst_229 : f32 to vector<16x128xf32>
    %260 = arith.addf %258, %259 : vector<16x128xf32>
    %261 = math.rsqrt %260 : vector<16x128xf32>
    %262 = arith.mulf %256, %261 : vector<16x128xf32>
    %c2_230 = arith.constant 2 : index
    %c0_231 = arith.constant 0 : index
    %c0_232 = arith.constant 0 : index
    %263 = vector.load %arg9[%c2_230, %c0_231, %c0_232] : memref<3x1x128xf32, #tpu.memory_space<vmem>>, vector<1x1x128xf32>
    %264 = vector.shape_cast %263 : vector<1x1x128xf32> to vector<1x128xf32>
    %265 = vector.broadcast %264 : vector<1x128xf32> to vector<16x128xf32>
    %266 = arith.mulf %262, %265 : vector<16x128xf32>
    %c2_233 = arith.constant 2 : index
    %c0_234 = arith.constant 0 : index
    %c0_235 = arith.constant 0 : index
    %267 = vector.load %arg10[%c2_233, %c0_234, %c0_235] : memref<3x1x128xf32, #tpu.memory_space<vmem>>, vector<1x1x128xf32>
    %268 = vector.shape_cast %267 : vector<1x1x128xf32> to vector<1x128xf32>
    %269 = vector.broadcast %268 : vector<1x128xf32> to vector<16x128xf32>
    %270 = arith.addf %266, %269 : vector<16x128xf32>
    %c2_236 = arith.constant 2 : index
    %c0_237 = arith.constant 0 : index
    %c0_238 = arith.constant 0 : index
    %271 = vector.load %arg11[%c2_236, %c0_237, %c0_238] : memref<3x128x1024xf32, #tpu.memory_space<vmem>>, vector<1x128x1024xf32>
    %272 = vector.shape_cast %271 : vector<1x128x1024xf32> to vector<128x1024xf32>
    %cst_239 = arith.constant dense<0.000000e+00> : vector<16x1024xf32>
    %273 = tpu.matmul %270, %272, %cst_239 {dimension_numbers = #tpu.dot_dimension_numbers<[1], [0], [0], [1], [0, 0, 1, 1], [], []>} : vector<16x128xf32>, vector<128x1024xf32>, vector<16x1024xf32> -> vector<16x1024xf32>
    %c2_240 = arith.constant 2 : index
    %c0_241 = arith.constant 0 : index
    %c0_242 = arith.constant 0 : index
    %274 = vector.load %arg12[%c2_240, %c0_241, %c0_242] : memref<3x1x1024xf32, #tpu.memory_space<vmem>>, vector<1x1x1024xf32>
    %275 = vector.shape_cast %274 : vector<1x1x1024xf32> to vector<1x1024xf32>
    %276 = vector.broadcast %275 : vector<1x1024xf32> to vector<16x1024xf32>
    %277 = arith.addf %273, %276 : vector<16x1024xf32>
    %cst_243 = arith.constant 5.000000e-01 : f32
    %278 = vector.broadcast %cst_243 : f32 to vector<16x1024xf32>
    %279 = arith.mulf %278, %277 : vector<16x1024xf32>
    %cst_244 = arith.constant 0.707106769 : f32
    %280 = vector.broadcast %cst_244 : f32 to vector<16x1024xf32>
    %281 = arith.mulf %277, %280 : vector<16x1024xf32>
    %282 = math.erf %281 : vector<16x1024xf32>
    %cst_245 = arith.constant 1.000000e+00 : f32
    %283 = vector.broadcast %cst_245 : f32 to vector<16x1024xf32>
    %284 = arith.addf %283, %282 : vector<16x1024xf32>
    %285 = arith.mulf %279, %284 : vector<16x1024xf32>
    %c2_246 = arith.constant 2 : index
    %c0_247 = arith.constant 0 : index
    %c0_248 = arith.constant 0 : index
    %286 = vector.load %arg13[%c2_246, %c0_247, %c0_248] : memref<3x1024x128xf32, #tpu.memory_space<vmem>>, vector<1x1024x128xf32>
    %287 = vector.shape_cast %286 : vector<1x1024x128xf32> to vector<1024x128xf32>
    %cst_249 = arith.constant dense<0.000000e+00> : vector<16x128xf32>
    %288 = tpu.matmul %285, %287, %cst_249 {dimension_numbers = #tpu.dot_dimension_numbers<[1], [0], [0], [1], [0, 0, 1, 1], [], []>} : vector<16x1024xf32>, vector<1024x128xf32>, vector<16x128xf32> -> vector<16x128xf32>
    %c2_250 = arith.constant 2 : index
    %c0_251 = arith.constant 0 : index
    %c0_252 = arith.constant 0 : index
    %289 = vector.load %arg14[%c2_250, %c0_251, %c0_252] : memref<3x1x128xf32, #tpu.memory_space<vmem>>, vector<1x1x128xf32>
    %290 = vector.shape_cast %289 : vector<1x1x128xf32> to vector<1x128xf32>
    %291 = vector.broadcast %290 : vector<1x128xf32> to vector<16x128xf32>
    %292 = arith.addf %288, %291 : vector<16x128xf32>
    %c2_253 = arith.constant 2 : index
    %c0_254 = arith.constant 0 : index
    %c0_255 = arith.constant 0 : index
    %293 = vector.load %arg15[%c2_253, %c0_254, %c0_255] : memref<3x1x128xf32, #tpu.memory_space<vmem>>, vector<1x1x128xf32>
    %294 = vector.shape_cast %293 : vector<1x1x128xf32> to vector<1x128xf32>
    %295 = vector.broadcast %294 : vector<1x128xf32> to vector<16x128xf32>
    %296 = arith.mulf %292, %295 : vector<16x128xf32>
    %297 = arith.addf %201, %296 : vector<16x128xf32>
    %c0_256 = arith.constant 0 : index
    %c0_257 = arith.constant 0 : index
    %c0_258 = arith.constant 0 : index
    %298 = vector.load %arg16[%c0_256, %c0_257, %c0_258] : memref<1x16x128xf32, #tpu.memory_space<vmem>>, vector<1x16x128xf32>
    %299 = vector.shape_cast %298 : vector<1x16x128xf32> to vector<16x128xf32>
    %300 = vector.shape_cast %297 : vector<16x128xf32> to vector<1x16x128xf32>
    tpu.vector_store %arg16[%c0_256, %c0_257, %c0_258], %300 {strides = array<i32>} : memref<1x16x128xf32, #tpu.memory_space<vmem>>, vector<1x16x128xf32>,
    return
  }
  func.func @transform_0(%arg0: i32) -> (i32, i32, i32) {
    %c0_i32 = arith.constant 0 : i32
    %c0_i32_0 = arith.constant 0 : i32
    %c0_i32_1 = arith.constant 0 : i32
    return %arg0, %c0_i32, %c0_i32_0 : i32, i32, i32
  }
  func.func @transform_1(%arg0: i32) -> (i32, i32, i32) {
    %c0_i32 = arith.constant 0 : i32
    %c0_i32_0 = arith.constant 0 : i32
    %c0_i32_1 = arith.constant 0 : i32
    return %arg0, %c0_i32, %c0_i32_0 : i32, i32, i32
  }
  func.func @transform_2(%arg0: i32) -> (i32, i32) {
    %c0_i32 = arith.constant 0 : i32
    %c0_i32_0 = arith.constant 0 : i32
    %c0_i32_1 = arith.constant 0 : i32
    return %c0_i32, %c0_i32_0 : i32, i32
  }
  func.func @transform_3(%arg0: i32) -> (i32, i32, i32) {
    %c0_i32 = arith.constant 0 : i32
    %c0_i32_0 = arith.constant 0 : i32
    %c0_i32_1 = arith.constant 0 : i32
    %c0_i32_2 = arith.constant 0 : i32
    return %c0_i32, %c0_i32_0, %c0_i32_1 : i32, i32, i32
  }
  func.func @transform_4(%arg0: i32) -> (i32, i32, i32) {
    %c0_i32 = arith.constant 0 : i32
    %c0_i32_0 = arith.constant 0 : i32
    %c0_i32_1 = arith.constant 0 : i32
    %c0_i32_2 = arith.constant 0 : i32
    return %c0_i32, %c0_i32_0, %c0_i32_1 : i32, i32, i32
  }
  func.func @transform_5(%arg0: i32) -> (i32, i32) {
    %c0_i32 = arith.constant 0 : i32
    %c0_i32_0 = arith.constant 0 : i32
    %c0_i32_1 = arith.constant 0 : i32
    return %c0_i32, %c0_i32_0 : i32, i32
  }
  func.func @transform_6(%arg0: i32) -> (i32, i32) {
    %c0_i32 = arith.constant 0 : i32
    %c0_i32_0 = arith.constant 0 : i32
    %c0_i32_1 = arith.constant 0 : i32
    return %c0_i32, %c0_i32_0 : i32, i32
  }
  func.func @transform_7(%arg0: i32) -> (i32, i32, i32) {
    %c0_i32 = arith.constant 0 : i32
    %c0_i32_0 = arith.constant 0 : i32
    %c0_i32_1 = arith.constant 0 : i32
    %c0_i32_2 = arith.constant 0 : i32
    return %c0_i32, %c0_i32_0, %c0_i32_1 : i32, i32, i32
  }
  func.func @transform_8(%arg0: i32) -> (i32, i32, i32) {
    %c0_i32 = arith.constant 0 : i32
    %c0_i32_0 = arith.constant 0 : i32
    %c0_i32_1 = arith.constant 0 : i32
    %c0_i32_2 = arith.constant 0 : i32
    return %c0_i32, %c0_i32_0, %c0_i32_1 : i32, i32, i32
  }
  func.func @transform_9(%arg0: i32) -> (i32, i32, i32) {
    %c0_i32 = arith.constant 0 : i32
    %c0_i32_0 = arith.constant 0 : i32
    %c0_i32_1 = arith.constant 0 : i32
    %c0_i32_2 = arith.constant 0 : i32
    return %c0_i32, %c0_i32_0, %c0_i32_1 : i32, i32, i32
  }
  func.func @transform_10(%arg0: i32) -> (i32, i32, i32) {
    %c0_i32 = arith.constant 0 : i32
    %c0_i32_0 = arith.constant 0 : i32
    %c0_i32_1 = arith.constant 0 : i32
    %c0_i32_2 = arith.constant 0 : i32
    return %c0_i32, %c0_i32_0, %c0_i32_1 : i32, i32, i32
  }
  func.func @transform_11(%arg0: i32) -> (i32, i32, i32) {
    %c0_i32 = arith.constant 0 : i32
    %c0_i32_0 = arith.constant 0 : i32
    %c0_i32_1 = arith.constant 0 : i32
    %c0_i32_2 = arith.constant 0 : i32
    return %c0_i32, %c0_i32_0, %c0_i32_1 : i32, i32, i32
  }
  func.func @transform_12(%arg0: i32) -> (i32, i32, i32) {
    %c0_i32 = arith.constant 0 : i32
    %c0_i32_0 = arith.constant 0 : i32
    %c0_i32_1 = arith.constant 0 : i32
    %c0_i32_2 = arith.constant 0 : i32
    return %c0_i32, %c0_i32_0, %c0_i32_1 : i32, i32, i32
  }
  func.func @transform_13(%arg0: i32) -> (i32, i32, i32) {
    %c0_i32 = arith.constant 0 : i32
    %c0_i32_0 = arith.constant 0 : i32
    %c0_i32_1 = arith.constant 0 : i32
    %c0_i32_2 = arith.constant 0 : i32
    return %c0_i32, %c0_i32_0, %c0_i32_1 : i32, i32, i32
  }
  func.func @transform_14(%arg0: i32) -> (i32, i32, i32) {
    %c0_i32 = arith.constant 0 : i32
    %c0_i32_0 = arith.constant 0 : i32
    %c0_i32_1 = arith.constant 0 : i32
    %c0_i32_2 = arith.constant 0 : i32
    return %c0_i32, %c0_i32_0, %c0_i32_1 : i32, i32, i32
  }
  func.func @transform_15(%arg0: i32) -> (i32, i32, i32) {
    %c0_i32 = arith.constant 0 : i32
    %c0_i32_0 = arith.constant 0 : i32
    %c0_i32_1 = arith.constant 0 : i32
    return %arg0, %c0_i32, %c0_i32_0 : i32, i32, i32
  }
}

</mosaic_0001>

<bundles_post_ra>
// kernel: tile.121
= control target key start
LH: loop header
LB: loop body
LE: loop exit
PB: predicated region body
PF: predicated region fallthrough
CT: control target
= control target key end

     0   :  { %s28_s0 = inlined_call_operand.vmem [shape: f32[64], index: 0, kind: input, shape index: {}]   ;;  %s29_s1 = inlined_call_operand.vmem [shape: f32[16,64], index: 1, kind: output, shape index: {}]  }
   0x1   :  { %v4_v0 = vld [vmem:[%s28_s0] ss:$0 sm:$0xff] }
   0x2   :  { %5 = vst [vmem:[%s29_s1] sm:$0xff] %v4_v0 }
   0x3   :  { %8 = vst [vmem:[%s29_s1 + $0x8] sm:$0xff] %v4_v0 }

// kernel: tile.128
= control target key start
LH: loop header
LB: loop body
LE: loop exit
PB: predicated region body
PF: predicated region fallthrough
CT: control target
= control target key end

     0   :  { %vm3_vm0 = vcmask 523264   ;;  %vm10_vm1 = vcmask 1048064   ;;  %s111_s0 = inlined_call_operand.vmem [shape: f32[16,64], index: 0, kind: input, shape index: {}]   ;;  %s112_s1 = inlined_call_operand.vmem [shape: f32[1,1,1024], index: 1, kind: output, shape index: {}]  }
   0x1   :  { %v61_v0 = vld [vmem:[%s111_s0 + $0x1] ss:$2 sm:$0xff]   ;;  %v2_v1 = vld [vmem:[%s111_s0] ss:$2 sm:$0xff]   ;;  %s70_s0 = smov 64  }
   0x2   :  { %8 = vrot.lane.b32.xlu0 %v61_v0, %s70_s0  ;;  %4 = vst.msk [vmem:[#allocation0] ss:$8 sm:$0xf] %vm3_vm0, %v2_v1  }
   0x3   :  { %5 = vst.msk [vmem:[#allocation0] ss:$8 sm:$0xf0] %vm3_vm0, %v2_v1  }
  0x74   :  { %v9_v2 = vpop.permute.xlu0 %8  }
  0x75   :  { %11 = vst.msk [vmem:[#allocation0] ss:$8 sm:$0xf] %vm10_vm1, %v9_v2  }
  0x76   :  { %12 = vst.msk [vmem:[#allocation0] ss:$8 sm:$0xf0] %vm10_vm1, %v9_v2  }
  0x7c   :  { %v15_v3 = vld [vmem:[#allocation0] sm:$0x1]  ;;  %v20_v4 = vld [vmem:[#allocation0 + $0x8] sm:$0x1]  ;;  %v26_v5 = vld [vmem:[#allocation0 + $0x10] sm:$0x1] }
  0x7d   :  { %18 = vst [vmem:[%s112_s1] sm:$0x1] %v15_v3  ;;  %v32_v6 = vld [vmem:[#allocation0 + $0x18] sm:$0x1]  ;;  %v38_v7 = vld [vmem:[#allocation0 + $0x20] sm:$0x1] }
  0x7e   :  { %62 = vst [vmem:[%s112_s1 + $0x1] sm:$0x1] %v20_v4  ;;  %v44_v8 = vld [vmem:[#allocation0 + $0x28] sm:$0x1]  ;;  %v50_v9 = vld [vmem:[#allocation0 + $0x30] sm:$0x1] }
  0x7f   :  { %63 = vst [vmem:[%s112_s1 + $0x2] sm:$0x1] %v26_v5  ;;  %v56_v10 = vld [vmem:[#allocation0 + $0x38] sm:$0x1] }
  0x80   :  { %64 = vst [vmem:[%s112_s1 + $0x3] sm:$0x1] %v32_v6 }
  0x81   :  { %65 = vst [vmem:[%s112_s1 + $0x4] sm:$0x1] %v38_v7 }
  0x82   :  { %66 = vst [vmem:[%s112_s1 + $0x5] sm:$0x1] %v44_v8 }
  0x83   :  { %67 = vst [vmem:[%s112_s1 + $0x6] sm:$0x1] %v50_v9 }
  0x84   :  { %68 = vst [vmem:[%s112_s1 + $0x7] sm:$0x1] %v56_v10 }

// kernel: tile.85
= control target key start
LH: loop header
LB: loop body
LE: loop exit
PB: predicated region body
PF: predicated region fallthrough
CT: control target
= control target key end

     0   :  { %s28_s0 = inlined_call_operand.vmem [shape: f32[8], index: 0, kind: input, shape index: {}]   ;;  %s29_s1 = inlined_call_operand.vmem [shape: f32[16,8], index: 1, kind: output, shape index: {}]  }
   0x1   :  { %v4_v0 = vld [vmem:[%s28_s0] ss:$0 sm:$0xff] }
   0x2   :  { %5 = vst [vmem:[%s29_s1] sm:$0xff] %v4_v0 }
   0x3   :  { %8 = vst [vmem:[%s29_s1 + $0x8] sm:$0xff] %v4_v0 }

// kernel: tile.92
= control target key start
LH: loop header
LB: loop body
LE: loop exit
PB: predicated region body
PF: predicated region fallthrough
CT: control target
= control target key end

     0   :  { %s131_s10 = smov 120   ;;  %s132_s11 = smov 104   ;;  %vm3_vm0 = vcmask 64512   ;;  %vm9_vm1 = vcmask 1048512   ;;  %vm15_vm2 = vcmask 982912   ;;  %vm21_vm3 = vcmask 917312   ;;  %s207_s0 = inlined_call_operand.vmem [shape: f32[16,8], index: 0, kind: input, shape index: {}]   ;;  %s208_s1 = inlined_call_operand.vmem [shape: f32[1,1,128], index: 1, kind: output, shape index: {}]  }
   0x1   :  { %v101_v0 = vld [vmem:[%s207_s0 + $0xf] sm:$0x1]   ;;  %v103_v1 = vld [vmem:[%s207_s0 + $0xd] sm:$0x1]   ;;  %v105_v2 = vld [vmem:[%s207_s0 + $0xb] sm:$0x1]  }
   0x2   :  { %7 = vrot.lane.b32.xlu0 %v101_v0, %s131_s10  ;;  %19 = vrot.lane.b32.xlu1 %v103_v1, %s132_s11  ;;  %s133_s14 = smov 88   ;;  %v102_v3 = vld [vmem:[%s207_s0 + $0xe] sm:$0x1]   ;;  %v104_v4 = vld [vmem:[%s207_s0 + $0xc] sm:$0x1]   ;;  %s134_s19 = smov 112  }
   0x3   :  { %31 = vrot.lane.b32.xlu2 %v105_v2, %s133_s14  ;;  %s135_s20 = smov 96   ;;  %v106_v5 = vld [vmem:[%s207_s0 + $0xa] sm:$0x1]   ;;  %s136_s23 = smov 80   ;;  %v107_v6 = vld [vmem:[%s207_s0 + $0x9] sm:$0x1]  }
   0x4   :  { %v108_v7 = vld [vmem:[%s207_s0 + $0x8] sm:$0x1]   ;;  %s137_s28 = smov 72   ;;  %s138_s29 = smov 64   ;;  %v109_v8 = vld [vmem:[%s207_s0 + $0x7] sm:$0x1]  }
   0x5   :  { %s139_s3 = smov 56   ;;  %v110_v9 = vld [vmem:[%s207_s0 + $0x6] sm:$0x1]   ;;  %v111_v10 = vld [vmem:[%s207_s0 + $0x5] sm:$0x1]   ;;  %s140_s8 = smov 48  }
   0x6   :  { %s141_s9 = smov 40   ;;  %v112_v11 = vld [vmem:[%s207_s0 + $0x4] sm:$0x1]   ;;  %s142_s12 = smov 32   ;;  %v113_v12 = vld [vmem:[%s207_s0 + $0x3] sm:$0x1]  }
   0x7   :  { %v114_v13 = vld [vmem:[%s207_s0 + $0x2] sm:$0x1]   ;;  %s143_s17 = smov 24   ;;  %s144_s18 = smov 16   ;;  %v115_v14 = vld [vmem:[%s207_s0 + $0x1] sm:$0x1]  }
   0x8   :  { %s145_s21 = smov 8   ;;  %v2_v15 = vld [vmem:[%s207_s0] sm:$0x1]   ;;  %vm27_vm4 = vcmask 851712   ;;  %vm33_vm5 = vcmask 786112   ;;  %vm39_vm6 = vcmask 720512  }
   0x9   :  { %4 = vst.msk [vmem:[#allocation0] sm:$0x1] %vm3_vm0, %v2_v15   ;;  %vm45_vm7 = vcmask 654912   ;;  %vm51_vm8 = vcmask 589312   ;;  %vm57_vm9 = vcmask 523712   ;;  %vm63_vm10 = vcmask 458112  }
   0xa   :  { %13 = vrot.lane.b32.xlu0 %v102_v3, %s134_s19  ;;  %25 = vrot.lane.b32.xlu1 %v104_v4, %s135_s20  ;;  %vm69_vm11 = vcmask 392512   ;;  %vm75_vm12 = vcmask 326912   ;;  %vm81_vm13 = vcmask 261312   ;;  %vm87_vm14 = vcmask 195712  }
   0xb   :  { %37 = vrot.lane.b32.xlu2 %v106_v5, %s136_s23  ;;  %vm93_vm15 = vcmask 130112  }
  0x12   :  { %43 = vrot.lane.b32.xlu0 %v107_v6, %s137_s28  ;;  %49 = vrot.lane.b32.xlu1 %v108_v7, %s138_s29 }
  0x13   :  { %55 = vrot.lane.b32.xlu2 %v109_v8, %s139_s3 }
  0x1a   :  { %61 = vrot.lane.b32.xlu0 %v110_v9, %s140_s8  ;;  %67 = vrot.lane.b32.xlu1 %v111_v10, %s141_s9 }
  0x1b   :  { %73 = vrot.lane.b32.xlu2 %v112_v11, %s142_s12 }
  0x22   :  { %79 = vrot.lane.b32.xlu0 %v113_v12, %s143_s17  ;;  %85 = vrot.lane.b32.xlu1 %v114_v13, %s144_s18 }
  0x23   :  { %91 = vrot.lane.b32.xlu2 %v115_v14, %s145_s21 }
  0x5d   :  { %v32_v16 = vpop.permute.xlu2 %31  }
  0x65   :  { %v38_v17 = vpop.permute.xlu2 %37  }
  0x6d   :  { %v56_v18 = vpop.permute.xlu2 %55  }
  0x74   :  { %v8_v19 = vpop.permute.xlu0 %7   ;;  %v20_v20 = vpop.permute.xlu1 %19  }
  0x75   :  { %10 = vst.msk [vmem:[#allocation0] sm:$0x1] %vm9_vm1, %v8_v19   ;;  %v74_v21 = vpop.permute.xlu2 %73  }
  0x7c   :  { %v14_v22 = vpop.permute.xlu0 %13   ;;  %v26_v23 = vpop.permute.xlu1 %25  }
  0x7d   :  { %16 = vst.msk [vmem:[#allocation0] sm:$0x1] %vm15_vm2, %v14_v22   ;;  %v92_v24 = vpop.permute.xlu2 %91  }
  0x7e   :  { %22 = vst.msk [vmem:[#allocation0] sm:$0x1] %vm21_vm3, %v20_v20  }
  0x7f   :  { %28 = vst.msk [vmem:[#allocation0] sm:$0x1] %vm27_vm4, %v26_v23  }
  0x80   :  { %34 = vst.msk [vmem:[#allocation0] sm:$0x1] %vm33_vm5, %v32_v16  }
  0x81   :  { %40 = vst.msk [vmem:[#allocation0] sm:$0x1] %vm39_vm6, %v38_v17  }
  0x84   :  { %v44_v25 = vpop.permute.xlu0 %43   ;;  %v50_v26 = vpop.permute.xlu1 %49  }
  0x85   :  { %46 = vst.msk [vmem:[#allocation0] sm:$0x1] %vm45_vm7, %v44_v25  }
  0x86   :  { %52 = vst.msk [vmem:[#allocation0] sm:$0x1] %vm51_vm8, %v50_v26  }
  0x87   :  { %58 = vst.msk [vmem:[#allocation0] sm:$0x1] %vm57_vm9, %v56_v18  }
  0x8c   :  { %v62_v27 = vpop.permute.xlu0 %61   ;;  %v68_v28 = vpop.permute.xlu1 %67  }
  0x8d   :  { %64 = vst.msk [vmem:[#allocation0] sm:$0x1] %vm63_vm10, %v62_v27  }
  0x8e   :  { %70 = vst.msk [vmem:[#allocation0] sm:$0x1] %vm69_vm11, %v68_v28  }
  0x8f   :  { %76 = vst.msk [vmem:[#allocation0] sm:$0x1] %vm75_vm12, %v74_v21  }
  0x94   :  { %v80_v29 = vpop.permute.xlu0 %79   ;;  %v86_v30 = vpop.permute.xlu1 %85  }
  0x95   :  { %82 = vst.msk [vmem:[#allocation0] sm:$0x1] %vm81_vm13, %v80_v29  }
  0x96   :  { %88 = vst.msk [vmem:[#allocation0] sm:$0x1] %vm87_vm14, %v86_v30  }
  0x97   :  { %94 = vst.msk [vmem:[#allocation0] sm:$0x1] %vm93_vm15, %v92_v24  }
  0x9e   :  { %v97_v31 = vld [vmem:[#allocation0] sm:$0x1] }
  0x9f   :  { %100 = vst [vmem:[%s208_s1] sm:$0x1] %v97_v31 }

// kernel: tile.82
= control target key start
LH: loop header
LB: loop body
LE: loop exit
PB: predicated region body
PF: predicated region fallthrough
CT: control target
= control target key end

     0   :  { %s131_s10 = smov 120   ;;  %s132_s11 = smov 104   ;;  %vm3_vm0 = vcmask 64512   ;;  %vm9_vm1 = vcmask 1048512   ;;  %vm15_vm2 = vcmask 982912   ;;  %vm21_vm3 = vcmask 917312   ;;  %s207_s0 = inlined_call_operand.vmem [shape: f32[16,8], index: 0, kind: input, shape index: {}]   ;;  %s208_s1 = inlined_call_operand.vmem [shape: f32[1,128], index: 1, kind: output, shape index: {}]  }
   0x1   :  { %v101_v0 = vld [vmem:[%s207_s0 + $0xf] sm:$0x1]   ;;  %v103_v1 = vld [vmem:[%s207_s0 + $0xd] sm:$0x1]   ;;  %v105_v2 = vld [vmem:[%s207_s0 + $0xb] sm:$0x1]  }
   0x2   :  { %7 = vrot.lane.b32.xlu0 %v101_v0, %s131_s10  ;;  %19 = vrot.lane.b32.xlu1 %v103_v1, %s132_s11  ;;  %s133_s14 = smov 88   ;;  %v102_v3 = vld [vmem:[%s207_s0 + $0xe] sm:$0x1]   ;;  %v104_v4 = vld [vmem:[%s207_s0 + $0xc] sm:$0x1]   ;;  %s134_s19 = smov 112  }
   0x3   :  { %31 = vrot.lane.b32.xlu2 %v105_v2, %s133_s14  ;;  %s135_s20 = smov 96   ;;  %v106_v5 = vld [vmem:[%s207_s0 + $0xa] sm:$0x1]   ;;  %s136_s23 = smov 80   ;;  %v107_v6 = vld [vmem:[%s207_s0 + $0x9] sm:$0x1]  }
   0x4   :  { %v108_v7 = vld [vmem:[%s207_s0 + $0x8] sm:$0x1]   ;;  %s137_s28 = smov 72   ;;  %s138_s29 = smov 64   ;;  %v109_v8 = vld [vmem:[%s207_s0 + $0x7] sm:$0x1]  }
   0x5   :  { %s139_s3 = smov 56   ;;  %v110_v9 = vld [vmem:[%s207_s0 + $0x6] sm:$0x1]   ;;  %v111_v10 = vld [vmem:[%s207_s0 + $0x5] sm:$0x1]   ;;  %s140_s8 = smov 48  }
   0x6   :  { %s141_s9 = smov 40   ;;  %v112_v11 = vld [vmem:[%s207_s0 + $0x4] sm:$0x1]   ;;  %s142_s12 = smov 32   ;;  %v113_v12 = vld [vmem:[%s207_s0 + $0x3] sm:$0x1]  }
   0x7   :  { %v114_v13 = vld [vmem:[%s207_s0 + $0x2] sm:$0x1]   ;;  %s143_s17 = smov 24   ;;  %s144_s18 = smov 16   ;;  %v115_v14 = vld [vmem:[%s207_s0 + $0x1] sm:$0x1]  }
   0x8   :  { %s145_s21 = smov 8   ;;  %v2_v15 = vld [vmem:[%s207_s0] sm:$0x1]   ;;  %vm27_vm4 = vcmask 851712   ;;  %vm33_vm5 = vcmask 786112   ;;  %vm39_vm6 = vcmask 720512  }
   0x9   :  { %4 = vst.msk [vmem:[#allocation0] sm:$0x1] %vm3_vm0, %v2_v15   ;;  %vm45_vm7 = vcmask 654912   ;;  %vm51_vm8 = vcmask 589312   ;;  %vm57_vm9 = vcmask 523712   ;;  %vm63_vm10 = vcmask 458112  }
   0xa   :  { %13 = vrot.lane.b32.xlu0 %v102_v3, %s134_s19  ;;  %25 = vrot.lane.b32.xlu1 %v104_v4, %s135_s20  ;;  %vm69_vm11 = vcmask 392512   ;;  %vm75_vm12 = vcmask 326912   ;;  %vm81_vm13 = vcmask 261312   ;;  %vm87_vm14 = vcmask 195712  }
   0xb   :  { %37 = vrot.lane.b32.xlu2 %v106_v5, %s136_s23  ;;  %vm93_vm15 = vcmask 130112  }
  0x12   :  { %43 = vrot.lane.b32.xlu0 %v107_v6, %s137_s28  ;;  %49 = vrot.lane.b32.xlu1 %v108_v7, %s138_s29 }
  0x13   :  { %55 = vrot.lane.b32.xlu2 %v109_v8, %s139_s3 }
  0x1a   :  { %61 = vrot.lane.b32.xlu0 %v110_v9, %s140_s8  ;;  %67 = vrot.lane.b32.xlu1 %v111_v10, %s141_s9 }
  0x1b   :  { %73 = vrot.lane.b32.xlu2 %v112_v11, %s142_s12 }
  0x22   :  { %79 = vrot.lane.b32.xlu0 %v113_v12, %s143_s17  ;;  %85 = vrot.lane.b32.xlu1 %v114_v13, %s144_s18 }
  0x23   :  { %91 = vrot.lane.b32.xlu2 %v115_v14, %s145_s21 }
  0x5d   :  { %v32_v16 = vpop.permute.xlu2 %31  }
  0x65   :  { %v38_v17 = vpop.permute.xlu2 %37  }
  0x6d   :  { %v56_v18 = vpop.permute.xlu2 %55  }
  0x74   :  { %v8_v19 = vpop.permute.xlu0 %7   ;;  %v20_v20 = vpop.permute.xlu1 %19  }
  0x75   :  { %10 = vst.msk [vmem:[#allocation0] sm:$0x1] %vm9_vm1, %v8_v19   ;;  %v74_v21 = vpop.permute.xlu2 %73  }
  0x7c   :  { %v14_v22 = vpop.permute.xlu0 %13   ;;  %v26_v23 = vpop.permute.xlu1 %25  }
  0x7d   :  { %16 = vst.msk [vmem:[#allocation0] sm:$0x1] %vm15_vm2, %v14_v22   ;;  %v92_v24 = vpop.permute.xlu2 %91  }
  0x7e   :  { %22 = vst.msk [vmem:[#allocation0] sm:$0x1] %vm21_vm3, %v20_v20  }
  0x7f   :  { %28 = vst.msk [vmem:[#allocation0] sm:$0x1] %vm27_vm4, %v26_v23  }
  0x80   :  { %34 = vst.msk [vmem:[#allocation0] sm:$0x1] %vm33_vm5, %v32_v16  }
  0x81   :  { %40 = vst.msk [vmem:[#allocation0] sm:$0x1] %vm39_vm6, %v38_v17  }
  0x84   :  { %v44_v25 = vpop.permute.xlu0 %43   ;;  %v50_v26 = vpop.permute.xlu1 %49  }
  0x85   :  { %46 = vst.msk [vmem:[#allocation0] sm:$0x1] %vm45_vm7, %v44_v25  }
  0x86   :  { %52 = vst.msk [vmem:[#allocation0] sm:$0x1] %vm51_vm8, %v50_v26  }
  0x87   :  { %58 = vst.msk [vmem:[#allocation0] sm:$0x1] %vm57_vm9, %v56_v18  }
  0x8c   :  { %v62_v27 = vpop.permute.xlu0 %61   ;;  %v68_v28 = vpop.permute.xlu1 %67  }
  0x8d   :  { %64 = vst.msk [vmem:[#allocation0] sm:$0x1] %vm63_vm10, %v62_v27  }
  0x8e   :  { %70 = vst.msk [vmem:[#allocation0] sm:$0x1] %vm69_vm11, %v68_v28  }
  0x8f   :  { %76 = vst.msk [vmem:[#allocation0] sm:$0x1] %vm75_vm12, %v74_v21  }
  0x94   :  { %v80_v29 = vpop.permute.xlu0 %79   ;;  %v86_v30 = vpop.permute.xlu1 %85  }
  0x95   :  { %82 = vst.msk [vmem:[#allocation0] sm:$0x1] %vm81_vm13, %v80_v29  }
  0x96   :  { %88 = vst.msk [vmem:[#allocation0] sm:$0x1] %vm87_vm14, %v86_v30  }
  0x97   :  { %94 = vst.msk [vmem:[#allocation0] sm:$0x1] %vm93_vm15, %v92_v24  }
  0x9e   :  { %v97_v31 = vld [vmem:[#allocation0] sm:$0x1] }
  0x9f   :  { %100 = vst [vmem:[%s208_s1] sm:$0x1] %v97_v31 }

// kernel: predictor_forward.1
= control target key start
LH: loop header
LB: loop body
LE: loop exit
PB: predicated region body
PF: predicated region fallthrough
CT: control target
= control target key end

     0   :  { %s8216_s18 = smov 0   ;;  %s15333_s0 = inlined_call_operand.vmem [shape: f32[2,16,256], index: 0, kind: input, shape index: {}]   ;;  %s15334_s1 = inlined_call_operand.vmem [shape: f32[2,3,128], index: 1, kind: input, shape index: {}]   ;;  %s15335_s2 = inlined_call_operand.vmem [shape: f32[128,128], index: 2, kind: input, shape index: {}]   ;;  %s15336_s3 = inlined_call_operand.vmem [shape: f32[7,16,16], index: 3, kind: input, shape index: {}]   ;;  %s15337_s4 = inlined_call_operand.vmem [shape: f32[7,256,128], index: 4, kind: input, shape index: {}]   ;;  %s15338_s5 = inlined_call_operand.vmem [shape: f32[256,128], index: 5, kind: input, shape index: {}]   ;;  %s15339_s6 = inlined_call_operand.vmem [shape: f32[1,128], index: 6, kind: input, shape index: {}]   ;;  %s15340_s7 = inlined_call_operand.vmem [shape: f32[14,128,128], index: 7, kind: input, shape index: {}]   ;;  %s15341_s8 = inlined_call_operand.vmem [shape: f32[3,1,128], index: 8, kind: input, shape index: {}]   ;;  %s15342_s9 = inlined_call_operand.vmem [shape: f32[3,1,128], index: 9, kind: input, shape index: {}]   ;;  %s15343_s10 = inlined_call_operand.vmem [shape: f32[3,128,1024], index: 10, kind: input, shape index: {}]   ;;  %s15344_s11 = inlined_call_operand.vmem [shape: f32[3,1,1024], index: 11, kind: input, shape index: {}]   ;;  %s15345_s12 = inlined_call_operand.vmem [shape: f32[3,1024,128], index: 12, kind: input, shape index: {}]   ;;  %s15346_s13 = inlined_call_operand.vmem [shape: f32[3,1,128], index: 13, kind: input, shape index: {}]   ;;  %s15347_s14 = inlined_call_operand.vmem [shape: f32[3,1,128], index: 14, kind: input, shape index: {}]   ;;  %s15348_s15 = inlined_call_operand.vmem [shape: f32[2,16,128], index: 15, kind: output, shape index: {}]  }
   0x1 LB: > { %s6881_s19 = sadd.s32 4294967295, %s8134_s18   ;;  %p6885_p0 = scmp.ge.s32.totalorder %s8134_s18, 1  ;;  %s8134_s18 = sphi %s8216_s18, %s25_s18  }
   0x2   : > { %p446_p1 = scmp.lt.s32.totalorder %s8134_s18, 3 }
   0x4   : > { %p447_p2 = pnand %p6885_p0, %p446_p1 }
   0x6   : > { %450 = sbr.rel (%p447_p2) target bundleno = 3837 (0xefd), region = 80 }
   0xb   : > { %p498_p3 = scmp.lt.s32.totalorder %s6881_s19, 1  ;;  %v533_v4 = vld [vmem:[%s15336_s3] sm:$0xff]  ;;  %vm535_vm0 = vcmask 130048   ;;  %v6895_v5 = vld [vmem:[%s15336_s3 + $0x10] sm:$0xff]  ;;  %v603_v6 = vld [vmem:[%s15337_s4 + $0x78] sm:$0xff] }
   0xc   : > { %v619_v7 = vld [vmem:[%s15337_s4 + $0xf8] sm:$0xff]  ;;  %v602_v8 = vld [vmem:[%s15337_s4 + $0x70] sm:$0xff]  ;;  %v601_v12 = vld [vmem:[%s15337_s4 + $0x68] sm:$0xff] }
   0xd   : > { %s15529_s19 = smov (!%p498_p3, %s6881_s19), 1  ;;  %v6916_v9 = vld [vmem:[%s15337_s4 + $0x178] sm:$0xff]  ;;  %v618_v11 = vld [vmem:[%s15337_s4 + $0xf0] sm:$0xff]  ;;  %v617_v15 = vld [vmem:[%s15337_s4 + $0xe8] sm:$0xff] }
   0xe   : > { %s7931_s20 = sshll.u32 %s15529_s19, 5  ;;  %v6932_v10 = vld [vmem:[%s15337_s4 + $0x1f8] sm:$0xff]  ;;  %v6915_v13 = vld [vmem:[%s15337_s4 + $0x170] sm:$0xff]  ;;  %v534_v16 = vld [vmem:[%s15336_s3 + $0x8] sm:$0xff]  ;;  %s6888_s28 = sshll.u32 %s15529_s19, 2 }
   0xf   : > { %s8230_s23 = scalar_lea.vmem %s15333_s0, %s7931_s20  ;;  %v6931_v14 = vld [vmem:[%s15337_s4 + $0x1f0] sm:$0xff]  ;;  %v600_v17 = vld [vmem:[%s15337_s4 + $0x60] sm:$0xff]  ;;  %v6896_v18 = vld [vmem:[%s15336_s3 + $0x18] sm:$0xff]  ;;  %s9110_s16 = scalar_lea.vmem %s15334_s1, %s6888_s28 }
  0x10   : > { %v8233_v0 = vld [vmem:[%s8230_s23 + $0x10] sm:$0xff]  ;;  %v8236_v1 = vld [vmem:[%s8230_s23 + $0x18] sm:$0xff]  ;;  %v8239_v2 = vld [vmem:[%s8230_s23] sm:$0xff]  ;;  %s7932_s30 = sshll.u32 %s15529_s19, 4 }
  0x11   : > { %556 = vmatpush.msra.mxu0 %v8233_v0  ;;  %643 = vmatpush.msra.mxu2 %v8233_v0  ;;  %v8244_v3 = vld [vmem:[%s8230_s23 + $0x8] sm:$0xff]  ;;  %v599_v19 = vld [vmem:[%s15337_s4 + $0x58] sm:$0xff]  ;;  %v598_v22 = vld [vmem:[%s15337_s4 + $0x50] sm:$0xff]  ;;  %s511_s21 = scalar_lea.vmem %s15348_s15, %s7932_s30 }
  0x12   : > { %666 = vmatpush.msra.mxu3 %v8236_v1  ;;  %579 = vmatpush.msra.mxu1 %v8236_v1  ;;  %v6914_v20 = vld [vmem:[%s15337_s4 + $0x168] sm:$0xff]  ;;  %v616_v23 = vld [vmem:[%s15337_s4 + $0xe0] sm:$0xff]  ;;  %v615_v27 = vld [vmem:[%s15337_s4 + $0xd8] sm:$0xff] }
  0x13   : > { %557 = vmatpush.msra.mxu0 %v8239_v2  ;;  %644 = vmatpush.msra.mxu2 %v8239_v2  ;;  %v6930_v21 = vld [vmem:[%s15337_s4 + $0x1e8] sm:$0xff]  ;;  %v6913_v24 = vld [vmem:[%s15337_s4 + $0x160] sm:$0xff]  ;;  %v6912_v28 = vld [vmem:[%s15337_s4 + $0x158] sm:$0xff] }
  0x14   : > { %667 = vmatpush.msra.mxu3 %v8244_v3  ;;  %6891 = vmatmul.msk.f32.vlgmr.msra.gmra.mxu0 %vm535_vm0, %v533_v4  ;;  %v6929_v25 = vld [vmem:[%s15337_s4 + $0x1e0] sm:$0xff]  ;;  %v597_v26 = vld [vmem:[%s15337_s4 + $0x48] sm:$0xff]  ;;  %v614_v29 = vld [vmem:[%s15337_s4 + $0xd0] sm:$0xff] }
  0x15   : > { %6897 = vmatmul.msk.f32.vlgmr.msra.gmra.mxu2 %vm535_vm0, %v6895_v5  ;;  %6899 = vmatmul.msk.f32.vlgmr.msra.gmra.mxu3 %vm535_vm0, %v6895_v5  ;;  %v6928_v30 = vld [vmem:[%s15337_s4 + $0x1d8] sm:$0xff]  ;;  %v596_v31 = vld [vmem:[%s15337_s4 + $0x40] sm:$0xff]  ;;  %v6911_v32 = vld [vmem:[%s15337_s4 + $0x150] sm:$0xff] }
  0x16   : > { %580 = vmatpush.msra.mxu1 %v8244_v3  ;;  %754 = vmatpush.msrb.mxu2 %v603_v6  ;;  %v613_v33 = vld [vmem:[%s15337_s4 + $0xc8] sm:$0xff]  ;;  %v6927_v34 = vld [vmem:[%s15337_s4 + $0x1d0] sm:$0xff]  ;;  %v595_v35 = vld [vmem:[%s15337_s4 + $0x38] sm:$0xff] }
  0x17   : > { %6893 = vmatmul.msk.f32.vlgmr.msra.gmra.mxu1 %vm535_vm0, %v533_v4  ;;  %777 = vmatpush.msrb.mxu3 %v619_v7  ;;  %v6910_v36 = vld [vmem:[%s15337_s4 + $0x148] sm:$0xff]  ;;  %v612_v37 = vld [vmem:[%s15337_s4 + $0xc0] sm:$0xff]  ;;  %v594_v39 = vld [vmem:[%s15337_s4 + $0x30] sm:$0xff] }
  0x18   : > { %755 = vmatpush.msrb.mxu2 %v602_v8  ;;  %708 = vmatpush.msrb.mxu0 %v6916_v9  ;;  %v6926_v38 = vld [vmem:[%s15337_s4 + $0x1c8] sm:$0xff]  ;;  %v6909_v40 = vld [vmem:[%s15337_s4 + $0x140] sm:$0xff]  ;;  %v611_v41 = vld [vmem:[%s15337_s4 + $0xb8] sm:$0xff] }
  0x19   : > { %731 = vmatpush.msrb.mxu1 %v6932_v10  ;;  %778 = vmatpush.msrb.mxu3 %v618_v11  ;;  %v6925_v42 = vld [vmem:[%s15337_s4 + $0x1c0] sm:$0xff]  ;;  %v593_v43 = vld [vmem:[%s15337_s4 + $0x28] sm:$0xff]  ;;  %v6908_v44 = vld [vmem:[%s15337_s4 + $0x138] sm:$0xff] }
  0x1a   : > { %756 = vmatpush.msrb.mxu2 %v601_v12  ;;  %709 = vmatpush.msrb.mxu0 %v6915_v13  ;;  %v610_v45 = vld [vmem:[%s15337_s4 + $0xb0] sm:$0xff]  ;;  %v6924_v46 = vld [vmem:[%s15337_s4 + $0x1b8] sm:$0xff]  ;;  %v592_v47 = vld [vmem:[%s15337_s4 + $0x20] sm:$0xff] }
  0x1b   : > { %732 = vmatpush.msrb.mxu1 %v6931_v14  ;;  %779 = vmatpush.msrb.mxu3 %v617_v15  ;;  %v6907_v48 = vld [vmem:[%s15337_s4 + $0x130] sm:$0xff]  ;;  %v609_v49 = vld [vmem:[%s15337_s4 + $0xa8] sm:$0xff]  ;;  %v591_v51 = vld [vmem:[%s15337_s4 + $0x18] sm:$0xff] }
  0x1c   : > { %6892 = vmatmul.msk.f32.gmra.mxu0 %vm535_vm0, %v534_v16  ;;  %757 = vmatpush.msrb.mxu2 %v600_v17  ;;  %v6923_v50 = vld [vmem:[%s15337_s4 + $0x1b0] sm:$0xff]  ;;  %v6906_v52 = vld [vmem:[%s15337_s4 + $0x128] sm:$0xff]  ;;  %v608_v53 = vld [vmem:[%s15337_s4 + $0xa0] sm:$0xff] }
  0x1d   : > { %6898 = vmatmul.msk.f32.gmra.mxu2 %vm535_vm0, %v6896_v18  ;;  %6900 = vmatmul.msk.f32.gmra.mxu3 %vm535_vm0, %v6896_v18  ;;  %v6922_v54 = vld [vmem:[%s15337_s4 + $0x1a8] sm:$0xff]  ;;  %v590_v55 = vld [vmem:[%s15337_s4 + $0x10] sm:$0xff]  ;;  %v6905_v56 = vld [vmem:[%s15337_s4 + $0x120] sm:$0xff] }
  0x1e   : > { %758 = vmatpush.msrb.mxu2 %v599_v19  ;;  %710 = vmatpush.msrb.mxu0 %v6914_v20  ;;  %v607_v57 = vld [vmem:[%s15337_s4 + $0x98] sm:$0xff]  ;;  %v6921_v58 = vld [vmem:[%s15337_s4 + $0x1a0] sm:$0xff]  ;;  %v589_v59 = vld [vmem:[%s15337_s4 + $0x8] sm:$0xff] }
  0x1f   : > { %6894 = vmatmul.msk.f32.gmra.mxu1 %vm535_vm0, %v534_v16  ;;  %780 = vmatpush.msrb.mxu3 %v616_v23  ;;  %v6904_v60 = vld [vmem:[%s15337_s4 + $0x118] sm:$0xff]  ;;  %v588_v62 = vld [vmem:[%s15337_s4] sm:$0xff]  ;;  %v606_v63 = vld [vmem:[%s15337_s4 + $0x90] sm:$0xff] }
  0x20   : > { %733 = vmatpush.msrb.mxu1 %v6930_v21  ;;  %759 = vmatpush.msrb.mxu2 %v598_v22  ;;  %v6920_v61 = vld [vmem:[%s15337_s4 + $0x198] sm:$0xff]  ;;  %v6903_v4 = vld [vmem:[%s15337_s4 + $0x110] sm:$0xff]  ;;  %v605_v6 = vld [vmem:[%s15337_s4 + $0x88] sm:$0xff] }
  0x21   : > { %711 = vmatpush.msrb.mxu0 %v6913_v24  ;;  %781 = vmatpush.msrb.mxu3 %v615_v27  ;;  %v6919_v5 = vld [vmem:[%s15337_s4 + $0x190] sm:$0xff]  ;;  %v6902_v7 = vld [vmem:[%s15337_s4 + $0x108] sm:$0xff]  ;;  %v604_v9 = vld [vmem:[%s15337_s4 + $0x80] sm:$0xff] }
  0x22   : > { %734 = vmatpush.msrb.mxu1 %v6929_v25  ;;  %760 = vmatpush.msrb.mxu2 %v597_v26  ;;  %v6918_v8 = vld [vmem:[%s15337_s4 + $0x188] sm:$0xff]  ;;  %v6901_v10 = vld [vmem:[%s15337_s4 + $0x100] sm:$0xff]  ;;  %v6954_v21 = vld [vmem:[%s15337_s4 + $0x278] sm:$0xff] }
  0x23   : > { %712 = vmatpush.msrb.mxu0 %v6912_v28  ;;  %782 = vmatpush.msrb.mxu3 %v614_v29  ;;  %v6917_v11 = vld [vmem:[%s15337_s4 + $0x180] sm:$0xff]  ;;  %v6970_v22 = vld [vmem:[%s15337_s4 + $0x2f8] sm:$0xff]  ;;  %v6953_v23 = vld [vmem:[%s15337_s4 + $0x270] sm:$0xff] }
  0x24   : > { %735 = vmatpush.msrb.mxu1 %v6928_v30  ;;  %761 = vmatpush.msrb.mxu2 %v596_v31  ;;  %v6933_v18 = vld [vmem:[%s15336_s3 + $0x20] sm:$0xff]  ;;  %v6969_v24 = vld [vmem:[%s15337_s4 + $0x2f0] sm:$0xff]  ;;  %v6968_v25 = vld [vmem:[%s15337_s4 + $0x2e8] sm:$0xff] }
  0x25   : > { %713 = vmatpush.msrb.mxu0 %v6911_v32  ;;  %783 = vmatpush.msrb.mxu3 %v613_v33  ;;  %v6952_v26 = vld [vmem:[%s15337_s4 + $0x268] sm:$0xff]  ;;  %v6967_v27 = vld [vmem:[%s15337_s4 + $0x2e0] sm:$0xff]  ;;  %v6971_v28 = vld [vmem:[%s15336_s3 + $0x30] sm:$0xff] }
  0x26   : > { %736 = vmatpush.msrb.mxu1 %v6927_v34  ;;  %762 = vmatpush.msrb.mxu2 %v595_v35  ;;  %v6934_v29 = vld [vmem:[%s15336_s3 + $0x28] sm:$0xff]  ;;  %v6966_v30 = vld [vmem:[%s15337_s4 + $0x2d8] sm:$0xff]  ;;  %v6951_v31 = vld [vmem:[%s15337_s4 + $0x260] sm:$0xff] }
  0x27   : > { %714 = vmatpush.msrb.mxu0 %v6910_v36  ;;  %784 = vmatpush.msrb.mxu3 %v612_v37  ;;  %v6965_v32 = vld [vmem:[%s15337_s4 + $0x2d0] sm:$0xff]  ;;  %v6950_v33 = vld [vmem:[%s15337_s4 + $0x258] sm:$0xff]  ;;  %v6964_v34 = vld [vmem:[%s15337_s4 + $0x2c8] sm:$0xff] }
  0x28   : > { %737 = vmatpush.msrb.mxu1 %v6926_v38  ;;  %763 = vmatpush.msrb.mxu2 %v594_v39  ;;  %v6949_v35 = vld [vmem:[%s15337_s4 + $0x250] sm:$0xff]  ;;  %v6972_v36 = vld [vmem:[%s15336_s3 + $0x38] sm:$0xff]  ;;  %v6948_v37 = vld [vmem:[%s15337_s4 + $0x248] sm:$0xff] }
  0x29   : > { %715 = vmatpush.msrb.mxu0 %v6909_v40  ;;  %785 = vmatpush.msrb.mxu3 %v611_v41  ;;  %v6947_v38 = vld [vmem:[%s15337_s4 + $0x240] sm:$0xff]  ;;  %v6946_v40 = vld [vmem:[%s15337_s4 + $0x238] sm:$0xff] }
  0x2a   : > { %738 = vmatpush.msrb.mxu1 %v6925_v42  ;;  %764 = vmatpush.msrb.mxu2 %v593_v43  ;;  %v6963_v39 = vld [vmem:[%s15337_s4 + $0x2c0] sm:$0xff]  ;;  %v6962_v41 = vld [vmem:[%s15337_s4 + $0x2b8] sm:$0xff] }
  0x2b   : > { %716 = vmatpush.msrb.mxu0 %v6908_v44  ;;  %786 = vmatpush.msrb.mxu3 %v610_v45  ;;  %v6992_v42 = vld [vmem:[%s15337_s4 + $0x378] sm:$0xff]  ;;  %v6945_v44 = vld [vmem:[%s15337_s4 + $0x230] sm:$0xff] }
  0x2c   : > { %739 = vmatpush.msrb.mxu1 %v6924_v46  ;;  %765 = vmatpush.msrb.mxu2 %v592_v47  ;;  %v7008_v43 = vld [vmem:[%s15337_s4 + $0x3f8] sm:$0xff]  ;;  %v6961_v45 = vld [vmem:[%s15337_s4 + $0x2b0] sm:$0xff] }
  0x2d   : > { %717 = vmatpush.msrb.mxu0 %v6907_v48  ;;  %787 = vmatpush.msrb.mxu3 %v609_v49  ;;  %v6991_v46 = vld [vmem:[%s15337_s4 + $0x370] sm:$0xff]  ;;  %v6944_v48 = vld [vmem:[%s15337_s4 + $0x228] sm:$0xff] }
  0x2e   : > { %740 = vmatpush.msrb.mxu1 %v6923_v50  ;;  %766 = vmatpush.msrb.mxu2 %v591_v51  ;;  %v7007_v47 = vld [vmem:[%s15337_s4 + $0x3f0] sm:$0xff]  ;;  %v6960_v49 = vld [vmem:[%s15337_s4 + $0x2a8] sm:$0xff] }
  0x2f   : > { %718 = vmatpush.msrb.mxu0 %v6906_v52  ;;  %788 = vmatpush.msrb.mxu3 %v608_v53  ;;  %v6990_v50 = vld [vmem:[%s15337_s4 + $0x368] sm:$0xff]  ;;  %v6943_v52 = vld [vmem:[%s15337_s4 + $0x220] sm:$0xff] }
  0x30   : > { %741 = vmatpush.msrb.mxu1 %v6922_v54  ;;  %767 = vmatpush.msrb.mxu2 %v590_v55  ;;  %v7006_v51 = vld [vmem:[%s15337_s4 + $0x3e8] sm:$0xff]  ;;  %v6959_v53 = vld [vmem:[%s15337_s4 + $0x2a0] sm:$0xff] }
  0x31   : > { %719 = vmatpush.msrb.mxu0 %v6905_v56  ;;  %789 = vmatpush.msrb.mxu3 %v607_v57  ;;  %v6989_v54 = vld [vmem:[%s15337_s4 + $0x360] sm:$0xff]  ;;  %v6942_v56 = vld [vmem:[%s15337_s4 + $0x218] sm:$0xff] }
  0x32   : > { %742 = vmatpush.msrb.mxu1 %v6921_v58  ;;  %768 = vmatpush.msrb.mxu2 %v589_v59  ;;  %v7005_v55 = vld [vmem:[%s15337_s4 + $0x3e0] sm:$0xff]  ;;  %v6958_v57 = vld [vmem:[%s15337_s4 + $0x298] sm:$0xff] }
  0x33   : > { %720 = vmatpush.msrb.mxu0 %v6904_v60  ;;  %790 = vmatpush.msrb.mxu3 %v606_v63  ;;  %v6988_v58 = vld [vmem:[%s15337_s4 + $0x358] sm:$0xff]  ;;  %v6941_v60 = vld [vmem:[%s15337_s4 + $0x210] sm:$0xff] }
  0x34   : > { %743 = vmatpush.msrb.mxu1 %v6920_v61  ;;  %769 = vmatpush.msrb.mxu2 %v588_v62  ;;  %v7004_v59 = vld [vmem:[%s15337_s4 + $0x3d8] sm:$0xff]  ;;  %v6957_v61 = vld [vmem:[%s15337_s4 + $0x290] sm:$0xff] }
  0x35   : > { %721 = vmatpush.msrb.mxu0 %v6903_v4  ;;  %791 = vmatpush.msrb.mxu3 %v605_v6  ;;  %v6987_v62 = vld [vmem:[%s15337_s4 + $0x350] sm:$0xff]  ;;  %v6940_v4 = vld [vmem:[%s15337_s4 + $0x208] sm:$0xff] }
  0x36   : > { %744 = vmatpush.msrb.mxu1 %v6919_v5  ;;  %823 = vmatpush.msra.mxu2 %v8233_v0  ;;  %v7003_v63 = vld [vmem:[%s15337_s4 + $0x3d0] sm:$0xff]  ;;  %v6956_v5 = vld [vmem:[%s15337_s4 + $0x288] sm:$0xff] }
  0x37   : > { %722 = vmatpush.msrb.mxu0 %v6902_v7  ;;  %792 = vmatpush.msrb.mxu3 %v604_v9  ;;  %v6986_v6 = vld [vmem:[%s15337_s4 + $0x348] sm:$0xff]  ;;  %v6955_v9 = vld [vmem:[%s15337_s4 + $0x280] sm:$0xff] }
  0x38   : > { %745 = vmatpush.msrb.mxu1 %v6918_v8  ;;  %824 = vmatpush.msra.mxu2 %v8239_v2  ;;  %v7002_v7 = vld [vmem:[%s15337_s4 + $0x3c8] sm:$0xff]  ;;  %v6939_v8 = vld [vmem:[%s15337_s4 + $0x200] sm:$0xff] }
  0x39   : > { %723 = vmatpush.msrb.mxu0 %v6901_v10  ;;  %911 = vmatpush.msra.mxu3 %v6970_v22  ;;  %v6985_v10 = vld [vmem:[%s15337_s4 + $0x340] sm:$0xff]  ;;  %v6979_v22 = vld [vmem:[%s15337_s4 + $0x310] sm:$0xff] }
  0x3a   : > { %746 = vmatpush.msrb.mxu1 %v6917_v11  ;;  %v7001_v11 = vld [vmem:[%s15337_s4 + $0x3c0] sm:$0xff] }
  0x3b   : > { %959 = vmatpush.msra.mxu0 %v8233_v0  ;;  %912 = vmatpush.msra.mxu3 %v6969_v24  ;;  %v6978_v24 = vld [vmem:[%s15337_s4 + $0x308] sm:$0xff] }
  0x3c   : > { %846 = vmatpush.msra.mxu1 %v8236_v1 }
  0x3d   : > { %960 = vmatpush.msra.mxu0 %v8239_v2  ;;  %913 = vmatpush.msra.mxu3 %v6968_v25  ;;  %v6994_v25 = vld [vmem:[%s15337_s4 + $0x388] sm:$0xff] }
  0x3e   : > { %847 = vmatpush.msra.mxu1 %v8244_v3 }
  0x3f   : > { %914 = vmatpush.msra.mxu3 %v6967_v27  ;;  %v6977_v27 = vld [vmem:[%s15337_s4 + $0x300] sm:$0xff] }
  0x41   : > { %915 = vmatpush.msra.mxu3 %v6966_v30 }
  0x43   : > { %916 = vmatpush.msra.mxu3 %v6965_v32 }
  0x45   : > { %917 = vmatpush.msra.mxu3 %v6964_v34 }
  0x47   : > { %918 = vmatpush.msra.mxu3 %v6963_v39 }
  0x49   : > { %919 = vmatpush.msra.mxu3 %v6962_v41  ;;  %v7046_v41 = vld [vmem:[%s15337_s4 + $0x4f8] sm:$0xff] }
  0x4b   : > { %920 = vmatpush.msra.mxu3 %v6961_v45  ;;  %v7044_v45 = vld [vmem:[%s15337_s4 + $0x4e8] sm:$0xff] }
  0x4d   : > { %921 = vmatpush.msra.mxu3 %v6960_v49  ;;  %v7047_v49 = vld [vmem:[%s15336_s3 + $0x50] sm:$0xff] }
  0x4f   : > { %922 = vmatpush.msra.mxu3 %v6959_v53  ;;  %v7084_v53 = vld [vmem:[%s15337_s4 + $0x5f8] sm:$0xff] }
  0x51   : > { %923 = vmatpush.msra.mxu3 %v6958_v57  ;;  %v7083_v57 = vld [vmem:[%s15337_s4 + $0x5f0] sm:$0xff] }
  0x53   : > { %924 = vmatpush.msra.mxu3 %v6957_v61  ;;  %v7048_v61 = vld [vmem:[%s15336_s3 + $0x58] sm:$0xff] }
  0x55   : > { %925 = vmatpush.msra.mxu3 %v6956_v5  ;;  %v7039_v5 = vld [vmem:[%s15337_s4 + $0x4c0] sm:$0xff] }
  0x57   : > { %926 = vmatpush.msra.mxu3 %v6955_v9  ;;  %v7038_v9 = vld [vmem:[%s15337_s4 + $0x4b8] sm:$0xff] }
  0x91   : > { %v559_v12 = vpop.f32.mrf.mxu0 }
  0x92   : > { %770 = vmatmul.f32.vlgmr.msrb.gmra.mxu2 %v559_v12  ;;  %v6984_v12 = vld [vmem:[%s15337_s4 + $0x338] sm:$0xff] }
  0x93   : > { %888 = vmatpush.msrb.mxu2 %v6954_v21  ;;  %v6996_v21 = vld [vmem:[%s15337_s4 + $0x398] sm:$0xff] }
  0x94   : > { %v582_v13 = vpop.f32.mrf.mxu1 }
  0x95   : > { %793 = vmatmul.f32.vlgmr.msrb.gmra.mxu3 %v582_v13  ;;  %889 = vmatpush.msrb.mxu2 %v6953_v23  ;;  %v7000_v13 = vld [vmem:[%s15337_s4 + $0x3b8] sm:$0xff]  ;;  %v6995_v23 = vld [vmem:[%s15337_s4 + $0x390] sm:$0xff] }
  0x96   : > { %1118 = vmatpush.msrb.mxu3 %v8236_v1 }
  0x97   : > { %890 = vmatpush.msrb.mxu2 %v6952_v26 }
  0x98   : > { %v646_v14 = vpop.f32.mrf.mxu2  ;;  %v669_v15 = vpop.f32.mrf.mxu3  ;;  %1119 = vmatpush.msrb.mxu3 %v8244_v3 }
  0x99   : > { %724 = vmatmul.f32.vlgmr.msrb.gmra.mxu0 %v646_v14  ;;  %747 = vmatmul.f32.vlgmr.msrb.gmra.mxu1 %v669_v15  ;;  %v562_v16 = vpop.f32.mrf.mxu0  ;;  %v6983_v14 = vld [vmem:[%s15337_s4 + $0x330] sm:$0xff] }
  0x9a   : > { %773 = vmatmul.f32.gmra.mxu2 %v562_v16  ;;  %982 = vmatpush.msrb.mxu1 %v8236_v1  ;;  %v6999_v15 = vld [vmem:[%s15337_s4 + $0x3b0] sm:$0xff]  ;;  %v6982_v16 = vld [vmem:[%s15337_s4 + $0x328] sm:$0xff] }
  0x9b   : > { %891 = vmatpush.msrb.mxu2 %v6951_v31  ;;  %1024 = vmatpush.msrb.mxu0 %v6992_v42  ;;  %v7029_v42 = vld [vmem:[%s15337_s4 + $0x470] sm:$0xff] }
  0x9c   : > { %v585_v17 = vpop.f32.mrf.mxu1  ;;  %983 = vmatpush.msrb.mxu1 %v8244_v3 }
  0x9d   : > { %796 = vmatmul.f32.gmra.mxu3 %v585_v17  ;;  %892 = vmatpush.msrb.mxu2 %v6950_v33  ;;  %v6998_v17 = vld [vmem:[%s15337_s4 + $0x3a8] sm:$0xff] }
  0x9e   : > { %1025 = vmatpush.msrb.mxu0 %v6991_v46  ;;  %v7009_v46 = vld [vmem:[%s15336_s3 + $0x40] sm:$0xff] }
  0x9f   : > { %893 = vmatpush.msrb.mxu2 %v6949_v35 }
  0xa0   : > { %v649_v19 = vpop.f32.mrf.mxu2  ;;  %v672_v20 = vpop.f32.mrf.mxu3  ;;  %1026 = vmatpush.msrb.mxu0 %v6990_v50  ;;  %v7027_v50 = vld [vmem:[%s15337_s4 + $0x460] sm:$0xff] }
  0xa1   : > { %727 = vmatmul.f32.gmra.mxu0 %v649_v19  ;;  %750 = vmatmul.f32.gmra.mxu1 %v672_v20  ;;  %v6997_v19 = vld [vmem:[%s15337_s4 + $0x3a0] sm:$0xff]  ;;  %v6980_v20 = vld [vmem:[%s15337_s4 + $0x318] sm:$0xff] }
  0xa2   : > { %6935 = vmatmul.msk.f32.vlgmr.msra.gmra.mxu2 %vm535_vm0, %v6933_v18  ;;  %1027 = vmatpush.msrb.mxu0 %v6989_v54  ;;  %v7026_v54 = vld [vmem:[%s15337_s4 + $0x458] sm:$0xff] }
  0xa3   : > { %894 = vmatpush.msrb.mxu2 %v6948_v37 }
  0xa4   : > { %1028 = vmatpush.msrb.mxu0 %v6988_v58  ;;  %v7025_v58 = vld [vmem:[%s15337_s4 + $0x450] sm:$0xff] }
  0xa5   : > { %895 = vmatpush.msrb.mxu2 %v6947_v38 }
  0xa6   : > { %1029 = vmatpush.msrb.mxu0 %v6987_v62  ;;  %v7024_v62 = vld [vmem:[%s15337_s4 + $0x448] sm:$0xff] }
  0xa7   : > { %896 = vmatpush.msrb.mxu2 %v6946_v40  ;;  %v7030_v40 = vld [vmem:[%s15337_s4 + $0x478] sm:$0xff] }
  0xa8   : > { %1030 = vmatpush.msrb.mxu0 %v6986_v6  ;;  %v7066_v6 = vld [vmem:[%s15337_s4 + $0x568] sm:$0xff] }
  0xa9   : > { %6937 = vmatmul.msk.f32.vlgmr.msra.gmra.mxu1 %vm535_vm0, %v6933_v18  ;;  %6973 = vmatmul.msk.f32.vlgmr.msra.gmra.mxu0 %vm535_vm0, %v6971_v28  ;;  %v6981_v18 = vld [vmem:[%s15337_s4 + $0x320] sm:$0xff] }
  0xaa   : > { %6936 = vmatmul.msk.f32.gmra.mxu2 %vm535_vm0, %v6934_v29  ;;  %1047 = vmatpush.msra.mxu1 %v7008_v43  ;;  %v7045_v43 = vld [vmem:[%s15337_s4 + $0x4f0] sm:$0xff] }
  0xab   : > { %897 = vmatpush.msrb.mxu2 %v6945_v44  ;;  %1031 = vmatpush.msrb.mxu0 %v6985_v10  ;;  %v7028_v44 = vld [vmem:[%s15337_s4 + $0x468] sm:$0xff]  ;;  %v7065_v10 = vld [vmem:[%s15337_s4 + $0x560] sm:$0xff] }
  0xac   : > { %1048 = vmatpush.msra.mxu1 %v7007_v47  ;;  %v7043_v47 = vld [vmem:[%s15337_s4 + $0x4e0] sm:$0xff] }
  0xad   : > { %898 = vmatpush.msrb.mxu2 %v6944_v48  ;;  %1032 = vmatpush.msrb.mxu0 %v6984_v12  ;;  %v7068_v48 = vld [vmem:[%s15337_s4 + $0x578] sm:$0xff]  ;;  %v7021_v12 = vld [vmem:[%s15337_s4 + $0x430] sm:$0xff] }
  0xae   : > { %1049 = vmatpush.msra.mxu1 %v7006_v51 }
  0xaf   : > { %899 = vmatpush.msrb.mxu2 %v6943_v52  ;;  %1033 = vmatpush.msrb.mxu0 %v6983_v14  ;;  %v7042_v52 = vld [vmem:[%s15337_s4 + $0x4d8] sm:$0xff] }
  0xb0   : > { %1050 = vmatpush.msra.mxu1 %v7005_v55  ;;  %v7067_v55 = vld [vmem:[%s15337_s4 + $0x570] sm:$0xff]  ;;  %v7064_v14 = vld [vmem:[%s15337_s4 + $0x558] sm:$0xff] }
  0xb1   : > { %6938 = vmatmul.msk.f32.gmra.mxu1 %vm535_vm0, %v6934_v29  ;;  %6974 = vmatmul.msk.f32.gmra.mxu0 %vm535_vm0, %v6972_v36 }
  0xb2   : > { %900 = vmatpush.msrb.mxu2 %v6942_v56  ;;  %1051 = vmatpush.msra.mxu1 %v7004_v59  ;;  %v7041_v56 = vld [vmem:[%s15337_s4 + $0x4d0] sm:$0xff]  ;;  %v7040_v59 = vld [vmem:[%s15337_s4 + $0x4c8] sm:$0xff] }
  0xb3   : > { %1034 = vmatpush.msrb.mxu0 %v6982_v16  ;;  %v7020_v16 = vld [vmem:[%s15337_s4 + $0x428] sm:$0xff] }
  0xb4   : > { %901 = vmatpush.msrb.mxu2 %v6941_v60  ;;  %1052 = vmatpush.msra.mxu1 %v7003_v63  ;;  %v7010_v60 = vld [vmem:[%s15336_s3 + $0x48] sm:$0xff] }
  0xb5   : > { %1035 = vmatpush.msrb.mxu0 %v6981_v18  ;;  %v7063_v18 = vld [vmem:[%s15337_s4 + $0x550] sm:$0xff] }
  0xb6   : > { %902 = vmatpush.msrb.mxu2 %v6940_v4  ;;  %1053 = vmatpush.msra.mxu1 %v7002_v7  ;;  %v7023_v4 = vld [vmem:[%s15337_s4 + $0x440] sm:$0xff]  ;;  %v7082_v7 = vld [vmem:[%s15337_s4 + $0x5e8] sm:$0xff] }
  0xb7   : > { %1036 = vmatpush.msrb.mxu0 %v6980_v20  ;;  %v7019_v20 = vld [vmem:[%s15337_s4 + $0x420] sm:$0xff] }
  0xb8   : > { %903 = vmatpush.msrb.mxu2 %v6939_v8  ;;  %1054 = vmatpush.msra.mxu1 %v7001_v11  ;;  %v7022_v8 = vld [vmem:[%s15337_s4 + $0x438] sm:$0xff]  ;;  %v7081_v11 = vld [vmem:[%s15337_s4 + $0x5e0] sm:$0xff] }
  0xb9   : > { %6975 = vmatmul.msk.f32.vlgmr.msrb.gmra.mxu1 %vm535_vm0, %v6971_v28  ;;  %1037 = vmatpush.msrb.mxu0 %v6979_v22  ;;  %v6993_v28 = vld [vmem:[%s15337_s4 + $0x380] sm:$0xff]  ;;  %v7062_v22 = vld [vmem:[%s15337_s4 + $0x548] sm:$0xff] }
  0xba   : > { %1095 = vmatpush.msra.mxu2 %v8233_v0  ;;  %1055 = vmatpush.msra.mxu1 %v7000_v13  ;;  %v7037_v13 = vld [vmem:[%s15337_s4 + $0x4b0] sm:$0xff] }
  0xbb   : > { %1038 = vmatpush.msrb.mxu0 %v6978_v24  ;;  %v7018_v24 = vld [vmem:[%s15337_s4 + $0x418] sm:$0xff] }
  0xbc   : > { %1096 = vmatpush.msra.mxu2 %v8239_v2  ;;  %1056 = vmatpush.msra.mxu1 %v6999_v15  ;;  %v7080_v15 = vld [vmem:[%s15337_s4 + $0x5d8] sm:$0xff] }
  0xbd   : > { %1039 = vmatpush.msrb.mxu0 %v6977_v27  ;;  %v7061_v27 = vld [vmem:[%s15337_s4 + $0x540] sm:$0xff] }
  0xbe   : > { %1057 = vmatpush.msra.mxu1 %v6998_v17  ;;  %v7036_v17 = vld [vmem:[%s15337_s4 + $0x4a8] sm:$0xff] }
  0xbf   : > { %1231 = vmatpush.msra.mxu0 %v8233_v0 }
  0xc0   : > { %1058 = vmatpush.msra.mxu1 %v6997_v19  ;;  %v7079_v19 = vld [vmem:[%s15337_s4 + $0x5d0] sm:$0xff] }
  0xc1   : > { %6976 = vmatmul.msk.f32.gmra.mxu1 %vm535_vm0, %v6972_v36  ;;  %1232 = vmatpush.msra.mxu0 %v8239_v2 }
  0xc2   : > { %1059 = vmatpush.msra.mxu1 %v6996_v21  ;;  %v7035_v21 = vld [vmem:[%s15337_s4 + $0x4a0] sm:$0xff] }
  0xc4   : > { %1060 = vmatpush.msra.mxu1 %v6995_v23  ;;  %v7078_v23 = vld [vmem:[%s15337_s4 + $0x5c8] sm:$0xff] }
  0xc6   : > { %1061 = vmatpush.msra.mxu1 %v6994_v25  ;;  %v7034_v25 = vld [vmem:[%s15337_s4 + $0x498] sm:$0xff] }
  0xc8   : > { %1062 = vmatpush.msra.mxu1 %v6993_v28  ;;  %v7077_v28 = vld [vmem:[%s15337_s4 + $0x5c0] sm:$0xff] }
  0xca   : > { %1254 = vmatpush.msrb.mxu1 %v8236_v1 }
  0xcc   : > { %1255 = vmatpush.msrb.mxu1 %v8244_v3 }
 0x115   : > { %v8682_v26 = vpop.f32.mrf.mxu2 }
 0x116   : > { %v8690_v29 = vpop.f32.mrf.mxu0  ;;  %v8692_v30 = vpop.f32.mrf.mxu1 }
 0x11d   : > { %v8698_v31 = vpop.f32.mrf.mxu2 }
 0x11e   : > { %v8700_v32 = vpop.f32.mrf.mxu0  ;;  %v8702_v33 = vpop.f32.mrf.mxu1 }
 0x125   : > { %v826_v34 = vpop.f32.mrf.mxu2 }
 0x126   : > { %v849_v35 = vpop.f32.mrf.mxu1  ;;  %904 = vmatmul.f32.vlgmr.msrb.gmra.mxu2 %v826_v34  ;;  %v962_v36 = vpop.f32.mrf.mxu0  ;;  %v7017_v34 = vld [vmem:[%s15337_s4 + $0x410] sm:$0xff] }
 0x127   : > { %927 = vmatmul.f32.vlgmr.msra.gmra.mxu3 %v849_v35  ;;  %1040 = vmatmul.f32.vlgmr.msrb.gmra.mxu0 %v962_v36  ;;  %v7033_v35 = vld [vmem:[%s15337_s4 + $0x490] sm:$0xff]  ;;  %v7060_v36 = vld [vmem:[%s15337_s4 + $0x538] sm:$0xff] }
 0x128   : > { %1160 = vmatpush.msrb.mxu2 %v7030_v40  ;;  %1183 = vmatpush.msra.mxu3 %v7046_v41  ;;  %v7059_v40 = vld [vmem:[%s15337_s4 + $0x530] sm:$0xff]  ;;  %v8871_v41 = vpop.f32.mrf.mxu3 }
 0x129   : > { %1296 = vmatpush.msrb.mxu0 %v7068_v48  ;;  %v7073_v48 = vld [vmem:[%s15337_s4 + $0x5a0] sm:$0xff] }
 0x12a   : > { %1161 = vmatpush.msrb.mxu2 %v7029_v42  ;;  %1184 = vmatpush.msra.mxu3 %v7045_v43  ;;  %v7075_v42 = vld [vmem:[%s15337_s4 + $0x5b0] sm:$0xff]  ;;  %v7015_v43 = vld [vmem:[%s15337_s4 + $0x400] sm:$0xff] }
 0x12b   : > { %1297 = vmatpush.msrb.mxu0 %v7067_v55 }
 0x12c   : > { %1162 = vmatpush.msrb.mxu2 %v7028_v44  ;;  %1185 = vmatpush.msra.mxu3 %v7044_v45  ;;  %v7031_v44 = vld [vmem:[%s15337_s4 + $0x480] sm:$0xff]  ;;  %v7058_v45 = vld [vmem:[%s15337_s4 + $0x528] sm:$0xff] }
 0x12d   : > { %v829_v37 = vpop.f32.mrf.mxu2  ;;  %1298 = vmatpush.msrb.mxu0 %v7066_v6  ;;  %v7105_v6 = vld [vmem:[%s15337_s4 + $0x670] sm:$0xff] }
 0x12e   : > { %v852_v38 = vpop.f32.mrf.mxu1  ;;  %907 = vmatmul.f32.gmra.mxu2 %v829_v37  ;;  %v965_v39 = vpop.f32.mrf.mxu0  ;;  %1186 = vmatpush.msra.mxu3 %v7043_v47  ;;  %v7076_v37 = vld [vmem:[%s15337_s4 + $0x5b8] sm:$0xff]  ;;  %v7057_v47 = vld [vmem:[%s15337_s4 + $0x520] sm:$0xff] }
 0x12f   : > { %930 = vmatmul.f32.gmra.mxu3 %v852_v38  ;;  %1043 = vmatmul.f32.gmra.mxu0 %v965_v39  ;;  %v7016_v38 = vld [vmem:[%s15337_s4 + $0x408] sm:$0xff] }
 0x130   : > { %1163 = vmatpush.msrb.mxu2 %v7027_v50  ;;  %1187 = vmatpush.msra.mxu3 %v7042_v52  ;;  %v7032_v39 = vld [vmem:[%s15337_s4 + $0x488] sm:$0xff]  ;;  %v7072_v50 = vld [vmem:[%s15337_s4 + $0x598] sm:$0xff]  ;;  %v7053_v52 = vld [vmem:[%s15337_s4 + $0x500] sm:$0xff] }
 0x131   : > { %1299 = vmatpush.msrb.mxu0 %v7065_v10 }
 0x132   : > { %1164 = vmatpush.msrb.mxu2 %v7026_v54  ;;  %1188 = vmatpush.msra.mxu3 %v7041_v56 }
 0x133   : > { %1300 = vmatpush.msrb.mxu0 %v7064_v14  ;;  %v7102_v14 = vld [vmem:[%s15337_s4 + $0x658] sm:$0xff] }
 0x134   : > { %1165 = vmatpush.msrb.mxu2 %v7025_v58  ;;  %1189 = vmatpush.msra.mxu3 %v7040_v59 }
 0x135   : > { %1301 = vmatpush.msrb.mxu0 %v7063_v18  ;;  %v7101_v18 = vld [vmem:[%s15337_s4 + $0x650] sm:$0xff] }
 0x136   : > { %v985_v51 = vpop.f32.mrf.mxu1  ;;  %7011 = vmatmul.msk.f32.vlgmr.msra.gmra.mxu2 %vm535_vm0, %v7009_v46  ;;  %1190 = vmatpush.msra.mxu3 %v7039_v5 }
 0x137   : > { %1063 = vmatmul.f32.vlgmr.msra.gmra.mxu1 %v985_v51  ;;  %7013 = vmatmul.msk.f32.vlgmr.msrb.gmra.mxu3 %vm535_vm0, %v7009_v46  ;;  %v7074_v46 = vld [vmem:[%s15337_s4 + $0x5a8] sm:$0xff] }
 0x138   : > { %7049 = vmatmul.msk.f32.vlgmr.msra.gmra.mxu0 %vm535_vm0, %v7047_v49  ;;  %1319 = vmatpush.msra.mxu1 %v7084_v53  ;;  %v7054_v51 = vld [vmem:[%s15337_s4 + $0x508] sm:$0xff]  ;;  %v7069_v53 = vld [vmem:[%s15337_s4 + $0x580] sm:$0xff] }
 0x139   : > { %1166 = vmatpush.msrb.mxu2 %v7024_v62  ;;  %1191 = vmatpush.msra.mxu3 %v7038_v9  ;;  %v7106_v62 = vld [vmem:[%s15337_s4 + $0x678] sm:$0xff]  ;;  %v7104_v9 = vld [vmem:[%s15337_s4 + $0x668] sm:$0xff] }
 0x13a   : > { %1320 = vmatpush.msra.mxu1 %v7083_v57  ;;  %1302 = vmatpush.msrb.mxu0 %v7062_v22  ;;  %v7116_v22 = vld [vmem:[%s15337_s4 + $0x6c8] sm:$0xff] }
 0x13b   : > { %1167 = vmatpush.msrb.mxu2 %v7023_v4  ;;  %1192 = vmatpush.msra.mxu3 %v7037_v13  ;;  %v7122_v4 = vld [vmem:[%s15337_s4 + $0x6f8] sm:$0xff]  ;;  %v7119_v13 = vld [vmem:[%s15337_s4 + $0x6e0] sm:$0xff] }
 0x13c   : > { %1321 = vmatpush.msra.mxu1 %v7082_v7  ;;  %1303 = vmatpush.msrb.mxu0 %v7061_v27  ;;  %v7121_v7 = vld [vmem:[%s15337_s4 + $0x6f0] sm:$0xff]  ;;  %v7099_v27 = vld [vmem:[%s15337_s4 + $0x640] sm:$0xff] }
 0x13d   : > { %1168 = vmatpush.msrb.mxu2 %v7022_v8  ;;  %1193 = vmatpush.msra.mxu3 %v7036_v17 }
 0x13e   : > { %v988_v63 = vpop.f32.mrf.mxu1  ;;  %7012 = vmatmul.msk.f32.gmra.mxu2 %vm535_vm0, %v7010_v60  ;;  %1322 = vmatpush.msra.mxu1 %v7081_v11  ;;  %v7120_v11 = vld [vmem:[%s15337_s4 + $0x6e8] sm:$0xff] }
 0x13f   : > { %1066 = vmatmul.f32.gmra.mxu1 %v988_v63  ;;  %7014 = vmatmul.msk.f32.gmra.mxu3 %vm535_vm0, %v7010_v60 }
 0x140   : > { %7050 = vmatmul.msk.f32.gmra.mxu0 %vm535_vm0, %v7048_v61  ;;  %1169 = vmatpush.msrb.mxu2 %v7021_v12  ;;  %v7103_v12 = vld [vmem:[%s15337_s4 + $0x660] sm:$0xff] }
 0x141   : > { %1323 = vmatpush.msra.mxu1 %v7080_v15  ;;  %1194 = vmatpush.msra.mxu3 %v7035_v21  ;;  %v7100_v21 = vld [vmem:[%s15337_s4 + $0x648] sm:$0xff] }
 0x142   : > { %1170 = vmatpush.msrb.mxu2 %v7020_v16  ;;  %1304 = vmatpush.msrb.mxu0 %v7060_v36  ;;  %v7118_v16 = vld [vmem:[%s15337_s4 + $0x6d8] sm:$0xff]  ;;  %v7097_v36 = vld [vmem:[%s15337_s4 + $0x630] sm:$0xff] }
 0x143   : > { %1324 = vmatpush.msra.mxu1 %v7079_v19  ;;  %1195 = vmatpush.msra.mxu3 %v7034_v25  ;;  %v7117_v19 = vld [vmem:[%s15337_s4 + $0x6d0] sm:$0xff]  ;;  %v7086_v25 = vld [vmem:[%s15336_s3 + $0x68] sm:$0xff] }
 0x144   : > { %1171 = vmatpush.msrb.mxu2 %v7019_v20  ;;  %1305 = vmatpush.msrb.mxu0 %v7059_v40  ;;  %v7095_v40 = vld [vmem:[%s15337_s4 + $0x620] sm:$0xff] }
 0x145   : > { %1325 = vmatpush.msra.mxu1 %v7078_v23  ;;  %1196 = vmatpush.msra.mxu3 %v7033_v35  ;;  %v7085_v23 = vld [vmem:[%s15336_s3 + $0x60] sm:$0xff]  ;;  %v7114_v35 = vld [vmem:[%s15337_s4 + $0x6b8] sm:$0xff] }
 0x146   : > { %1172 = vmatpush.msrb.mxu2 %v7018_v24  ;;  %1306 = vmatpush.msrb.mxu0 %v7058_v45  ;;  %v7093_v45 = vld [vmem:[%s15337_s4 + $0x610] sm:$0xff] }
 0x147   : > { %7051 = vmatmul.msk.f32.vlgmr.msrb.gmra.mxu1 %vm535_vm0, %v7047_v49  ;;  %1197 = vmatpush.msra.mxu3 %v7032_v39  ;;  %v7056_v49 = vld [vmem:[%s15337_s4 + $0x518] sm:$0xff]  ;;  %v7112_v39 = vld [vmem:[%s15337_s4 + $0x6a8] sm:$0xff] }
 0x148   : > { %1326 = vmatpush.msra.mxu1 %v7077_v28  ;;  %1173 = vmatpush.msrb.mxu2 %v7017_v34  ;;  %v7115_v28 = vld [vmem:[%s15337_s4 + $0x6c0] sm:$0xff]  ;;  %v7098_v34 = vld [vmem:[%s15337_s4 + $0x638] sm:$0xff] }
 0x149   : > { %1198 = vmatpush.msra.mxu3 %v7031_v44  ;;  %1307 = vmatpush.msrb.mxu0 %v7057_v47  ;;  %v7110_v44 = vld [vmem:[%s15337_s4 + $0x698] sm:$0xff]  ;;  %v7092_v47 = vld [vmem:[%s15337_s4 + $0x608] sm:$0xff] }
 0x14a   : > { %1327 = vmatpush.msra.mxu1 %v7076_v37  ;;  %1174 = vmatpush.msrb.mxu2 %v7016_v38  ;;  %v7113_v37 = vld [vmem:[%s15337_s4 + $0x6b0] sm:$0xff]  ;;  %v7096_v38 = vld [vmem:[%s15337_s4 + $0x628] sm:$0xff] }
 0x14b   : > { %1390 = vmatpush.msrb.mxu3 %v8236_v1  ;;  %1308 = vmatpush.msrb.mxu0 %v7056_v49  ;;  %v7071_v1 = vld [vmem:[%s15337_s4 + $0x590] sm:$0xff]  ;;  %v7091_v49 = vld [vmem:[%s15337_s4 + $0x600] sm:$0xff] }
 0x14c   : > { %1328 = vmatpush.msra.mxu1 %v7075_v42  ;;  %1175 = vmatpush.msrb.mxu2 %v7015_v43  ;;  %v7111_v42 = vld [vmem:[%s15337_s4 + $0x6a0] sm:$0xff]  ;;  %v7094_v43 = vld [vmem:[%s15337_s4 + $0x618] sm:$0xff] }
 0x14d   : > { %1391 = vmatpush.msrb.mxu3 %v8244_v3  ;;  %v8916_v3 = vpop.f32.mrf.mxu3 }
 0x14e   : > { %1329 = vmatpush.msra.mxu1 %v7074_v46  ;;  %1367 = vmatpush.msra.mxu2 %v8233_v0  ;;  %v7055_v0 = vld [vmem:[%s15337_s4 + $0x510] sm:$0xff] }
 0x14f   : > { %7052 = vmatmul.msk.f32.gmra.mxu1 %vm535_vm0, %v7048_v61  ;;  %1309 = vmatpush.msrb.mxu0 %v7055_v0  ;;  %v7109_v46 = vld [vmem:[%s15337_s4 + $0x690] sm:$0xff]  ;;  %v527_v0 = vld [vmem:[%s15335_s2 + $0x78] sm:$0xff] }
 0x150   : > { %1330 = vmatpush.msra.mxu1 %v7073_v48  ;;  %1368 = vmatpush.msra.mxu2 %v8239_v2  ;;  %v7070_v2 = vld [vmem:[%s15337_s4 + $0x588] sm:$0xff] }
 0x151   : > { %1310 = vmatpush.msrb.mxu0 %v7054_v51  ;;  %v7108_v48 = vld [vmem:[%s15337_s4 + $0x688] sm:$0xff] }
 0x152   : > { %1331 = vmatpush.msra.mxu1 %v7072_v50  ;;  %v7107_v50 = vld [vmem:[%s15337_s4 + $0x680] sm:$0xff]  ;;  %v525_v51 = vld [vmem:[%s15335_s2 + $0x68] sm:$0xff] }
 0x153   : > { %1311 = vmatpush.msrb.mxu0 %v7053_v52 }
 0x154   : > { %1332 = vmatpush.msra.mxu1 %v7071_v1  ;;  %v526_v1 = vld [vmem:[%s15335_s2 + $0x70] sm:$0xff] }
 0x156   : > { %1333 = vmatpush.msra.mxu1 %v7070_v2  ;;  %v524_v2 = vld [vmem:[%s15335_s2 + $0x60] sm:$0xff] }
 0x158   : > { %1334 = vmatpush.msra.mxu1 %v7069_v53  ;;  %v523_v53 = vld [vmem:[%s15335_s2 + $0x58] sm:$0xff] }
 0x1a4   : > { %v8924_v54 = vpop.f32.mrf.mxu0 }
 0x1a9   : > { %v8926_v55 = vpop.f32.mrf.mxu2 }
 0x1aa   : > { %v8928_v56 = vpop.f32.mrf.mxu3 }
 0x1ac   : > { %v8930_v57 = vpop.f32.mrf.mxu0 }
 0x1b1   : > { %v8932_v58 = vpop.f32.mrf.mxu2 }
 0x1b2   : > { %v8934_v59 = vpop.f32.mrf.mxu3 }
 0x1b4   : > { %v8936_v60 = vpop.f32.mrf.mxu1 }
 0x1b5   : > { %v1234_v61 = vpop.f32.mrf.mxu0 }
 0x1b6   : > { %1312 = vmatmul.f32.vlgmr.msrb.gmra.mxu0 %v1234_v61 }
 0x1b9   : > { %v1098_v63 = vpop.f32.mrf.mxu2 }
 0x1ba   : > { %v1121_v5 = vpop.f32.mrf.mxu3  ;;  %1176 = vmatmul.f32.vlgmr.msrb.gmra.mxu2 %v1098_v63  ;;  %v521_v63 = vld [vmem:[%s15335_s2 + $0x48] sm:$0xff] }
 0x1bb   : > { %1199 = vmatmul.f32.vlgmr.msra.gmra.mxu3 %v1121_v5  ;;  %1432 = vmatpush.msrb.mxu2 %v7106_v62  ;;  %v522_v62 = vld [vmem:[%s15335_s2 + $0x50] sm:$0xff] }
 0x1bc   : > { %v8950_v8 = vpop.f32.mrf.mxu1  ;;  %1455 = vmatpush.msra.mxu3 %v7122_v4  ;;  %v520_v4 = vld [vmem:[%s15335_s2 + $0x40] sm:$0xff] }
 0x1bd   : > { %v1237_v10 = vpop.f32.mrf.mxu0  ;;  %1433 = vmatpush.msrb.mxu2 %v7105_v6  ;;  %v519_v6 = vld [vmem:[%s15335_s2 + $0x38] sm:$0xff] }
 0x1be   : > { %1315 = vmatmul.f32.gmra.mxu0 %v1237_v10  ;;  %1456 = vmatpush.msra.mxu3 %v7121_v7  ;;  %v517_v10 = vld [vmem:[%s15335_s2 + $0x28] sm:$0xff] }
 0x1bf   : > { %1434 = vmatpush.msrb.mxu2 %v7104_v9  ;;  %v518_v9 = vld [vmem:[%s15335_s2 + $0x30] sm:$0xff] }
 0x1c0   : > { %1457 = vmatpush.msra.mxu3 %v7120_v11  ;;  %v516_v11 = vld [vmem:[%s15335_s2 + $0x20] sm:$0xff] }
 0x1c1   : > { %v1101_v15 = vpop.f32.mrf.mxu2  ;;  %1435 = vmatpush.msrb.mxu2 %v7103_v12 }
 0x1c2   : > { %v1124_v17 = vpop.f32.mrf.mxu3  ;;  %1179 = vmatmul.f32.gmra.mxu2 %v1101_v15  ;;  %1458 = vmatpush.msra.mxu3 %v7119_v13 }
 0x1c3   : > { %1202 = vmatmul.f32.gmra.mxu3 %v1124_v17  ;;  %1436 = vmatpush.msrb.mxu2 %v7102_v14  ;;  %v514_v17 = vld [vmem:[%s15335_s2 + $0x10] sm:$0xff] }
 0x1c4   : > { %v1257_v20 = vpop.f32.mrf.mxu1  ;;  %1459 = vmatpush.msra.mxu3 %v7118_v16  ;;  %v515_v16 = vld [vmem:[%s15335_s2 + $0x18] sm:$0xff] }
 0x1c5   : > { %1335 = vmatmul.f32.vlgmr.msra.gmra.mxu1 %v1257_v20  ;;  %1437 = vmatpush.msrb.mxu2 %v7101_v18  ;;  %v513_v18 = vld [vmem:[%s15335_s2 + $0x8] sm:$0xff]  ;;  %v749_v20 = vadd.f32 %v8692_v30, %v8690_v29 }
 0x1c6   : > { %1460 = vmatpush.msra.mxu3 %v7117_v19  ;;  %v512_v19 = vld [vmem:[%s15335_s2] sm:$0xff] }
 0x1c7   : > { %1438 = vmatpush.msrb.mxu2 %v7100_v21  ;;  %v772_v21 = vadd.f32 %v8682_v26, %v749_v20  ;;  %v1489_v20 = vld [vmem:[%s15338_s5 + $0x30] sm:$0xff] }
 0x1c8   : > { %1461 = vmatpush.msra.mxu3 %v7116_v22  ;;  %v929_v22 = vadd.f32 %v8928_v56, %v8926_v55 }
 0x1c9   : > { %1439 = vmatpush.msrb.mxu2 %v7099_v27  ;;  %v795_v27 = vadd.f32 %v8871_v41, %v772_v21  ;;  %v1505_v21 = vld [vmem:[%s15338_s5 + $0xb0] sm:$0xff] }
 0x1ca   : > { %7087 = vmatmul.msk.f32.vlgmr.msra.gmra.mxu2 %vm535_vm0, %v7085_v23  ;;  %1462 = vmatpush.msra.mxu3 %v7115_v28  ;;  %v1065_v28 = vadd.f32 %v8936_v60, %v8924_v54  ;;  %v1068_v60 = vadd.f32 %v8950_v8, %v8930_v57 }
 0x1cb   : > { %7089 = vmatmul.msk.f32.vlgmr.msrb.gmra.mxu3 %vm535_vm0, %v7085_v23  ;;  %1440 = vmatpush.msrb.mxu2 %v7098_v34  ;;  %v752_v23 = vadd.f32 %v8702_v33, %v8700_v32  ;;  %v934_v34 = vadd.f32 %v929_v22, %v795_v27  ;;  %v528_v32 = vld [vmem:[%s9110_s16] sm:$0x7]  ;;  %v932_v33 = vadd.f32 %v8934_v59, %v8932_v58  ;;  %v1739_v22 = vld [vmem:[%s15343_s10 + $0x2d0] sm:$0xff] }
 0x1cc   : > { %v1260_v24 = vpop.f32.mrf.mxu1  ;;  %1463 = vmatpush.msra.mxu3 %v7114_v35 }
 0x1cd   : > { %1338 = vmatmul.f32.gmra.mxu1 %v1260_v24  ;;  %1441 = vmatpush.msrb.mxu2 %v7097_v36  ;;  %v775_v26 = vadd.f32 %v8698_v31, %v752_v23  ;;  %v1070_v29 = vadd.f32 %v1065_v28, %v934_v34  ;;  %v1740_v23 = vld [vmem:[%s15343_s10 + $0x2d8] sm:$0xff]  ;;  %v1731_v28 = vld [vmem:[%s15343_s10 + $0x290] sm:$0xff] }
 0x1ce   : > { %1464 = vmatpush.msra.mxu3 %v7113_v37  ;;  %v1732_v34 = vld [vmem:[%s15343_s10 + $0x298] sm:$0xff] }
 0x1cf   : > { %1442 = vmatpush.msrb.mxu2 %v7096_v38  ;;  %v798_v54 = vadd.f32 %v8916_v3, %v775_v26  ;;  %v1480_v38 = vperm.slane %v528_v32, 0  ;;  %v1487_v26 = vld [vmem:[%s15338_s5 + $0x20] sm:$0xff] }
 0x1d0   : > { %1465 = vmatpush.msra.mxu3 %v7112_v39 }
 0x1d1   : > { %1443 = vmatpush.msrb.mxu2 %v7095_v40  ;;  %v935_v31 = vadd.f32 %v932_v33, %v798_v54  ;;  %v1486_v33 = vld [vmem:[%s15338_s5 + $0x18] sm:$0xff]  ;;  %v1715_v54 = vld [vmem:[%s15343_s10 + $0x210] sm:$0xff] }
 0x1d2   : > { %7088 = vmatmul.msk.f32.gmra.mxu2 %vm535_vm0, %v7086_v25  ;;  %1466 = vmatpush.msra.mxu3 %v7111_v42 }
 0x1d3   : > { %7090 = vmatmul.msk.f32.gmra.mxu3 %vm535_vm0, %v7086_v25  ;;  %1444 = vmatpush.msrb.mxu2 %v7094_v43 }
 0x1d4   : > { %1467 = vmatpush.msra.mxu3 %v7110_v44  ;;  %v1071_v44 = vadd.f32 %v1068_v60, %v935_v31  ;;  %v1501_v60 = vld [vmem:[%s15338_s5 + $0x90] sm:$0xff]  ;;  %v1708_v31 = vld [vmem:[%s15343_s10 + $0x1d8] sm:$0xff] }
 0x1d5   : > { %1445 = vmatpush.msrb.mxu2 %v7093_v45 }
 0x1d6   : > { %1468 = vmatpush.msra.mxu3 %v7109_v46 }
 0x1d7   : > { %1446 = vmatpush.msrb.mxu2 %v7092_v47 }
 0x1d8   : > { %1469 = vmatpush.msra.mxu3 %v7108_v48 }
 0x1d9   : > { %1447 = vmatpush.msrb.mxu2 %v7091_v49  ;;  %v1498_v49 = vld [vmem:[%s15338_s5 + $0x78] sm:$0xff] }
 0x1da   : > { %1470 = vmatpush.msra.mxu3 %v7107_v50  ;;  %v1514_v50 = vld [vmem:[%s15338_s5 + $0xf8] sm:$0xff]  ;;  %1519 = vmatpush.msra.mxu0 %v1498_v49  ;;  %v8062_v49 = vld [vmem:[%s8230_s23 + $0x8] sm:$0xff] }
 0x1db   : > { %1565 = vmatpush.msra.mxu2 %v527_v0  ;;  %1542 = vmatpush.msrb.mxu1 %v1514_v50  ;;  %v1745_v50 = vld [vmem:[%s15343_s10 + $0x300] sm:$0xff] }
 0x1dc   : > { %1592 = vmatpush.msrb.mxu3 %v527_v0  ;;  %v1497_v0 = vld [vmem:[%s15338_s5 + $0x70] sm:$0xff] }
 0x1dd   : > { %1566 = vmatpush.msra.mxu2 %v526_v1  ;;  %1520 = vmatpush.msra.mxu0 %v1497_v0  ;;  %v8063_v0 = vld [vmem:[%s8230_s23] sm:$0xff] }
 0x1de   : > { %1593 = vmatpush.msrb.mxu3 %v526_v1  ;;  %v1513_v1 = vld [vmem:[%s15338_s5 + $0xf0] sm:$0xff] }
 0x1df   : > { %1567 = vmatpush.msra.mxu2 %v525_v51  ;;  %1543 = vmatpush.msrb.mxu1 %v1513_v1  ;;  %v1746_v1 = vld [vmem:[%s15343_s10 + $0x308] sm:$0xff] }
 0x1e0   : > { %1594 = vmatpush.msrb.mxu3 %v525_v51  ;;  %v1496_v51 = vld [vmem:[%s15338_s5 + $0x68] sm:$0xff] }
 0x1e1   : > { %1568 = vmatpush.msra.mxu2 %v524_v2  ;;  %1521 = vmatpush.msra.mxu0 %v1496_v51  ;;  %v1737_v51 = vld [vmem:[%s15343_s10 + $0x2c0] sm:$0xff] }
 0x1e2   : > { %1595 = vmatpush.msrb.mxu3 %v524_v2  ;;  %v1512_v2 = vld [vmem:[%s15338_s5 + $0xe8] sm:$0xff] }
 0x1e3   : > { %1569 = vmatpush.msra.mxu2 %v523_v53  ;;  %1544 = vmatpush.msrb.mxu1 %v1512_v2  ;;  %v1738_v2 = vld [vmem:[%s15343_s10 + $0x2c8] sm:$0xff] }
 0x1e4   : > { %1596 = vmatpush.msrb.mxu3 %v523_v53  ;;  %v1511_v53 = vld [vmem:[%s15338_s5 + $0xe0] sm:$0xff] }
 0x1e5   : > { %1570 = vmatpush.msra.mxu2 %v522_v62  ;;  %1545 = vmatpush.msrb.mxu1 %v1511_v53  ;;  %v1730_v53 = vld [vmem:[%s15343_s10 + $0x288] sm:$0xff] }
 0x1e6   : > { %1597 = vmatpush.msrb.mxu3 %v522_v62  ;;  %v1510_v62 = vld [vmem:[%s15338_s5 + $0xd8] sm:$0xff] }
 0x1e7   : > { %1571 = vmatpush.msra.mxu2 %v521_v63  ;;  %1546 = vmatpush.msrb.mxu1 %v1510_v62  ;;  %v1722_v62 = vld [vmem:[%s15343_s10 + $0x248] sm:$0xff] }
 0x1e8   : > { %1598 = vmatpush.msrb.mxu3 %v521_v63  ;;  %v1493_v63 = vld [vmem:[%s15338_s5 + $0x50] sm:$0xff] }
 0x1e9   : > { %1572 = vmatpush.msra.mxu2 %v520_v4 }
 0x1ea   : > { %1599 = vmatpush.msrb.mxu3 %v520_v4  ;;  %v1509_v4 = vld [vmem:[%s15338_s5 + $0xd0] sm:$0xff] }
 0x1eb   : > { %1573 = vmatpush.msra.mxu2 %v519_v6  ;;  %1547 = vmatpush.msrb.mxu1 %v1509_v4  ;;  %v1713_v4 = vld [vmem:[%s15343_s10 + $0x200] sm:$0xff] }
 0x1ec   : > { %1600 = vmatpush.msrb.mxu3 %v519_v6  ;;  %v1508_v6 = vld [vmem:[%s15338_s5 + $0xc8] sm:$0xff] }
 0x1ed   : > { %1574 = vmatpush.msra.mxu2 %v518_v9  ;;  %1548 = vmatpush.msrb.mxu1 %v1508_v6  ;;  %v1714_v6 = vld [vmem:[%s15343_s10 + $0x208] sm:$0xff] }
 0x1ee   : > { %1601 = vmatpush.msrb.mxu3 %v518_v9  ;;  %v1772_v9 = vld [vmem:[%s15343_s10 + $0x3d8] sm:$0xff] }
 0x1ef   : > { %1575 = vmatpush.msra.mxu2 %v517_v10 }
 0x1f0   : > { %1602 = vmatpush.msrb.mxu3 %v517_v10  ;;  %v1491_v10 = vld [vmem:[%s15338_s5 + $0x40] sm:$0xff] }
 0x1f1   : > { %1576 = vmatpush.msra.mxu2 %v516_v11 }
 0x1f2   : > { %1603 = vmatpush.msrb.mxu3 %v516_v11  ;;  %v1507_v11 = vld [vmem:[%s15338_s5 + $0xc0] sm:$0xff] }
 0x1f3   : > { %1577 = vmatpush.msra.mxu2 %v515_v16  ;;  %1549 = vmatpush.msrb.mxu1 %v1507_v11  ;;  %v1698_v11 = vld [vmem:[%s15343_s10 + $0x188] sm:$0xff] }
 0x1f4   : > { %1604 = vmatpush.msrb.mxu3 %v515_v16  ;;  %v1755_v16 = vld [vmem:[%s15343_s10 + $0x350] sm:$0xff] }
 0x1f5   : > { %1578 = vmatpush.msra.mxu2 %v514_v17 }
 0x1f6   : > { %1605 = vmatpush.msrb.mxu3 %v514_v17  ;;  %v1756_v17 = vld [vmem:[%s15343_s10 + $0x358] sm:$0xff] }
 0x1f7   : > { %1579 = vmatpush.msra.mxu2 %v513_v18 }
 0x1f8   : > { %1606 = vmatpush.msrb.mxu3 %v513_v18  ;;  %v1747_v18 = vld [vmem:[%s15343_s10 + $0x310] sm:$0xff] }
 0x1f9   : > { %1580 = vmatpush.msra.mxu2 %v512_v19 }
 0x1fa   : > { %1607 = vmatpush.msrb.mxu3 %v512_v19  ;;  %v1748_v19 = vld [vmem:[%s15343_s10 + $0x318] sm:$0xff] }
 0x233   : > { %v1313_v24 = vpop.f32.mrf.mxu0 }
 0x23b   : > { %v1316_v39 = vpop.f32.mrf.mxu0 }
 0x23d   : > { %v1177_v52 = vpop.f32.mrf.mxu2 }
 0x23e   : > { %v1200_v61 = vpop.f32.mrf.mxu3 }
 0x23f   : > { %v1201_v35 = vadd.f32 %v1200_v61, %v1177_v52  ;;  %v1495_v52 = vld [vmem:[%s15338_s5 + $0x60] sm:$0xff]  ;;  %v1494_v61 = vld [vmem:[%s15338_s5 + $0x58] sm:$0xff] }
 0x240   : > { %1522 = vmatpush.msra.mxu0 %v1495_v52  ;;  %v1729_v52 = vld [vmem:[%s15343_s10 + $0x280] sm:$0xff] }
 0x241   : > { %v1206_v41 = vadd.f32 %v1201_v35, %v1070_v29  ;;  %v1503_v29 = vld [vmem:[%s15338_s5 + $0xa0] sm:$0xff] }
 0x242   : > { %v1336_v25 = vpop.f32.mrf.mxu1  ;;  %1523 = vmatpush.msra.mxu0 %v1494_v61  ;;  %v1721_v61 = vld [vmem:[%s15343_s10 + $0x240] sm:$0xff] }
 0x243   : > { %v1337_v30 = vadd.f32 %v1336_v25, %v1313_v24  ;;  %v1488_v24 = vld [vmem:[%s15338_s5 + $0x28] sm:$0xff] }
 0x244   : > { %1524 = vmatpush.msra.mxu0 %v1493_v63  ;;  %v1504_v25 = vld [vmem:[%s15338_s5 + $0xa8] sm:$0xff]  ;;  %v8064_v63 = vld [vmem:[%s8230_s23 + $0x18] sm:$0xff] }
 0x245   : > { %v9070_v5 = vpop.f32.mrf.mxu2  ;;  %v1342_v36 = vadd.f32 %v1337_v30, %v1206_v41  ;;  %v1723_v30 = vld [vmem:[%s15343_s10 + $0x250] sm:$0xff]  ;;  %v1502_v41 = vld [vmem:[%s15338_s5 + $0x98] sm:$0xff] }
 0x246   : > { %v1203_v7 = vpop.f32.mrf.mxu3 }
 0x247   : > { %v1204_v42 = vadd.f32 %v1203_v7, %v9070_v5  ;;  %v1492_v5 = vld [vmem:[%s15338_s5 + $0x48] sm:$0xff]  ;;  %v1771_v7 = vld [vmem:[%s15343_s10 + $0x3d0] sm:$0xff] }
 0x248   : > { %1525 = vmatpush.msra.mxu0 %v1492_v5  ;;  %v8065_v5 = vld [vmem:[%s8230_s23 + $0x10] sm:$0xff] }
 0x249   : > { %v1207_v59 = vadd.f32 %v1204_v42, %v1071_v44  ;;  %v1699_v42 = vld [vmem:[%s15343_s10 + $0x190] sm:$0xff]  ;;  %v1483_v44 = vld [vmem:[%s15338_s5] sm:$0xff] }
 0x24a   : > { %v1339_v40 = vpop.f32.mrf.mxu1  ;;  %1526 = vmatpush.msra.mxu0 %v1491_v10  ;;  %v1697_v10 = vld [vmem:[%s15343_s10 + $0x180] sm:$0xff] }
 0x24b   : > { %v1340_v45 = vadd.f32 %v1339_v40, %v1316_v39  ;;  %v1500_v39 = vld [vmem:[%s15338_s5 + $0x88] sm:$0xff] }
 0x24d   : > { %v1370_v12 = vpop.f32.mrf.mxu2  ;;  %v1343_v47 = vadd.f32 %v1340_v45, %v1207_v59  ;;  %v1499_v45 = vld [vmem:[%s15338_s5 + $0x80] sm:$0xff] }
 0x24e   : > { %v1393_v13 = vpop.f32.mrf.mxu3  ;;  %1448 = vmatmul.f32.vlgmr.msrb.gmra.mxu2 %v1370_v12  ;;  %v1763_v12 = vld [vmem:[%s15343_s10 + $0x390] sm:$0xff] }
 0x24f   : > { %1471 = vmatmul.f32.vlgmr.msra.gmra.mxu3 %v1393_v13  ;;  %1841 = vmatpush.msrb.mxu2 %v1771_v7  ;;  %v1490_v13 = vld [vmem:[%s15338_s5 + $0x38] sm:$0xff]  ;;  %v1705_v7 = vld [vmem:[%s15343_s10 + $0x1c0] sm:$0xff] }
 0x250   : > { %1864 = vmatpush.msra.mxu3 %v1772_v9  ;;  %1527 = vmatpush.msra.mxu0 %v1490_v13  ;;  %v1706_v9 = vld [vmem:[%s15343_s10 + $0x1c8] sm:$0xff] }
 0x251   : > { %1842 = vmatpush.msrb.mxu2 %v1763_v12  ;;  %v1689_v12 = vld [vmem:[%s15343_s10 + $0x140] sm:$0xff]  ;;  %v1690_v13 = vld [vmem:[%s15343_s10 + $0x148] sm:$0xff] }
 0x252   : > { %1528 = vmatpush.msra.mxu0 %v1489_v20  ;;  %v1673_v20 = vld [vmem:[%s15343_s10 + $0xc0] sm:$0xff] }
 0x253   : > { %1843 = vmatpush.msrb.mxu2 %v1755_v16  ;;  %v1681_v16 = vld [vmem:[%s15343_s10 + $0x100] sm:$0xff] }
 0x254   : > { %1529 = vmatpush.msra.mxu0 %v1488_v24  ;;  %v1665_v24 = vld [vmem:[%s15343_s10 + $0x80] sm:$0xff] }
 0x255   : > { %v1373_v14 = vpop.f32.mrf.mxu2  ;;  %1844 = vmatpush.msrb.mxu2 %v1747_v18  ;;  %v1683_v18 = vld [vmem:[%s15343_s10 + $0x110] sm:$0xff] }
 0x256   : > { %v1396_v15 = vpop.f32.mrf.mxu3  ;;  %1451 = vmatmul.f32.gmra.mxu2 %v1373_v14  ;;  %v1764_v14 = vld [vmem:[%s15343_s10 + $0x398] sm:$0xff]  ;;  %1530 = vmatpush.msra.mxu0 %v1487_v26  ;;  %v1658_v26 = vld [vmem:[%s15343_s10 + $0x48] sm:$0xff] }
 0x257   : > { %1474 = vmatmul.f32.gmra.mxu3 %v1396_v15  ;;  %v1506_v15 = vld [vmem:[%s15338_s5 + $0xb8] sm:$0xff]  ;;  %1845 = vmatpush.msrb.mxu2 %v1739_v22  ;;  %v1675_v22 = vld [vmem:[%s15343_s10 + $0xd0] sm:$0xff] }
 0x258   : > { %1865 = vmatpush.msra.mxu3 %v1764_v14  ;;  %1550 = vmatpush.msrb.mxu1 %v1506_v15  ;;  %v1691_v14 = vld [vmem:[%s15343_s10 + $0x150] sm:$0xff]  ;;  %v1692_v15 = vld [vmem:[%s15343_s10 + $0x158] sm:$0xff] }
 0x259   : > { %1846 = vmatpush.msrb.mxu2 %v1731_v28  ;;  %1531 = vmatpush.msra.mxu0 %v1486_v33  ;;  %v1668_v28 = vld [vmem:[%s15343_s10 + $0x98] sm:$0xff]  ;;  %v1650_v33 = vld [vmem:[%s15343_s10 + $0x8] sm:$0xff] }
 0x25a   : > { %1866 = vmatpush.msra.mxu3 %v1756_v17  ;;  %1551 = vmatpush.msrb.mxu1 %v1505_v21  ;;  %v1682_v17 = vld [vmem:[%s15343_s10 + $0x108] sm:$0xff] }
 0x25b   : > { %1847 = vmatpush.msrb.mxu2 %v1723_v30  ;;  %v1674_v21 = vld [vmem:[%s15343_s10 + $0xc8] sm:$0xff]  ;;  %v1660_v30 = vld [vmem:[%s15343_s10 + $0x58] sm:$0xff] }
 0x25c   : > { %1867 = vmatpush.msra.mxu3 %v1748_v19  ;;  %1552 = vmatpush.msrb.mxu1 %v1504_v25  ;;  %v1684_v19 = vld [vmem:[%s15343_s10 + $0x118] sm:$0xff]  ;;  %v1666_v25 = vld [vmem:[%s15343_s10 + $0x88] sm:$0xff] }
 0x25d   : > { %1848 = vmatpush.msrb.mxu2 %v1715_v54  ;;  %v1773_v54 = vld [vmem:[%s15343_s10 + $0x3e0] sm:$0xff] }
 0x25e   : > { %1868 = vmatpush.msra.mxu3 %v1740_v23  ;;  %1553 = vmatpush.msrb.mxu1 %v1503_v29  ;;  %v1676_v23 = vld [vmem:[%s15343_s10 + $0xd8] sm:$0xff]  ;;  %v1659_v29 = vld [vmem:[%s15343_s10 + $0x50] sm:$0xff] }
 0x260   : > { %1869 = vmatpush.msra.mxu3 %v1732_v34  ;;  %1554 = vmatpush.msrb.mxu1 %v1502_v41  ;;  %v1657_v34 = vld [vmem:[%s15343_s10 + $0x40] sm:$0xff]  ;;  %v1651_v41 = vld [vmem:[%s15343_s10 + $0x10] sm:$0xff] }
 0x262   : > { %1555 = vmatpush.msrb.mxu1 %v1501_v60  ;;  %v1775_v60 = vld [vmem:[%s15343_s10 + $0x3f0] sm:$0xff] }
 0x264   : > { %1556 = vmatpush.msrb.mxu1 %v1500_v39  ;;  %v1767_v39 = vld [vmem:[%s15343_s10 + $0x3b0] sm:$0xff] }
 0x266   : > { %1557 = vmatpush.msrb.mxu1 %v1499_v45  ;;  %v1760_v45 = vld [vmem:[%s15343_s10 + $0x378] sm:$0xff] }
 0x267   : > { %1558 = vmatmul.f32.vlgmr.msrb.gmra.mxu1 %v8062_v49  ;;  %v1733_v49 = vld [vmem:[%s15343_s10 + $0x2a0] sm:$0xff] }
 0x26f   : > { %1561 = vmatmul.f32.gmra.mxu1 %v8064_v63  ;;  %v1719_v63 = vld [vmem:[%s15343_s10 + $0x230] sm:$0xff] }
 0x2d1   : > { %v1449_v55 = vpop.f32.mrf.mxu2 }
 0x2d2   : > { %v1472_v56 = vpop.f32.mrf.mxu3 }
 0x2d3   : > { %v1473_v37 = vadd.f32 %v1472_v56, %v1449_v55  ;;  %v1724_v55 = vld [vmem:[%s15343_s10 + $0x258] sm:$0xff]  ;;  %v1485_v56 = vld [vmem:[%s15338_s5 + $0x10] sm:$0xff] }
 0x2d4   : > { %1870 = vmatpush.msra.mxu3 %v1724_v55  ;;  %1532 = vmatpush.msra.mxu0 %v1485_v56  ;;  %v1652_v55 = vld [vmem:[%s15343_s10 + $0x18] sm:$0xff]  ;;  %v1774_v56 = vld [vmem:[%s15343_s10 + $0x3e8] sm:$0xff] }
 0x2d5   : > { %v1478_v43 = vadd.f32 %v1473_v37, %v1342_v36  ;;  %v1716_v36 = vld [vmem:[%s15343_s10 + $0x218] sm:$0xff]  ;;  %v1707_v37 = vld [vmem:[%s15343_s10 + $0x1d0] sm:$0xff] }
 0x2d6   : > { %1871 = vmatpush.msra.mxu3 %v1716_v36  ;;  %1849 = vmatpush.msrb.mxu2 %v1707_v37  ;;  %v1776_v36 = vld [vmem:[%s15343_s10 + $0x3f8] sm:$0xff]  ;;  %v1765_v37 = vld [vmem:[%s15343_s10 + $0x3a0] sm:$0xff] }
 0x2d7   : > { %v9120_v58 = vadd.f32 %v1480_v38, %v1478_v43 }
 0x2d8   : > { %1872 = vmatpush.msra.mxu3 %v1708_v31  ;;  %1850 = vmatpush.msrb.mxu2 %v1699_v42  ;;  %v1757_v31 = vld [vmem:[%s15343_s10 + $0x360] sm:$0xff]  ;;  %v1758_v42 = vld [vmem:[%s15343_s10 + $0x368] sm:$0xff] }
 0x2d9   : > { %1581 = vmatmul.f32.vlgmr.msra.gmra.mxu2 %v9120_v58  ;;  %v1452_v3 = vpop.f32.mrf.mxu2 }
 0x2da   : > { %v1475_v46 = vpop.f32.mrf.mxu3  ;;  %1851 = vmatpush.msrb.mxu2 %v1691_v14 }
 0x2db   : > { %v1476_v57 = vadd.f32 %v1475_v46, %v1452_v3  ;;  %v1770_v3 = vld [vmem:[%s15343_s10 + $0x3c8] sm:$0xff]  ;;  %v1700_v46 = vld [vmem:[%s15343_s10 + $0x198] sm:$0xff] }
 0x2dc   : > { %1818 = vmatpush.msra.mxu1 %v1770_v3  ;;  %1873 = vmatpush.msra.mxu3 %v1700_v46  ;;  %v1751_v3 = vld [vmem:[%s15343_s10 + $0x330] sm:$0xff]  ;;  %v1752_v46 = vld [vmem:[%s15343_s10 + $0x338] sm:$0xff] }
 0x2dd   : > { %v1479_v8 = vadd.f32 %v1476_v57, %v1343_v47  ;;  %v1761_v47 = vld [vmem:[%s15343_s10 + $0x380] sm:$0xff]  ;;  %v1762_v57 = vld [vmem:[%s15343_s10 + $0x388] sm:$0xff]  ;;  %1852 = vmatpush.msrb.mxu2 %v1683_v18 }
 0x2de   : > { %1819 = vmatpush.msra.mxu1 %v1762_v57  ;;  %1874 = vmatpush.msra.mxu3 %v1692_v15  ;;  %v1742_v57 = vld [vmem:[%s15343_s10 + $0x2e8] sm:$0xff]  ;;  %v1693_v15 = vld [vmem:[%s15343_s10 + $0x160] sm:$0xff] }
 0x2df   : > { %v9123_v48 = vadd.f32 %v1480_v38, %v1479_v8  ;;  %v1484_v38 = vld [vmem:[%s15338_s5 + $0x8] sm:$0xff]  ;;  %v1753_v8 = vld [vmem:[%s15343_s10 + $0x340] sm:$0xff]  ;;  %1853 = vmatpush.msrb.mxu2 %v1675_v22  ;;  %v1687_v22 = vld [vmem:[%s15343_s10 + $0x130] sm:$0xff] }
 0x2e0   : > { %1533 = vmatpush.msra.mxu0 %v1484_v38  ;;  %1875 = vmatpush.msra.mxu3 %v1684_v19  ;;  %v1766_v38 = vld [vmem:[%s15343_s10 + $0x3a8] sm:$0xff]  ;;  %v1696_v19 = vld [vmem:[%s15343_s10 + $0x178] sm:$0xff] }
 0x2e1   : > { %1584 = vmatmul.f32.gmra.mxu2 %v9123_v48 }
 0x2e2   : > { %1534 = vmatpush.msra.mxu0 %v1483_v44  ;;  %1876 = vmatpush.msra.mxu3 %v1676_v23  ;;  %v1759_v44 = vld [vmem:[%s15343_s10 + $0x370] sm:$0xff]  ;;  %v1688_v23 = vld [vmem:[%s15343_s10 + $0x138] sm:$0xff] }
 0x2e3   : > { %1535 = vmatmul.f32.vlgmr.msra.gmra.mxu0 %v8063_v0  ;;  %v1735_v0 = vld [vmem:[%s15343_s10 + $0x2b0] sm:$0xff] }
 0x2e4   : > { %1877 = vmatpush.msra.mxu3 %v1668_v28  ;;  %v1680_v28 = vld [vmem:[%s15343_s10 + $0xf8] sm:$0xff] }
 0x2e6   : > { %1878 = vmatpush.msra.mxu3 %v1660_v30  ;;  %v1672_v30 = vld [vmem:[%s15343_s10 + $0xb8] sm:$0xff] }
 0x2e8   : > { %1879 = vmatpush.msra.mxu3 %v1652_v55  ;;  %v1664_v55 = vld [vmem:[%s15343_s10 + $0x78] sm:$0xff] }
 0x2eb   : > { %1538 = vmatmul.f32.gmra.mxu0 %v8065_v5  ;;  %v1709_v5 = vld [vmem:[%s15343_s10 + $0x1e0] sm:$0xff] }
 0x35c   : > { %v1582_v27 = vpop.f32.mrf.mxu2 }
 0x35d   : > { %v9229_v35 = vsub.f32 %v9120_v58, %v1582_v27  ;;  %v1769_v58 = vld [vmem:[%s15343_s10 + $0x3c0] sm:$0xff]  ;;  %v1667_v27 = vld [vmem:[%s15343_s10 + $0x90] sm:$0xff] }
 0x35e   : > { %1795 = vmatpush.msrb.mxu0 %v1769_v58  ;;  %1854 = vmatpush.msrb.mxu2 %v1667_v27  ;;  %v1749_v58 = vld [vmem:[%s15343_s10 + $0x320] sm:$0xff]  ;;  %v1679_v27 = vld [vmem:[%s15343_s10 + $0xf0] sm:$0xff] }
 0x35f   : > { %v1590_v32 = vmul.f32 %v9229_v35, %v9229_v35 }
 0x360   : > { %1796 = vmatpush.msrb.mxu0 %v1761_v47  ;;  %1855 = vmatpush.msrb.mxu2 %v1659_v29  ;;  %v1741_v47 = vld [vmem:[%s15343_s10 + $0x2e0] sm:$0xff]  ;;  %v1671_v29 = vld [vmem:[%s15343_s10 + $0xb0] sm:$0xff] }
 0x361   : > { %1608 = vmatmul.f32.vlgmr.msrb.gmra.mxu3 %v1590_v32  ;;  %v1649_v32 = vld [vmem:[%s15343_s10] sm:$0xff] }
 0x362   : > { %1797 = vmatpush.msrb.mxu0 %v1753_v8  ;;  %1856 = vmatpush.msrb.mxu2 %v1651_v41  ;;  %v1743_v8 = vld [vmem:[%s15343_s10 + $0x2f0] sm:$0xff] }
 0x363   : > { %1956 = vmatpush.msrb.mxu3 %v1776_v36  ;;  %v1663_v41 = vld [vmem:[%s15343_s10 + $0x70] sm:$0xff] }
 0x364   : > { %v1585_v40 = vpop.f32.mrf.mxu2  ;;  %1798 = vmatpush.msrb.mxu0 %v1745_v50  ;;  %1933 = vmatpush.msra.mxu2 %v1775_v60  ;;  %v1734_v50 = vld [vmem:[%s15343_s10 + $0x2a8] sm:$0xff] }
 0x365   : > { %v9279_v43 = vsub.f32 %v9123_v48, %v1585_v40  ;;  %v1754_v48 = vld [vmem:[%s15343_s10 + $0x348] sm:$0xff]  ;;  %v1768_v40 = vld [vmem:[%s15343_s10 + $0x3b8] sm:$0xff] }
 0x366   : > { %1820 = vmatpush.msra.mxu1 %v1754_v48  ;;  %1799 = vmatpush.msrb.mxu0 %v1737_v51  ;;  %v1744_v48 = vld [vmem:[%s15343_s10 + $0x2f8] sm:$0xff]  ;;  %v1725_v51 = vld [vmem:[%s15343_s10 + $0x260] sm:$0xff]  ;;  %v1654_v60 = vld [vmem:[%s15343_s10 + $0x28] sm:$0xff] }
 0x367   : > { %v1591_v59 = vmul.f32 %v9279_v43, %v9279_v43  ;;  %1934 = vmatpush.msra.mxu2 %v1767_v39  ;;  %1957 = vmatpush.msrb.mxu3 %v1768_v40  ;;  %v1656_v39 = vld [vmem:[%s15343_s10 + $0x38] sm:$0xff] }
 0x368   : > { %1821 = vmatpush.msra.mxu1 %v1746_v1  ;;  %1800 = vmatpush.msrb.mxu0 %v1729_v52  ;;  %v1736_v1 = vld [vmem:[%s15343_s10 + $0x2b8] sm:$0xff]  ;;  %v1727_v52 = vld [vmem:[%s15343_s10 + $0x270] sm:$0xff] }
 0x369   : > { %1611 = vmatmul.f32.gmra.mxu3 %v1591_v59  ;;  %v1750_v59 = vld [vmem:[%s15343_s10 + $0x328] sm:$0xff]  ;;  %1935 = vmatpush.msra.mxu2 %v1759_v44 }
 0x36a   : > { %1822 = vmatpush.msra.mxu1 %v1738_v2  ;;  %1801 = vmatpush.msrb.mxu0 %v1721_v61  ;;  %v1726_v2 = vld [vmem:[%s15343_s10 + $0x268] sm:$0xff]  ;;  %v1717_v61 = vld [vmem:[%s15343_s10 + $0x220] sm:$0xff] }
 0x36b   : > { %1958 = vmatpush.msrb.mxu3 %v1760_v45  ;;  %1936 = vmatpush.msra.mxu2 %v1751_v3  ;;  %v7941_v3 = vld [vmem:[%s15341_s8] ss:$0 sm:$0xff] }
 0x36c   : > { %1823 = vmatpush.msra.mxu1 %v1730_v53  ;;  %1802 = vmatpush.msrb.mxu0 %v1713_v4  ;;  %v1728_v53 = vld [vmem:[%s15343_s10 + $0x278] sm:$0xff] }
 0x36d   : > { %1959 = vmatpush.msrb.mxu3 %v1752_v46  ;;  %1937 = vmatpush.msra.mxu2 %v1743_v8  ;;  %v1720_v4 = vld [vmem:[%s15343_s10 + $0x238] sm:$0xff]  ;;  %v7942_v8 = vld [vmem:[%s15342_s9] ss:$0 sm:$0xff] }
 0x36e   : > { %1824 = vmatpush.msra.mxu1 %v1722_v62  ;;  %1803 = vmatpush.msrb.mxu0 %v1705_v7  ;;  %v1718_v62 = vld [vmem:[%s15343_s10 + $0x228] sm:$0xff]  ;;  %v1711_v7 = vld [vmem:[%s15343_s10 + $0x1f0] sm:$0xff] }
 0x36f   : > { %1960 = vmatpush.msrb.mxu3 %v1744_v48  ;;  %1938 = vmatpush.msra.mxu2 %v1735_v0 }
 0x370   : > { %1825 = vmatpush.msra.mxu1 %v1714_v6  ;;  %1804 = vmatpush.msrb.mxu0 %v1697_v10  ;;  %v1710_v6 = vld [vmem:[%s15343_s10 + $0x1e8] sm:$0xff]  ;;  %v1701_v10 = vld [vmem:[%s15343_s10 + $0x1a0] sm:$0xff] }
 0x371   : > { %1961 = vmatpush.msrb.mxu3 %v1736_v1  ;;  %1939 = vmatpush.msra.mxu2 %v1727_v52 }
 0x372   : > { %1826 = vmatpush.msra.mxu1 %v1706_v9  ;;  %1805 = vmatpush.msrb.mxu0 %v1689_v12  ;;  %v1712_v9 = vld [vmem:[%s15343_s10 + $0x1f8] sm:$0xff]  ;;  %v1703_v12 = vld [vmem:[%s15343_s10 + $0x1b0] sm:$0xff] }
 0x373   : > { %1962 = vmatpush.msrb.mxu3 %v1728_v53  ;;  %1940 = vmatpush.msra.mxu2 %v1719_v63  ;;  %v9628_v53 = vpop.f32.mrf.mxu0  ;;  %v9639_v63 = vld [vmem:[%s15344_s11] sm:$0xff] }
 0x374   : > { %1827 = vmatpush.msra.mxu1 %v1698_v11  ;;  %1806 = vmatpush.msrb.mxu0 %v1681_v16  ;;  %v1702_v11 = vld [vmem:[%s15343_s10 + $0x1a8] sm:$0xff]  ;;  %15364 = vst [vmem:[#allocation2_spill] sm:$0xff] %v9628_v53 }
 0x375   : > { %1963 = vmatpush.msrb.mxu3 %v1720_v4  ;;  %1941 = vmatpush.msra.mxu2 %v1711_v7  ;;  %v1694_v16 = vld [vmem:[%s15343_s10 + $0x168] sm:$0xff]  ;;  %v1779_v4 = vperm.slane %v9639_v63, 0  ;;  %v2714_v7 = vld [vmem:[%s15345_s12 + $0xf8] sm:$0xff] }
 0x376   : > { %1828 = vmatpush.msra.mxu1 %v1690_v13  ;;  %1807 = vmatpush.msrb.mxu0 %v1673_v20  ;;  %v1704_v13 = vld [vmem:[%s15343_s10 + $0x1b8] sm:$0xff]  ;;  %v1685_v20 = vld [vmem:[%s15343_s10 + $0x120] sm:$0xff] }
 0x377   : > { %1964 = vmatpush.msrb.mxu3 %v1712_v9  ;;  %1942 = vmatpush.msra.mxu2 %v1703_v12  ;;  %v2713_v12 = vld [vmem:[%s15345_s12 + $0xf0] sm:$0xff] }
 0x378   : > { %1829 = vmatpush.msra.mxu1 %v1682_v17  ;;  %1808 = vmatpush.msrb.mxu0 %v1665_v24  ;;  %v1695_v17 = vld [vmem:[%s15343_s10 + $0x170] sm:$0xff]  ;;  %v1677_v24 = vld [vmem:[%s15343_s10 + $0xe0] sm:$0xff] }
 0x379   : > { %1965 = vmatpush.msrb.mxu3 %v1704_v13  ;;  %1943 = vmatpush.msra.mxu2 %v1695_v17 }
 0x37a   : > { %1830 = vmatpush.msra.mxu1 %v1674_v21  ;;  %1809 = vmatpush.msrb.mxu0 %v1657_v34  ;;  %v1686_v21 = vld [vmem:[%s15343_s10 + $0x128] sm:$0xff]  ;;  %v1669_v34 = vld [vmem:[%s15343_s10 + $0xa0] sm:$0xff] }
 0x37b   : > { %1966 = vmatpush.msrb.mxu3 %v1696_v19  ;;  %1944 = vmatpush.msra.mxu2 %v1687_v22  ;;  %v1781_v19 = vperm.slane %v9639_v63, 2 }
 0x37c   : > { %1831 = vmatpush.msra.mxu1 %v1666_v25  ;;  %1810 = vmatpush.msrb.mxu0 %v1649_v32  ;;  %v1678_v25 = vld [vmem:[%s15343_s10 + $0xe8] sm:$0xff]  ;;  %v1661_v32 = vld [vmem:[%s15343_s10 + $0x60] sm:$0xff] }
 0x37d   : > { %1967 = vmatpush.msrb.mxu3 %v1688_v23  ;;  %1945 = vmatpush.msra.mxu2 %v1679_v27 }
 0x37e   : > { %1832 = vmatpush.msra.mxu1 %v1658_v26  ;;  %1887 = vmatpush.msra.mxu0 %v1773_v54  ;;  %v1670_v26 = vld [vmem:[%s15343_s10 + $0xa8] sm:$0xff] }
 0x37f   : > { %1968 = vmatpush.msrb.mxu3 %v1680_v28  ;;  %1946 = vmatpush.msra.mxu2 %v1671_v29 }
 0x380   : > { %1833 = vmatpush.msra.mxu1 %v1650_v33  ;;  %1888 = vmatpush.msra.mxu0 %v1765_v37  ;;  %v1662_v33 = vld [vmem:[%s15343_s10 + $0x68] sm:$0xff] }
 0x381   : > { %1969 = vmatpush.msrb.mxu3 %v1672_v30  ;;  %1947 = vmatpush.msra.mxu2 %v1663_v41 }
 0x382   : > { %1910 = vmatpush.msrb.mxu1 %v1774_v56  ;;  %1889 = vmatpush.msra.mxu0 %v1757_v31  ;;  %v1653_v56 = vld [vmem:[%s15343_s10 + $0x20] sm:$0xff] }
 0x383   : > { %1970 = vmatpush.msrb.mxu3 %v1664_v55 }
 0x384   : > { %1911 = vmatpush.msrb.mxu1 %v1766_v38  ;;  %1890 = vmatpush.msra.mxu0 %v1749_v58  ;;  %v1655_v38 = vld [vmem:[%s15343_s10 + $0x30] sm:$0xff] }
 0x385   : > { %1948 = vmatpush.msra.mxu2 %v1655_v38  ;;  %1971 = vmatpush.msrb.mxu3 %v1656_v39  ;;  %v2695_v38 = vld [vmem:[%s15345_s12 + $0x60] sm:$0xff] }
 0x386   : > { %1912 = vmatpush.msrb.mxu1 %v1758_v42  ;;  %1891 = vmatpush.msra.mxu0 %v1741_v47  ;;  %v2711_v39 = vld [vmem:[%s15345_s12 + $0xe0] sm:$0xff] }
 0x388   : > { %1913 = vmatpush.msrb.mxu1 %v1750_v59  ;;  %1892 = vmatpush.msra.mxu0 %v1733_v49 }
 0x38a   : > { %1914 = vmatpush.msrb.mxu1 %v1742_v57  ;;  %1893 = vmatpush.msra.mxu0 %v1725_v51 }
 0x38c   : > { %1915 = vmatpush.msrb.mxu1 %v1734_v50  ;;  %1894 = vmatpush.msra.mxu0 %v1717_v61  ;;  %v9630_v61 = vpop.f32.mrf.mxu1 }
 0x38d   : > { %15365 = vst [vmem:[#allocation3_spill] sm:$0xff] %v9630_v61 }
 0x38e   : > { %1916 = vmatpush.msrb.mxu1 %v1726_v2  ;;  %1895 = vmatpush.msra.mxu0 %v1709_v5  ;;  %v1780_v5 = vperm.slane %v9639_v63, 1 }
 0x390   : > { %1917 = vmatpush.msrb.mxu1 %v1718_v62  ;;  %1896 = vmatpush.msra.mxu0 %v1701_v10  ;;  %v9632_v62 = vpop.f32.mrf.mxu0 }
 0x391   : > { %15366 = vst [vmem:[#allocation4_spill] sm:$0xff] %v9632_v62  ;;  %v2738_v62 = vld [vmem:[%s15345_s12 + $0x1b8] sm:$0xff] }
 0x392   : > { %1918 = vmatpush.msrb.mxu1 %v1710_v6  ;;  %1897 = vmatpush.msra.mxu0 %v1693_v15  ;;  %v2698_v6 = vld [vmem:[%s15345_s12 + $0x78] sm:$0xff]  ;;  %v2696_v15 = vld [vmem:[%s15345_s12 + $0x68] sm:$0xff] }
 0x394   : > { %1919 = vmatpush.msrb.mxu1 %v1702_v11  ;;  %1898 = vmatpush.msra.mxu0 %v1685_v20  ;;  %v2697_v11 = vld [vmem:[%s15345_s12 + $0x70] sm:$0xff]  ;;  %v1782_v20 = vperm.slane %v9639_v63, 3 }
 0x396   : > { %1920 = vmatpush.msrb.mxu1 %v1694_v16  ;;  %1899 = vmatpush.msra.mxu0 %v1677_v24  ;;  %v2712_v16 = vld [vmem:[%s15345_s12 + $0xe8] sm:$0xff] }
 0x398   : > { %1921 = vmatpush.msrb.mxu1 %v1686_v21  ;;  %1900 = vmatpush.msra.mxu0 %v1669_v34 }
 0x39a   : > { %1922 = vmatpush.msrb.mxu1 %v1678_v25  ;;  %1901 = vmatpush.msra.mxu0 %v1661_v32 }
 0x39c   : > { %1923 = vmatpush.msrb.mxu1 %v1670_v26  ;;  %1902 = vmatpush.msra.mxu0 %v1653_v56 }
 0x39e   : > { %1924 = vmatpush.msrb.mxu1 %v1662_v33 }
 0x3a0   : > { %1925 = vmatpush.msrb.mxu1 %v1654_v60 }
 0x3e4   : > { %v1609_v14 = vpop.f32.mrf.mxu3 }
 0x3e5   : > { %v1610_v18 = vadd.f32 1e-06, %v1609_v14 }
 0x3e7   : > { %7954 = vrsqrt.f32 %v1610_v18  ;;  %vm1621_vm2 = vweird.f32 %v1610_v18 }
 0x3ec   : > { %v1612_v54 = vpop.f32.mrf.mxu3 }
 0x3ed   : > { %v7955_v36 = vpop.eup %7954  ;;  %v1613_v37 = vadd.f32 1e-06, %v1612_v54 }
 0x3ee   : > { %v1616_v40 = vmul.f32 %v7955_v36, %v1610_v18  ;;  %vm1622_vm1 = vweird.f32 %v7955_v36 }
 0x3ef   : > { %7956 = vrsqrt.f32 %v1613_v37  ;;  %vm1623_vm3 = vmor %vm1621_vm2, %vm1622_vm1  ;;  %vm1631_vm5 = vweird.f32 %v1613_v37 }
 0x3f0   : > { %v1617_v31 = vmul.f32 %v7955_v36, %v1616_v40  ;;  %v2730_v40 = vld [vmem:[%s15345_s12 + $0x178] sm:$0xff] }
 0x3f2   : > { %v1618_v42 = vmul.f32 0.5, %v1617_v31 }
 0x3f4   : > { %v1619_v44 = vsub.f32 1.5, %v1618_v42 }
 0x3f5   : > { %v7957_v45 = vpop.eup %7956 }
 0x3f6   : > { %v1620_v58 = vmul.f32 %v7955_v36, %v1619_v44  ;;  %v1626_v59 = vmul.f32 %v7957_v45, %v1613_v37  ;;  %vm1632_vm4 = vweird.f32 %v7957_v45 }
 0x3f7   : > { %vm1633_vm6 = vmor %vm1631_vm5, %vm1632_vm4 }
 0x3f8   : > { %v1624_v46 = vsel %vm1623_vm3, %v7955_v36, %v1620_v58  ;;  %v1627_v47 = vmul.f32 %v7957_v45, %v1626_v59  ;;  %v2746_v58 = vld [vmem:[%s15345_s12 + $0x1f8] sm:$0xff] }
 0x3f9   : > { %v1635_v57 = vmul.f32 %v1624_v46, %v9229_v35 }
 0x3fa   : > { %v1628_v48 = vmul.f32 0.5, %v1627_v47 }
 0x3fb   : > { %v1641_v49 = vmul.f32 %v7941_v3, %v1635_v57 }
 0x3fc   : > { %v1629_v50 = vsub.f32 1.5, %v1628_v48 }
 0x3fd   : > { %v1647_v0 = vadd.f32 %v7942_v8, %v1641_v49 }
 0x3fe   : > { %v1630_v1 = vmul.f32 %v7957_v45, %v1629_v50 }
 0x3ff   : > { %1811 = vmatmul.f32.vlgmr.msrb.gmra.mxu0 %v1647_v0  ;;  %1834 = vmatmul.f32.vlgmr.msra.gmra.mxu1 %v1647_v0 }
 0x400   : > { %v1634_v51 = vsel %vm1633_vm6, %v7957_v45, %v1630_v1  ;;  %1857 = vmatmul.f32.vlgmr.msrb.gmra.mxu2 %v1647_v0  ;;  %1880 = vmatmul.f32.vlgmr.msra.gmra.mxu3 %v1647_v0 }
 0x401   : > { %v1636_v2 = vmul.f32 %v1634_v51, %v9279_v43  ;;  %v9634_v43 = vpop.f32.mrf.mxu1  ;;  %2815 = vmatpush.msrb.mxu0 %v2698_v6  ;;  %2838 = vmatpush.msra.mxu1 %v2714_v7 }
 0x402   : > { %15367 = vst [vmem:[#allocation5_spill] sm:$0xff] %v9634_v43  ;;  %2861 = vmatpush.msrb.mxu2 %v2730_v40  ;;  %2884 = vmatpush.msra.mxu3 %v2746_v58  ;;  %v2745_v58 = vld [vmem:[%s15345_s12 + $0x1f0] sm:$0xff] }
 0x403   : > { %v1642_v35 = vmul.f32 %v7941_v3, %v1636_v2  ;;  %2816 = vmatpush.msrb.mxu0 %v2697_v11  ;;  %2839 = vmatpush.msra.mxu1 %v2713_v12 }
 0x404   : > { %2885 = vmatpush.msra.mxu3 %v2745_v58 }
 0x405   : > { %v1648_v52 = vadd.f32 %v7942_v8, %v1642_v35  ;;  %2817 = vmatpush.msrb.mxu0 %v2696_v15  ;;  %2840 = vmatpush.msra.mxu1 %v2712_v16 }
 0x407   : > { %1814 = vmatmul.f32.gmra.mxu0 %v1648_v52  ;;  %1837 = vmatmul.f32.gmra.mxu1 %v1648_v52 }
 0x408   : > { %1860 = vmatmul.f32.gmra.mxu2 %v1648_v52  ;;  %1883 = vmatmul.f32.gmra.mxu3 %v1648_v52 }
 0x409   : > { %2818 = vmatpush.msrb.mxu0 %v2695_v38  ;;  %2841 = vmatpush.msra.mxu1 %v2711_v39 }
 0x40f   : > { %1903 = vmatmul.f32.vlgmr.msra.gmra.mxu0 %v1647_v0  ;;  %1926 = vmatmul.f32.vlgmr.msrb.gmra.mxu1 %v1647_v0 }
 0x410   : > { %1949 = vmatmul.f32.vlgmr.msra.gmra.mxu2 %v1647_v0  ;;  %1972 = vmatmul.f32.vlgmr.msrb.gmra.mxu3 %v1647_v0 }
 0x417   : > { %1906 = vmatmul.f32.gmra.mxu0 %v1648_v52  ;;  %1929 = vmatmul.f32.gmra.mxu1 %v1648_v52 }
 0x418   : > { %1952 = vmatmul.f32.gmra.mxu2 %v1648_v52  ;;  %1975 = vmatmul.f32.gmra.mxu3 %v1648_v52 }
 0x47c   : > { %v1812_v9 = vpop.f32.mrf.mxu0  ;;  %v1835_v10 = vpop.f32.mrf.mxu1 }
 0x47d   : > { %v9657_v13 = vadd.f32 %v1812_v9, %v1779_v4  ;;  %v9661_v14 = vadd.f32 %v1835_v10, %v1780_v5 }
 0x47f   : > { %v9670_v17 = vmul.f32 0.70710677, %v9657_v13  ;;  %v9673_v18 = vmul.f32 0.70710677, %v9661_v14 }
 0x481   : > { %v2011_v21 = vmul.f32 %v9670_v17, %v9670_v17  ;;  %v2051_v22 = vmul.f32 %v9673_v18, %v9673_v18 }
 0x483   : > { %v9681_v23 = vmin.f32 %v2011_v21, 16.0  ;;  %v9683_v24 = vmin.f32 %v2051_v22, 16.0  ;;  %v1858_v25 = vpop.f32.mrf.mxu2  ;;  %v1881_v27 = vpop.f32.mrf.mxu3 }
 0x484   : > { %v9687_v28 = vadd.f32 %v1858_v25, %v1781_v19  ;;  %v9691_v34 = vadd.f32 %v1881_v27, %v1782_v20  ;;  %v1815_v1 = vpop.f32.mrf.mxu0  ;;  %v1838_v10 = vpop.f32.mrf.mxu1 }
 0x485   : > { %v2013_v26 = vmul.f32 2.1237322e-06, %v9681_v23  ;;  %v2024_v29 = vmul.f32 3.8918573e-05, %v9681_v23  ;;  %v2053_v30 = vmul.f32 2.1237322e-06, %v9683_v24  ;;  %v9736_v9 = vadd.f32 %v1815_v1, %v1779_v4 }
 0x486   : > { %v2064_v32 = vmul.f32 3.8918573e-05, %v9683_v24  ;;  %v9698_v33 = vmul.f32 0.70710677, %v9687_v28  ;;  %v9703_v36 = vmul.f32 0.70710677, %v9691_v34 }
 0x487   : > { %v2014_v41 = vadd.f32 0.00028619796, %v2013_v26  ;;  %v2025_v55 = vadd.f32 0.001143296, %v2024_v29  ;;  %v2054_v54 = vadd.f32 0.00028619796, %v2053_v30  ;;  %v9745_v29 = vadd.f32 %v1838_v10, %v1780_v5 }
 0x488   : > { %v2065_v56 = vadd.f32 0.001143296, %v2064_v32  ;;  %v2091_v60 = vmul.f32 %v9698_v33, %v9698_v33  ;;  %v2131_v45 = vmul.f32 %v9703_v36, %v9703_v36  ;;  %v9749_v32 = vmul.f32 0.70710677, %v9736_v9  ;;  %v2694_v5 = vld [vmem:[%s15345_s12 + $0x58] sm:$0xff] }
 0x489   : > { %v2026_v37 = vmul.f32 %v2025_v55, %v9681_v23  ;;  %v2015_v31 = vmul.f32 %v2014_v41, %v9681_v23  ;;  %v2055_v3 = vmul.f32 %v2054_v54, %v9683_v24  ;;  %2819 = vmatpush.msrb.mxu0 %v2694_v5 }
 0x48a   : > { %v2066_v42 = vmul.f32 %v2065_v56, %v9683_v24  ;;  %v9717_v44 = vmin.f32 %v2091_v60, 16.0  ;;  %v9727_v8 = vmin.f32 %v2131_v45, 16.0  ;;  %v2729_v45 = vld [vmem:[%s15345_s12 + $0x170] sm:$0xff]  ;;  %v2331_v1 = vmul.f32 %v9749_v32, %v9749_v32 }
 0x48b   : > { %v2027_v59 = vadd.f32 0.014752088, %v2026_v37  ;;  %v2016_v48 = vadd.f32 0.0036580483, %v2015_v31  ;;  %v2056_v2 = vadd.f32 0.0036580483, %v2055_v3  ;;  %2862 = vmatpush.msrb.mxu2 %v2729_v45 }
 0x48c   : > { %v2067_v46 = vadd.f32 0.014752088, %v2066_v42  ;;  %v2104_v47 = vmul.f32 3.8918573e-05, %v9717_v44  ;;  %v2093_v50 = vmul.f32 2.1237322e-06, %v9717_v44 }
 0x48d   : > { %v2028_v57 = vmul.f32 %v2027_v59, %v9681_v23  ;;  %v2144_v7 = vmul.f32 3.8918573e-05, %v9727_v8  ;;  %v2017_v11 = vmul.f32 %v2016_v48, %v9681_v23  ;;  %v2057_v22 = vmul.f32 %v2056_v2, %v9683_v24  ;;  %v2710_v42 = vld [vmem:[%s15345_s12 + $0xd8] sm:$0xff]  ;;  %v2693_v3 = vld [vmem:[%s15345_s12 + $0x50] sm:$0xff] }
 0x48e   : > { %v2068_v49 = vmul.f32 %v2067_v46, %v9683_v24  ;;  %v2105_v0 = vadd.f32 0.001143296, %v2104_v47  ;;  %v2094_v15 = vadd.f32 0.00028619796, %v2093_v50  ;;  %v2133_v25 = vmul.f32 2.1237322e-06, %v9727_v8  ;;  %2842 = vmatpush.msra.mxu1 %v2710_v42  ;;  %2820 = vmatpush.msrb.mxu0 %v2693_v3 }
 0x48f   : > { %v2029_v51 = vadd.f32 0.112945676, %v2028_v57  ;;  %v2145_v30 = vadd.f32 0.001143296, %v2144_v7  ;;  %v2018_v41 = vadd.f32 0.05243302, %v2017_v11 }
 0x490   : > { %v2069_v35 = vadd.f32 0.112945676, %v2068_v49  ;;  %v2106_v52 = vmul.f32 %v2105_v0, %v9717_v44  ;;  %v2095_v54 = vmul.f32 %v2094_v15, %v9717_v44  ;;  %v2058_v37 = vadd.f32 0.05243302, %v2057_v22  ;;  %v2709_v46 = vld [vmem:[%s15345_s12 + $0xd0] sm:$0xff]  ;;  %v2728_v47 = vld [vmem:[%s15345_s12 + $0x168] sm:$0xff] }
 0x491   : > { %v2030_v6 = vmul.f32 %v2029_v51, %v9681_v23  ;;  %v2134_v38 = vadd.f32 0.00028619796, %v2133_v25  ;;  %v9762_v31 = vmul.f32 0.70710677, %v9745_v29  ;;  %v2146_v59 = vmul.f32 %v2145_v30, %v9727_v8  ;;  %v2744_v49 = vld [vmem:[%s15345_s12 + $0x1e8] sm:$0xff]  ;;  %2843 = vmatpush.msra.mxu1 %v2709_v46  ;;  %2863 = vmatpush.msrb.mxu2 %v2728_v47  ;;  %v2727_v15 = vld [vmem:[%s15345_s12 + $0x160] sm:$0xff] }
 0x492   : > { %v2070_v12 = vmul.f32 %v2069_v35, %v9683_v24  ;;  %v2107_v16 = vadd.f32 0.014752088, %v2106_v52  ;;  %v2019_v57 = vmul.f32 %v2018_v41, %v9681_v23  ;;  %v2096_v48 = vadd.f32 0.0036580483, %v2095_v54  ;;  %2886 = vmatpush.msra.mxu3 %v2744_v49  ;;  %v1861_v52 = vpop.f32.mrf.mxu2  ;;  %v2708_v7 = vld [vmem:[%s15345_s12 + $0xc8] sm:$0xff] }
 0x493   : > { %v2031_v21 = vadd.f32 0.4994258, %v2030_v6  ;;  %v2059_v50 = vmul.f32 %v2058_v37, %v9683_v24  ;;  %v2135_v0 = vmul.f32 %v2134_v38, %v9727_v8  ;;  %v2371_v2 = vmul.f32 %v9762_v31, %v9762_v31  ;;  %v2692_v6 = vld [vmem:[%s15345_s12 + $0x48] sm:$0xff]  ;;  %2844 = vmatpush.msra.mxu1 %v2708_v7  ;;  %2864 = vmatpush.msrb.mxu2 %v2727_v15  ;;  %v2726_v7 = vld [vmem:[%s15345_s12 + $0x158] sm:$0xff] }
 0x494   : > { %v2071_v27 = vadd.f32 0.4994258, %v2070_v12  ;;  %v2108_v26 = vmul.f32 %v2107_v16, %v9717_v44  ;;  %v2147_v35 = vadd.f32 0.014752088, %v2146_v59  ;;  %v2020_v10 = vadd.f32 0.18741608, %v2019_v57  ;;  %2821 = vmatpush.msrb.mxu0 %v2692_v6 }
 0x495   : > { %v2032_v4 = vmul.f32 %v2031_v21, %v9681_v23  ;;  %v2097_v11 = vmul.f32 %v2096_v48, %v9717_v44  ;;  %v2743_v16 = vld [vmem:[%s15345_s12 + $0x1e0] sm:$0xff]  ;;  %v2060_v22 = vadd.f32 0.18741608, %v2059_v50  ;;  %v2136_v25 = vadd.f32 0.0036580483, %v2135_v0  ;;  %v1884_v0 = vpop.f32.mrf.mxu3  ;;  %2865 = vmatpush.msrb.mxu2 %v2726_v7 }
 0x496   : > { %v2072_v55 = vmul.f32 %v2071_v27, %v9683_v24  ;;  %v2109_v56 = vadd.f32 0.112945676, %v2108_v26  ;;  %v2148_v27 = vmul.f32 %v2147_v35, %v9727_v8  ;;  %v9812_v26 = vmin.f32 %v2331_v1, 16.0  ;;  %2887 = vmatpush.msra.mxu3 %v2743_v16  ;;  %v2691_v35 = vld [vmem:[%s15345_s12 + $0x40] sm:$0xff] }
 0x497   : > { %v9753_v60 = vadd.f32 1.0, %v2032_v4  ;;  %v9818_v41 = vmin.f32 %v2371_v2, 16.0  ;;  %v2021_v37 = vmul.f32 %v2020_v10, %v9681_v23  ;;  %v2098_v38 = vadd.f32 0.05243302, %v2097_v11  ;;  %2822 = vmatpush.msrb.mxu0 %v2691_v35  ;;  %v2707_v6 = vld [vmem:[%s15345_s12 + $0xc0] sm:$0xff]  ;;  %v2742_v10 = vld [vmem:[%s15345_s12 + $0x1d8] sm:$0xff] }
 0x498   : > { %v9758_v39 = vadd.f32 1.0, %v2072_v55  ;;  %v2110_v40 = vmul.f32 %v2109_v56, %v9717_v44  ;;  %v9822_v55 = vadd.f32 %v1861_v52, %v1781_v19  ;;  %v2149_v56 = vadd.f32 0.112945676, %v2148_v27  ;;  %2845 = vmatpush.msra.mxu1 %v2707_v6  ;;  %2888 = vmatpush.msra.mxu3 %v2742_v10 }
 0x499   : > { %7958 = vrcp.f32 %v9753_v60  ;;  %v2137_v42 = vmul.f32 %v2136_v25, %v9727_v8  ;;  %v2333_v45 = vmul.f32 2.1237322e-06, %v9812_v26  ;;  %v2373_v59 = vmul.f32 2.1237322e-06, %v9818_v41 }
 0x49a   : > { %7960 = vrcp.f32 %v9758_v39  ;;  %v2111_v51 = vadd.f32 0.4994258, %v2110_v40  ;;  %v2061_v40 = vmul.f32 %v2060_v22, %v9683_v24  ;;  %v9834_v19 = vmul.f32 0.70710677, %v9822_v55 }
 0x49b   : > { %v2150_v46 = vmul.f32 %v2149_v56, %v9727_v8  ;;  %v9838_v23 = vmul.f32 0.5, %v9657_v13  ;;  %v2022_v47 = vadd.f32 1.1283791, %v2021_v37  ;;  %v2099_v57 = vmul.f32 %v2098_v38, %v9717_v44 }
 0x49c   : > { %v2112_v12 = vmul.f32 %v2111_v51, %v9717_v44  ;;  %v9843_v24 = vmul.f32 0.5, %v9661_v14  ;;  %v2062_v48 = vadd.f32 1.1283791, %v2061_v40  ;;  %v9846_v49 = vmul.f32 0.5, %v9687_v28 }
 0x49d   : > { %v2138_v50 = vadd.f32 0.05243302, %v2137_v42  ;;  %v2334_v51 = vadd.f32 0.00028619796, %v2333_v45  ;;  %v2374_v2 = vadd.f32 0.00028619796, %v2373_v59  ;;  %v2411_v13 = vmul.f32 %v9834_v19, %v9834_v19 }
 0x49e   : > { %v9827_v5 = vadd.f32 1.0, %v2112_v12  ;;  %v9856_v52 = vmul.f32 0.5, %v9691_v34  ;;  %v2151_v28 = vadd.f32 0.4994258, %v2150_v46  ;;  %v2023_v11 = vmul.f32 %v2022_v47, %v9670_v17 }
 0x49f   : > { %v9809_v21 = vpop.eup %7958  ;;  %vm2039_vm7 = vweird.f32 %v9753_v60  ;;  %v2100_v34 = vadd.f32 0.18741608, %v2099_v57  ;;  %v9871_v12 = vadd.f32 %v1884_v0, %v1782_v20  ;;  %v2043_v15 = vand.u32 2147483647, %v9753_v60 }
 0x4a0   : > { %v9814_v4 = vpop.eup %7960  ;;  %v2035_v30 = vmul.f32 %v9809_v21, %v9753_v60  ;;  %7962 = vrcp.f32 %v9827_v5  ;;  %v2045_v16 = vand.u32 2147483648, %v9753_v60  ;;  %v2063_v22 = vmul.f32 %v2062_v48, %v9673_v18  ;;  %v2706_v60 = vld [vmem:[%s15345_s12 + $0xb8] sm:$0xff] }
 0x4a1   : > { %v2075_v54 = vmul.f32 %v9814_v4, %v9758_v39  ;;  %v2139_v25 = vmul.f32 %v2138_v50, %v9727_v8  ;;  %vm2040_vm8 = vweird.f32 %v9809_v21  ;;  %v2335_v20 = vmul.f32 %v2334_v51, %v9812_v26  ;;  %2846 = vmatpush.msra.mxu1 %v2706_v60 }
 0x4a2   : > { %v2036_v58 = vsub.f32 1.0, %v2035_v30  ;;  %v9882_v30 = vmin.f32 %v2411_v13, 16.0  ;;  %vm2080_vm9 = vweird.f32 %v9814_v4  ;;  %v2152_v56 = vmul.f32 %v2151_v28, %v9727_v8  ;;  %vm9896_vm11 = vmor %vm2039_vm7, %vm2040_vm8 }
 0x4a3   : > { %v2076_v3 = vsub.f32 1.0, %v2075_v54  ;;  %v2375_v18 = vmul.f32 %v2374_v2, %v9818_v41  ;;  %vm2079_vm10 = vweird.f32 %v9758_v39  ;;  %v2085_v37 = vand.u32 2147483648, %v9758_v39 }
 0x4a4   : > { %v2037_v1 = vmul.f32 %v9809_v21, %v2036_v58  ;;  %v2101_v38 = vmul.f32 %v2100_v34, %v9717_v44  ;;  %v9892_v40 = vmul.f32 0.70710677, %v9871_v12  ;;  %vm9900_vm12 = vcmp.eq.f32.partialorder %v2043_v15, 8.507059e+37  ;;  %vm9910_vm13 = vmor %vm2079_vm10, %vm2080_vm9 }
 0x4a5   : > { %v2077_v14 = vmul.f32 %v9814_v4, %v2076_v3  ;;  %v2083_v58 = vand.u32 2147483647, %v9758_v39  ;;  %v2140_v3 = vadd.f32 0.18741608, %v2139_v25  ;;  %v2046_v46 = vor.u32 1.1754944e-38, %v2045_v16  ;;  %v1927_v25 = vpop.f32.mrf.mxu1 }
 0x4a6   : > { %v9877_v27 = vpop.eup %7962  ;;  %v2038_v17 = vadd.f32 %v9809_v21, %v2037_v1  ;;  %v2336_v47 = vadd.f32 0.0036580483, %v2335_v20  ;;  %v2413_v57 = vmul.f32 2.1237322e-06, %v9882_v30  ;;  %v9918_v48 = vadd.f32 1.0, %v2152_v56  ;;  %v1904_v1 = vpop.f32.mrf.mxu0 }
 0x4a7   : > { %v2078_v54 = vadd.f32 %v9814_v4, %v2077_v14  ;;  %v2115_v59 = vmul.f32 %v9877_v27, %v9827_v5  ;;  %v2376_v50 = vadd.f32 0.0036580483, %v2375_v18  ;;  %v1783_v0 = vperm.slane %v9639_v63, 4 }
 0x4a8   : > { %v2042_v44 = vsel %vm9896_vm11, %v9809_v21, %v2038_v17  ;;  %v2086_v51 = vor.u32 1.1754944e-38, %v2085_v37  ;;  %v2102_v21 = vadd.f32 1.1283791, %v2101_v38  ;;  %v2125_v2 = vand.u32 2147483648, %v9827_v5 }
 0x4a9   : > { %v2082_v39 = vsel %vm9910_vm13, %v9814_v4, %v2078_v54  ;;  %v2451_v13 = vmul.f32 %v9892_v40, %v9892_v40  ;;  %v2047_v35 = vsel %vm9900_vm12, %v2046_v46, %v2042_v44  ;;  %vm2084_vm14 = vcmp.eq.f32.partialorder %v2083_v58, 8.507059e+37  ;;  %v1950_v58 = vpop.f32.mrf.mxu2  ;;  %v2690_v46 = vld [vmem:[%s15345_s12 + $0x38] sm:$0xff] }
 0x4aa   : > { %v2116_v14 = vsub.f32 1.0, %v2115_v59  ;;  %v2141_v4 = vmul.f32 %v2140_v3, %v9727_v8  ;;  %v2087_v28 = vsel %vm2084_vm14, %v2086_v51, %v2082_v39  ;;  %v2337_v6 = vmul.f32 %v2336_v47, %v9812_v26  ;;  %v2725_v47 = vld [vmem:[%s15345_s12 + $0x150] sm:$0xff]  ;;  %2823 = vmatpush.msrb.mxu0 %v2690_v46 }
 0x4ab   : > { %v2414_v7 = vadd.f32 0.00028619796, %v2413_v57  ;;  %v9930_v10 = vadd.f32 %v1904_v1, %v1783_v0  ;;  %v2123_v34 = vand.u32 2147483647, %v9827_v5  ;;  %7964 = vrcp.f32 %v9918_v48  ;;  %v2741_v1 = vld [vmem:[%s15345_s12 + $0x1d0] sm:$0xff]  ;;  %2866 = vmatpush.msrb.mxu2 %v2725_v47 }
 0x4ac   : > { %v2377_v15 = vmul.f32 %v2376_v50, %v9818_v41  ;;  %v15351_v16 = vperm.slane %v9639_v63, 5  ;;  %v2048_v17 = vmul.f32 %v2047_v35, %v2023_v11  ;;  %v9937_v8 = vmul.f32 %v2102_v21, %v9698_v33  ;;  %2889 = vmatpush.msra.mxu3 %v2741_v1  ;;  %v2704_v1 = vld [vmem:[%s15345_s12 + $0xa8] sm:$0xff] }
 0x4ad   : > { %v9939_v20 = vor.u32 1.1754944e-38, %v2125_v2  ;;  %v9941_v54 = vmin.f32 %v2451_v13, 16.0  ;;  %v9943_v56 = vmul.f32 %v2087_v28, %v2063_v22  ;;  %v2117_v18 = vmul.f32 %v9877_v27, %v2116_v14  ;;  %v2689_v14 = vld [vmem:[%s15345_s12 + $0x30] sm:$0xff]  ;;  %v2724_v28 = vld [vmem:[%s15345_s12 + $0x148] sm:$0xff] }
 0x4ae   : > { %v9946_v37 = vadd.f32 1.1283791, %v2141_v4  ;;  %v9949_v38 = vmul.f32 0.70710677, %v9930_v10  ;;  %v2338_v45 = vadd.f32 0.05243302, %v2337_v6  ;;  %v2415_v11 = vmul.f32 %v2414_v7, %v9882_v30  ;;  %2824 = vmatpush.msrb.mxu0 %v2689_v14  ;;  %2867 = vmatpush.msrb.mxu2 %v2724_v28 }
 0x4af   : > { %v9955_v33 = vadd.f32 %v1927_v25, %v15351_v16  ;;  %vm2119_vm15 = vweird.f32 %v9827_v5  ;;  %vm9958_vm1 = vcmp.eq.f32.partialorder %v2123_v34, 8.507059e+37  ;;  %v2378_v59 = vadd.f32 0.05243302, %v2377_v15  ;;  %v2705_v4 = vld [vmem:[%s15345_s12 + $0xb0] sm:$0xff]  ;;  %v2740_v25 = vld [vmem:[%s15345_s12 + $0x1c8] sm:$0xff] }
 0x4b0   : > { %v2171_v3 = vmul.f32 %v9949_v38, %v9949_v38  ;;  %v15349_v44 = vperm.slane %v9639_v63, 6  ;;  %v7123_v57 = vclamps-f32 %v2048_v17, 1.0  ;;  %vm2120_vm2 = vweird.f32 %v9877_v27  ;;  %2847 = vmatpush.msra.mxu1 %v2705_v4  ;;  %2890 = vmatpush.msra.mxu3 %v2740_v25 }
 0x4b1   : > { %v2453_v39 = vmul.f32 2.1237322e-06, %v9941_v54  ;;  %v9977_v50 = vmul.f32 0.70710677, %v9955_v33  ;;  %v9982_v51 = vpop.eup %7964  ;;  %v7124_v21 = vclamps-f32 %v9943_v56, 1.0  ;;  %v2118_v2 = vadd.f32 %v9877_v27, %v2117_v18  ;;  %vm10019_vm3 = vmor %vm2119_vm15, %vm2120_vm2 }
 0x4b2   : > { %v9986_v13 = vmin.f32 %v2171_v3, 16.0  ;;  %v9990_v35 = vadd.f32 %v1950_v58, %v15349_v44  ;;  %v2339_v6 = vmul.f32 %v2338_v45, %v9812_v26  ;;  %v2416_v7 = vadd.f32 0.0036580483, %v2415_v11  ;;  %v1973_v11 = vpop.f32.mrf.mxu3  ;;  %v2688_v58 = vld [vmem:[%s15345_s12 + $0x28] sm:$0xff]  ;;  %2848 = vmatpush.msra.mxu1 %v2704_v1 }
 0x4b3   : > { %v2211_v34 = vmul.f32 %v9977_v50, %v9977_v50  ;;  %v15350_v15 = vperm.slane %v9639_v63, 7  ;;  %v2379_v56 = vmul.f32 %v2378_v59, %v9818_v41  ;;  %v2155_v59 = vmul.f32 %v9982_v51, %v9918_v48  ;;  %2825 = vmatpush.msrb.mxu0 %v2688_v58 }
 0x4b4   : > { %v2173_v18 = vmul.f32 2.1237322e-06, %v9986_v13  ;;  %v2184_v45 = vmul.f32 3.8918573e-05, %v9986_v13  ;;  %v2454_v46 = vadd.f32 0.00028619796, %v2453_v39  ;;  %v2122_v5 = vsel %vm10019_vm3, %v9877_v27, %v2118_v2 }
 0x4b5   : > { %v10025_v60 = vmin.f32 %v2211_v34, 16.0  ;;  %v10028_v47 = vmul.f32 0.70710677, %v9990_v35  ;;  %v10033_v14 = vadd.f32 1.0, %v7123_v57  ;;  %v2723_v39 = vld [vmem:[%s15345_s12 + $0x140] sm:$0xff]  ;;  %v10045_v57 = vadd.f32 %v1973_v11, %v15350_v15 }
 0x4b6   : > { %v2174_v4 = vadd.f32 0.00028619796, %v2173_v18  ;;  %v2185_v28 = vadd.f32 0.001143296, %v2184_v45  ;;  %v2340_v34 = vadd.f32 0.18741608, %v2339_v6  ;;  %2868 = vmatpush.msrb.mxu2 %v2723_v39  ;;  %v2417_v27 = vmul.f32 %v2416_v7, %v9882_v30 }
 0x4b7   : > { %v2213_v25 = vmul.f32 2.1237322e-06, %v10025_v60  ;;  %v2224_v58 = vmul.f32 3.8918573e-05, %v10025_v60  ;;  %v10047_v44 = vadd.f32 1.0, %v7124_v21  ;;  %v2251_v18 = vmul.f32 %v10028_v47, %v10028_v47  ;;  %v2739_v6 = vld [vmem:[%s15345_s12 + $0x1c0] sm:$0xff] }
 0x4b8   : > { %v2186_v2 = vmul.f32 %v2185_v28, %v9986_v13  ;;  %v10059_v45 = vsel %vm9958_vm1, %v9939_v20, %v2122_v5  ;;  %v2156_v11 = vsub.f32 1.0, %v2155_v59  ;;  %v2380_v3 = vadd.f32 0.18741608, %v2379_v56  ;;  %2891 = vmatpush.msra.mxu3 %v2739_v6  ;;  %v1907_v20 = vpop.f32.mrf.mxu0 }
 0x4b9   : > { %v2225_v21 = vadd.f32 0.001143296, %v2224_v58  ;;  %v2455_v7 = vmul.f32 %v2454_v46, %v9941_v54  ;;  %v2175_v1 = vmul.f32 %v2174_v4, %v9986_v13  ;;  %v10063_v39 = vmin.f32 %v2251_v18, 16.0 }
 0x4ba   : > { %v2187_v28 = vadd.f32 0.014752088, %v2186_v2  ;;  %v2341_v15 = vmul.f32 %v2340_v34, %v9812_v26  ;;  %v2214_v16 = vadd.f32 0.00028619796, %v2213_v25  ;;  %v10068_v22 = vmul.f32 0.70710677, %v10045_v57  ;;  %2892 = vmatpush.msra.mxu3 %v2738_v62 }
 0x4bb   : > { %v2226_v17 = vmul.f32 %v2225_v21, %v10025_v60  ;;  %v2418_v59 = vadd.f32 0.05243302, %v2417_v27  ;;  %v2253_v5 = vmul.f32 2.1237322e-06, %v10063_v39  ;;  %v2264_v46 = vmul.f32 3.8918573e-05, %v10063_v39 }
 0x4bc   : > { %v2188_v56 = vmul.f32 %v2187_v28, %v9986_v13  ;;  %v2157_v4 = vmul.f32 %v9982_v51, %v2156_v11  ;;  %vm2159_vm4 = vweird.f32 %v9918_v48  ;;  %v2381_v34 = vmul.f32 %v2380_v3, %v9818_v41 }
 0x4bd   : > { %v2227_v25 = vadd.f32 0.014752088, %v2226_v17  ;;  %v2291_v58 = vmul.f32 %v10068_v22, %v10068_v22  ;;  %v2456_v2 = vadd.f32 0.0036580483, %v2455_v7  ;;  %v2176_v18 = vadd.f32 0.0036580483, %v2175_v1 }
 0x4be   : > { %v2189_v6 = vadd.f32 0.112945676, %v2188_v56  ;;  %v10080_v27 = vadd.f32 %v1907_v20, %v1783_v0  ;;  %v2215_v21 = vmul.f32 %v2214_v16, %v10025_v60  ;;  %v2265_v11 = vadd.f32 0.001143296, %v2264_v46  ;;  %v2687_v1 = vld [vmem:[%s15345_s12 + $0x20] sm:$0xff]  ;;  %v2722_v16 = vld [vmem:[%s15345_s12 + $0x138] sm:$0xff] }
 0x4bf   : > { %v2228_v28 = vmul.f32 %v2227_v25, %v10025_v60  ;;  %v10084_v42 = vmin.f32 %v2291_v58, 16.0  ;;  %vm2160_vm5 = vweird.f32 %v9982_v51  ;;  %v2419_v17 = vmul.f32 %v2418_v59, %v9882_v30  ;;  %v2703_v0 = vld [vmem:[%s15345_s12 + $0xa0] sm:$0xff]  ;;  %2826 = vmatpush.msrb.mxu0 %v2687_v1  ;;  %2869 = vmatpush.msrb.mxu2 %v2722_v16  ;;  %v2721_v1 = vld [vmem:[%s15345_s12 + $0x130] sm:$0xff]  ;;  %v2734_v56 = vld [vmem:[%s15345_s12 + $0x198] sm:$0xff] }
 0x4c0   : > { %v2190_v3 = vmul.f32 %v2189_v6, %v9986_v13  ;;  %v2254_v7 = vadd.f32 0.00028619796, %v2253_v5  ;;  %v15378_v20 = vand.u32 2147483647, %v9918_v48  ;;  %v2266_v5 = vmul.f32 %v2265_v11, %v10063_v39  ;;  %2849 = vmatpush.msra.mxu1 %v2703_v0  ;;  %vm10153_vm7 = vmor %vm2159_vm4, %vm2160_vm5 }
 0x4c1   : > { %v2229_v59 = vadd.f32 0.112945676, %v2228_v28  ;;  %v2293_v46 = vmul.f32 2.1237322e-06, %v10084_v42  ;;  %v10107_v25 = vmul.f32 0.70710677, %v10080_v27  ;;  %v2457_v61 = vmul.f32 %v2456_v2, %v9941_v54  ;;  %2870 = vmatpush.msrb.mxu2 %v2721_v1 }
 0x4c2   : > { %vm10100_vm6 = vcmp.eq.f32.partialorder %v15378_v20, 8.507059e+37  ;;  %v10109_v58 = vadd.f32 1.1283791, %v2341_v15  ;;  %v10111_v6 = vadd.f32 1.1283791, %v2381_v34  ;;  %v2158_v43 = vadd.f32 %v9982_v51, %v2157_v4  ;;  %v2686_v15 = vld [vmem:[%s15345_s12 + $0x18] sm:$0xff] }
 0x4c3   : > { %v2191_v20 = vadd.f32 0.4994258, %v2190_v3  ;;  %v2216_v28 = vadd.f32 0.0036580483, %v2215_v21  ;;  %v2230_v11 = vmul.f32 %v2229_v59, %v10025_v60  ;;  %v2267_v53 = vadd.f32 0.014752088, %v2266_v5  ;;  %2827 = vmatpush.msrb.mxu0 %v2686_v15 }
 0x4c4   : > { %v10122_v34 = vadd.f32 0.18741608, %v2419_v17  ;;  %v2177_v2 = vmul.f32 %v2176_v18, %v9986_v13  ;;  %v2255_v4 = vmul.f32 %v2254_v7, %v10063_v39  ;;  %v2702_v21 = vld [vmem:[%s15345_s12 + $0x98] sm:$0xff]  ;;  %v2737_v17 = vld [vmem:[%s15345_s12 + $0x1b0] sm:$0xff]  ;;  %v2294_v16 = vadd.f32 0.00028619796, %v2293_v46 }
 0x4c5   : > { %v2192_v3 = vmul.f32 %v2191_v20, %v9986_v13  ;;  %v2231_v0 = vadd.f32 0.4994258, %v2230_v11  ;;  %v2268_v18 = vmul.f32 %v2267_v53, %v10063_v39  ;;  %v2491_v62 = vmul.f32 %v10107_v25, %v10107_v25  ;;  %2850 = vmatpush.msra.mxu1 %v2702_v21  ;;  %v2685_v7 = vld [vmem:[%s15345_s12 + $0x10] sm:$0xff]  ;;  %2893 = vmatpush.msra.mxu3 %v2737_v17 }
 0x4c6   : > { %v2701_v59 = vld [vmem:[%s15345_s12 + $0x90] sm:$0xff]  ;;  %v10147_v5 = vmul.f32 %v10059_v45, %v9937_v8  ;;  %v2458_v46 = vadd.f32 0.05243302, %v2457_v61  ;;  %v2304_v11 = vmul.f32 3.8918573e-05, %v10084_v42  ;;  %2828 = vmatpush.msrb.mxu0 %v2685_v7  ;;  %v2162_v8 = vsel %vm10153_vm7, %v9982_v51, %v2158_v43  ;;  %v2720_v61 = vld [vmem:[%s15345_s12 + $0x128] sm:$0xff] }
 0x4c7   : > { %v10157_v20 = vadd.f32 1.0, %v2192_v3  ;;  %v2217_v45 = vmul.f32 %v2216_v28, %v10025_v60  ;;  %v2232_v15 = vmul.f32 %v2231_v0, %v10025_v60  ;;  %v2269_v21 = vadd.f32 0.112945676, %v2268_v18  ;;  %2851 = vmatpush.msra.mxu1 %v2701_v59  ;;  %v2736_v3 = vld [vmem:[%s15345_s12 + $0x1a8] sm:$0xff]  ;;  %2871 = vmatpush.msrb.mxu2 %v2720_v61  ;;  %v2735_v7 = vld [vmem:[%s15345_s12 + $0x1a0] sm:$0xff]  ;;  %v2718_v61 = vld [vmem:[%s15345_s12 + $0x118] sm:$0xff] }
 0x4c8   : > { %v2143_v1 = vmul.f32 %v9946_v37, %v9703_v36  ;;  %v15383_v17 = vand.u32 2147483648, %v9918_v48  ;;  %v2256_v51 = vadd.f32 0.0036580483, %v2255_v4  ;;  %2894 = vmatpush.msra.mxu3 %v2736_v3  ;;  %v2684_v28 = vld [vmem:[%s15345_s12 + $0x8] sm:$0xff]  ;;  %v2719_v36 = vld [vmem:[%s15345_s12 + $0x120] sm:$0xff]  ;;  %v2295_v18 = vmul.f32 %v2294_v16, %v10084_v42  ;;  %v2778_v3 = vld [vmem:[%s15345_s12 + $0x2f8] sm:$0xff] }
 0x4c9   : > { %7966 = vrcp.f32 %v10157_v20  ;;  %v2700_v0 = vld [vmem:[%s15345_s12 + $0x88] sm:$0xff]  ;;  %v2178_v37 = vadd.f32 0.05243302, %v2177_v2  ;;  %v10185_v48 = vadd.f32 1.0, %v2232_v15  ;;  %v10188_v4 = vmin.f32 %v2491_v62, 16.0  ;;  %2829 = vmatpush.msrb.mxu0 %v2684_v28  ;;  %v2683_v59 = vld [vmem:[%s15345_s12] sm:$0xff]  ;;  %2872 = vmatpush.msrb.mxu2 %v2719_v36 }
 0x4ca   : > { %v2166_v43 = vor.u32 1.1754944e-38, %v15383_v17  ;;  %2852 = vmatpush.msra.mxu1 %v2700_v0  ;;  %v2459_v2 = vmul.f32 %v2458_v46, %v9941_v54  ;;  %v2270_v15 = vmul.f32 %v2269_v21, %v10063_v39  ;;  %v2305_v16 = vadd.f32 0.001143296, %v2304_v11  ;;  %2895 = vmatpush.msra.mxu3 %v2735_v7  ;;  %v2699_v62 = vld [vmem:[%s15345_s12 + $0x80] sm:$0xff]  ;;  %v2762_v21 = vld [vmem:[%s15345_s12 + $0x278] sm:$0xff]  ;;  %v2717_v17 = vld [vmem:[%s15345_s12 + $0x110] sm:$0xff] }
 0x4cb   : > { %v2668_v46 = vmul.f32 %v10047_v44, %v9843_v24  ;;  %v2218_v11 = vadd.f32 0.05243302, %v2217_v45  ;;  %7968 = vrcp.f32 %v10185_v48  ;;  %2830 = vmatpush.msrb.mxu0 %v2683_v59  ;;  %v2421_v24 = vmul.f32 %v10122_v34, %v9882_v30  ;;  %2873 = vmatpush.msrb.mxu2 %v2718_v61  ;;  %v1930_v34 = vpop.f32.mrf.mxu1  ;;  %v2760_v61 = vld [vmem:[%s15345_s12 + $0x268] sm:$0xff] }
 0x4cc   : > { %v2167_v53 = vsel %vm10100_vm6, %v2166_v43, %v2162_v8  ;;  %v7125_v8 = vclamps-f32 %v10147_v5, 1.0  ;;  %2853 = vmatpush.msra.mxu1 %v2699_v62  ;;  %v10225_v44 = vmul.f32 0.5, %v9930_v10  ;;  %v2257_v5 = vmul.f32 %v2256_v51, %v10063_v39  ;;  %2896 = vmatpush.msra.mxu3 %v2734_v56  ;;  %v2733_v43 = vld [vmem:[%s15345_s12 + $0x190] sm:$0xff] }
 0x4cd   : > { %v2306_v45 = vmul.f32 %v2305_v16, %v10084_v42  ;;  %v10232_v28 = vmul.f32 %v2167_v53, %v2143_v1  ;;  %v2271_v0 = vadd.f32 0.4994258, %v2270_v15  ;;  %v2296_v36 = vadd.f32 0.0036580483, %v2295_v18  ;;  %2907 = vmatpush.msra.mxu0 %v2762_v21  ;;  %2874 = vmatpush.msrb.mxu2 %v2717_v17  ;;  %v2761_v1 = vld [vmem:[%s15345_s12 + $0x270] sm:$0xff] }
 0x4ce   : > { %v2493_v7 = vmul.f32 2.1237322e-06, %v10188_v4  ;;  %2930 = vmatpush.msrb.mxu1 %v2778_v3  ;;  %v10239_v51 = vmul.f32 %v10033_v14, %v9838_v23  ;;  %v2460_v59 = vadd.f32 0.18741608, %v2459_v2  ;;  %v2179_v16 = vmul.f32 %v2178_v37, %v9986_v13  ;;  %2897 = vmatpush.msra.mxu3 %v2733_v43  ;;  %v2777_v18 = vld [vmem:[%s15345_s12 + $0x2f0] sm:$0xff]  ;;  %v2716_v37 = vld [vmem:[%s15345_s12 + $0x108] sm:$0xff] }
 0x4cf   : > { %v10235_v10 = vpop.eup %7966  ;;  %v2307_v62 = vadd.f32 0.014752088, %v2306_v45  ;;  %v2653_v53 = vadd.f32 1.0, %v7125_v8  ;;  %v2219_v23 = vmul.f32 %v2218_v11, %v10025_v60  ;;  %v2272_v14 = vmul.f32 %v2271_v0, %v10063_v39  ;;  %2908 = vmatpush.msra.mxu0 %v2761_v1  ;;  %v2732_v2 = vld [vmem:[%s15345_s12 + $0x188] sm:$0xff]  ;;  %2875 = vmatpush.msrb.mxu2 %v2716_v37 }
 0x4d0   : > { %v2195_v15 = vmul.f32 %v10235_v10, %v10157_v20  ;;  %2931 = vmatpush.msrb.mxu1 %v2777_v18  ;;  %v10261_v56 = vadd.f32 1.1283791, %v2421_v24  ;;  %v2258_v8 = vadd.f32 0.05243302, %v2257_v5  ;;  %v15384_v21 = vperm.slane %v9639_v63, 5  ;;  %2898 = vmatpush.msra.mxu3 %v2732_v2  ;;  %v2776_v24 = vld [vmem:[%s15345_s12 + $0x2e8] sm:$0xff] }
 0x4d1   : > { %v2308_v11 = vmul.f32 %v2307_v62, %v10084_v42  ;;  %v10268_v17 = vpop.eup %7968  ;;  %v7126_v45 = vclamps-f32 %v10232_v28, 1.0  ;;  %v10271_v43 = vadd.f32 1.0, %v2272_v14  ;;  %v2297_v0 = vmul.f32 %v2296_v36, %v10084_v42  ;;  %2909 = vmatpush.msra.mxu0 %v2760_v61  ;;  %v2715_v5 = vld [vmem:[%s15345_s12 + $0x100] sm:$0xff]  ;;  %2854 = vmatmul.f32.vlgmr.msra.gmra.mxu1 %v2668_v46  ;;  %v2810_v14 = vld [vmem:[%s15345_s12 + $0x3f8] sm:$0xff] }
 0x4d2   : > { %v10266_v3 = vadd.f32 %v1930_v34, %v15384_v21  ;;  %v2494_v1 = vadd.f32 0.00028619796, %v2493_v7  ;;  %v10282_v34 = vmul.f32 %v10109_v58, %v9749_v32  ;;  %v2461_v28 = vmul.f32 %v2460_v59, %v9941_v54  ;;  %2932 = vmatpush.msrb.mxu1 %v2776_v24  ;;  %2876 = vmatpush.msrb.mxu2 %v2715_v5  ;;  %v2731_v36 = vld [vmem:[%s15345_s12 + $0x180] sm:$0xff]  ;;  %v2758_v61 = vld [vmem:[%s15345_s12 + $0x258] sm:$0xff] }
 0x4d3   : > { %v2196_v62 = vsub.f32 1.0, %v2195_v15  ;;  %v2309_v18 = vadd.f32 0.112945676, %v2308_v11  ;;  %v2759_v7 = vld [vmem:[%s15345_s12 + $0x260] sm:$0xff]  ;;  %v2180_v32 = vadd.f32 0.18741608, %v2179_v16  ;;  %v10296_v59 = vmul.f32 %v10268_v17, %v10185_v48  ;;  %2899 = vmatpush.msra.mxu3 %v2731_v36  ;;  %2831 = vmatmul.f32.vlgmr.msrb.gmra.mxu0 %v10239_v51 }
 0x4d4   : > { %15385 = vst [vmem:[#allocation6_spill] sm:$0xff] %v10266_v3  ;;  %v2775_v46 = vld [vmem:[%s15345_s12 + $0x2e0] sm:$0xff]  ;;  %v2220_v58 = vadd.f32 0.18741608, %v2219_v23  ;;  %7970 = vrcp.f32 %v10271_v43  ;;  %2910 = vmatpush.msra.mxu0 %v2759_v7  ;;  %v2794_v15 = vld [vmem:[%s15345_s12 + $0x378] sm:$0xff]  ;;  %v10306_v37 = vmul.f32 0.5, %v9955_v33  ;;  %v2259_v16 = vmul.f32 %v2258_v8, %v10063_v39 }
 0x4d5   : > { %v2310_v23 = vmul.f32 %v2309_v18, %v10084_v42  ;;  %v10311_v2 = vmul.f32 0.70710677, %v10266_v3  ;;  %2933 = vmatpush.msrb.mxu1 %v2775_v46  ;;  %2953 = vmatpush.msra.mxu2 %v2794_v15  ;;  %v2774_v11 = vld [vmem:[%s15345_s12 + $0x2d8] sm:$0xff]  ;;  %v2793_v33 = vld [vmem:[%s15345_s12 + $0x370] sm:$0xff]  ;;  %v10323_v8 = vmul.f32 %v2653_v53, %v9846_v49  ;;  %v10327_v21 = vmul.f32 %v10111_v6, %v9762_v31  ;;  %v1953_v18 = vpop.f32.mrf.mxu2  ;;  %v2792_v7 = vld [vmem:[%s15345_s12 + $0x368] sm:$0xff] }
 0x4d6   : > { %v10330_v24 = vmul.f32 0.5, %v9990_v35  ;;  %v2298_v5 = vadd.f32 0.05243302, %v2297_v0  ;;  %2976 = vmatpush.msrb.mxu3 %v2810_v14  ;;  %2911 = vmatpush.msra.mxu0 %v2758_v61  ;;  %v2809_v36 = vld [vmem:[%s15345_s12 + $0x3f0] sm:$0xff]  ;;  %v2654_v6 = vadd.f32 1.0, %v7126_v45  ;;  %v2197_v35 = vmul.f32 %v10235_v10, %v2196_v62  ;;  %v2808_v45 = vld [vmem:[%s15345_s12 + $0x3e8] sm:$0xff] }
 0x4d7   : > { %15386 = vst [vmem:[#allocation7_spill] sm:$0xff] %v10311_v2  ;;  %v2757_v49 = vld [vmem:[%s15345_s12 + $0x250] sm:$0xff]  ;;  %v2311_v53 = vadd.f32 0.4994258, %v2310_v23  ;;  %v2495_v0 = vmul.f32 %v2494_v1, %v10188_v4  ;;  %2934 = vmatpush.msrb.mxu1 %v2774_v11  ;;  %2954 = vmatpush.msra.mxu2 %v2793_v33  ;;  %v2462_v46 = vadd.f32 1.1283791, %v2461_v28  ;;  %v2181_v15 = vmul.f32 %v2180_v32, %v9986_v13 }
 0x4d8   : > { %v2773_v31 = vld [vmem:[%s15345_s12 + $0x2d0] sm:$0xff]  ;;  %v2221_v14 = vmul.f32 %v2220_v58, %v10025_v60  ;;  %v2236_v61 = vsub.f32 1.0, %v10296_v59  ;;  %2977 = vmatpush.msrb.mxu3 %v2809_v36  ;;  %2912 = vmatpush.msra.mxu0 %v2757_v49  ;;  %v2756_v1 = vld [vmem:[%s15345_s12 + $0x248] sm:$0xff]  ;;  %v10357_v62 = vmul.f32 %v10261_v56, %v9834_v19  ;;  %v2260_v28 = vadd.f32 0.18741608, %v2259_v16  ;;  %v2791_v59 = vld [vmem:[%s15345_s12 + $0x360] sm:$0xff] }
 0x4d9   : > { %v2531_v13 = vmul.f32 %v10311_v2, %v10311_v2  ;;  %v15387_v60 = vperm.slane %v9639_v63, 6  ;;  %2935 = vmatpush.msrb.mxu1 %v2773_v31  ;;  %v2772_v58 = vld [vmem:[%s15345_s12 + $0x2c8] sm:$0xff]  ;;  %v2807_v19 = vld [vmem:[%s15345_s12 + $0x3e0] sm:$0xff]  ;;  %v2203_v16 = vand.u32 2147483647, %v10157_v20  ;;  %v2205_v23 = vand.u32 2147483648, %v10157_v20  ;;  %2955 = vmatpush.msra.mxu2 %v2792_v7 }
 0x4da   : > { %v10374_v56 = vpop.eup %7970  ;;  %v2299_v11 = vmul.f32 %v2298_v5, %v10084_v42  ;;  %v2312_v33 = vmul.f32 %v2311_v53, %v10084_v42  ;;  %2978 = vmatpush.msrb.mxu3 %v2808_v45  ;;  %v2771_v36 = vld [vmem:[%s15345_s12 + $0x2c0] sm:$0xff]  ;;  %v2198_v49 = vadd.f32 %v10235_v10, %v2197_v35  ;;  %vm2200_vm8 = vweird.f32 %v10235_v10  ;;  %2913 = vmatpush.msra.mxu0 %v2756_v1  ;;  %v2790_v53 = vld [vmem:[%s15345_s12 + $0x358] sm:$0xff]  ;;  %v2804_v51 = vld [vmem:[%s15345_s12 + $0x3c8] sm:$0xff] }
 0x4db   : > { %v10363_v32 = vadd.f32 %v1953_v18, %v15387_v60  ;;  %v2755_v18 = vld [vmem:[%s15345_s12 + $0x240] sm:$0xff]  ;;  %v10390_v31 = vmul.f32 %v10374_v56, %v10271_v43  ;;  %v2496_v5 = vadd.f32 0.0036580483, %v2495_v0  ;;  %2936 = vmatpush.msrb.mxu1 %v2772_v58  ;;  %v2806_v7 = vld [vmem:[%s15345_s12 + $0x3d8] sm:$0xff]  ;;  %v10399_v45 = vmul.f32 %v2654_v6, %v9856_v52  ;;  %2956 = vmatpush.msra.mxu2 %v2791_v59  ;;  %v2789_v6 = vld [vmem:[%s15345_s12 + $0x350] sm:$0xff] }
 0x4dc   : > { %v2182_v35 = vadd.f32 1.1283791, %v2181_v15  ;;  %v2222_v60 = vadd.f32 1.1283791, %v2221_v14  ;;  %v2237_v3 = vmul.f32 %v10268_v17, %v2236_v61  ;;  %2979 = vmatpush.msrb.mxu3 %v2807_v19  ;;  %v2770_v0 = vld [vmem:[%s15345_s12 + $0x2b8] sm:$0xff]  ;;  %vm2199_vm9 = vweird.f32 %v10157_v20  ;;  %2914 = vmatpush.msra.mxu0 %v2755_v18  ;;  %v2768_v18 = vld [vmem:[%s15345_s12 + $0x2a8] sm:$0xff] }
 0x4dd   : > { %v2261_v1 = vmul.f32 %v2260_v28, %v10063_v39  ;;  %v10407_v58 = vmin.f32 %v2531_v13, 16.0  ;;  %v10410_v2 = vmul.f32 0.70710677, %v10363_v32  ;;  %2937 = vmatpush.msrb.mxu1 %v2771_v36  ;;  %v2754_v52 = vld [vmem:[%s15345_s12 + $0x238] sm:$0xff]  ;;  %v10419_v15 = vmul.f32 %v2462_v46, %v9892_v40  ;;  %vm10423_vm10 = vmor %vm2199_vm9, %vm2200_vm8  ;;  %2957 = vmatpush.msra.mxu2 %v2790_v53  ;;  %v2805_v40 = vld [vmem:[%s15345_s12 + $0x3d0] sm:$0xff] }
 0x4de   : > { %vm10427_vm11 = vcmp.eq.f32.partialorder %v2203_v16, 8.507059e+37  ;;  %v2300_v14 = vadd.f32 0.18741608, %v2299_v11  ;;  %v10431_v61 = vadd.f32 1.0, %v2312_v33  ;;  %2980 = vmatpush.msrb.mxu3 %v2806_v7  ;;  %v2769_v46 = vld [vmem:[%s15345_s12 + $0x2b0] sm:$0xff]  ;;  %v2202_v28 = vsel %vm10423_vm10, %v10235_v10, %v2198_v49  ;;  %v2788_v11 = vld [vmem:[%s15345_s12 + $0x348] sm:$0xff]  ;;  %2915 = vmatpush.msra.mxu0 %v2754_v52 }
 0x4df   : > { %v2206_v13 = vor.u32 1.1754944e-38, %v2205_v23  ;;  %v2276_v59 = vsub.f32 1.0, %v10390_v31  ;;  %v2497_v19 = vmul.f32 %v2496_v5, %v10188_v4  ;;  %2938 = vmatpush.msrb.mxu1 %v2770_v0  ;;  %v2753_v16 = vld [vmem:[%s15345_s12 + $0x230] sm:$0xff]  ;;  %v2238_v33 = vadd.f32 %v10268_v17, %v2237_v3  ;;  %2958 = vmatpush.msra.mxu2 %v2789_v6  ;;  %v2752_v31 = vld [vmem:[%s15345_s12 + $0x228] sm:$0xff]  ;;  %v2787_v5 = vld [vmem:[%s15345_s12 + $0x340] sm:$0xff] }
 0x4e0   : > { %vm2240_vm12 = vweird.f32 %v10268_v17  ;;  %v2243_v10 = vand.u32 2147483647, %v10185_v48  ;;  %v2245_v23 = vand.u32 2147483648, %v10185_v48  ;;  %vm2239_vm13 = vweird.f32 %v10185_v48  ;;  %2981 = vmatpush.msrb.mxu3 %v2805_v40  ;;  %2916 = vmatpush.msra.mxu0 %v2753_v16  ;;  %v2803_v0 = vld [vmem:[%s15345_s12 + $0x3c0] sm:$0xff]  ;;  %v2786_v40 = vld [vmem:[%s15345_s12 + $0x338] sm:$0xff] }
 0x4e1   : > { %v2262_v36 = vadd.f32 1.1283791, %v2261_v1  ;;  %v2533_v3 = vmul.f32 2.1237322e-06, %v10407_v58  ;;  %v2571_v49 = vmul.f32 %v10410_v2, %v10410_v2  ;;  %2939 = vmatpush.msrb.mxu1 %v2769_v46  ;;  %v2207_v53 = vsel %vm10427_vm11, %v2206_v13, %v2202_v28  ;;  %2959 = vmatpush.msra.mxu2 %v2788_v11  ;;  %vm10485_vm14 = vmor %vm2239_vm13, %vm2240_vm12 }
 0x4e2   : > { %v2301_v7 = vmul.f32 %v2300_v14, %v10084_v42  ;;  %7972 = vrcp.f32 %v10431_v61  ;;  %v2344_v1 = vmul.f32 3.8918573e-05, %v9812_v26  ;;  %v2183_v52 = vmul.f32 %v2182_v35, %v9949_v38  ;;  %2982 = vmatpush.msrb.mxu3 %v2804_v51  ;;  %v2751_v14 = vld [vmem:[%s15345_s12 + $0x220] sm:$0xff]  ;;  %2917 = vmatpush.msra.mxu0 %v2752_v31 }
 0x4e3   : > { %v2223_v6 = vmul.f32 %v2222_v60, %v9977_v50  ;;  %v2277_v39 = vmul.f32 %v10374_v56, %v2276_v59  ;;  %v2498_v20 = vadd.f32 0.05243302, %v2497_v19  ;;  %2940 = vmatpush.msrb.mxu1 %v2768_v18  ;;  %v2242_v38 = vsel %vm10485_vm14, %v10268_v17, %v2238_v33  ;;  %2960 = vmatpush.msra.mxu2 %v2787_v5  ;;  %v2767_v60 = vld [vmem:[%s15345_s12 + $0x2a0] sm:$0xff]  ;;  %v1976_v59 = vpop.f32.mrf.mxu3  ;;  %v2802_v19 = vld [vmem:[%s15345_s12 + $0x3b8] sm:$0xff] }
 0x4e4   : > { %vm10496_vm15 = vcmp.eq.f32.partialorder %v2243_v10, 8.507059e+37  ;;  %v2246_v48 = vor.u32 1.1754944e-38, %v2245_v23  ;;  %v2283_v35 = vand.u32 2147483647, %v10271_v43  ;;  %v2208_v46 = vmul.f32 %v2207_v53, %v2183_v52  ;;  %2983 = vmatpush.msrb.mxu3 %v2803_v0  ;;  %2877 = vmatmul.f32.vlgmr.msrb.gmra.mxu2 %v10323_v8 }
 0x4e5   : > { %v2285_v17 = vand.u32 2147483648, %v10271_v43  ;;  %v2534_v28 = vadd.f32 0.00028619796, %v2533_v3  ;;  %v10508_v13 = vmin.f32 %v2571_v49, 16.0  ;;  %v2263_v16 = vmul.f32 %v2262_v36, %v10028_v47  ;;  %2900 = vmatmul.f32.vlgmr.msra.gmra.mxu3 %v10399_v45  ;;  %2918 = vmatpush.msra.mxu0 %v2751_v14 }
 0x4e6   : > { %vm2279_vm1 = vweird.f32 %v10271_v43  ;;  %v2302_v11 = vadd.f32 1.1283791, %v2301_v7  ;;  %v2345_v33 = vadd.f32 0.001143296, %v2344_v1  ;;  %v2247_v10 = vsel %vm10496_vm15, %v2246_v48, %v2242_v38  ;;  %2941 = vmatpush.msrb.mxu1 %v2767_v60  ;;  %2961 = vmatpush.msra.mxu2 %v2786_v40 }
 0x4e7   : > { %v2278_v23 = vadd.f32 %v10374_v56, %v2277_v39  ;;  %vm2280_vm2 = vweird.f32 %v10374_v56  ;;  %v2499_v8 = vmul.f32 %v2498_v20, %v10188_v4  ;;  %vm10524_vm3 = vcmp.eq.f32.partialorder %v2283_v35, 8.507059e+37  ;;  %2984 = vmatpush.msrb.mxu3 %v2802_v19 }
 0x4e8   : > { %v10522_v51 = vpop.eup %7972  ;;  %v15398_v45 = vperm.slane %v9639_v63, 7  ;;  %v2346_v36 = vmul.f32 %v2345_v33, %v9812_v26  ;;  %v2384_v3 = vmul.f32 3.8918573e-05, %v9818_v41  ;;  %v7127_v49 = vclamps-f32 %v2208_v46, 1.0  ;;  %vm10540_vm4 = vmor %vm2279_vm1, %vm2280_vm2 }
 0x4e9   : > { %v2286_v31 = vor.u32 1.1754944e-38, %v2285_v17  ;;  %v2535_v5 = vmul.f32 %v2534_v28, %v10407_v58  ;;  %v2573_v53 = vmul.f32 2.1237322e-06, %v10508_v13  ;;  %v2248_v7 = vmul.f32 %v2247_v10, %v2223_v6 }
 0x4ea   : > { %v10530_v18 = vadd.f32 %v1976_v59, %v15398_v45  ;;  %v2347_v0 = vadd.f32 0.014752088, %v2346_v36  ;;  %v2385_v1 = vadd.f32 0.001143296, %v2384_v3  ;;  %v2424_v52 = vmul.f32 3.8918573e-05, %v9882_v30 }
 0x4eb   : > { %v2282_v42 = vsel %vm10540_vm4, %v10374_v56, %v2278_v23  ;;  %v10549_v39 = vmul.f32 %v2302_v11, %v10068_v22  ;;  %v2315_v6 = vmul.f32 %v10522_v51, %v10431_v61  ;;  %v2500_v20 = vadd.f32 0.18741608, %v2499_v8 }
 0x4ec   : > { %v10554_v43 = vmul.f32 0.70710677, %v10530_v18  ;;  %v2348_v14 = vmul.f32 %v2347_v0, %v9812_v26  ;;  %v2386_v38 = vmul.f32 %v2385_v1, %v9818_v41  ;;  %v2425_v50 = vadd.f32 0.001143296, %v2424_v52 }
 0x4ed   : > { %v2655_v48 = vadd.f32 1.0, %v7127_v49  ;;  %v2325_v35 = vand.u32 2147483648, %v10431_v61  ;;  %v2536_v60 = vadd.f32 0.0036580483, %v2535_v5  ;;  %v2574_v56 = vadd.f32 0.00028619796, %v2573_v53 }
 0x4ee   : > { %v7128_v40 = vclamps-f32 %v2248_v7, 1.0  ;;  %v2349_v22 = vadd.f32 0.112945676, %v2348_v14  ;;  %v2387_v46 = vadd.f32 0.014752088, %v2386_v38  ;;  %v2426_v17 = vmul.f32 %v2425_v50, %v9882_v30 }
 0x4ef   : > { %v2287_v28 = vsel %vm10524_vm3, %v2286_v31, %v2282_v42  ;;  %v2316_v59 = vsub.f32 1.0, %v2315_v6  ;;  %v2323_v19 = vand.u32 2147483647, %v10431_v61  ;;  %v2501_v11 = vmul.f32 %v2500_v20, %v10188_v4 }
 0x4f0   : > { %v2611_v33 = vmul.f32 %v10554_v43, %v10554_v43  ;;  %v2350_v10 = vmul.f32 %v2349_v22, %v9812_v26  ;;  %v2388_v23 = vmul.f32 %v2387_v46, %v9818_v41  ;;  %v2427_v8 = vadd.f32 0.014752088, %v2426_v17  ;;  %v2785_v22 = vld [vmem:[%s15345_s12 + $0x330] sm:$0xff] }
 0x4f1   : > { %v10568_v45 = vor.u32 1.1754944e-38, %v2325_v35  ;;  %v2537_v36 = vmul.f32 %v2536_v60, %v10407_v58  ;;  %v2575_v47 = vmul.f32 %v2574_v56, %v10508_v13  ;;  %v2464_v3 = vmul.f32 3.8918573e-05, %v9941_v54  ;;  %2962 = vmatpush.msra.mxu2 %v2785_v22 }
 0x4f2   : > { %v2656_v49 = vadd.f32 1.0, %v7128_v40  ;;  %v2351_v31 = vadd.f32 0.4994258, %v2350_v10  ;;  %v2389_v5 = vadd.f32 0.112945676, %v2388_v23  ;;  %v2428_v53 = vmul.f32 %v2427_v8, %v9882_v30  ;;  %v2766_v40 = vld [vmem:[%s15345_s12 + $0x298] sm:$0xff] }
 0x4f3   : > { %v10574_v7 = vmul.f32 %v2287_v28, %v2263_v16  ;;  %v2317_v63 = vmul.f32 %v10522_v51, %v2316_v59  ;;  %v2502_v0 = vadd.f32 1.1283791, %v2501_v11  ;;  %v2465_v1 = vadd.f32 0.001143296, %v2464_v3  ;;  %2942 = vmatpush.msrb.mxu1 %v2766_v40  ;;  %v2749_v11 = vld [vmem:[%s15345_s12 + $0x210] sm:$0xff]  ;;  %v2800_v10 = vld [vmem:[%s15345_s12 + $0x3a8] sm:$0xff] }
 0x4f4   : > { %v10577_v52 = vmin.f32 %v2611_v33, 16.0  ;;  %v2352_v42 = vmul.f32 %v2351_v31, %v9812_v26  ;;  %v2390_v6 = vmul.f32 %v2389_v5, %v9818_v41  ;;  %v2429_v20 = vadd.f32 0.112945676, %v2428_v53  ;;  %v2750_v26 = vld [vmem:[%s15345_s12 + $0x218] sm:$0xff]  ;;  %v2784_v33 = vld [vmem:[%s15345_s12 + $0x328] sm:$0xff]  ;;  %v2799_v31 = vld [vmem:[%s15345_s12 + $0x3a0] sm:$0xff] }
 0x4f5   : > { %v2538_v14 = vadd.f32 0.05243302, %v2537_v36  ;;  %v2576_v38 = vadd.f32 0.0036580483, %v2575_v47  ;;  %v2466_v50 = vmul.f32 %v2465_v1, %v9941_v54  ;;  %v2504_v35 = vmul.f32 3.8918573e-05, %v10188_v4  ;;  %2919 = vmatpush.msra.mxu0 %v2750_v26  ;;  %2963 = vmatpush.msra.mxu2 %v2784_v33 }
 0x4f6   : > { %vm2319_vm5 = vweird.f32 %v10431_v61  ;;  %vm10584_vm6 = vcmp.eq.f32.partialorder %v2323_v19, 8.507059e+37  ;;  %v10588_v60 = vadd.f32 1.0, %v2352_v42  ;;  %v2391_v56 = vadd.f32 0.4994258, %v2390_v6  ;;  %v2801_v19 = vld [vmem:[%s15345_s12 + $0x3b0] sm:$0xff]  ;;  %v2748_v23 = vld [vmem:[%s15345_s12 + $0x208] sm:$0xff] }
 0x4f7   : > { %v2430_v46 = vmul.f32 %v2429_v20, %v9882_v30  ;;  %v10601_v17 = vmul.f32 %v2655_v48, %v10225_v44  ;;  %v10604_v28 = vmul.f32 %v2656_v49, %v10306_v37  ;;  %v10607_v59 = vmul.f32 0.5, %v9736_v9  ;;  %v2765_v44 = vld [vmem:[%s15345_s12 + $0x290] sm:$0xff]  ;;  %2985 = vmatpush.msrb.mxu3 %v2801_v19  ;;  %2920 = vmatpush.msra.mxu0 %v2749_v11  ;;  %v2764_v3 = vld [vmem:[%s15345_s12 + $0x288] sm:$0xff]  ;;  %v2783_v49 = vld [vmem:[%s15345_s12 + $0x320] sm:$0xff] }
 0x4f8   : > { %v2467_v48 = vadd.f32 0.014752088, %v2466_v50  ;;  %v2318_v37 = vadd.f32 %v10522_v51, %v2317_v63  ;;  %vm2320_vm7 = vweird.f32 %v10522_v51  ;;  %v2613_v9 = vmul.f32 2.1237322e-06, %v10577_v52  ;;  %2943 = vmatpush.msrb.mxu1 %v2765_v44  ;;  %2964 = vmatpush.msra.mxu2 %v2783_v49  ;;  %v2747_v16 = vld [vmem:[%s15345_s12 + $0x200] sm:$0xff]  ;;  %v2781_v49 = vld [vmem:[%s15345_s12 + $0x310] sm:$0xff] }
 0x4f9   : > { %7974 = vrcp.f32 %v10588_v60  ;;  %v7129_v8 = vclamps-f32 %v10574_v7, 1.0  ;;  %v10633_v36 = vmul.f32 %v2502_v0, %v10107_v25  ;;  %v2392_v47 = vmul.f32 %v2391_v56, %v9818_v41  ;;  %2986 = vmatpush.msrb.mxu3 %v2800_v10  ;;  %vm10656_vm8 = vmor %vm2319_vm5, %vm2320_vm7  ;;  %2921 = vmatpush.msra.mxu0 %v2748_v23  ;;  %v2782_v10 = vld [vmem:[%s15345_s12 + $0x318] sm:$0xff] }
 0x4fa   : > { %v2468_v5 = vmul.f32 %v2467_v48, %v9941_v54  ;;  %v10647_v25 = vmul.f32 %v2538_v14, %v10407_v58  ;;  %v10650_v41 = vmul.f32 0.5, %v9745_v29  ;;  %v2431_v53 = vadd.f32 0.4994258, %v2430_v46  ;;  %2944 = vmatpush.msrb.mxu1 %v2764_v3  ;;  %v2798_v23 = vld [vmem:[%s15345_s12 + $0x398] sm:$0xff]  ;;  %2965 = vmatpush.msra.mxu2 %v2782_v10 }
 0x4fb   : > { %v2505_v7 = vadd.f32 0.001143296, %v2504_v35  ;;  %v2577_v0 = vmul.f32 %v2576_v38, %v10508_v13  ;;  %v10661_v1 = vadd.f32 1.0, %v2392_v47  ;;  %v10664_v29 = vmul.f32 0.5, %v9822_v55  ;;  %2987 = vmatpush.msrb.mxu3 %v2799_v31  ;;  %2922 = vmatpush.msra.mxu0 %v2747_v16  ;;  %v2797_v31 = vld [vmem:[%s15345_s12 + $0x390] sm:$0xff] }
 0x4fc   : > { %v2469_v42 = vadd.f32 0.112945676, %v2468_v5  ;;  %v2322_v6 = vsel %vm10656_vm8, %v10522_v51, %v2318_v37  ;;  %v2614_v20 = vadd.f32 0.00028619796, %v2613_v9  ;;  %v2432_v61 = vmul.f32 %v2431_v53, %v9882_v30  ;;  %2966 = vmatpush.msra.mxu2 %v2781_v49 }
 0x4fd   : > { %v2506_v14 = vmul.f32 %v2505_v7, %v10188_v4  ;;  %v10671_v38 = vadd.f32 1.0, %v7129_v8  ;;  %v2363_v50 = vand.u32 2147483647, %v10588_v60  ;;  %v2365_v35 = vand.u32 2147483648, %v10588_v60  ;;  %2988 = vmatpush.msrb.mxu3 %v2798_v23 }
 0x4fe   : > { %7976 = vrcp.f32 %v10661_v1  ;;  %v10678_v56 = vadd.f32 1.0, %v2432_v61  ;;  %v2470_v51 = vmul.f32 %v2469_v42, %v9941_v54  ;;  %v2544_v40 = vmul.f32 3.8918573e-05, %v10407_v58  ;;  %v2796_v42 = vld [vmem:[%s15345_s12 + $0x388] sm:$0xff] }
 0x4ff   : > { %v10676_v55 = vpop.eup %7974  ;;  %v2507_v26 = vadd.f32 0.014752088, %v2506_v14  ;;  %v10685_v30 = vsel %vm10584_vm6, %v10568_v45, %v2322_v6  ;;  %v10687_v22 = vadd.f32 0.05243302, %v2577_v0  ;;  %v2584_v19 = vmul.f32 3.8918573e-05, %v10508_v13  ;;  %2989 = vmatpush.msrb.mxu3 %v2797_v31 }
 0x500   : > { %v2355_v46 = vmul.f32 %v10676_v55, %v10588_v60  ;;  %v10693_v11 = vmul.f32 %v2614_v20, %v10577_v52  ;;  %v2403_v44 = vand.u32 2147483647, %v10661_v1  ;;  %7978 = vrcp.f32 %v10678_v56  ;;  %v2763_v45 = vld [vmem:[%s15345_s12 + $0x280] sm:$0xff]  ;;  %v2780_v0 = vld [vmem:[%s15345_s12 + $0x308] sm:$0xff] }
 0x501   : > { %v2624_v48 = vmul.f32 3.8918573e-05, %v10577_v52  ;;  %vm10704_vm9 = vcmp.eq.f32.partialorder %v2363_v50, 8.507059e+37  ;;  %v2471_v33 = vadd.f32 0.4994258, %v2470_v51  ;;  %2945 = vmatpush.msrb.mxu1 %v2763_v45  ;;  %v2508_v8 = vmul.f32 %v2507_v26, %v10188_v4  ;;  %v2779_v51 = vld [vmem:[%s15345_s12 + $0x300] sm:$0xff]  ;;  %2967 = vmatpush.msra.mxu2 %v2780_v0 }
 0x502   : > { %v2356_v37 = vsub.f32 1.0, %v2355_v46  ;;  %vm2359_vm10 = vweird.f32 %v10588_v60  ;;  %v2366_v47 = vor.u32 1.1754944e-38, %v2365_v35  ;;  %v2405_v3 = vand.u32 2147483648, %v10661_v1  ;;  %v2795_v26 = vld [vmem:[%s15345_s12 + $0x380] sm:$0xff]  ;;  %2990 = vmatpush.msrb.mxu3 %v2796_v42 }
 0x503   : > { %v2545_v5 = vadd.f32 0.001143296, %v2544_v40  ;;  %vm2360_vm11 = vweird.f32 %v10676_v55  ;;  %v2472_v63 = vmul.f32 %v2471_v33, %v9941_v54  ;;  %v2509_v6 = vadd.f32 0.112945676, %v2508_v8  ;;  %2968 = vmatpush.msra.mxu2 %v2779_v51 }
 0x504   : > { %v7977_v53 = vpop.eup %7976  ;;  %v2357_v7 = vmul.f32 %v10676_v55, %v2356_v37  ;;  %vm2399_vm12 = vweird.f32 %v10661_v1  ;;  %v2585_v14 = vadd.f32 0.001143296, %v2584_v19  ;;  %vm10736_vm13 = vcmp.eq.f32.partialorder %v2403_v44, 8.507059e+37  ;;  %vm2361_vm14 = vmor %vm2359_vm10, %vm2360_vm11  ;;  %2991 = vmatpush.msrb.mxu3 %v2795_v26 }
 0x505   : > { %v2395_v20 = vmul.f32 %v7977_v53, %v10661_v1  ;;  %v2546_v61 = vmul.f32 %v2545_v5, %v10407_v58  ;;  %v10740_v35 = vadd.f32 1.0, %v2472_v63  ;;  %v2510_v40 = vmul.f32 %v2509_v6, %v10188_v4 }
 0x506   : > { %v2358_v54 = vadd.f32 %v10676_v55, %v2357_v7  ;;  %v7979_v46 = vpop.eup %7978  ;;  %v2406_v44 = vor.u32 1.1754944e-38, %v2405_v3  ;;  %v2586_v45 = vmul.f32 %v2585_v14, %v10508_v13  ;;  %vm2439_vm15 = vweird.f32 %v10678_v56 }
 0x507   : > { %v2396_v19 = vsub.f32 1.0, %v2395_v20  ;;  %v2547_v16 = vadd.f32 0.014752088, %v2546_v61  ;;  %v2435_v33 = vmul.f32 %v7979_v46, %v10678_v56  ;;  %7980 = vrcp.f32 %v10740_v35 }
 0x508   : > { %v2362_v37 = vsel %vm2361_vm14, %v10676_v55, %v2358_v54  ;;  %vm2400_vm1 = vweird.f32 %v7977_v53  ;;  %v2445_v23 = vand.u32 2147483648, %v10678_v56  ;;  %v2443_v55 = vand.u32 2147483647, %v10678_v56 }
 0x509   : > { %v2367_v10 = vsel %vm10704_vm9, %v2366_v47, %v2362_v37  ;;  %v2397_v60 = vmul.f32 %v7977_v53, %v2396_v19  ;;  %v2436_v3 = vsub.f32 1.0, %v2435_v33  ;;  %v2511_v49 = vadd.f32 0.4994258, %v2510_v40  ;;  %vm2401_vm2 = vmor %vm2399_vm12, %vm2400_vm1 }
 0x50a   : > { %v2368_v8 = vmul.f32 %v2367_v10, %v10282_v34  ;;  %v2548_v5 = vmul.f32 %v2547_v16, %v10407_v58  ;;  %v2587_v7 = vadd.f32 0.014752088, %v2586_v45  ;;  %v2625_v63 = vadd.f32 0.001143296, %v2624_v48 }
 0x50b   : > { %v2398_v31 = vadd.f32 %v7977_v53, %v2397_v60  ;;  %v2437_v9 = vmul.f32 %v7979_v46, %v2436_v3  ;;  %vm2440_vm3 = vweird.f32 %v7979_v46  ;;  %v2512_v47 = vmul.f32 %v2511_v49, %v10188_v4 }
 0x50c   : > { %v7131_v0 = vclamps-f32 %v2368_v8, 1.0  ;;  %v2446_v6 = vor.u32 1.1754944e-38, %v2445_v23  ;;  %v2549_v34 = vadd.f32 0.112945676, %v2548_v5  ;;  %v2588_v20 = vmul.f32 %v2587_v7, %v10508_v13  ;;  %vm2441_vm4 = vmor %vm2439_vm15, %vm2440_vm3 }
 0x50d   : > { %v2402_v42 = vsel %vm2401_vm2, %v7977_v53, %v2398_v31  ;;  %v7981_v61 = vpop.eup %7980  ;;  %v2438_v51 = vadd.f32 %v7979_v46, %v2437_v9  ;;  %v10770_v48 = vadd.f32 1.0, %v2512_v47  ;;  %v2626_v26 = vmul.f32 %v2625_v63, %v10577_v52 }
 0x50e   : > { %v2659_v14 = vadd.f32 1.0, %v7131_v0  ;;  %v2407_v54 = vsel %vm10736_vm13, %v2406_v44, %v2402_v42  ;;  %v2475_v4 = vmul.f32 %v7981_v61, %v10740_v35  ;;  %v2550_v53 = vmul.f32 %v2549_v34, %v10407_v58 }
 0x50f   : > { %v2408_v1 = vmul.f32 %v2407_v54, %v10327_v21  ;;  %v2442_v19 = vsel %vm2441_vm4, %v7979_v46, %v2438_v51  ;;  %vm2444_vm5 = vcmp.eq.f32.partialorder %v2443_v55, 8.507059e+37  ;;  %7982 = vrcp.f32 %v10770_v48 }
 0x510   : > { %v2675_v40 = vmul.f32 %v2659_v14, %v10607_v59  ;;  %v2447_v44 = vsel %vm2444_vm5, %v2446_v6, %v2442_v19  ;;  %v2476_v16 = vsub.f32 1.0, %v2475_v4  ;;  %v2483_v21 = vand.u32 2147483647, %v10740_v35 }
 0x511   : > { %v7132_v50 = vclamps-f32 %v2408_v1, 1.0  ;;  %v2448_v56 = vmul.f32 %v2447_v44, %v10357_v62  ;;  %v2485_v45 = vand.u32 2147483648, %v10740_v35  ;;  %v2551_v37 = vadd.f32 0.4994258, %v2550_v53 }
 0x512   : > { %2834 = vmatmul.f32.gmra.mxu0 %v2675_v40  ;;  %v2589_v33 = vadd.f32 0.112945676, %v2588_v20  ;;  %v2477_v60 = vmul.f32 %v7981_v61, %v2476_v16  ;;  %vm2480_vm6 = vweird.f32 %v7981_v61  ;;  %v2627_v59 = vadd.f32 0.014752088, %v2626_v26 }
 0x513   : > { %v2660_v10 = vadd.f32 1.0, %v7132_v50  ;;  %v2616_v46 = vadd.f32 0.0036580483, %v10693_v11  ;;  %v7133_v23 = vclamps-f32 %v2448_v56, 1.0  ;;  %v2552_v8 = vmul.f32 %v2551_v37, %v10407_v58 }
 0x514   : > { %v2590_v3 = vmul.f32 %v2589_v33, %v10508_v13  ;;  %v2478_v49 = vadd.f32 %v7981_v61, %v2477_v60  ;;  %vm2479_vm7 = vweird.f32 %v10740_v35  ;;  %v2628_v62 = vmul.f32 %v2627_v59, %v10577_v52 }
 0x515   : > { %v2676_v55 = vmul.f32 %v2660_v10, %v10650_v41  ;;  %v7983_v31 = vpop.eup %7982  ;;  %v2661_v5 = vadd.f32 1.0, %v7133_v23  ;;  %vm2481_vm8 = vmor %vm2479_vm7, %vm2480_vm6  ;;  %v2486_v7 = vor.u32 1.1754944e-38, %v2485_v45  ;;  %v10789_v63 = vadd.f32 1.0, %v2552_v8 }
 0x516   : > { %v2591_v0 = vadd.f32 0.4994258, %v2590_v3  ;;  %v2482_v11 = vsel %vm2481_vm8, %v7981_v61, %v2478_v49  ;;  %vm2484_vm9 = vcmp.eq.f32.partialorder %v2483_v21, 8.507059e+37  ;;  %v2515_v9 = vmul.f32 %v7983_v31, %v10770_v48 }
 0x517   : > { %2857 = vmatmul.f32.gmra.mxu1 %v2676_v55  ;;  %v2629_v47 = vadd.f32 0.112945676, %v2628_v62  ;;  %v2328_v41 = vmul.f32 %v10685_v30, %v10549_v39  ;;  %v2677_v35 = vmul.f32 %v2661_v5, %v10664_v29  ;;  %v2487_v42 = vsel %vm2484_vm9, %v2486_v7, %v2482_v11 }
 0x518   : > { %7984 = vrcp.f32 %v10789_v63  ;;  %v2673_v6 = vmul.f32 %v10671_v38, %v10330_v24  ;;  %v2540_v34 = vadd.f32 0.18741608, %v10647_v25  ;;  %v2488_v20 = vmul.f32 %v2487_v42, %v10419_v15 }
 0x519   : > { %v2516_v61 = vsub.f32 1.0, %v2515_v9  ;;  %v2617_v14 = vmul.f32 %v2616_v46, %v10577_v52  ;;  %2880 = vmatmul.f32.gmra.mxu2 %v2677_v35  ;;  %v2525_v39 = vand.u32 2147483648, %v10770_v48  ;;  %v2592_v29 = vmul.f32 %v2591_v0, %v10508_v13 }
 0x51a   : > { %2923 = vmatmul.f32.vlgmr.msra.gmra.mxu0 %v10601_v17  ;;  %v2630_v30 = vmul.f32 %v2629_v47, %v10577_v52  ;;  %v7134_v54 = vclamps-f32 %v2488_v20, 1.0  ;;  %vm2520_vm10 = vweird.f32 %v7983_v31  ;;  %v2523_v24 = vand.u32 2147483647, %v10770_v48 }
 0x51b   : > { %v2517_v51 = vmul.f32 %v7983_v31, %v2516_v61  ;;  %v7130_v25 = vclamps-f32 %v2328_v41, 1.0  ;;  %v2579_v15 = vmul.f32 %v10687_v22, %v10508_v13  ;;  %v10808_v38 = vadd.f32 1.0, %v2592_v29  ;;  %v15410_v29 = vld [vmem:[#allocation6_spill] sm:$0xff] }
 0x51c   : > { %v2631_v1 = vadd.f32 0.4994258, %v2630_v30  ;;  %v1990_v17 = vmul.f32 0.5, %v9871_v12  ;;  %v2662_v4 = vadd.f32 1.0, %v7134_v54  ;;  %vm2519_vm11 = vweird.f32 %v10770_v48 }
 0x51d   : > { %v2518_v53 = vadd.f32 %v7983_v31, %v2517_v51  ;;  %v2541_v40 = vmul.f32 %v2540_v34, %v10407_v58  ;;  %v2618_v19 = vadd.f32 0.05243302, %v2617_v14  ;;  %vm2521_vm12 = vmor %vm2519_vm11, %vm2520_vm10  ;;  %v2526_v50 = vor.u32 1.1754944e-38, %v2525_v39 }
 0x51e   : > { %v7985_v26 = vpop.eup %7984  ;;  %7986 = vrcp.f32 %v10808_v38  ;;  %v2678_v44 = vmul.f32 %v2662_v4, %v1990_v17  ;;  %vm2524_vm13 = vcmp.eq.f32.partialorder %v2523_v24, 8.507059e+37  ;;  %v2658_v12 = vadd.f32 1.0, %v7130_v25 }
 0x51f   : > { %2946 = vmatmul.f32.vlgmr.msrb.gmra.mxu1 %v10604_v28  ;;  %v2522_v22 = vsel %vm2521_vm12, %v7983_v31, %v2518_v53  ;;  %v2555_v16 = vmul.f32 %v7985_v26, %v10789_v63  ;;  %v2580_v21 = vadd.f32 0.18741608, %v2579_v15  ;;  %v2632_v48 = vmul.f32 %v2631_v1, %v10577_v52  ;;  %v15409_v31 = vld [vmem:[#allocation7_spill] sm:$0xff] }
 0x520   : > { %v2527_v56 = vsel %vm2524_vm13, %v2526_v50, %v2522_v22  ;;  %v1986_v45 = vmul.f32 0.5, %v10045_v57  ;;  %2903 = vmatmul.f32.gmra.mxu3 %v2678_v44  ;;  %v2542_v33 = vadd.f32 1.1283791, %v2541_v40  ;;  %v2619_v10 = vmul.f32 %v2618_v19, %v10577_v52 }
 0x521   : > { %v2528_v58 = vmul.f32 %v2527_v56, %v10633_v36  ;;  %v2556_v37 = vsub.f32 1.0, %v2555_v16  ;;  %2969 = vmatmul.f32.vlgmr.msra.gmra.mxu2 %v2673_v6  ;;  %v2565_v28 = vand.u32 2147483648, %v10789_v63  ;;  %v10821_v60 = vadd.f32 1.0, %v2632_v48 }
 0x522   : > { %vm2560_vm14 = vweird.f32 %v7985_v26  ;;  %v2563_v23 = vand.u32 2147483647, %v10789_v63  ;;  %v2674_v3 = vmul.f32 %v2658_v12, %v1986_v45  ;;  %v2581_v57 = vmul.f32 %v2580_v21, %v10508_v13 }
 0x523   : > { %v7135_v59 = vclamps-f32 %v2528_v58, 1.0  ;;  %v2557_v46 = vmul.f32 %v7985_v26, %v2556_v37  ;;  %v1991_v36 = vmul.f32 0.5, %v10080_v27  ;;  %7988 = vrcp.f32 %v10821_v60  ;;  %v7174_v37 = vld [vmem:[%s15340_s7 + $0x168] sm:$0xff] }
 0x524   : > { %v7987_v8 = vpop.eup %7986  ;;  %vm2559_vm15 = vweird.f32 %v10789_v63  ;;  %v2543_v5 = vmul.f32 %v2542_v33, %v15409_v31  ;;  %v2620_v7 = vadd.f32 0.18741608, %v2619_v10  ;;  %v2566_v0 = vor.u32 1.1754944e-38, %v2565_v28  ;;  %v7172_v33 = vld [vmem:[%s15340_s7 + $0x158] sm:$0xff]  ;;  %v7171_v10 = vld [vmem:[%s15340_s7 + $0x150] sm:$0xff]  ;;  %v7170_v28 = vld [vmem:[%s15340_s7 + $0x148] sm:$0xff] }
 0x525   : > { %v2663_v55 = vadd.f32 1.0, %v7135_v59  ;;  %v2558_v49 = vadd.f32 %v7985_v26, %v2557_v46  ;;  %v2595_v62 = vmul.f32 %v7987_v8, %v10808_v38  ;;  %vm2561_vm1 = vmor %vm2559_vm15, %vm2560_vm14  ;;  %vm2564_vm2 = vcmp.eq.f32.partialorder %v2563_v23, 8.507059e+37  ;;  %v7168_v59 = vld [vmem:[%s15340_s7 + $0x138] sm:$0xff]  ;;  %v7167_v46 = vld [vmem:[%s15340_s7 + $0x130] sm:$0xff] }
 0x526   : > { %v2582_v13 = vadd.f32 1.1283791, %v2581_v57  ;;  %v2605_v27 = vand.u32 2147483648, %v10808_v38  ;;  %vm2600_vm3 = vweird.f32 %v7987_v8  ;;  %v2603_v63 = vand.u32 2147483647, %v10808_v38 }
 0x527   : > { %v2679_v11 = vmul.f32 %v2663_v55, %v1991_v36  ;;  %v2562_v9 = vsel %vm2561_vm1, %v7985_v26, %v2558_v49  ;;  %v2596_v47 = vsub.f32 1.0, %v2595_v62  ;;  %v2621_v34 = vmul.f32 %v2620_v7, %v10577_v52  ;;  %v7165_v36 = vld [vmem:[%s15340_s7 + $0x120] sm:$0xff]  ;;  %v7164_v49 = vld [vmem:[%s15340_s7 + $0x118] sm:$0xff]  ;;  %v7162_v7 = vld [vmem:[%s15340_s7 + $0x108] sm:$0xff] }
 0x528   : > { %v2567_v41 = vsel %vm2564_vm2, %v2566_v0, %v2562_v9  ;;  %2992 = vmatmul.f32.vlgmr.msrb.gmra.mxu3 %v2674_v3  ;;  %vm2599_vm4 = vweird.f32 %v10808_v38  ;;  %v2583_v39 = vmul.f32 %v2582_v13, %v10410_v2  ;;  %v1992_v30 = vmul.f32 0.5, %v15410_v29  ;;  %v7944_v31 = vld [vmem:[%s15346_s13] ss:$0 sm:$0xff] }
 0x529   : > { %2926 = vmatmul.f32.gmra.mxu0 %v2679_v11  ;;  %v2568_v35 = vmul.f32 %v2567_v41, %v2543_v5  ;;  %v2597_v42 = vmul.f32 %v7987_v8, %v2596_v47  ;;  %v7989_v6 = vpop.eup %7988  ;;  %vm2601_vm5 = vmor %vm2599_vm4, %vm2600_vm3  ;;  %v2606_v54 = vor.u32 1.1754944e-38, %v2605_v27  ;;  %vm2604_vm6 = vcmp.eq.f32.partialorder %v2603_v63, 8.507059e+37  ;;  %v7163_v5 = vld [vmem:[%s15340_s7 + $0x110] sm:$0xff]  ;;  %v7161_v0 = vld [vmem:[%s15340_s7 + $0x100] sm:$0xff] }
 0x52a   : > { %v2635_v14 = vmul.f32 %v7989_v6, %v10821_v60  ;;  %v2622_v15 = vadd.f32 1.1283791, %v2621_v34  ;;  %v2643_v52 = vand.u32 2147483647, %v10821_v60  ;;  %v2645_v17 = vand.u32 2147483648, %v10821_v60 }
 0x52b   : > { %v7136_v20 = vclamps-f32 %v2568_v35, 1.0  ;;  %v2598_v61 = vadd.f32 %v7987_v8, %v2597_v42  ;;  %vm2640_vm7 = vweird.f32 %v7989_v6  ;;  %vm2639_vm8 = vweird.f32 %v10821_v60  ;;  %v7169_v60 = vld [vmem:[%s15340_s7 + $0x140] sm:$0xff] }
 0x52c   : > { %v2636_v25 = vsub.f32 1.0, %v2635_v14  ;;  %v1993_v40 = vmul.f32 0.5, %v10363_v32  ;;  %vm2641_vm9 = vmor %vm2639_vm8, %vm2640_vm7  ;;  %v2646_v19 = vor.u32 1.1754944e-38, %v2645_v17  ;;  %v2623_v50 = vmul.f32 %v2622_v15, %v10554_v43  ;;  %v7176_v32 = vld [vmem:[%s15340_s7 + $0x178] sm:$0xff]  ;;  %v7175_v43 = vld [vmem:[%s15340_s7 + $0x170] sm:$0xff] }
 0x52d   : > { %v2664_v51 = vadd.f32 1.0, %v7136_v20  ;;  %v2602_v24 = vsel %vm2601_vm5, %v7987_v8, %v2598_v61  ;;  %vm2644_vm10 = vcmp.eq.f32.partialorder %v2643_v52, 8.507059e+37  ;;  %v1994_v48 = vmul.f32 0.5, %v10530_v18  ;;  %3172 = vmatpush.msra.mxu3 %v7176_v32  ;;  %v7173_v18 = vld [vmem:[%s15340_s7 + $0x160] sm:$0xff]  ;;  %v7166_v8 = vld [vmem:[%s15340_s7 + $0x128] sm:$0xff]  ;;  %v3044_v32 = vld [vmem:[%s15340_s7 + $0x70] sm:$0xff] }
 0x52e   : > { %v2607_v1 = vsel %vm2604_vm6, %v2606_v54, %v2602_v24  ;;  %v2637_v53 = vmul.f32 %v7989_v6, %v2636_v25  ;;  %v7943_v52 = vld [vmem:[%s15339_s6] ss:$0 sm:$0xff] }
 0x52f   : > { %v2680_v4 = vmul.f32 %v2664_v51, %v1992_v30  ;;  %v2608_v38 = vmul.f32 %v2607_v1, %v2583_v39  ;;  %3173 = vmatpush.msra.mxu3 %v7175_v43  ;;  %v8066_v43 = vld [vmem:[%s15336_s3] sm:$0xff] }
 0x530   : > { %v2638_v26 = vadd.f32 %v7989_v6, %v2637_v53 }
 0x531   : > { %2949 = vmatmul.f32.gmra.mxu1 %v2680_v4  ;;  %v7137_v2 = vclamps-f32 %v2608_v38, 1.0  ;;  %3174 = vmatpush.msra.mxu3 %v7174_v37  ;;  %v15411_v4 = vld [vmem:[#allocation4_spill] sm:$0xff]  ;;  %v8067_v37 = vld [vmem:[%s15336_s3 + $0x20] sm:$0xff] }
 0x532   : > { %v2642_v22 = vsel %vm2641_vm9, %v7989_v6, %v2638_v26  ;;  %v1540_v38 = vadd.f32 %v7943_v52, %v15411_v4  ;;  %v7186_v4 = vld [vmem:[%s15340_s7 + $0x1b8] sm:$0xff] }
 0x533   : > { %v2665_v44 = vadd.f32 1.0, %v7137_v2  ;;  %v2647_v16 = vsel %vm2644_vm10, %v2646_v19, %v2642_v22  ;;  %3175 = vmatpush.msra.mxu3 %v7173_v18  ;;  %v7945_v2 = vld [vmem:[%s15347_s14] ss:$0 sm:$0xff]  ;;  %v3043_v18 = vld [vmem:[%s15340_s7 + $0x68] sm:$0xff] }
 0x534   : > { %v2648_v21 = vmul.f32 %v2647_v16, %v2623_v50 }
 0x535   : > { %v2681_v12 = vmul.f32 %v2665_v44, %v1993_v40  ;;  %3176 = vmatpush.msra.mxu3 %v7172_v33  ;;  %v15412_v40 = vld [vmem:[#allocation2_spill] sm:$0xff]  ;;  %v15413_v44 = vld [vmem:[#allocation5_spill] sm:$0xff]  ;;  %v8068_v33 = vld [vmem:[%s15336_s3 + $0x10] sm:$0xff] }
 0x536   : > { %v7138_v56 = vclamps-f32 %v2648_v21, 1.0  ;;  %v1537_v19 = vadd.f32 %v7943_v52, %v15412_v40  ;;  %v1563_v22 = vadd.f32 %v15413_v44, %v1540_v38  ;;  %v15414_v21 = vld [vmem:[#allocation3_spill] sm:$0xff]  ;;  %v7185_v38 = vld [vmem:[%s15340_s7 + $0x1b0] sm:$0xff] }
 0x537   : > { %2972 = vmatmul.f32.gmra.mxu2 %v2681_v12  ;;  %3177 = vmatpush.msra.mxu3 %v7171_v10  ;;  %v7158_v10 = vld [vmem:[%s15340_s7 + $0xf8] sm:$0xff]  ;;  %v7188_v52 = vld [vmem:[%s15340_s7 + $0x1c8] sm:$0xff]  ;;  %v7181_v40 = vld [vmem:[%s15340_s7 + $0x190] sm:$0xff] }
 0x538   : > { %v2666_v45 = vadd.f32 1.0, %v7138_v56  ;;  %v1560_v56 = vadd.f32 %v15414_v21, %v1537_v19  ;;  %v7180_v19 = vld [vmem:[%s15340_s7 + $0x188] sm:$0xff] }
 0x539   : > { %3178 = vmatpush.msra.mxu3 %v7170_v28  ;;  %v7157_v28 = vld [vmem:[%s15340_s7 + $0xf0] sm:$0xff] }
 0x53a   : > { %v2682_v58 = vmul.f32 %v2666_v45, %v1994_v48 }
 0x53b   : > { %3179 = vmatpush.msra.mxu3 %v7169_v60  ;;  %v3042_v60 = vld [vmem:[%s15340_s7 + $0x60] sm:$0xff] }
 0x53c   : > { %2995 = vmatmul.f32.gmra.mxu3 %v2682_v58  ;;  %v3045_v58 = vld [vmem:[%s15340_s7 + $0x78] sm:$0xff] }
 0x53d   : > { %3180 = vmatpush.msra.mxu3 %v7168_v59  ;;  %v7156_v59 = vld [vmem:[%s15340_s7 + $0xe8] sm:$0xff] }
 0x53f   : > { %3181 = vmatpush.msra.mxu3 %v7167_v46  ;;  %v3041_v46 = vld [vmem:[%s15340_s7 + $0x58] sm:$0xff] }
 0x541   : > { %3182 = vmatpush.msra.mxu3 %v7166_v8  ;;  %v7155_v8 = vld [vmem:[%s15340_s7 + $0xe0] sm:$0xff] }
 0x543   : > { %3183 = vmatpush.msra.mxu3 %v7165_v36  ;;  %v3039_v36 = vld [vmem:[%s15340_s7 + $0x48] sm:$0xff] }
 0x545   : > { %3184 = vmatpush.msra.mxu3 %v7164_v49  ;;  %v7154_v49 = vld [vmem:[%s15340_s7 + $0xd8] sm:$0xff] }
 0x547   : > { %3185 = vmatpush.msra.mxu3 %v7163_v5  ;;  %v3037_v5 = vld [vmem:[%s15340_s7 + $0x38] sm:$0xff] }
 0x549   : > { %3186 = vmatpush.msra.mxu3 %v7162_v7  ;;  %v7152_v7 = vld [vmem:[%s15340_s7 + $0xc8] sm:$0xff] }
 0x54b   : > { %3187 = vmatpush.msra.mxu3 %v7161_v0  ;;  %v3036_v0 = vld [vmem:[%s15340_s7 + $0x30] sm:$0xff] }
 0x54e   : > { %v2855_v3 = vpop.f32.mrf.mxu1 }
 0x550   : > { %v2832_v23 = vpop.f32.mrf.mxu0 }
 0x551   : > { %v2833_v47 = vadd.f32 %v7944_v31, %v2832_v23  ;;  %v3040_v23 = vld [vmem:[%s15340_s7 + $0x50] sm:$0xff] }
 0x553   : > { %v2856_v27 = vadd.f32 %v2855_v3, %v2833_v47  ;;  %v8069_v3 = vld [vmem:[%s15336_s3 + $0x8] sm:$0xff] }
 0x554   : > { %v3035_v47 = vld [vmem:[%s15340_s7 + $0x28] sm:$0xff] }
 0x567   : > { %v2878_v57 = vpop.f32.mrf.mxu2 }
 0x568   : > { %v2901_v62 = vpop.f32.mrf.mxu3  ;;  %v2879_v63 = vadd.f32 %v2878_v57, %v2856_v27  ;;  %v8070_v57 = vld [vmem:[%s15336_s3 + $0x28] sm:$0xff]  ;;  %v7149_v27 = vld [vmem:[%s15340_s7 + $0xb0] sm:$0xff] }
 0x56a   : > { %v2902_v61 = vadd.f32 %v2901_v62, %v2879_v63  ;;  %v3038_v62 = vld [vmem:[%s15340_s7 + $0x40] sm:$0xff]  ;;  %v3032_v63 = vld [vmem:[%s15340_s7 + $0x10] sm:$0xff] }
 0x58f   : > { %v2835_v55 = vpop.f32.mrf.mxu0 }
 0x590   : > { %v2836_v13 = vadd.f32 %v7944_v31, %v2835_v55  ;;  %v8071_v55 = vld [vmem:[%s15336_s3 + $0x18] sm:$0xff]  ;;  %v7153_v31 = vld [vmem:[%s15340_s7 + $0xd0] sm:$0xff] }
 0x594   : > { %v2858_v11 = vpop.f32.mrf.mxu1 }
 0x595   : > { %v2859_v42 = vadd.f32 %v2858_v11, %v2836_v13  ;;  %v7151_v11 = vld [vmem:[%s15340_s7 + $0xc0] sm:$0xff]  ;;  %v7150_v13 = vld [vmem:[%s15340_s7 + $0xb8] sm:$0xff] }
 0x597   : > { %v2924_v41 = vpop.f32.mrf.mxu0 }
 0x598   : > { %v2925_v29 = vadd.f32 %v2924_v41, %v2902_v61  ;;  %v3034_v41 = vld [vmem:[%s15340_s7 + $0x20] sm:$0xff]  ;;  %v7146_v61 = vld [vmem:[%s15340_s7 + $0x98] sm:$0xff] }
 0x59c   : > { %v2881_v9 = vpop.f32.mrf.mxu2  ;;  %v2947_v34 = vpop.f32.mrf.mxu1 }
 0x59d   : > { %v2882_v6 = vadd.f32 %v2881_v9, %v2859_v42  ;;  %v2948_v51 = vadd.f32 %v2947_v34, %v2925_v29  ;;  %v8072_v9 = vld [vmem:[%s15336_s3 + $0x30] sm:$0xff]  ;;  %v7148_v42 = vld [vmem:[%s15340_s7 + $0xa8] sm:$0xff]  ;;  %v8073_v34 = vld [vmem:[%s15336_s3 + $0x38] sm:$0xff] }
 0x59e   : > { %v7144_v29 = vld [vmem:[%s15340_s7 + $0x88] sm:$0xff] }
 0x5a3   : > { %v2904_v35 = vpop.f32.mrf.mxu3 }
 0x5a4   : > { %v2970_v20 = vpop.f32.mrf.mxu2  ;;  %v2905_v14 = vadd.f32 %v2904_v35, %v2882_v6  ;;  %v3033_v35 = vld [vmem:[%s15340_s7 + $0x18] sm:$0xff]  ;;  %v7147_v6 = vld [vmem:[%s15340_s7 + $0xa0] sm:$0xff] }
 0x5a5   : > { %v2971_v1 = vadd.f32 %v2970_v20, %v2948_v51  ;;  %v3031_v20 = vld [vmem:[%s15340_s7 + $0x8] sm:$0xff]  ;;  %v7193_v51 = vld [vmem:[%s15340_s7 + $0x1f0] sm:$0xff] }
 0x5a6   : > { %v2927_v39 = vpop.f32.mrf.mxu0 }
 0x5a7   : > { %v2928_v54 = vadd.f32 %v2927_v39, %v2905_v14  ;;  %v3030_v14 = vld [vmem:[%s15340_s7] sm:$0xff]  ;;  %v7145_v39 = vld [vmem:[%s15340_s7 + $0x90] sm:$0xff] }
 0x5ab   : > { %v2993_v30 = vpop.f32.mrf.mxu3 }
 0x5ac   : > { %v2994_v53 = vadd.f32 %v2993_v30, %v2971_v1  ;;  %v7143_v30 = vld [vmem:[%s15340_s7 + $0x80] sm:$0xff]  ;;  %v7189_v1 = vld [vmem:[%s15340_s7 + $0x1d0] sm:$0xff] }
 0x5ae   : > { %v2950_v24 = vpop.f32.mrf.mxu1  ;;  %v3003_v16 = vmul.f32 %v7945_v2, %v2994_v53  ;;  %v7184_v53 = vld [vmem:[%s15340_s7 + $0x1a8] sm:$0xff] }
 0x5af   : > { %v2951_v15 = vadd.f32 %v2950_v24, %v2928_v54  ;;  %v7194_v54 = vld [vmem:[%s15340_s7 + $0x1f8] sm:$0xff]  ;;  %v7192_v24 = vld [vmem:[%s15340_s7 + $0x1e8] sm:$0xff] }
 0x5b0   : > { %v10906_v45 = vadd.f32 %v3003_v16, %v1560_v56 }
 0x5b2   : > { %15416 = vst [vmem:[#allocation6_spill] sm:$0xff] %v10906_v45 }
 0x5ba   : > { %v2973_v25 = vpop.f32.mrf.mxu2 }
 0x5bb   : > { %v2974_v17 = vadd.f32 %v2973_v25, %v2951_v15  ;;  %v7191_v25 = vld [vmem:[%s15340_s7 + $0x1e0] sm:$0xff]  ;;  %v7190_v15 = vld [vmem:[%s15340_s7 + $0x1d8] sm:$0xff] }
 0x5bf   : > { %v2996_v26 = vpop.f32.mrf.mxu3 }
 0x5c0   : > { %v2997_v50 = vadd.f32 %v2996_v26, %v2974_v17  ;;  %v7187_v17 = vld [vmem:[%s15340_s7 + $0x1c0] sm:$0xff]  ;;  %v7182_v26 = vld [vmem:[%s15340_s7 + $0x198] sm:$0xff] }
 0x5c2   : > { %v3004_v12 = vmul.f32 %v7945_v2, %v2997_v50  ;;  %v7183_v2 = vld [vmem:[%s15340_s7 + $0x1a0] sm:$0xff] }
 0x5c3   : > { %v7179_v50 = vld [vmem:[%s15340_s7 + $0x180] sm:$0xff] }
 0x5c4   : > { %v10904_v48 = vadd.f32 %v3004_v12, %v1563_v22 }
 0x5c6   : > { %15415 = vst [vmem:[#allocation7_spill] sm:$0xff] %v10904_v48  ;;  %3021 = vmatpush.msrb.mxu0 %v10904_v48  ;;  %3060 = vmatpush.msra.mxu1 %v10904_v48 }
 0x5c7   : > { %3146 = vmatpush.msrb.mxu2 %v10904_v48  ;;  %3341 = vmatpush.msrb.mxu3 %v10904_v48 }
 0x5c8   : > { %3022 = vmatpush.msrb.mxu0 %v10906_v45  ;;  %3061 = vmatpush.msra.mxu1 %v10906_v45 }
 0x5c9   : > { %3147 = vmatpush.msrb.mxu2 %v10906_v45  ;;  %3342 = vmatpush.msrb.mxu3 %v10906_v45 }
 0x5ca   : > { %7139 = vmatmul.msk.f32.vlgmr.msrb.gmra.mxu0 %vm535_vm0, %v8066_v43  ;;  %3109 = vmatpush.msrb.mxu1 %v3045_v58  ;;  %v7212_v58 = vld [vmem:[%s15340_s7 + $0x278] sm:$0xff]  ;;  %v8074_v43 = vld [vmem:[%s15336_s3 + $0x40] sm:$0xff] }
 0x5cb   : > { %7159 = vmatmul.msk.f32.vlgmr.msrb.gmra.mxu2 %vm535_vm0, %v8067_v37  ;;  %7141 = vmatmul.msk.f32.vlgmr.msra.gmra.mxu1 %vm535_vm0, %v8068_v33  ;;  %v7210_v37 = vld [vmem:[%s15340_s7 + $0x268] sm:$0xff]  ;;  %v7209_v33 = vld [vmem:[%s15340_s7 + $0x260] sm:$0xff] }
 0x5cc   : > { %3211 = vmatpush.msra.mxu2 %v10904_v48  ;;  %3110 = vmatpush.msrb.mxu1 %v3044_v32  ;;  %v7211_v32 = vld [vmem:[%s15340_s7 + $0x270] sm:$0xff] }
 0x5cd   : > { %3086 = vmatpush.msra.mxu0 %v7158_v10  ;;  %v7208_v10 = vld [vmem:[%s15340_s7 + $0x258] sm:$0xff] }
 0x5ce   : > { %3212 = vmatpush.msra.mxu2 %v10906_v45  ;;  %3111 = vmatpush.msrb.mxu1 %v3043_v18  ;;  %v7230_v18 = vld [vmem:[%s15340_s7 + $0x2f8] sm:$0xff] }
 0x5cf   : > { %3087 = vmatpush.msra.mxu0 %v7157_v28 }
 0x5d0   : > { %3112 = vmatpush.msrb.mxu1 %v3042_v60  ;;  %3302 = vmatpush.msrb.mxu2 %v7212_v58  ;;  %v8075_v60 = vld [vmem:[%s15336_s3 + $0x50] sm:$0xff]  ;;  %v7215_v58 = vld [vmem:[%s15340_s7 + $0x280] sm:$0xff] }
 0x5d1   : > { %3088 = vmatpush.msra.mxu0 %v7156_v59  ;;  %v7207_v59 = vld [vmem:[%s15340_s7 + $0x250] sm:$0xff] }
 0x5d2   : > { %7140 = vmatmul.msk.f32.gmra.mxu0 %vm535_vm0, %v8069_v3  ;;  %3113 = vmatpush.msrb.mxu1 %v3041_v46  ;;  %v8076_v46 = vld [vmem:[%s15336_s3 + $0x48] sm:$0xff]  ;;  %v11143_v3 = vld [vmem:[%s15335_s2 + $0x70] sm:$0xff] }
 0x5d3   : > { %7160 = vmatmul.msk.f32.gmra.mxu2 %vm535_vm0, %v8070_v57  ;;  %7142 = vmatmul.msk.f32.gmra.mxu1 %vm535_vm0, %v8071_v55  ;;  %v11149_v57 = vld [vmem:[%s15335_s2 + $0x68] sm:$0xff]  ;;  %v8080_v55 = vld [vmem:[%s15336_s3 + $0x58] sm:$0xff] }
 0x5d4   : > { %3114 = vmatpush.msrb.mxu1 %v3040_v23  ;;  %3089 = vmatpush.msra.mxu0 %v7155_v8  ;;  %v7206_v23 = vld [vmem:[%s15340_s7 + $0x248] sm:$0xff]  ;;  %v11137_v8 = vld [vmem:[%s15335_s2 + $0x78] sm:$0xff] }
 0x5d5   : > { %3303 = vmatpush.msrb.mxu2 %v7211_v32  ;;  %v7241_v32 = vld [vmem:[%s15340_s7 + $0x340] sm:$0xff] }
 0x5d6   : > { %3115 = vmatpush.msrb.mxu1 %v3039_v36  ;;  %3090 = vmatpush.msra.mxu0 %v7154_v49  ;;  %v11159_v49 = vld [vmem:[%s15335_s2 + $0x60] sm:$0xff] }
 0x5d7   : > { %3304 = vmatpush.msrb.mxu2 %v7210_v37 }
 0x5d8   : > { %3116 = vmatpush.msrb.mxu1 %v3038_v62  ;;  %3091 = vmatpush.msra.mxu0 %v7153_v31  ;;  %v11165_v62 = vld [vmem:[%s15335_s2 + $0x58] sm:$0xff]  ;;  %v11171_v31 = vld [vmem:[%s15335_s2 + $0x50] sm:$0xff] }
 0x5d9   : > { %3305 = vmatpush.msrb.mxu2 %v7209_v33  ;;  %v7238_v33 = vld [vmem:[%s15340_s7 + $0x328] sm:$0xff] }
 0x5da   : > { %3117 = vmatpush.msrb.mxu1 %v3037_v5  ;;  %3092 = vmatpush.msra.mxu0 %v7152_v7  ;;  %v11177_v5 = vld [vmem:[%s15335_s2 + $0x48] sm:$0xff]  ;;  %v8085_v7 = vld [vmem:[%s15336_s3 + $0x60] sm:$0xff] }
 0x5db   : > { %7177 = vmatmul.msk.f32.vlgmr.msra.gmra.mxu2 %vm535_vm0, %v8072_v9  ;;  %v11199_v9 = vld [vmem:[%s15335_s2 + $0x30] sm:$0xff] }
 0x5dc   : > { %3118 = vmatpush.msrb.mxu1 %v3036_v0  ;;  %3093 = vmatpush.msra.mxu0 %v7151_v11  ;;  %v11187_v0 = vld [vmem:[%s15335_s2 + $0x40] sm:$0xff]  ;;  %v11193_v11 = vld [vmem:[%s15335_s2 + $0x38] sm:$0xff] }
 0x5dd   : > { %3306 = vmatpush.msrb.mxu2 %v7208_v10  ;;  %v7237_v10 = vld [vmem:[%s15340_s7 + $0x320] sm:$0xff] }
 0x5de   : > { %3119 = vmatpush.msrb.mxu1 %v3035_v47  ;;  %3094 = vmatpush.msra.mxu0 %v7150_v13  ;;  %v11205_v47 = vld [vmem:[%s15335_s2 + $0x28] sm:$0xff] }
 0x5df   : > { %3307 = vmatpush.msrb.mxu2 %v7207_v59  ;;  %v8090_v13 = vld [vmem:[%s15336_s3 + $0x68] sm:$0xff] }
 0x5e0   : > { %3120 = vmatpush.msrb.mxu1 %v3034_v41  ;;  %3095 = vmatpush.msra.mxu0 %v7149_v27  ;;  %v11215_v41 = vld [vmem:[%s15335_s2 + $0x20] sm:$0xff]  ;;  %v11221_v27 = vld [vmem:[%s15335_s2 + $0x18] sm:$0xff] }
 0x5e1   : > { %3308 = vmatpush.msrb.mxu2 %v7206_v23 }
 0x5e2   : > { %3121 = vmatpush.msrb.mxu1 %v3033_v35  ;;  %3096 = vmatpush.msra.mxu0 %v7148_v42  ;;  %v11227_v35 = vld [vmem:[%s15335_s2 + $0x10] sm:$0xff]  ;;  %v11233_v42 = vld [vmem:[%s15335_s2 + $0x8] sm:$0xff] }
 0x5e3   : > { %7178 = vmatmul.msk.f32.gmra.mxu2 %vm535_vm0, %v8073_v34  ;;  %v7229_v34 = vld [vmem:[%s15340_s7 + $0x2f0] sm:$0xff] }
 0x5e4   : > { %3122 = vmatpush.msrb.mxu1 %v3032_v63  ;;  %3097 = vmatpush.msra.mxu0 %v7147_v6  ;;  %v11239_v63 = vld [vmem:[%s15335_s2] sm:$0xff] }
 0x5e5   : > { %v7205_v6 = vld [vmem:[%s15340_s7 + $0x240] sm:$0xff] }
 0x5e6   : > { %3123 = vmatpush.msrb.mxu1 %v3031_v20  ;;  %3098 = vmatpush.msra.mxu0 %v7146_v61  ;;  %v7204_v20 = vld [vmem:[%s15340_s7 + $0x238] sm:$0xff]  ;;  %v7228_v61 = vld [vmem:[%s15340_s7 + $0x2e8] sm:$0xff] }
 0x5e7   : > { %3309 = vmatpush.msrb.mxu2 %v7205_v6  ;;  %v8096_v6 = vld [vmem:[%s9110_s16] sm:$0x7] }
 0x5e8   : > { %3124 = vmatpush.msrb.mxu1 %v3030_v14  ;;  %3099 = vmatpush.msra.mxu0 %v7145_v39  ;;  %v7203_v14 = vld [vmem:[%s15340_s7 + $0x230] sm:$0xff]  ;;  %v7227_v39 = vld [vmem:[%s15340_s7 + $0x2e0] sm:$0xff] }
 0x5e9   : > { %3310 = vmatpush.msrb.mxu2 %v7204_v20 }
 0x5ea   : > { %3276 = vmatpush.msra.mxu1 %v10904_v48  ;;  %3100 = vmatpush.msra.mxu0 %v7144_v29  ;;  %v7202_v29 = vld [vmem:[%s15340_s7 + $0x228] sm:$0xff] }
 0x5eb   : > { %3311 = vmatpush.msrb.mxu2 %v7203_v14 }
 0x5ec   : > { %3277 = vmatpush.msra.mxu1 %v10906_v45  ;;  %3101 = vmatpush.msra.mxu0 %v7143_v30  ;;  %v7226_v30 = vld [vmem:[%s15340_s7 + $0x2d8] sm:$0xff] }
 0x5ed   : > { %3312 = vmatpush.msrb.mxu2 %v7202_v29 }
 0x5ee   : > { %3237 = vmatpush.msrb.mxu0 %v7194_v54  ;;  %v7201_v54 = vld [vmem:[%s15340_s7 + $0x220] sm:$0xff] }
 0x5ef   : > { %3313 = vmatpush.msrb.mxu2 %v7201_v54 }
 0x5f0   : > { %3238 = vmatpush.msrb.mxu0 %v7193_v51  ;;  %v7225_v51 = vld [vmem:[%s15340_s7 + $0x2d0] sm:$0xff] }
 0x5f2   : > { %3239 = vmatpush.msrb.mxu0 %v7192_v24  ;;  %v7200_v24 = vld [vmem:[%s15340_s7 + $0x218] sm:$0xff] }
 0x5f3   : > { %3314 = vmatpush.msrb.mxu2 %v7200_v24 }
 0x5f4   : > { %3240 = vmatpush.msrb.mxu0 %v7191_v25  ;;  %v7224_v25 = vld [vmem:[%s15340_s7 + $0x2c8] sm:$0xff] }
 0x5f6   : > { %3241 = vmatpush.msrb.mxu0 %v7190_v15  ;;  %v7199_v15 = vld [vmem:[%s15340_s7 + $0x210] sm:$0xff] }
 0x5f7   : > { %3315 = vmatpush.msrb.mxu2 %v7199_v15 }
 0x5f8   : > { %3242 = vmatpush.msrb.mxu0 %v7189_v1  ;;  %v7223_v1 = vld [vmem:[%s15340_s7 + $0x2c0] sm:$0xff] }
 0x5fa   : > { %3243 = vmatpush.msrb.mxu0 %v7188_v52  ;;  %v7198_v52 = vld [vmem:[%s15340_s7 + $0x208] sm:$0xff] }
 0x5fb   : > { %3316 = vmatpush.msrb.mxu2 %v7198_v52  ;;  %v7371_v52 = vld [vmem:[%s15343_s10 + $0x7c0] sm:$0xff] }
 0x5fc   : > { %3244 = vmatpush.msrb.mxu0 %v7187_v17  ;;  %v7222_v17 = vld [vmem:[%s15340_s7 + $0x2b8] sm:$0xff] }
 0x5fe   : > { %3245 = vmatpush.msrb.mxu0 %v7186_v4  ;;  %v7248_v4 = vld [vmem:[%s15340_s7 + $0x378] sm:$0xff] }
 0x600   : > { %3246 = vmatpush.msrb.mxu0 %v7185_v38  ;;  %v7197_v38 = vld [vmem:[%s15340_s7 + $0x200] sm:$0xff] }
 0x601   : > { %3317 = vmatpush.msrb.mxu2 %v7197_v38  ;;  %v7374_v38 = vld [vmem:[%s15343_s10 + $0x7d8] sm:$0xff] }
 0x602   : > { %3247 = vmatpush.msrb.mxu0 %v7184_v53  ;;  %v7221_v53 = vld [vmem:[%s15340_s7 + $0x2b0] sm:$0xff] }
 0x603   : > { %3460 = vmatpush.msra.mxu2 %v11137_v8 }
 0x604   : > { %3248 = vmatpush.msrb.mxu0 %v7183_v2  ;;  %v7247_v2 = vld [vmem:[%s15340_s7 + $0x370] sm:$0xff] }
 0x605   : > { %3461 = vmatpush.msra.mxu2 %v11143_v3 }
 0x606   : > { %3249 = vmatpush.msrb.mxu0 %v7182_v26  ;;  %v7220_v26 = vld [vmem:[%s15340_s7 + $0x2a8] sm:$0xff] }
 0x607   : > { %3462 = vmatpush.msra.mxu2 %v11149_v57 }
 0x608   : > { %3250 = vmatpush.msrb.mxu0 %v7181_v40  ;;  %v7246_v40 = vld [vmem:[%s15340_s7 + $0x368] sm:$0xff] }
 0x609   : > { %3463 = vmatpush.msra.mxu2 %v11159_v49 }
 0x60a   : > { %3251 = vmatpush.msrb.mxu0 %v7180_v19  ;;  %v7219_v19 = vld [vmem:[%s15340_s7 + $0x2a0] sm:$0xff] }
 0x60b   : > { %3464 = vmatpush.msra.mxu2 %v11165_v62 }
 0x60c   : > { %3252 = vmatpush.msrb.mxu0 %v7179_v50  ;;  %v7245_v50 = vld [vmem:[%s15340_s7 + $0x360] sm:$0xff] }
 0x60d   : > { %3465 = vmatpush.msra.mxu2 %v11171_v31 }
 0x60f   : > { %3466 = vmatpush.msra.mxu2 %v11177_v5 }
 0x611   : > { %3467 = vmatpush.msra.mxu2 %v11187_v0 }
 0x613   : > { %3468 = vmatpush.msra.mxu2 %v11193_v11 }
 0x615   : > { %3469 = vmatpush.msra.mxu2 %v11199_v9 }
 0x617   : > { %3470 = vmatpush.msra.mxu2 %v11205_v47 }
 0x619   : > { %3471 = vmatpush.msra.mxu2 %v11215_v41 }
 0x61b   : > { %3472 = vmatpush.msra.mxu2 %v11221_v27 }
 0x61d   : > { %3473 = vmatpush.msra.mxu2 %v11227_v35 }
 0x61f   : > { %3474 = vmatpush.msra.mxu2 %v11233_v42 }
 0x621   : > { %3475 = vmatpush.msra.mxu2 %v11239_v63 }
 0x647   : > { %v3024_v44 = vpop.f32.mrf.mxu0 }
 0x648   : > { %3125 = vmatmul.f32.vlgmr.msrb.gmra.mxu1 %v3024_v44  ;;  %v3063_v22 = vpop.f32.mrf.mxu1  ;;  %v7218_v44 = vld [vmem:[%s15340_s7 + $0x298] sm:$0xff] }
 0x649   : > { %3102 = vmatmul.f32.vlgmr.msra.gmra.mxu0 %v3063_v22  ;;  %3367 = vmatpush.msrb.mxu1 %v7230_v18  ;;  %v7244_v22 = vld [vmem:[%s15340_s7 + $0x358] sm:$0xff]  ;;  %v7239_v18 = vld [vmem:[%s15340_s7 + $0x330] sm:$0xff] }
 0x64a   : > { %3432 = vmatpush.msra.mxu0 %v7248_v4  ;;  %v7373_v4 = vld [vmem:[%s15343_s10 + $0x7d0] sm:$0xff] }
 0x64b   : > { %3368 = vmatpush.msrb.mxu1 %v7229_v34  ;;  %v3457_v34 = vperm.slane %v8096_v6, 1  ;;  %v7293_v6 = vld [vmem:[%s15343_s10 + $0x550] sm:$0xff] }
 0x64c   : > { %3433 = vmatpush.msra.mxu0 %v7247_v2  ;;  %v7364_v2 = vld [vmem:[%s15343_s10 + $0x788] sm:$0xff] }
 0x64d   : > { %3369 = vmatpush.msrb.mxu1 %v7228_v61 }
 0x64e   : > { %v3149_v16 = vpop.f32.mrf.mxu2  ;;  %3434 = vmatpush.msra.mxu0 %v7246_v40  ;;  %v7366_v40 = vld [vmem:[%s15343_s10 + $0x798] sm:$0xff] }
 0x64f   : > { %3188 = vmatmul.f32.vlgmr.msra.gmra.mxu3 %v3149_v16  ;;  %v3027_v12 = vpop.f32.mrf.mxu0  ;;  %3370 = vmatpush.msrb.mxu1 %v7227_v39  ;;  %v7217_v16 = vld [vmem:[%s15340_s7 + $0x290] sm:$0xff] }
 0x650   : > { %3406 = vmatpush.msra.mxu3 %v10904_v48  ;;  %3128 = vmatmul.f32.gmra.mxu1 %v3027_v12  ;;  %v3066_v21 = vpop.f32.mrf.mxu1  ;;  %v7243_v12 = vld [vmem:[%s15340_s7 + $0x350] sm:$0xff] }
 0x651   : > { %3105 = vmatmul.f32.gmra.mxu0 %v3066_v21  ;;  %3371 = vmatpush.msrb.mxu1 %v7226_v30  ;;  %v7216_v21 = vld [vmem:[%s15340_s7 + $0x288] sm:$0xff] }
 0x652   : > { %3407 = vmatpush.msra.mxu3 %v10906_v45  ;;  %3435 = vmatpush.msra.mxu0 %v7245_v50  ;;  %v7356_v50 = vld [vmem:[%s15343_s10 + $0x748] sm:$0xff]  ;;  %v7472_v45 = vld [vmem:[%s15345_s12 + $0x660] sm:$0xff] }
 0x653   : > { %3372 = vmatpush.msrb.mxu1 %v7225_v51 }
 0x654   : > { %3436 = vmatpush.msra.mxu0 %v7244_v22  ;;  %v7358_v22 = vld [vmem:[%s15343_s10 + $0x758] sm:$0xff] }
 0x655   : > { %3373 = vmatpush.msrb.mxu1 %v7224_v25 }
 0x656   : > { %v3152_v56 = vpop.f32.mrf.mxu2  ;;  %3437 = vmatpush.msra.mxu0 %v7243_v12  ;;  %v7348_v12 = vld [vmem:[%s15343_s10 + $0x708] sm:$0xff] }
 0x657   : > { %3191 = vmatmul.f32.gmra.mxu3 %v3152_v56  ;;  %3374 = vmatpush.msrb.mxu1 %v7223_v1  ;;  %v7242_v56 = vld [vmem:[%s15340_s7 + $0x348] sm:$0xff] }
 0x658   : > { %7195 = vmatmul.msk.f32.vlgmr.msra.gmra.mxu1 %vm535_vm0, %v8074_v43  ;;  %3438 = vmatpush.msra.mxu0 %v7242_v56  ;;  %v7240_v43 = vld [vmem:[%s15340_s7 + $0x338] sm:$0xff] }
 0x659   : > { %3375 = vmatpush.msrb.mxu1 %v7222_v17  ;;  %v7372_v17 = vld [vmem:[%s15343_s10 + $0x7c8] sm:$0xff]  ;;  %v7350_v56 = vld [vmem:[%s15343_s10 + $0x718] sm:$0xff] }
 0x65a   : > { %3439 = vmatpush.msra.mxu0 %v7241_v32  ;;  %v7340_v32 = vld [vmem:[%s15343_s10 + $0x6c8] sm:$0xff] }
 0x65b   : > { %3376 = vmatpush.msrb.mxu1 %v7221_v53  ;;  %v7363_v53 = vld [vmem:[%s15343_s10 + $0x780] sm:$0xff] }
 0x65c   : > { %3440 = vmatpush.msra.mxu0 %v7240_v43  ;;  %v7341_v43 = vld [vmem:[%s15343_s10 + $0x6d0] sm:$0xff] }
 0x65d   : > { %3377 = vmatpush.msrb.mxu1 %v7220_v26  ;;  %v7365_v26 = vld [vmem:[%s15343_s10 + $0x790] sm:$0xff] }
 0x65e   : > { %v3214_v28 = vpop.f32.mrf.mxu2  ;;  %3441 = vmatpush.msra.mxu0 %v7239_v18  ;;  %v7331_v18 = vld [vmem:[%s15343_s10 + $0x680] sm:$0xff] }
 0x65f   : > { %3253 = vmatmul.f32.vlgmr.msrb.gmra.mxu0 %v3214_v28  ;;  %7213 = vmatmul.msk.f32.vlgmr.msrb.gmra.mxu3 %vm535_vm0, %v8075_v60  ;;  %v7236_v28 = vld [vmem:[%s15340_s7 + $0x318] sm:$0xff]  ;;  %v7235_v60 = vld [vmem:[%s15340_s7 + $0x310] sm:$0xff] }
 0x660   : > { %7196 = vmatmul.msk.f32.gmra.mxu1 %vm535_vm0, %v8076_v46  ;;  %3487 = vmatpush.msrb.mxu3 %v11137_v8  ;;  %v7234_v46 = vld [vmem:[%s15340_s7 + $0x308] sm:$0xff]  ;;  %v7233_v8 = vld [vmem:[%s15340_s7 + $0x300] sm:$0xff] }
 0x661   : > { %3378 = vmatpush.msrb.mxu1 %v7219_v19  ;;  %3442 = vmatpush.msra.mxu0 %v7238_v33  ;;  %v7355_v19 = vld [vmem:[%s15343_s10 + $0x740] sm:$0xff]  ;;  %v7332_v33 = vld [vmem:[%s15343_s10 + $0x688] sm:$0xff] }
 0x662   : > { %3488 = vmatpush.msrb.mxu3 %v11143_v3 }
 0x663   : > { %3379 = vmatpush.msrb.mxu1 %v7218_v44  ;;  %3443 = vmatpush.msra.mxu0 %v7237_v10  ;;  %v7357_v44 = vld [vmem:[%s15343_s10 + $0x750] sm:$0xff] }
 0x664   : > { %3489 = vmatpush.msrb.mxu3 %v11149_v57  ;;  %v7333_v10 = vld [vmem:[%s15343_s10 + $0x690] sm:$0xff] }
 0x665   : > { %3380 = vmatpush.msrb.mxu1 %v7217_v16  ;;  %3444 = vmatpush.msra.mxu0 %v7236_v28  ;;  %v7347_v16 = vld [vmem:[%s15343_s10 + $0x700] sm:$0xff]  ;;  %v7334_v28 = vld [vmem:[%s15343_s10 + $0x698] sm:$0xff] }
 0x666   : > { %v3217_v36 = vpop.f32.mrf.mxu2  ;;  %3490 = vmatpush.msrb.mxu3 %v11159_v49 }
 0x667   : > { %3256 = vmatmul.f32.gmra.mxu0 %v3217_v36  ;;  %7214 = vmatmul.msk.f32.gmra.mxu3 %vm535_vm0, %v8080_v55 }
 0x668   : > { %3491 = vmatpush.msrb.mxu3 %v11165_v62  ;;  %3381 = vmatpush.msrb.mxu1 %v7216_v21  ;;  %v7349_v21 = vld [vmem:[%s15343_s10 + $0x710] sm:$0xff] }
 0x669   : > { %3445 = vmatpush.msra.mxu0 %v7235_v60  ;;  %v7323_v60 = vld [vmem:[%s15343_s10 + $0x640] sm:$0xff] }
 0x66a   : > { %3492 = vmatpush.msrb.mxu3 %v11171_v31  ;;  %3382 = vmatpush.msrb.mxu1 %v7215_v58  ;;  %v7339_v58 = vld [vmem:[%s15343_s10 + $0x6c0] sm:$0xff] }
 0x66b   : > { %3446 = vmatpush.msra.mxu0 %v7234_v46  ;;  %v7325_v46 = vld [vmem:[%s15343_s10 + $0x650] sm:$0xff] }
 0x66c   : > { %3493 = vmatpush.msrb.mxu3 %v11177_v5  ;;  %3694 = vmatpush.msra.mxu1 %v7371_v52  ;;  %v7259_v52 = vld [vmem:[%s15343_s10 + $0x440] sm:$0xff] }
 0x66d   : > { %3447 = vmatpush.msra.mxu0 %v7233_v8  ;;  %v7315_v8 = vld [vmem:[%s15343_s10 + $0x600] sm:$0xff] }
 0x66e   : > { %3494 = vmatpush.msrb.mxu3 %v11187_v0  ;;  %3695 = vmatpush.msra.mxu1 %v7363_v53  ;;  %v7251_v53 = vld [vmem:[%s15343_s10 + $0x400] sm:$0xff] }
 0x66f   : > { %7231 = vmatmul.msk.f32.vlgmr.msra.gmra.mxu3 %vm535_vm0, %v8085_v7  ;;  %3717 = vmatpush.msrb.mxu0 %v7372_v17  ;;  %v7260_v17 = vld [vmem:[%s15343_s10 + $0x448] sm:$0xff] }
 0x670   : > { %3495 = vmatpush.msrb.mxu3 %v11193_v11  ;;  %3696 = vmatpush.msra.mxu1 %v7355_v19  ;;  %v7375_v19 = vld [vmem:[%s15343_s10 + $0x7e0] sm:$0xff] }
 0x671   : > { %3718 = vmatpush.msrb.mxu0 %v7364_v2  ;;  %v7252_v2 = vld [vmem:[%s15343_s10 + $0x408] sm:$0xff] }
 0x672   : > { %3496 = vmatpush.msrb.mxu3 %v11199_v9  ;;  %3697 = vmatpush.msra.mxu1 %v7347_v16  ;;  %v7367_v16 = vld [vmem:[%s15343_s10 + $0x7a0] sm:$0xff] }
 0x673   : > { %3719 = vmatpush.msrb.mxu0 %v7356_v50  ;;  %v7376_v50 = vld [vmem:[%s15343_s10 + $0x7e8] sm:$0xff] }
 0x674   : > { %3497 = vmatpush.msrb.mxu3 %v11205_v47  ;;  %3698 = vmatpush.msra.mxu1 %v7339_v58  ;;  %v7359_v58 = vld [vmem:[%s15343_s10 + $0x760] sm:$0xff] }
 0x675   : > { %3720 = vmatpush.msrb.mxu0 %v7348_v12  ;;  %v7368_v12 = vld [vmem:[%s15343_s10 + $0x7a8] sm:$0xff] }
 0x676   : > { %3498 = vmatpush.msrb.mxu3 %v11215_v41  ;;  %3699 = vmatpush.msra.mxu1 %v7331_v18  ;;  %v7351_v18 = vld [vmem:[%s15343_s10 + $0x720] sm:$0xff] }
 0x677   : > { %7232 = vmatmul.msk.f32.gmra.mxu3 %vm535_vm0, %v8090_v13  ;;  %3721 = vmatpush.msrb.mxu0 %v7340_v32  ;;  %v7360_v32 = vld [vmem:[%s15343_s10 + $0x768] sm:$0xff] }
 0x678   : > { %3499 = vmatpush.msrb.mxu3 %v11221_v27  ;;  %3700 = vmatpush.msra.mxu1 %v7323_v60  ;;  %v7343_v60 = vld [vmem:[%s15343_s10 + $0x6e0] sm:$0xff] }
 0x679   : > { %3722 = vmatpush.msrb.mxu0 %v7332_v33  ;;  %v7352_v33 = vld [vmem:[%s15343_s10 + $0x728] sm:$0xff] }
 0x67a   : > { %3500 = vmatpush.msrb.mxu3 %v11227_v35  ;;  %3701 = vmatpush.msra.mxu1 %v7315_v8  ;;  %v7335_v8 = vld [vmem:[%s15343_s10 + $0x6a0] sm:$0xff] }
 0x67c   : > { %3501 = vmatpush.msrb.mxu3 %v11233_v42 }
 0x67e   : > { %3502 = vmatpush.msrb.mxu3 %v11239_v63 }
 0x680   : > { %3763 = vmatpush.msra.mxu3 %v7374_v38  ;;  %v7262_v38 = vld [vmem:[%s15343_s10 + $0x458] sm:$0xff] }
 0x682   : > { %3764 = vmatpush.msra.mxu3 %v7366_v40  ;;  %v7254_v40 = vld [vmem:[%s15343_s10 + $0x418] sm:$0xff] }
 0x684   : > { %3765 = vmatpush.msra.mxu3 %v7358_v22  ;;  %v7378_v22 = vld [vmem:[%s15343_s10 + $0x7f8] sm:$0xff] }
 0x686   : > { %3766 = vmatpush.msra.mxu3 %v7350_v56  ;;  %v7370_v56 = vld [vmem:[%s15343_s10 + $0x7b8] sm:$0xff] }
 0x6c5   : > { %v3126_v37 = vpop.f32.mrf.mxu1 }
 0x6c6   : > { %v3103_v5 = vpop.f32.mrf.mxu0 }
 0x6c7   : > { %v3127_v11 = vadd.f32 %v3126_v37, %v3103_v5  ;;  %v7342_v37 = vld [vmem:[%s15343_s10 + $0x6d8] sm:$0xff]  ;;  %v7299_v5 = vld [vmem:[%s15343_s10 + $0x580] sm:$0xff] }
 0x6c8   : > { %3767 = vmatpush.msra.mxu3 %v7342_v37  ;;  %v7362_v37 = vld [vmem:[%s15343_s10 + $0x778] sm:$0xff] }
 0x6ca   : > { %3768 = vmatpush.msra.mxu3 %v7334_v28  ;;  %v7354_v28 = vld [vmem:[%s15343_s10 + $0x738] sm:$0xff] }
 0x6cd   : > { %v3129_v59 = vpop.f32.mrf.mxu1 }
 0x6ce   : > { %v3106_v7 = vpop.f32.mrf.mxu0 }
 0x6cf   : > { %v3130_v35 = vadd.f32 %v3129_v59, %v3106_v7  ;;  %v7324_v59 = vld [vmem:[%s15343_s10 + $0x648] sm:$0xff] }
 0x6d0   : > { %3723 = vmatpush.msrb.mxu0 %v7324_v59  ;;  %v7300_v7 = vld [vmem:[%s15343_s10 + $0x588] sm:$0xff] }
 0x6d1   : > { %v7344_v59 = vld [vmem:[%s15343_s10 + $0x6e8] sm:$0xff] }
 0x6d2   : > { %v3189_v23 = vpop.f32.mrf.mxu3 }
 0x6d3   : > { %v3195_v13 = vadd.f32 %v3189_v23, %v3127_v11  ;;  %v7326_v23 = vld [vmem:[%s15343_s10 + $0x658] sm:$0xff] }
 0x6d4   : > { %3769 = vmatpush.msra.mxu3 %v7326_v23  ;;  %v7302_v11 = vld [vmem:[%s15343_s10 + $0x598] sm:$0xff] }
 0x6d5   : > { %v3279_v3 = vpop.f32.mrf.mxu1  ;;  %v7346_v23 = vld [vmem:[%s15343_s10 + $0x6f8] sm:$0xff] }
 0x6d6   : > { %3318 = vmatmul.f32.vlgmr.msrb.gmra.mxu2 %v3279_v3  ;;  %v7316_v3 = vld [vmem:[%s15343_s10 + $0x608] sm:$0xff] }
 0x6d7   : > { %3740 = vmatpush.msrb.mxu2 %v7373_v4  ;;  %3724 = vmatpush.msrb.mxu0 %v7316_v3  ;;  %v7261_v4 = vld [vmem:[%s15343_s10 + $0x450] sm:$0xff]  ;;  %v7336_v3 = vld [vmem:[%s15343_s10 + $0x6a8] sm:$0xff] }
 0x6d9   : > { %3741 = vmatpush.msrb.mxu2 %v7365_v26  ;;  %v7253_v26 = vld [vmem:[%s15343_s10 + $0x410] sm:$0xff] }
 0x6da   : > { %v3192_v57 = vpop.f32.mrf.mxu3 }
 0x6db   : > { %v3196_v61 = vadd.f32 %v3192_v57, %v3130_v35  ;;  %3742 = vmatpush.msrb.mxu2 %v7357_v44  ;;  %v7317_v57 = vld [vmem:[%s15343_s10 + $0x610] sm:$0xff] }
 0x6dc   : > { %v3254_v0 = vpop.f32.mrf.mxu0  ;;  %v7377_v44 = vld [vmem:[%s15343_s10 + $0x7f0] sm:$0xff] }
 0x6dd   : > { %v3282_v36 = vpop.f32.mrf.mxu1  ;;  %v3260_v27 = vadd.f32 %v3254_v0, %v3195_v13  ;;  %3743 = vmatpush.msrb.mxu2 %v7349_v21  ;;  %v7301_v0 = vld [vmem:[%s15343_s10 + $0x590] sm:$0xff] }
 0x6de   : > { %3321 = vmatmul.f32.gmra.mxu2 %v3282_v36  ;;  %v7318_v36 = vld [vmem:[%s15343_s10 + $0x618] sm:$0xff]  ;;  %v7369_v21 = vld [vmem:[%s15343_s10 + $0x7b0] sm:$0xff] }
 0x6df   : > { %3744 = vmatpush.msrb.mxu2 %v7341_v43  ;;  %3770 = vmatpush.msra.mxu3 %v7318_v36  ;;  %v7361_v43 = vld [vmem:[%s15343_s10 + $0x770] sm:$0xff]  ;;  %v7338_v36 = vld [vmem:[%s15343_s10 + $0x6b8] sm:$0xff] }
 0x6e1   : > { %3745 = vmatpush.msrb.mxu2 %v7333_v10  ;;  %v7353_v10 = vld [vmem:[%s15343_s10 + $0x730] sm:$0xff] }
 0x6e2   : > { %v3344_v55 = vpop.f32.mrf.mxu3 }
 0x6e3   : > { %3383 = vmatmul.f32.vlgmr.msrb.gmra.mxu1 %v3344_v55  ;;  %3746 = vmatpush.msrb.mxu2 %v7325_v46  ;;  %v7307_v55 = vld [vmem:[%s15343_s10 + $0x5c0] sm:$0xff]  ;;  %v7345_v46 = vld [vmem:[%s15343_s10 + $0x6f0] sm:$0xff] }
 0x6e4   : > { %v3257_v9 = vpop.f32.mrf.mxu0  ;;  %3702 = vmatpush.msra.mxu1 %v7307_v55  ;;  %v7327_v55 = vld [vmem:[%s15343_s10 + $0x660] sm:$0xff] }
 0x6e5   : > { %v3261_v29 = vadd.f32 %v3257_v9, %v3196_v61  ;;  %3747 = vmatpush.msrb.mxu2 %v7317_v57  ;;  %v7284_v61 = vld [vmem:[%s15343_s10 + $0x508] sm:$0xff]  ;;  %v7337_v57 = vld [vmem:[%s15343_s10 + $0x6b0] sm:$0xff] }
 0x6e6   : > { %3703 = vmatpush.msra.mxu1 %v7299_v5  ;;  %v7319_v5 = vld [vmem:[%s15343_s10 + $0x620] sm:$0xff] }
 0x6ea   : > { %v3347_v49 = vpop.f32.mrf.mxu3 }
 0x6eb   : > { %3386 = vmatmul.f32.gmra.mxu1 %v3347_v49  ;;  %v7308_v49 = vld [vmem:[%s15343_s10 + $0x5c8] sm:$0xff] }
 0x6ec   : > { %3725 = vmatpush.msrb.mxu0 %v7308_v49  ;;  %v7328_v49 = vld [vmem:[%s15343_s10 + $0x668] sm:$0xff] }
 0x6ee   : > { %3726 = vmatpush.msrb.mxu0 %v7300_v7  ;;  %v7320_v7 = vld [vmem:[%s15343_s10 + $0x628] sm:$0xff] }
 0x6f2   : > { %v3409_v62 = vpop.f32.mrf.mxu3 }
 0x6f3   : > { %3448 = vmatmul.f32.vlgmr.msra.gmra.mxu0 %v3409_v62  ;;  %v7309_v62 = vld [vmem:[%s15343_s10 + $0x5d0] sm:$0xff] }
 0x6f4   : > { %3748 = vmatpush.msrb.mxu2 %v7309_v62  ;;  %v7329_v62 = vld [vmem:[%s15343_s10 + $0x670] sm:$0xff] }
 0x6f6   : > { %3749 = vmatpush.msrb.mxu2 %v7301_v0  ;;  %v7321_v0 = vld [vmem:[%s15343_s10 + $0x630] sm:$0xff] }
 0x6f8   : > { %3750 = vmatpush.msrb.mxu2 %v7293_v6  ;;  %v7305_v6 = vld [vmem:[%s15343_s10 + $0x5b0] sm:$0xff] }
 0x6fa   : > { %v3412_v31 = vpop.f32.mrf.mxu3 }
 0x6fb   : > { %3451 = vmatmul.f32.gmra.mxu0 %v3412_v31  ;;  %v7310_v31 = vld [vmem:[%s15343_s10 + $0x5d8] sm:$0xff] }
 0x6fc   : > { %3771 = vmatpush.msra.mxu3 %v7310_v31  ;;  %v7330_v31 = vld [vmem:[%s15343_s10 + $0x678] sm:$0xff] }
 0x6fe   : > { %3772 = vmatpush.msra.mxu3 %v7302_v11  ;;  %v7322_v11 = vld [vmem:[%s15343_s10 + $0x638] sm:$0xff] }
 0x759   : > { %v3319_v47 = vpop.f32.mrf.mxu2 }
 0x75a   : > { %v3325_v42 = vadd.f32 %v3319_v47, %v3260_v27 }
 0x760   : > { %v3384_v41 = vpop.f32.mrf.mxu1 }
 0x761   : > { %v3390_v63 = vadd.f32 %v3384_v41, %v3325_v42  ;;  %v3322_v39 = vpop.f32.mrf.mxu2  ;;  %v7291_v42 = vld [vmem:[%s15343_s10 + $0x540] sm:$0xff] }
 0x762   : > { %v3326_v51 = vadd.f32 %v3322_v39, %v3261_v29  ;;  %3704 = vmatpush.msra.mxu1 %v7291_v42  ;;  %v7286_v39 = vld [vmem:[%s15343_s10 + $0x518] sm:$0xff]  ;;  %v7275_v29 = vld [vmem:[%s15343_s10 + $0x4c0] sm:$0xff] }
 0x763   : > { %v7303_v42 = vld [vmem:[%s15343_s10 + $0x5a0] sm:$0xff] }
 0x768   : > { %v3387_v54 = vpop.f32.mrf.mxu1 }
 0x769   : > { %v3391_v24 = vadd.f32 %v3387_v54, %v3326_v51  ;;  %v7277_v54 = vld [vmem:[%s15343_s10 + $0x4d0] sm:$0xff]  ;;  %v7278_v51 = vld [vmem:[%s15343_s10 + $0x4d8] sm:$0xff] }
 0x770   : > { %v3449_v20 = vpop.f32.mrf.mxu0 }
 0x771   : > { %v3455_v14 = vadd.f32 %v3449_v20, %v3390_v63  ;;  %v7292_v63 = vld [vmem:[%s15343_s10 + $0x548] sm:$0xff]  ;;  %v7283_v20 = vld [vmem:[%s15343_s10 + $0x500] sm:$0xff] }
 0x772   : > { %3727 = vmatpush.msrb.mxu0 %v7292_v63  ;;  %3705 = vmatpush.msra.mxu1 %v7283_v20  ;;  %v7304_v63 = vld [vmem:[%s15343_s10 + $0x5a8] sm:$0xff] }
 0x773   : > { %v11379_v30 = vadd.f32 %v3457_v34, %v3455_v14  ;;  %v7285_v14 = vld [vmem:[%s15343_s10 + $0x510] sm:$0xff] }
 0x774   : > { %3728 = vmatpush.msrb.mxu0 %v7284_v61  ;;  %3751 = vmatpush.msrb.mxu2 %v7285_v14  ;;  %v7295_v61 = vld [vmem:[%s15343_s10 + $0x560] sm:$0xff]  ;;  %v7296_v14 = vld [vmem:[%s15343_s10 + $0x568] sm:$0xff] }
 0x775   : > { %3476 = vmatmul.f32.vlgmr.msra.gmra.mxu2 %v11379_v30  ;;  %3706 = vmatpush.msra.mxu1 %v7275_v29 }
 0x776   : > { %3752 = vmatpush.msrb.mxu2 %v7277_v54  ;;  %v7287_v54 = vld [vmem:[%s15343_s10 + $0x520] sm:$0xff] }
 0x778   : > { %v3452_v25 = vpop.f32.mrf.mxu0 }
 0x779   : > { %v3456_v15 = vadd.f32 %v3452_v25, %v3391_v24  ;;  %v7267_v24 = vld [vmem:[%s15343_s10 + $0x480] sm:$0xff]  ;;  %v7268_v25 = vld [vmem:[%s15343_s10 + $0x488] sm:$0xff] }
 0x77a   : > { %3707 = vmatpush.msra.mxu1 %v7267_v24  ;;  %v7289_v24 = vld [vmem:[%s15343_s10 + $0x530] sm:$0xff] }
 0x77b   : > { %v11382_v1 = vadd.f32 %v3457_v34, %v3456_v15  ;;  %v7294_v34 = vld [vmem:[%s15343_s10 + $0x558] sm:$0xff]  ;;  %v7269_v15 = vld [vmem:[%s15343_s10 + $0x490] sm:$0xff] }
 0x77c   : > { %3773 = vmatpush.msra.mxu3 %v7294_v34  ;;  %3753 = vmatpush.msrb.mxu2 %v7269_v15  ;;  %v7306_v34 = vld [vmem:[%s15343_s10 + $0x5b8] sm:$0xff]  ;;  %v7279_v15 = vld [vmem:[%s15343_s10 + $0x4e0] sm:$0xff] }
 0x77d   : > { %3479 = vmatmul.f32.gmra.mxu2 %v11382_v1  ;;  %3708 = vmatpush.msra.mxu1 %v7259_v52  ;;  %v7281_v52 = vld [vmem:[%s15343_s10 + $0x4f0] sm:$0xff] }
 0x77e   : > { %3774 = vmatpush.msra.mxu3 %v7286_v39  ;;  %3754 = vmatpush.msrb.mxu2 %v7261_v4  ;;  %v7297_v39 = vld [vmem:[%s15343_s10 + $0x570] sm:$0xff]  ;;  %v7271_v4 = vld [vmem:[%s15343_s10 + $0x4a0] sm:$0xff] }
 0x77f   : > { %3709 = vmatpush.msra.mxu1 %v7251_v53  ;;  %v7273_v53 = vld [vmem:[%s15343_s10 + $0x4b0] sm:$0xff] }
 0x780   : > { %3775 = vmatpush.msra.mxu3 %v7278_v51  ;;  %3755 = vmatpush.msrb.mxu2 %v7253_v26  ;;  %v7288_v51 = vld [vmem:[%s15343_s10 + $0x528] sm:$0xff]  ;;  %v7263_v26 = vld [vmem:[%s15343_s10 + $0x460] sm:$0xff] }
 0x781   : > { %3786 = vmatpush.msrb.mxu1 %v7375_v19 }
 0x782   : > { %3832 = vmatpush.msra.mxu2 %v7377_v44  ;;  %v7266_v44 = vld [vmem:[%s15343_s10 + $0x478] sm:$0xff] }
 0x783   : > { %3787 = vmatpush.msrb.mxu1 %v7367_v16 }
 0x784   : > { %3833 = vmatpush.msra.mxu2 %v7369_v21  ;;  %v7256_v21 = vld [vmem:[%s15343_s10 + $0x428] sm:$0xff] }
 0x785   : > { %3788 = vmatpush.msrb.mxu1 %v7359_v58  ;;  %v7257_v58 = vld [vmem:[%s15343_s10 + $0x430] sm:$0xff] }
 0x786   : > { %3834 = vmatpush.msra.mxu2 %v7361_v43 }
 0x787   : > { %3789 = vmatpush.msrb.mxu1 %v7351_v18 }
 0x788   : > { %3835 = vmatpush.msra.mxu2 %v7353_v10 }
 0x789   : > { %3790 = vmatpush.msrb.mxu1 %v7343_v60  ;;  %v7946_v60 = vld [vmem:[%s15341_s8 + $0x1] ss:$0 sm:$0xff] }
 0x78a   : > { %3836 = vmatpush.msra.mxu2 %v7345_v46 }
 0x78b   : > { %3791 = vmatpush.msrb.mxu1 %v7335_v8  ;;  %v7947_v8 = vld [vmem:[%s15342_s9 + $0x1] ss:$0 sm:$0xff] }
 0x78c   : > { %3837 = vmatpush.msra.mxu2 %v7337_v57 }
 0x78d   : > { %3792 = vmatpush.msrb.mxu1 %v7327_v55 }
 0x78e   : > { %3838 = vmatpush.msra.mxu2 %v7329_v62 }
 0x78f   : > { %3793 = vmatpush.msrb.mxu1 %v7319_v5 }
 0x790   : > { %3839 = vmatpush.msra.mxu2 %v7321_v0 }
 0x7f8   : > { %v3477_v9 = vpop.f32.mrf.mxu2 }
 0x7f9   : > { %v11506_v47 = vsub.f32 %v11379_v30, %v3477_v9  ;;  %v7276_v30 = vld [vmem:[%s15343_s10 + $0x4c8] sm:$0xff]  ;;  %v7311_v9 = vld [vmem:[%s15343_s10 + $0x5e0] sm:$0xff] }
 0x7fa   : > { %3729 = vmatpush.msrb.mxu0 %v7276_v30  ;;  %3794 = vmatpush.msrb.mxu1 %v7311_v9  ;;  %v7298_v30 = vld [vmem:[%s15343_s10 + $0x578] sm:$0xff] }
 0x7fb   : > { %v3485_v13 = vmul.f32 %v11506_v47, %v11506_v47 }
 0x7fc   : > { %3730 = vmatpush.msrb.mxu0 %v7268_v25  ;;  %3795 = vmatpush.msrb.mxu1 %v7303_v42  ;;  %v7290_v25 = vld [vmem:[%s15343_s10 + $0x538] sm:$0xff] }
 0x7fd   : > { %3503 = vmatmul.f32.vlgmr.msrb.gmra.mxu3 %v3485_v13  ;;  %v7312_v13 = vld [vmem:[%s15343_s10 + $0x5e8] sm:$0xff] }
 0x7fe   : > { %3731 = vmatpush.msrb.mxu0 %v7260_v17  ;;  %3796 = vmatpush.msrb.mxu1 %v7295_v61  ;;  %v7282_v17 = vld [vmem:[%s15343_s10 + $0x4f8] sm:$0xff] }
 0x800   : > { %v3480_v41 = vpop.f32.mrf.mxu2  ;;  %3732 = vmatpush.msrb.mxu0 %v7252_v2  ;;  %3797 = vmatpush.msrb.mxu1 %v7287_v54  ;;  %v7274_v2 = vld [vmem:[%s15343_s10 + $0x4b8] sm:$0xff] }
 0x801   : > { %v11511_v27 = vsub.f32 %v11382_v1, %v3480_v41  ;;  %v7270_v1 = vld [vmem:[%s15343_s10 + $0x498] sm:$0xff]  ;;  %v7313_v41 = vld [vmem:[%s15343_s10 + $0x5f0] sm:$0xff] }
 0x802   : > { %3776 = vmatpush.msra.mxu3 %v7270_v1  ;;  %3809 = vmatpush.msra.mxu0 %v7376_v50  ;;  %v7280_v1 = vld [vmem:[%s15343_s10 + $0x4e8] sm:$0xff]  ;;  %v7265_v50 = vld [vmem:[%s15343_s10 + $0x470] sm:$0xff]  ;;  %v7427_v54 = vld [vmem:[%s15345_s12 + $0x4f8] sm:$0xff] }
 0x803   : > { %v3486_v35 = vmul.f32 %v11511_v27, %v11511_v27  ;;  %3840 = vmatpush.msra.mxu2 %v7313_v41  ;;  %3798 = vmatpush.msrb.mxu1 %v7279_v15 }
 0x804   : > { %3777 = vmatpush.msra.mxu3 %v7262_v38  ;;  %3810 = vmatpush.msra.mxu0 %v7368_v12  ;;  %v7272_v38 = vld [vmem:[%s15343_s10 + $0x4a8] sm:$0xff]  ;;  %v7255_v12 = vld [vmem:[%s15343_s10 + $0x420] sm:$0xff] }
 0x805   : > { %3506 = vmatmul.f32.gmra.mxu3 %v3486_v35  ;;  %v7314_v35 = vld [vmem:[%s15343_s10 + $0x5f8] sm:$0xff]  ;;  %3841 = vmatpush.msra.mxu2 %v7305_v6 }
 0x806   : > { %3778 = vmatpush.msra.mxu3 %v7254_v40  ;;  %3811 = vmatpush.msra.mxu0 %v7360_v32  ;;  %v7264_v40 = vld [vmem:[%s15343_s10 + $0x468] sm:$0xff]  ;;  %v7258_v32 = vld [vmem:[%s15343_s10 + $0x438] sm:$0xff] }
 0x807   : > { %3842 = vmatpush.msra.mxu2 %v7297_v39  ;;  %3799 = vmatpush.msrb.mxu1 %v7271_v4 }
 0x808   : > { %3855 = vmatpush.msrb.mxu3 %v7378_v22  ;;  %3812 = vmatpush.msra.mxu0 %v7352_v33 }
 0x809   : > { %3843 = vmatpush.msra.mxu2 %v7289_v24  ;;  %3800 = vmatpush.msrb.mxu1 %v7263_v26  ;;  %v7426_v26 = vld [vmem:[%s15345_s12 + $0x4f0] sm:$0xff] }
 0x80a   : > { %3856 = vmatpush.msrb.mxu3 %v7370_v56  ;;  %3813 = vmatpush.msra.mxu0 %v7344_v59 }
 0x80b   : > { %3844 = vmatpush.msra.mxu2 %v7281_v52  ;;  %3801 = vmatpush.msrb.mxu1 %v7255_v12 }
 0x80c   : > { %3857 = vmatpush.msrb.mxu3 %v7362_v37  ;;  %3814 = vmatpush.msra.mxu0 %v7336_v3 }
 0x80d   : > { %3845 = vmatpush.msra.mxu2 %v7273_v53  ;;  %v7410_v53 = vld [vmem:[%s15345_s12 + $0x470] sm:$0xff] }
 0x80e   : > { %3858 = vmatpush.msrb.mxu3 %v7354_v28  ;;  %3815 = vmatpush.msra.mxu0 %v7328_v49 }
 0x80f   : > { %3846 = vmatpush.msra.mxu2 %v7265_v50 }
 0x810   : > { %3859 = vmatpush.msrb.mxu3 %v7346_v23  ;;  %3816 = vmatpush.msra.mxu0 %v7320_v7  ;;  %v11790_v7 = vld [vmem:[%s15344_s11 + $0x8] sm:$0xff] }
 0x811   : > { %3847 = vmatpush.msra.mxu2 %v7257_v58  ;;  %v3679_v0 = vperm.slane %v11790_v7, 1  ;;  %v3681_v6 = vperm.slane %v11790_v7, 3 }
 0x812   : > { %3860 = vmatpush.msrb.mxu3 %v7338_v36  ;;  %3817 = vmatpush.msra.mxu0 %v7312_v13 }
 0x814   : > { %3861 = vmatpush.msrb.mxu3 %v7330_v31  ;;  %3818 = vmatpush.msra.mxu0 %v7304_v63  ;;  %v3680_v63 = vperm.slane %v11790_v7, 2 }
 0x816   : > { %3862 = vmatpush.msrb.mxu3 %v7322_v11  ;;  %3819 = vmatpush.msra.mxu0 %v7296_v14 }
 0x818   : > { %3863 = vmatpush.msrb.mxu3 %v7314_v35  ;;  %3820 = vmatpush.msra.mxu0 %v7288_v51 }
 0x81a   : > { %3864 = vmatpush.msrb.mxu3 %v7306_v34  ;;  %3821 = vmatpush.msra.mxu0 %v7280_v1 }
 0x81c   : > { %3865 = vmatpush.msrb.mxu3 %v7298_v30  ;;  %3822 = vmatpush.msra.mxu0 %v7272_v38  ;;  %v7411_v30 = vld [vmem:[%s15345_s12 + $0x478] sm:$0xff] }
 0x81e   : > { %3866 = vmatpush.msrb.mxu3 %v7290_v25  ;;  %3823 = vmatpush.msra.mxu0 %v7264_v40  ;;  %v7409_v40 = vld [vmem:[%s15345_s12 + $0x468] sm:$0xff] }
 0x820   : > { %3867 = vmatpush.msrb.mxu3 %v7282_v17  ;;  %3824 = vmatpush.msra.mxu0 %v7256_v21 }
 0x822   : > { %3868 = vmatpush.msrb.mxu3 %v7274_v2 }
 0x824   : > { %3869 = vmatpush.msrb.mxu3 %v7266_v44 }
 0x826   : > { %3870 = vmatpush.msrb.mxu3 %v7258_v32 }
 0x880   : > { %v3504_v20 = vpop.f32.mrf.mxu3 }
 0x881   : > { %v3505_v29 = vadd.f32 1e-06, %v3504_v20 }
 0x883   : > { %7990 = vrsqrt.f32 %v3505_v29  ;;  %vm3516_vm12 = vweird.f32 %v3505_v29 }
 0x888   : > { %v3507_v19 = vpop.f32.mrf.mxu3 }
 0x889   : > { %v7991_v22 = vpop.eup %7990  ;;  %v3508_v16 = vadd.f32 1e-06, %v3507_v19  ;;  %v7425_v19 = vld [vmem:[%s15345_s12 + $0x4e8] sm:$0xff] }
 0x88a   : > { %v3511_v56 = vmul.f32 %v7991_v22, %v3505_v29  ;;  %vm3517_vm11 = vweird.f32 %v7991_v22 }
 0x88b   : > { %7992 = vrsqrt.f32 %v3508_v16  ;;  %vm3518_vm13 = vmor %vm3516_vm12, %vm3517_vm11  ;;  %vm3526_vm15 = vweird.f32 %v3508_v16 }
 0x88c   : > { %v3512_v43 = vmul.f32 %v7991_v22, %v3511_v56 }
 0x88e   : > { %v3513_v37 = vmul.f32 0.5, %v3512_v43 }
 0x890   : > { %v3514_v18 = vsub.f32 1.5, %v3513_v37 }
 0x891   : > { %v7993_v33 = vpop.eup %7992 }
 0x892   : > { %v3515_v10 = vmul.f32 %v7991_v22, %v3514_v18  ;;  %v3521_v28 = vmul.f32 %v7993_v33, %v3508_v16  ;;  %vm3527_vm14 = vweird.f32 %v7993_v33 }
 0x893   : > { %vm3528_vm1 = vmor %vm3526_vm15, %vm3527_vm14 }
 0x894   : > { %v3519_v59 = vsel %vm3518_vm13, %v7991_v22, %v3515_v10  ;;  %v3522_v46 = vmul.f32 %v7993_v33, %v3521_v28 }
 0x895   : > { %v3530_v23 = vmul.f32 %v3519_v59, %v11506_v47 }
 0x896   : > { %v3523_v3 = vmul.f32 0.5, %v3522_v46 }
 0x897   : > { %v3537_v57 = vmul.f32 %v7946_v60, %v3530_v23 }
 0x898   : > { %v3524_v36 = vsub.f32 1.5, %v3523_v3 }
 0x899   : > { %v3544_v55 = vadd.f32 %v7947_v8, %v3537_v57 }
 0x89a   : > { %v3525_v49 = vmul.f32 %v7993_v33, %v3524_v36 }
 0x89b   : > { %3710 = vmatmul.f32.vlgmr.msra.gmra.mxu1 %v3544_v55  ;;  %3733 = vmatmul.f32.vlgmr.msrb.gmra.mxu0 %v3544_v55 }
 0x89c   : > { %v3529_v62 = vsel %vm3528_vm1, %v7993_v33, %v3525_v49  ;;  %3756 = vmatmul.f32.vlgmr.msrb.gmra.mxu2 %v3544_v55  ;;  %3779 = vmatmul.f32.vlgmr.msra.gmra.mxu3 %v3544_v55  ;;  %v7408_v49 = vld [vmem:[%s15345_s12 + $0x460] sm:$0xff] }
 0x89d   : > { %v3531_v31 = vmul.f32 %v3529_v62, %v11511_v27  ;;  %v3678_v27 = vperm.slane %v11790_v7, 0  ;;  %4716 = vmatpush.msra.mxu1 %v7411_v30  ;;  %4739 = vmatpush.msrb.mxu0 %v7427_v54  ;;  %v7424_v62 = vld [vmem:[%s15345_s12 + $0x4e0] sm:$0xff] }
 0x89f   : > { %v3538_v47 = vmul.f32 %v7946_v60, %v3531_v31  ;;  %4717 = vmatpush.msra.mxu1 %v7410_v53  ;;  %4740 = vmatpush.msrb.mxu0 %v7426_v26  ;;  %v7443_v31 = vld [vmem:[%s15345_s12 + $0x578] sm:$0xff] }
 0x8a0   : > { %4762 = vmatpush.msrb.mxu2 %v7443_v31 }
 0x8a1   : > { %v3545_v5 = vadd.f32 %v7947_v8, %v3538_v47  ;;  %4718 = vmatpush.msra.mxu1 %v7409_v40  ;;  %4741 = vmatpush.msrb.mxu0 %v7425_v19 }
 0x8a3   : > { %3713 = vmatmul.f32.gmra.mxu1 %v3545_v5  ;;  %3736 = vmatmul.f32.gmra.mxu0 %v3545_v5 }
 0x8a4   : > { %3759 = vmatmul.f32.gmra.mxu2 %v3545_v5  ;;  %3782 = vmatmul.f32.gmra.mxu3 %v3545_v5 }
 0x8a5   : > { %4719 = vmatpush.msra.mxu1 %v7408_v49  ;;  %4742 = vmatpush.msrb.mxu0 %v7424_v62  ;;  %v7407_v49 = vld [vmem:[%s15345_s12 + $0x458] sm:$0xff]  ;;  %v7442_v62 = vld [vmem:[%s15345_s12 + $0x570] sm:$0xff] }
 0x8a6   : > { %4763 = vmatpush.msrb.mxu2 %v7442_v62 }
 0x8a7   : > { %4720 = vmatpush.msra.mxu1 %v7407_v49 }
 0x8ab   : > { %3802 = vmatmul.f32.vlgmr.msrb.gmra.mxu1 %v3544_v55  ;;  %3825 = vmatmul.f32.vlgmr.msra.gmra.mxu0 %v3544_v55 }
 0x8ac   : > { %3848 = vmatmul.f32.vlgmr.msra.gmra.mxu2 %v3544_v55  ;;  %3871 = vmatmul.f32.vlgmr.msrb.gmra.mxu3 %v3544_v55 }
 0x8b3   : > { %3805 = vmatmul.f32.gmra.mxu1 %v3545_v5  ;;  %3828 = vmatmul.f32.gmra.mxu0 %v3545_v5 }
 0x8b4   : > { %3851 = vmatmul.f32.gmra.mxu2 %v3545_v5  ;;  %3874 = vmatmul.f32.gmra.mxu3 %v3545_v5  ;;  %v7459_v5 = vld [vmem:[%s15345_s12 + $0x5f8] sm:$0xff] }
 0x8b5   : > { %4785 = vmatpush.msra.mxu3 %v7459_v5 }
 0x918   : > { %v3711_v11 = vpop.f32.mrf.mxu1  ;;  %v3734_v9 = vpop.f32.mrf.mxu0 }
 0x919   : > { %v11796_v13 = vadd.f32 %v3711_v11, %v3678_v27  ;;  %v11800_v41 = vadd.f32 %v3734_v9, %v3679_v0 }
 0x91b   : > { %v11803_v35 = vmul.f32 0.70710677, %v11796_v13  ;;  %v11806_v42 = vmul.f32 0.70710677, %v11800_v41 }
 0x91d   : > { %v3910_v34 = vmul.f32 %v11803_v35, %v11803_v35  ;;  %v3950_v20 = vmul.f32 %v11806_v42, %v11806_v42 }
 0x91f   : > { %v11814_v61 = vmin.f32 %v3910_v34, 16.0  ;;  %v11816_v14 = vmin.f32 %v3950_v20, 16.0  ;;  %v3757_v39 = vpop.f32.mrf.mxu2  ;;  %v3780_v29 = vpop.f32.mrf.mxu3 }
 0x920   : > { %v11826_v51 = vadd.f32 %v3757_v39, %v3680_v63  ;;  %v11830_v24 = vadd.f32 %v3780_v29, %v3681_v6  ;;  %v3714_v8 = vpop.f32.mrf.mxu1 }
 0x921   : > { %v3923_v25 = vmul.f32 3.8918573e-05, %v11814_v61  ;;  %v3963_v15 = vmul.f32 3.8918573e-05, %v11816_v14  ;;  %v3912_v50 = vmul.f32 2.1237322e-06, %v11814_v61  ;;  %v11884_v47 = vadd.f32 %v3714_v8, %v3678_v27 }
 0x922   : > { %v11835_v1 = vmul.f32 0.70710677, %v11826_v51  ;;  %v11840_v38 = vmul.f32 0.70710677, %v11830_v24  ;;  %v3952_v32 = vmul.f32 2.1237322e-06, %v11816_v14 }
 0x923   : > { %v3924_v52 = vadd.f32 0.001143296, %v3923_v25  ;;  %v3964_v17 = vadd.f32 0.001143296, %v3963_v15  ;;  %v3913_v43 = vadd.f32 0.00028619796, %v3912_v50 }
 0x924   : > { %v3990_v4 = vmul.f32 %v11835_v1, %v11835_v1  ;;  %v4030_v16 = vmul.f32 %v11840_v38, %v11840_v38  ;;  %v3953_v59 = vadd.f32 0.00028619796, %v3952_v32  ;;  %v11892_v27 = vmul.f32 0.70710677, %v11884_v47 }
 0x925   : > { %v3925_v2 = vmul.f32 %v3924_v52, %v11814_v61  ;;  %v3965_v44 = vmul.f32 %v3964_v17, %v11816_v14  ;;  %v3914_v60 = vmul.f32 %v3913_v43, %v11814_v61 }
 0x926   : > { %v11857_v22 = vmin.f32 %v3990_v4, 16.0  ;;  %v11864_v18 = vmin.f32 %v4030_v16, 16.0  ;;  %v3954_v9 = vmul.f32 %v3953_v59, %v11816_v14 }
 0x927   : > { %v3926_v12 = vadd.f32 0.014752088, %v3925_v2  ;;  %v3966_v21 = vadd.f32 0.014752088, %v3965_v44  ;;  %v3915_v11 = vadd.f32 0.0036580483, %v3914_v60  ;;  %v4230_v2 = vmul.f32 %v11892_v27, %v11892_v27 }
 0x928   : > { %v4003_v56 = vmul.f32 3.8918573e-05, %v11857_v22  ;;  %v4043_v23 = vmul.f32 3.8918573e-05, %v11864_v18  ;;  %v3992_v36 = vmul.f32 2.1237322e-06, %v11857_v22 }
 0x929   : > { %v3927_v58 = vmul.f32 %v3926_v12, %v11814_v61  ;;  %v3967_v10 = vmul.f32 %v3966_v21, %v11816_v14  ;;  %v3916_v54 = vmul.f32 %v3915_v11, %v11814_v61  ;;  %v3955_v25 = vadd.f32 0.0036580483, %v3954_v9  ;;  %v7458_v11 = vld [vmem:[%s15345_s12 + $0x5f0] sm:$0xff] }
 0x92a   : > { %v4004_v37 = vadd.f32 0.001143296, %v4003_v56  ;;  %v4044_v34 = vadd.f32 0.001143296, %v4043_v23  ;;  %v3993_v29 = vadd.f32 0.00028619796, %v3992_v36  ;;  %4786 = vmatpush.msra.mxu3 %v7458_v11 }
 0x92b   : > { %v3928_v33 = vadd.f32 0.112945676, %v3927_v58  ;;  %v3968_v57 = vadd.f32 0.112945676, %v3967_v10  ;;  %v3917_v26 = vadd.f32 0.05243302, %v3916_v54  ;;  %v3956_v40 = vmul.f32 %v3955_v25, %v11816_v14  ;;  %v3760_v58 = vpop.f32.mrf.mxu2 }
 0x92c   : > { %v4005_v28 = vmul.f32 %v4004_v37, %v11857_v22  ;;  %v4045_v15 = vmul.f32 %v4044_v34, %v11864_v18  ;;  %v3994_v4 = vmul.f32 %v3993_v29, %v11857_v22  ;;  %v4032_v16 = vmul.f32 2.1237322e-06, %v11864_v18  ;;  %v7441_v29 = vld [vmem:[%s15345_s12 + $0x568] sm:$0xff] }
 0x92d   : > { %v3929_v3 = vmul.f32 %v3928_v33, %v11814_v61  ;;  %v3969_v39 = vmul.f32 %v3968_v57, %v11816_v14  ;;  %v11906_v56 = vmin.f32 %v4230_v2, 16.0  ;;  %v3918_v32 = vmul.f32 %v3917_v26, %v11814_v61  ;;  %4764 = vmatpush.msrb.mxu2 %v7441_v29 }
 0x92e   : > { %v4006_v46 = vadd.f32 0.014752088, %v4005_v28  ;;  %v4046_v19 = vadd.f32 0.014752088, %v4045_v15  ;;  %v3995_v12 = vadd.f32 0.0036580483, %v3994_v4  ;;  %v3737_v28 = vpop.f32.mrf.mxu0 }
 0x92f   : > { %v3930_v20 = vadd.f32 0.4994258, %v3929_v3  ;;  %v3970_v17 = vadd.f32 0.4994258, %v3969_v39  ;;  %v3957_v43 = vadd.f32 0.05243302, %v3956_v40  ;;  %v11923_v36 = vadd.f32 %v3737_v28, %v3679_v0 }
 0x930   : > { %v4007_v55 = vmul.f32 %v4006_v46, %v11857_v22  ;;  %v4047_v37 = vmul.f32 %v4046_v19, %v11864_v18  ;;  %v4033_v10 = vadd.f32 0.00028619796, %v4032_v16  ;;  %v3996_v60 = vmul.f32 %v3995_v12, %v11857_v22  ;;  %v7422_v39 = vld [vmem:[%s15345_s12 + $0x4d0] sm:$0xff]  ;;  %v7405_v4 = vld [vmem:[%s15345_s12 + $0x448] sm:$0xff]  ;;  %v7456_v19 = vld [vmem:[%s15345_s12 + $0x5e0] sm:$0xff] }
 0x931   : > { %v3931_v52 = vmul.f32 %v3930_v20, %v11814_v61  ;;  %v3971_v44 = vmul.f32 %v3970_v17, %v11816_v14  ;;  %v11917_v46 = vadd.f32 %v3760_v58, %v3680_v63  ;;  %v4243_v23 = vmul.f32 3.8918573e-05, %v11906_v56  ;;  %15417 = vst [vmem:[#allocation4_spill] sm:$0xff] %v11923_v36  ;;  %v7423_v63 = vld [vmem:[%s15345_s12 + $0x4d8] sm:$0xff]  ;;  %v7406_v20 = vld [vmem:[%s15345_s12 + $0x450] sm:$0xff] }
 0x932   : > { %v4008_v30 = vadd.f32 0.112945676, %v4007_v55  ;;  %v3919_v8 = vadd.f32 0.18741608, %v3918_v32  ;;  %v3958_v3 = vmul.f32 %v3957_v43, %v11816_v14  ;;  %v4048_v57 = vadd.f32 0.112945676, %v4047_v37  ;;  %4743 = vmatpush.msrb.mxu0 %v7423_v63  ;;  %4721 = vmatpush.msra.mxu1 %v7406_v20 }
 0x933   : > { %v11902_v50 = vadd.f32 1.0, %v3931_v52  ;;  %v11911_v33 = vadd.f32 1.0, %v3971_v44  ;;  %v4034_v55 = vmul.f32 %v4033_v10, %v11864_v18  ;;  %v3997_v31 = vadd.f32 0.05243302, %v3996_v60  ;;  %v7457_v52 = vld [vmem:[%s15345_s12 + $0x5e8] sm:$0xff]  ;;  %v3783_v10 = vpop.f32.mrf.mxu3 }
 0x934   : > { %v4009_v53 = vmul.f32 %v4008_v30, %v11857_v22  ;;  %v11939_v0 = vmul.f32 0.70710677, %v11917_v46  ;;  %v4244_v34 = vadd.f32 0.001143296, %v4243_v23  ;;  %v3920_v30 = vmul.f32 %v3919_v8, %v11814_v61  ;;  %4744 = vmatpush.msrb.mxu0 %v7422_v39  ;;  %4787 = vmatpush.msra.mxu3 %v7457_v52  ;;  %v7421_v61 = vld [vmem:[%s15345_s12 + $0x4c8] sm:$0xff] }
 0x935   : > { %7994 = vrcp.f32 %v11902_v50  ;;  %v3959_v54 = vadd.f32 0.18741608, %v3958_v3  ;;  %v4049_v25 = vmul.f32 %v4048_v57, %v11864_v18  ;;  %v11958_v15 = vmul.f32 0.70710677, %v11923_v36  ;;  %4722 = vmatpush.msra.mxu1 %v7405_v4 }
 0x936   : > { %v4010_v21 = vadd.f32 0.4994258, %v4009_v53  ;;  %7996 = vrcp.f32 %v11911_v33  ;;  %v4035_v17 = vadd.f32 0.0036580483, %v4034_v55  ;;  %v7440_v53 = vld [vmem:[%s15345_s12 + $0x560] sm:$0xff]  ;;  %v3998_v26 = vmul.f32 %v3997_v31, %v11857_v22  ;;  %4745 = vmatpush.msrb.mxu0 %v7421_v61  ;;  %4788 = vmatpush.msra.mxu3 %v7456_v19 }
 0x937   : > { %v4310_v40 = vmul.f32 %v11939_v0, %v11939_v0  ;;  %v11984_v16 = vmul.f32 0.5, %v11796_v13  ;;  %v4232_v12 = vmul.f32 2.1237322e-06, %v11906_v56  ;;  %4765 = vmatpush.msrb.mxu2 %v7440_v53  ;;  %v3921_v58 = vadd.f32 1.1283791, %v3920_v30 }
 0x938   : > { %v4011_v59 = vmul.f32 %v4010_v21, %v11857_v22  ;;  %v4245_v21 = vmul.f32 %v4244_v34, %v11906_v56  ;;  %v3960_v32 = vmul.f32 %v3959_v54, %v11816_v14  ;;  %v4050_v43 = vadd.f32 0.4994258, %v4049_v25 }
 0x939   : > { %v4270_v37 = vmul.f32 %v11958_v15, %v11958_v15  ;;  %v11992_v28 = vmul.f32 0.5, %v11800_v41  ;;  %v11995_v13 = vmul.f32 0.5, %v11826_v51  ;;  %v11998_v60 = vmul.f32 0.5, %v11830_v24 }
 0x93a   : > { %v11936_v5 = vadd.f32 1.0, %v4011_v59  ;;  %v4036_v59 = vmul.f32 %v4035_v17, %v11864_v18  ;;  %v3999_v8 = vadd.f32 0.18741608, %v3998_v26  ;;  %v12003_v3 = vmin.f32 %v4310_v40, 16.0 }
 0x93b   : > { %v11944_v9 = vpop.eup %7994  ;;  %v12006_v57 = vmul.f32 0.5, %v11884_v47  ;;  %v4233_v41 = vadd.f32 0.00028619796, %v4232_v12  ;;  %v4246_v55 = vadd.f32 0.014752088, %v4245_v21  ;;  %v12010_v51 = vadd.f32 %v3783_v10, %v3681_v6 }
 0x93c   : > { %v3934_v2 = vmul.f32 %v11944_v9, %v11902_v50  ;;  %7998 = vrcp.f32 %v11936_v5  ;;  %v11981_v44 = vpop.eup %7996  ;;  %v12015_v49 = vmul.f32 %v3921_v58, %v11803_v35  ;;  %v3961_v63 = vadd.f32 1.1283791, %v3960_v32 }
 0x93d   : > { %v3974_v14 = vmul.f32 %v11981_v44, %v11911_v33  ;;  %v4051_v62 = vmul.f32 %v4050_v43, %v11864_v18  ;;  %v12018_v31 = vmin.f32 %v4270_v37, 16.0  ;;  %vm3938_vm2 = vweird.f32 %v11902_v50 }
 0x93e   : > { %v3935_v23 = vsub.f32 1.0, %v3934_v2  ;;  %v3942_v47 = vand.u32 2147483647, %v11902_v50  ;;  %v3944_v11 = vand.u32 2147483648, %v11902_v50  ;;  %v4037_v34 = vadd.f32 0.05243302, %v4036_v59 }
 0x93f   : > { %v3975_v20 = vsub.f32 1.0, %v3974_v14  ;;  %v4000_v39 = vmul.f32 %v3999_v8, %v11857_v22  ;;  %v4323_v35 = vmul.f32 3.8918573e-05, %v12003_v3  ;;  %v4234_v30 = vmul.f32 %v4233_v41, %v11906_v56  ;;  %v7439_v41 = vld [vmem:[%s15345_s12 + $0x558] sm:$0xff] }
 0x940   : > { %v3936_v6 = vmul.f32 %v11944_v9, %v3935_v23  ;;  %v4247_v54 = vmul.f32 %v4246_v55, %v11906_v56  ;;  %v12031_v25 = vmul.f32 0.70710677, %v12010_v51  ;;  %v12034_v52 = vmul.f32 %v3961_v63, %v11806_v42  ;;  %4766 = vmatpush.msrb.mxu2 %v7439_v41 }
 0x941   : > { %v12036_v17 = vadd.f32 1.0, %v4051_v62  ;;  %v4272_v4 = vmul.f32 2.1237322e-06, %v12018_v31  ;;  %v4324_v22 = vadd.f32 0.001143296, %v4323_v35  ;;  %vm12039_vm3 = vcmp.eq.f32.partialorder %v3942_v47, 8.507059e+37  ;;  %v3803_v47 = vpop.f32.mrf.mxu1 }
 0x942   : > { %v12012_v24 = vpop.eup %7998  ;;  %vm3978_vm4 = vweird.f32 %v11911_v33  ;;  %v3982_v53 = vand.u32 2147483647, %v11911_v33  ;;  %v3984_v2 = vand.u32 2147483648, %v11911_v33  ;;  %v4350_v26 = vmul.f32 %v12031_v25, %v12031_v25 }
 0x943   : > { %v4014_v29 = vmul.f32 %v12012_v24, %v11936_v5  ;;  %vm3939_vm5 = vweird.f32 %v11944_v9  ;;  %v3976_v42 = vmul.f32 %v11981_v44, %v3975_v20  ;;  %v4001_v40 = vadd.f32 1.1283791, %v4000_v39 }
 0x944   : > { %v4038_v19 = vmul.f32 %v4037_v34, %v11864_v18  ;;  %v3937_v12 = vadd.f32 %v11944_v9, %v3936_v6  ;;  %v4235_v58 = vadd.f32 0.0036580483, %v4234_v30  ;;  %v4248_v32 = vadd.f32 0.112945676, %v4247_v54  ;;  %vm12064_vm6 = vmor %vm3938_vm2, %vm3939_vm5 }
 0x945   : > { %v4015_v21 = vsub.f32 1.0, %v4014_v29  ;;  %8000 = vrcp.f32 %v12036_v17  ;;  %v4273_v43 = vadd.f32 0.00028619796, %v4272_v4  ;;  %v4325_v37 = vmul.f32 %v4324_v22, %v12003_v3 }
 0x946   : > { %v12054_v10 = vmin.f32 %v4350_v26, 16.0  ;;  %v3945_v59 = vor.u32 1.1754944e-38, %v3944_v11  ;;  %v3985_v23 = vor.u32 1.1754944e-38, %v3984_v2  ;;  %v12057_v14 = vmul.f32 0.5, %v11917_v46 }
 0x947   : > { %v3682_v8 = vperm.slane %v11790_v7, 4  ;;  %vm3979_vm7 = vweird.f32 %v11981_v44  ;;  %vm12069_vm8 = vcmp.eq.f32.partialorder %v3982_v53, 8.507059e+37  ;;  %v12074_v63 = vmul.f32 %v4001_v40, %v11835_v1 }
 0x948   : > { %v4039_v46 = vadd.f32 0.18741608, %v4038_v19  ;;  %v4363_v62 = vmul.f32 3.8918573e-05, %v12054_v10  ;;  %v3941_v50 = vsel %vm12064_vm6, %v11944_v9, %v3937_v12  ;;  %v3977_v11 = vadd.f32 %v11981_v44, %v3976_v42  ;;  %vm12100_vm10 = vmor %vm3978_vm4, %vm3979_vm7  ;;  %v3826_v42 = vpop.f32.mrf.mxu0 }
 0x949   : > { %v4249_v34 = vmul.f32 %v4248_v32, %v11906_v56  ;;  %v4326_v6 = vadd.f32 0.014752088, %v4325_v37  ;;  %v4016_v20 = vmul.f32 %v12012_v24, %v4015_v21  ;;  %v4236_v39 = vmul.f32 %v4235_v58, %v11906_v56  ;;  %v7404_v37 = vld [vmem:[%s15345_s12 + $0x440] sm:$0xff] }
 0x94a   : > { %v4274_v1 = vmul.f32 %v4273_v43, %v12018_v31  ;;  %v4364_v35 = vadd.f32 0.001143296, %v4363_v62  ;;  %vm4018_vm9 = vweird.f32 %v11936_v5  ;;  %v4022_v29 = vand.u32 2147483647, %v11936_v5  ;;  %4723 = vmatpush.msra.mxu1 %v7404_v37 }
 0x94b   : > { %v12089_v30 = vadd.f32 %v3803_v47, %v3682_v8  ;;  %v3683_v9 = vperm.slane %v11790_v7, 5  ;;  %v12092_v54 = vpop.eup %8000  ;;  %v3946_v4 = vsel %vm12039_vm3, %v3945_v59, %v3941_v50  ;;  %v4024_v53 = vand.u32 2147483648, %v11936_v5  ;;  %v7420_v59 = vld [vmem:[%s15345_s12 + $0x4c0] sm:$0xff] }
 0x94c   : > { %v4040_v2 = vmul.f32 %v4039_v46, %v11864_v18  ;;  %v4312_v26 = vmul.f32 2.1237322e-06, %v12003_v3  ;;  %v3981_v61 = vsel %vm12100_vm10, %v11981_v44, %v3977_v11  ;;  %vm4019_vm11 = vweird.f32 %v12012_v24  ;;  %4746 = vmatpush.msrb.mxu0 %v7420_v59  ;;  %v7455_v11 = vld [vmem:[%s15345_s12 + $0x5d8] sm:$0xff] }
 0x94d   : > { %v4250_v40 = vadd.f32 0.4994258, %v4249_v34  ;;  %v4327_v33 = vmul.f32 %v4326_v6, %v12003_v3  ;;  %v4017_v19 = vadd.f32 %v12012_v24, %v4016_v20  ;;  %v4237_v12 = vadd.f32 0.05243302, %v4236_v39  ;;  %vm12147_vm13 = vmor %vm4018_vm9, %vm4019_vm11  ;;  %4789 = vmatpush.msra.mxu3 %v7455_v11 }
 0x94e   : > { %v4275_v21 = vadd.f32 0.0036580483, %v4274_v1  ;;  %v4365_v58 = vmul.f32 %v4364_v35, %v12054_v10  ;;  %vm12114_vm12 = vcmp.eq.f32.partialorder %v4022_v29, 8.507059e+37  ;;  %v4054_v32 = vmul.f32 %v12092_v54, %v12036_v17 }
 0x94f   : > { %v12121_v44 = vmul.f32 0.70710677, %v12089_v30  ;;  %v12125_v43 = vadd.f32 %v3826_v42, %v3683_v9  ;;  %v3947_v46 = vmul.f32 %v3946_v4, %v12015_v49  ;;  %v4025_v62 = vor.u32 1.1754944e-38, %v4024_v53 }
 0x950   : > { %v4313_v47 = vadd.f32 0.00028619796, %v4312_v26  ;;  %v4352_v50 = vmul.f32 2.1237322e-06, %v12054_v10  ;;  %v3986_v34 = vsel %vm12069_vm8, %v3985_v23, %v3981_v61  ;;  %v4251_v49 = vmul.f32 %v4250_v40, %v11906_v56  ;;  %v3849_v61 = vpop.f32.mrf.mxu2 }
 0x951   : > { %15428 = vst [vmem:[#allocation2_spill] sm:$0xff] %v12125_v43  ;;  %v4328_v20 = vadd.f32 0.112945676, %v4327_v33  ;;  %v4070_v39 = vmul.f32 %v12121_v44, %v12121_v44  ;;  %v4021_v23 = vsel %vm12147_vm13, %v12012_v24, %v4017_v19  ;;  %v4238_v55 = vmul.f32 %v4237_v12, %v11906_v56 }
 0x952   : > { %v4276_v5 = vmul.f32 %v4275_v21, %v12018_v31  ;;  %v4366_v1 = vadd.f32 0.014752088, %v4365_v58  ;;  %v4055_v35 = vsub.f32 1.0, %v4054_v32  ;;  %v12162_v4 = vmul.f32 0.70710677, %v12125_v43 }
 0x953   : > { %v12159_v29 = vmin.f32 %v4070_v39, 16.0  ;;  %v15355_v22 = vperm.slane %v11790_v7, 6  ;;  %v3987_v53 = vmul.f32 %v3986_v34, %v12034_v52  ;;  %v12166_v26 = vadd.f32 1.1283791, %v4040_v2 }
 0x954   : > { %v4314_v42 = vmul.f32 %v4313_v47, %v12003_v3  ;;  %v4353_v24 = vadd.f32 0.00028619796, %v4352_v50  ;;  %v7380_v40 = vclamps-f32 %v3947_v46, 1.0  ;;  %v12169_v33 = vadd.f32 1.0, %v4251_v49 }
 0x955   : > { %v4329_v19 = vmul.f32 %v4328_v20, %v12003_v3  ;;  %v4083_v12 = vmul.f32 3.8918573e-05, %v12159_v29  ;;  %v4026_v21 = vsel %vm12114_vm12, %v4025_v62, %v4021_v23  ;;  %v4062_v58 = vand.u32 2147483647, %v12036_v17 }
 0x956   : > { %v4239_v32 = vadd.f32 0.18741608, %v4238_v55  ;;  %v4367_v52 = vmul.f32 %v4366_v1, %v12054_v10  ;;  %v4056_v2 = vmul.f32 %v12092_v54, %v4055_v35  ;;  %v4277_v37 = vadd.f32 0.05243302, %v4276_v5 }
 0x957   : > { %v4110_v59 = vmul.f32 %v12162_v4, %v12162_v4  ;;  %v12182_v41 = vadd.f32 %v3849_v61, %v15355_v22  ;;  %v7381_v46 = vclamps-f32 %v3987_v53, 1.0  ;;  %v4315_v47 = vadd.f32 0.0036580483, %v4314_v42 }
 0x958   : > { %v4354_v18 = vmul.f32 %v4353_v24, %v12054_v10  ;;  %v4084_v62 = vadd.f32 0.001143296, %v4083_v12  ;;  %v4027_v50 = vmul.f32 %v4026_v21, %v12074_v63  ;;  %v4064_v11 = vand.u32 2147483648, %v12036_v17 }
 0x959   : > { %8002 = vrcp.f32 %v12169_v33  ;;  %v4330_v34 = vadd.f32 0.4994258, %v4329_v19  ;;  %v4240_v6 = vmul.f32 %v4239_v32, %v11906_v56  ;;  %v4368_v49 = vadd.f32 0.112945676, %v4367_v52  ;;  %v7437_v19 = vld [vmem:[%s15345_s12 + $0x548] sm:$0xff] }
 0x95a   : > { %v4085_v20 = vmul.f32 %v4084_v62, %v12159_v29  ;;  %v12191_v39 = vmul.f32 0.70710677, %v12182_v41  ;;  %v4057_v23 = vadd.f32 %v12092_v54, %v4056_v2  ;;  %vm4059_vm14 = vweird.f32 %v12092_v54 }
 0x95b   : > { %v4278_v55 = vmul.f32 %v4277_v37, %v12018_v31  ;;  %v12196_v63 = vmin.f32 %v4110_v59, 16.0  ;;  %v4316_v5 = vmul.f32 %v4315_v47, %v12003_v3  ;;  %v4355_v1 = vadd.f32 0.0036580483, %v4354_v18  ;;  %v7403_v37 = vld [vmem:[%s15345_s12 + $0x438] sm:$0xff] }
 0x95c   : > { %v4086_v35 = vadd.f32 0.014752088, %v4085_v20  ;;  %v4150_v56 = vmul.f32 %v12191_v39, %v12191_v39  ;;  %v4550_v53 = vadd.f32 1.0, %v7380_v40  ;;  %vm4058_vm15 = vweird.f32 %v12036_v17  ;;  %v7419_v59 = vld [vmem:[%s15345_s12 + $0x4b8] sm:$0xff]  ;;  %4724 = vmatpush.msra.mxu1 %v7403_v37 }
 0x95d   : > { %vm12202_vm1 = vcmp.eq.f32.partialorder %v4062_v58, 8.507059e+37  ;;  %v4331_v24 = vmul.f32 %v4330_v34, %v12003_v3  ;;  %v4551_v61 = vadd.f32 1.0, %v7381_v46  ;;  %vm12207_vm2 = vmor %vm4058_vm15, %vm4059_vm14  ;;  %v4065_v12 = vor.u32 1.1754944e-38, %v4064_v11  ;;  %v7438_v46 = vld [vmem:[%s15345_s12 + $0x550] sm:$0xff]  ;;  %4747 = vmatpush.msrb.mxu0 %v7419_v59 }
 0x95e   : > { %v4241_v21 = vadd.f32 1.1283791, %v4240_v6  ;;  %v4369_v32 = vmul.f32 %v4368_v49, %v12054_v10  ;;  %v7382_v40 = vclamps-f32 %v4027_v50, 1.0  ;;  %v4061_v17 = vsel %vm12207_vm2, %v12092_v54, %v4057_v23  ;;  %v7454_v50 = vld [vmem:[%s15345_s12 + $0x5d0] sm:$0xff]  ;;  %4767 = vmatpush.msrb.mxu2 %v7438_v46 }
 0x95f   : > { %v12212_v52 = vpop.eup %8002  ;;  %v4087_v58 = vmul.f32 %v4086_v35, %v12159_v29  ;;  %v4123_v2 = vmul.f32 3.8918573e-05, %v12196_v63  ;;  %v4279_v47 = vadd.f32 0.18741608, %v4278_v55  ;;  %v4317_v18 = vadd.f32 0.05243302, %v4316_v5  ;;  %4790 = vmatpush.msra.mxu3 %v7454_v50 }
 0x960   : > { %v4356_v54 = vmul.f32 %v4355_v1, %v12054_v10  ;;  %v12229_v62 = vmin.f32 %v4150_v56, 16.0  ;;  %v12234_v11 = vadd.f32 1.0, %v4331_v24  ;;  %v12237_v34 = vmul.f32 0.5, %v12010_v51  ;;  %v7402_v1 = vld [vmem:[%s15345_s12 + $0x430] sm:$0xff]  ;;  %4768 = vmatpush.msrb.mxu2 %v7437_v19 }
 0x961   : > { %v4072_v6 = vmul.f32 2.1237322e-06, %v12159_v29  ;;  %v4088_v49 = vadd.f32 0.112945676, %v4087_v58  ;;  %v4066_v20 = vsel %vm12202_vm1, %v4065_v12, %v4061_v17  ;;  %v4254_v23 = vmul.f32 %v12212_v52, %v12169_v33  ;;  %v7418_v51 = vld [vmem:[%s15345_s12 + $0x4b0] sm:$0xff]  ;;  %4725 = vmatpush.msra.mxu1 %v7402_v1  ;;  %v7453_v12 = vld [vmem:[%s15345_s12 + $0x5c8] sm:$0xff] }
 0x962   : > { %v4370_v55 = vadd.f32 0.4994258, %v4369_v32  ;;  %v4112_v5 = vmul.f32 2.1237322e-06, %v12196_v63  ;;  %v12252_v35 = vmul.f32 %v4550_v53, %v11984_v16  ;;  %v12254_v56 = vadd.f32 1.0, %v7382_v40  ;;  %v7401_v16 = vld [vmem:[%s15345_s12 + $0x428] sm:$0xff]  ;;  %4748 = vmatpush.msrb.mxu0 %v7418_v51  ;;  %4791 = vmatpush.msra.mxu3 %v7453_v12 }
 0x963   : > { %v4042_v42 = vmul.f32 %v12166_v26, %v11840_v38  ;;  %v4124_v24 = vadd.f32 0.001143296, %v4123_v2  ;;  %v12268_v53 = vmul.f32 %v4551_v61, %v11992_v28  ;;  %v4318_v32 = vmul.f32 %v4317_v18, %v12003_v3  ;;  %v7417_v40 = vld [vmem:[%s15345_s12 + $0x4a8] sm:$0xff]  ;;  %v7436_v17 = vld [vmem:[%s15345_s12 + $0x540] sm:$0xff]  ;;  %4726 = vmatpush.msra.mxu1 %v7401_v16 }
 0x964   : > { %v4357_v38 = vadd.f32 0.05243302, %v4356_v54  ;;  %v4163_v26 = vmul.f32 3.8918573e-05, %v12229_v62  ;;  %8004 = vrcp.f32 %v12234_v11  ;;  %v4073_v28 = vadd.f32 0.00028619796, %v4072_v6  ;;  %4749 = vmatpush.msrb.mxu0 %v7417_v40  ;;  %4769 = vmatpush.msrb.mxu2 %v7436_v17 }
 0x965   : > { %v4067_v58 = vmul.f32 %v4066_v20, %v4042_v42  ;;  %v4089_v61 = vmul.f32 %v4088_v49, %v12159_v29  ;;  %v12281_v2 = vmul.f32 %v4241_v21, %v11892_v27  ;;  %v4255_v37 = vsub.f32 1.0, %v4254_v23  ;;  %v7452_v18 = vld [vmem:[%s15345_s12 + $0x5c0] sm:$0xff] }
 0x966   : > { %v4264_v59 = vand.u32 2147483648, %v12169_v33  ;;  %v4371_v46 = vmul.f32 %v4370_v55, %v12054_v10  ;;  %v4280_v54 = vmul.f32 %v4279_v47, %v12018_v31  ;;  %v4113_v50 = vadd.f32 0.00028619796, %v4112_v5  ;;  %4792 = vmatpush.msra.mxu3 %v7452_v18  ;;  %v3872_v55 = vpop.f32.mrf.mxu3 }
 0x967   : > { %v4125_v6 = vmul.f32 %v4124_v24, %v12196_v63  ;;  %v15354_v49 = vperm.slane %v11790_v7, 7  ;;  %vm4258_vm3 = vweird.f32 %v12169_v33  ;;  %v4319_v27 = vadd.f32 0.18741608, %v4318_v32 }
 0x968   : > { %v4358_v21 = vmul.f32 %v4357_v38, %v12054_v10  ;;  %v4152_v20 = vmul.f32 2.1237322e-06, %v12229_v62  ;;  %v4164_v23 = vadd.f32 0.001143296, %v4163_v26  ;;  %v7383_v1 = vclamps-f32 %v4067_v58, 1.0 }
 0x969   : > { %v4262_v51 = vand.u32 2147483647, %v12169_v33  ;;  %v4074_v47 = vmul.f32 %v4073_v28, %v12159_v29  ;;  %v4090_v5 = vadd.f32 0.4994258, %v4089_v61  ;;  %v4256_v42 = vmul.f32 %v12212_v52, %v4255_v37 }
 0x96a   : > { %v4265_v24 = vor.u32 1.1754944e-38, %v4264_v59  ;;  %v12297_v19 = vadd.f32 1.0, %v4371_v46  ;;  %v4165_v12 = vmul.f32 %v4164_v23, %v12229_v62  ;;  %v12300_v16 = vpop.eup %8004  ;;  %vm4259_vm4 = vweird.f32 %v12212_v52 }
 0x96b   : > { %v4114_v32 = vmul.f32 %v4113_v50, %v12196_v63  ;;  %v4126_v38 = vadd.f32 0.014752088, %v4125_v6  ;;  %v12306_v26 = vadd.f32 %v3872_v55, %v15354_v49  ;;  %v12308_v40 = vadd.f32 1.1283791, %v4280_v54  ;;  %v3806_v50 = vpop.f32.mrf.mxu1  ;;  %vm12338_vm6 = vmor %vm4258_vm3, %vm4259_vm4 }
 0x96c   : > { %v4320_v17 = vmul.f32 %v4319_v27, %v12003_v3  ;;  %v4359_v58 = vadd.f32 0.18741608, %v4358_v21  ;;  %v4153_v28 = vadd.f32 0.00028619796, %v4152_v20  ;;  %v4553_v61 = vadd.f32 1.0, %v7383_v1 }
 0x96d   : > { %vm12311_vm5 = vcmp.eq.f32.partialorder %v4262_v51, 8.507059e+37  ;;  %v4075_v59 = vadd.f32 0.0036580483, %v4074_v47  ;;  %v4091_v46 = vmul.f32 %v4090_v5, %v12159_v29  ;;  %v4166_v18 = vadd.f32 0.014752088, %v4165_v12 }
 0x96e   : > { %v4257_v6 = vadd.f32 %v12212_v52, %v4256_v42  ;;  %v4334_v54 = vmul.f32 %v12300_v16, %v12234_v11  ;;  %8006 = vrcp.f32 %v12297_v19  ;;  %v12321_v3 = vmul.f32 0.5, %v12089_v30 }
 0x96f   : > { %v4115_v27 = vadd.f32 0.0036580483, %v4114_v32  ;;  %v4127_v21 = vmul.f32 %v4126_v38, %v12196_v63  ;;  %v4167_v20 = vmul.f32 %v4166_v18, %v12229_v62  ;;  %v12326_v23 = vmul.f32 0.70710677, %v12306_v26  ;;  %v7451_v18 = vld [vmem:[%s15345_s12 + $0x5b8] sm:$0xff] }
 0x970   : > { %v4321_v55 = vadd.f32 1.1283791, %v4320_v17  ;;  %v4360_v1 = vmul.f32 %v4359_v58, %v12054_v10  ;;  %v4154_v51 = vmul.f32 %v4153_v28, %v12229_v62  ;;  %v12332_v47 = vadd.f32 %v3806_v50, %v3682_v8  ;;  %v3829_v17 = vpop.f32.mrf.mxu0  ;;  %v7400_v58 = vld [vmem:[%s15345_s12 + $0x420] sm:$0xff]  ;;  %4793 = vmatpush.msra.mxu3 %v7451_v18 }
 0x971   : > { %v4342_v5 = vand.u32 2147483647, %v12234_v11  ;;  %v4076_v42 = vmul.f32 %v4075_v59, %v12159_v29  ;;  %v12344_v12 = vadd.f32 1.0, %v4091_v46  ;;  %v4190_v10 = vmul.f32 %v12326_v23, %v12326_v23  ;;  %v7416_v28 = vld [vmem:[%s15345_s12 + $0x4a0] sm:$0xff]  ;;  %4727 = vmatpush.msra.mxu1 %v7400_v58  ;;  %v7415_v58 = vld [vmem:[%s15345_s12 + $0x498] sm:$0xff] }
 0x972   : > { %v12350_v8 = vmul.f32 %v12254_v56, %v11995_v13  ;;  %v4261_v33 = vsel %vm12338_vm6, %v12212_v52, %v4257_v6  ;;  %v4344_v32 = vand.u32 2147483648, %v12234_v11  ;;  %v4168_v38 = vadd.f32 0.112945676, %v4167_v20  ;;  %v7435_v13 = vld [vmem:[%s15345_s12 + $0x538] sm:$0xff]  ;;  %4750 = vmatpush.msrb.mxu0 %v7416_v28  ;;  %v7398_v28 = vld [vmem:[%s15345_s12 + $0x410] sm:$0xff] }
 0x973   : > { %v4335_v56 = vsub.f32 1.0, %v4334_v54  ;;  %v4116_v59 = vmul.f32 %v4115_v27, %v12196_v63  ;;  %v4128_v52 = vadd.f32 0.112945676, %v4127_v21  ;;  %v12366_v46 = vmin.f32 %v4190_v10, 16.0  ;;  %4770 = vmatpush.msrb.mxu2 %v7435_v13 }
 0x974   : > { %v12371_v50 = vpop.eup %8006  ;;  %v12374_v6 = vmul.f32 %v4553_v61, %v11998_v60  ;;  %v12376_v20 = vadd.f32 1.1283791, %v4360_v1  ;;  %v4155_v30 = vadd.f32 0.0036580483, %v4154_v51  ;;  %v12379_v54 = vmul.f32 0.70710677, %v12332_v47  ;;  %4751 = vmatpush.msrb.mxu0 %v7415_v58 }
 0x975   : > { %v4077_v21 = vadd.f32 0.05243302, %v4076_v42  ;;  %8008 = vrcp.f32 %v12344_v12  ;;  %v12385_v10 = vadd.f32 %v3829_v17, %v3683_v9  ;;  %v4266_v60 = vsel %vm12311_vm5, %v4265_v24, %v4261_v33  ;;  %v7399_v42 = vld [vmem:[%s15345_s12 + $0x418] sm:$0xff]  ;;  %v7434_v9 = vld [vmem:[%s15345_s12 + $0x530] sm:$0xff] }
 0x976   : > { %v4169_v61 = vmul.f32 %v4168_v38, %v12229_v62  ;;  %v4203_v1 = vmul.f32 3.8918573e-05, %v12366_v46  ;;  %v4390_v51 = vmul.f32 %v12379_v54, %v12379_v54  ;;  %v12403_v24 = vmul.f32 %v4321_v55, %v11939_v0  ;;  %4728 = vmatpush.msra.mxu1 %v7399_v42  ;;  %v7450_v17 = vld [vmem:[%s15345_s12 + $0x5b0] sm:$0xff]  ;;  %4771 = vmatpush.msrb.mxu2 %v7434_v9  ;;  %v7413_v9 = vld [vmem:[%s15345_s12 + $0x488] sm:$0xff] }
 0x977   : > { %15439 = vst [vmem:[#allocation5_spill] sm:$0xff] %v12385_v10  ;;  %v4336_v37 = vmul.f32 %v12300_v16, %v4335_v56  ;;  %v4117_v33 = vadd.f32 0.05243302, %v4116_v59  ;;  %v4129_v38 = vmul.f32 %v4128_v52, %v12196_v63  ;;  %v7414_v0 = vld [vmem:[%s15345_s12 + $0x490] sm:$0xff]  ;;  %v12418_v55 = vmul.f32 %v12371_v50, %v12297_v19  ;;  %4794 = vmatpush.msra.mxu3 %v7450_v17  ;;  %v7433_v52 = vld [vmem:[%s15345_s12 + $0x528] sm:$0xff]  ;;  %v7432_v17 = vld [vmem:[%s15345_s12 + $0x520] sm:$0xff] }
 0x978   : > { %v4156_v13 = vmul.f32 %v4155_v30, %v12229_v62  ;;  %v4192_v56 = vmul.f32 2.1237322e-06, %v12366_v46  ;;  %v4204_v59 = vadd.f32 0.001143296, %v4203_v1  ;;  %v12426_v18 = vmul.f32 %v4266_v60, %v12281_v2  ;;  %4729 = vmatpush.msra.mxu1 %v7398_v28  ;;  %4752 = vmatpush.msrb.mxu0 %v7414_v0  ;;  %v7449_v30 = vld [vmem:[%s15345_s12 + $0x5a8] sm:$0xff] }
 0x979   : > { %v12428_v42 = vor.u32 1.1754944e-38, %v4344_v32  ;;  %v12430_v58 = vmin.f32 %v4390_v51, 16.0  ;;  %v12433_v49 = vmul.f32 0.70710677, %v12385_v10  ;;  %v7397_v1 = vld [vmem:[%s15345_s12 + $0x408] sm:$0xff]  ;;  %vm4339_vm7 = vweird.f32 %v12300_v16  ;;  %4772 = vmatpush.msrb.mxu2 %v7433_v52  ;;  %4795 = vmatpush.msra.mxu3 %v7449_v30  ;;  %v7412_v52 = vld [vmem:[%s15345_s12 + $0x480] sm:$0xff] }
 0x97a   : > { %vm12442_vm8 = vcmp.eq.f32.partialorder %v4342_v5, 8.507059e+37  ;;  %v4078_v32 = vmul.f32 %v4077_v21, %v12159_v29  ;;  %v4170_v60 = vadd.f32 0.4994258, %v4169_v61  ;;  %v4205_v51 = vmul.f32 %v4204_v59, %v12366_v46  ;;  %v7448_v5 = vld [vmem:[%s15345_s12 + $0x5a0] sm:$0xff]  ;;  %4730 = vmatpush.msra.mxu1 %v7397_v1  ;;  %4753 = vmatpush.msrb.mxu0 %v7413_v9  ;;  %v7447_v1 = vld [vmem:[%s15345_s12 + $0x598] sm:$0xff]  ;;  %v7490_v9 = vld [vmem:[%s15345_s12 + $0x6f0] sm:$0xff] }
 0x97b   : > { %15440 = vst [vmem:[#allocation3_spill] sm:$0xff] %v12433_v49  ;;  %v12457_v28 = vpop.eup %8008  ;;  %v12460_v21 = vadd.f32 %v12300_v16, %v4336_v37  ;;  %vm4338_vm9 = vweird.f32 %v12234_v11  ;;  %v4130_v61 = vadd.f32 0.4994258, %v4129_v38  ;;  %v12464_v0 = vmul.f32 0.5, %v12182_v41  ;;  %v7396_v59 = vld [vmem:[%s15345_s12 + $0x400] sm:$0xff]  ;;  %v7431_v37 = vld [vmem:[%s15345_s12 + $0x518] sm:$0xff]  ;;  %4773 = vmatpush.msrb.mxu2 %v7432_v17  ;;  %4796 = vmatpush.msra.mxu3 %v7448_v5 }
 0x97c   : > { %v4375_v30 = vsub.f32 1.0, %v12418_v55  ;;  %v4118_v38 = vmul.f32 %v4117_v33, %v12196_v63  ;;  %v4157_v41 = vadd.f32 0.05243302, %v4156_v13  ;;  %v4193_v22 = vadd.f32 0.00028619796, %v4192_v56  ;;  %vm12484_vm10 = vmor %vm4338_vm9, %vm4339_vm7  ;;  %4731 = vmatpush.msra.mxu1 %v7396_v59  ;;  %4754 = vmatpush.msrb.mxu0 %v7412_v52 }
 0x97d   : > { %v12490_v55 = vmul.f32 %v12376_v20, %v12031_v25  ;;  %v4206_v13 = vadd.f32 0.014752088, %v4205_v51  ;;  %v4403_v56 = vmul.f32 3.8918573e-05, %v12430_v58  ;;  %v4079_v17 = vadd.f32 0.18741608, %v4078_v32  ;;  %4774 = vmatpush.msrb.mxu2 %v7431_v37  ;;  %4797 = vmatpush.msra.mxu3 %v7447_v1 }
 0x97e   : > { %v12496_v5 = vmul.f32 %v12457_v28, %v12344_v12  ;;  %v4171_v11 = vmul.f32 %v4170_v60, %v12229_v62  ;;  %v4430_v27 = vmul.f32 %v12433_v49, %v12433_v49  ;;  %v7475_v25 = vld [vmem:[%s15345_s12 + $0x678] sm:$0xff]  ;;  %v7430_v32 = vld [vmem:[%s15345_s12 + $0x510] sm:$0xff]  ;;  %v4341_v60 = vsel %vm12484_vm10, %v12300_v16, %v12460_v21  ;;  %4732 = vmatmul.f32.vlgmr.msra.gmra.mxu1 %v12252_v35 }
 0x97f   : > { %v7491_v20 = vld [vmem:[%s15345_s12 + $0x6f8] sm:$0xff]  ;;  %v4131_v51 = vmul.f32 %v4130_v61, %v12196_v63  ;;  %v4207_v59 = vmul.f32 %v4206_v13, %v12366_v46  ;;  %v4404_v52 = vadd.f32 0.001143296, %v4403_v56  ;;  %4808 = vmatpush.msrb.mxu1 %v7475_v25  ;;  %v7446_v37 = vld [vmem:[%s15345_s12 + $0x590] sm:$0xff]  ;;  %v4376_v16 = vmul.f32 %v12371_v50, %v4375_v30  ;;  %4775 = vmatpush.msrb.mxu2 %v7430_v32  ;;  %v7429_v56 = vld [vmem:[%s15345_s12 + $0x508] sm:$0xff] }
 0x980   : > { %4831 = vmatpush.msra.mxu0 %v7491_v20  ;;  %v7474_v1 = vld [vmem:[%s15345_s12 + $0x670] sm:$0xff]  ;;  %v12526_v21 = vadd.f32 0.18741608, %v4118_v38  ;;  %v4158_v61 = vmul.f32 %v4157_v41, %v12229_v62  ;;  %v4194_v13 = vmul.f32 %v4193_v22, %v12366_v46  ;;  %4798 = vmatpush.msra.mxu3 %v7446_v37  ;;  %vm4378_vm11 = vweird.f32 %v12297_v19  ;;  %v7445_v30 = vld [vmem:[%s15345_s12 + $0x588] sm:$0xff]  ;;  %v7428_v37 = vld [vmem:[%s15345_s12 + $0x500] sm:$0xff] }
 0x981   : > { %v4208_v25 = vadd.f32 0.112945676, %v4207_v59  ;;  %v4392_v20 = vmul.f32 2.1237322e-06, %v12430_v58  ;;  %v4405_v33 = vmul.f32 %v4404_v52, %v12430_v58  ;;  %4809 = vmatpush.msrb.mxu1 %v7474_v1  ;;  %v7473_v22 = vld [vmem:[%s15345_s12 + $0x668] sm:$0xff]  ;;  %vm4379_vm12 = vweird.f32 %v12371_v50  ;;  %v3852_v59 = vpop.f32.mrf.mxu2  ;;  %4776 = vmatpush.msrb.mxu2 %v7429_v56  ;;  %v7444_v1 = vld [vmem:[%s15345_s12 + $0x580] sm:$0xff] }
 0x982   : > { %4832 = vmatpush.msra.mxu0 %v7490_v9  ;;  %v4095_v38 = vsub.f32 1.0, %v12496_v5  ;;  %v12544_v41 = vadd.f32 1.0, %v4171_v11  ;;  %v12546_v32 = vmin.f32 %v4430_v27, 16.0  ;;  %4799 = vmatpush.msra.mxu3 %v7445_v30  ;;  %v7489_v52 = vld [vmem:[%s15345_s12 + $0x6e8] sm:$0xff]  ;;  %v4346_v27 = vsel %vm12442_vm8, %v12428_v42, %v4341_v60  ;;  %v7488_v42 = vld [vmem:[%s15345_s12 + $0x6e0] sm:$0xff]  ;;  %vm12586_vm14 = vmor %vm4378_vm11, %vm4379_vm12 }
 0x983   : > { %v15445_v5 = vand.u32 2147483647, %v12297_v19  ;;  %v12566_v9 = vadd.f32 1.0, %v4131_v51  ;;  %v4209_v56 = vmul.f32 %v4208_v25, %v12366_v46  ;;  %v4406_v30 = vadd.f32 0.014752088, %v4405_v33  ;;  %4810 = vmatpush.msrb.mxu1 %v7473_v22  ;;  %4777 = vmatpush.msrb.mxu2 %v7428_v37  ;;  %v7507_v33 = vld [vmem:[%s15345_s12 + $0x778] sm:$0xff] }
 0x984   : > { %4833 = vmatpush.msra.mxu0 %v7489_v52  ;;  %v12576_v2 = vadd.f32 %v12371_v50, %v4376_v16  ;;  %v4080_v60 = vmul.f32 %v4079_v17, %v12159_v29  ;;  %v4159_v51 = vadd.f32 0.18741608, %v4158_v61  ;;  %4800 = vmatpush.msra.mxu3 %v7444_v1  ;;  %v4393_v22 = vadd.f32 0.00028619796, %v4392_v20  ;;  %v7469_v25 = vld [vmem:[%s15345_s12 + $0x648] sm:$0xff]  ;;  %v7482_v35 = vld [vmem:[%s15345_s12 + $0x6b0] sm:$0xff] }
 0x985   : > { %vm12562_vm13 = vcmp.eq.f32.partialorder %v15445_v5, 8.507059e+37  ;;  %v4195_v5 = vadd.f32 0.0036580483, %v4194_v13  ;;  %v4210_v16 = vadd.f32 0.4994258, %v4209_v56  ;;  %v4407_v29 = vmul.f32 %v4406_v30, %v12430_v58  ;;  %4811 = vmatpush.msrb.mxu1 %v7472_v45  ;;  %v7523_v13 = vld [vmem:[%s15345_s12 + $0x7f8] sm:$0xff]  ;;  %4854 = vmatpush.msra.mxu2 %v7507_v33 }
 0x986   : > { %v15450_v17 = vperm.slane %v11790_v7, 6  ;;  %4834 = vmatpush.msra.mxu0 %v7488_v42  ;;  %v15451_v52 = vand.u32 2147483648, %v12297_v19  ;;  %v4096_v1 = vmul.f32 %v12457_v28, %v4095_v38  ;;  %8010 = vrcp.f32 %v12544_v41  ;;  %4877 = vmatpush.msrb.mxu3 %v7523_v13  ;;  %v7471_v45 = vld [vmem:[%s15345_s12 + $0x658] sm:$0xff]  ;;  %v7506_v19 = vld [vmem:[%s15345_s12 + $0x770] sm:$0xff] }
 0x987   : > { %v4443_v20 = vmul.f32 3.8918573e-05, %v12546_v32  ;;  %v12613_v38 = vmul.f32 %v4346_v27, %v12403_v24  ;;  %8012 = vrcp.f32 %v12566_v9  ;;  %v4211_v56 = vmul.f32 %v4210_v16, %v12366_v46  ;;  %4812 = vmatpush.msrb.mxu1 %v7471_v45  ;;  %v7522_v42 = vld [vmem:[%s15345_s12 + $0x7f0] sm:$0xff]  ;;  %4855 = vmatpush.msra.mxu2 %v7506_v19  ;;  %v7520_v19 = vld [vmem:[%s15345_s12 + $0x7e0] sm:$0xff] }
 0x988   : > { %v12593_v61 = vadd.f32 %v3852_v59, %v15450_v17  ;;  %v4385_v37 = vor.u32 1.1754944e-38, %v15451_v52  ;;  %v7487_v59 = vld [vmem:[%s15345_s12 + $0x6d8] sm:$0xff]  ;;  %v4408_v30 = vadd.f32 0.112945676, %v4407_v29  ;;  %v7470_v33 = vld [vmem:[%s15345_s12 + $0x650] sm:$0xff]  ;;  %v4381_v27 = vsel %vm12586_vm14, %v12371_v50, %v12576_v2  ;;  %4878 = vmatpush.msrb.mxu3 %v7522_v42  ;;  %v7505_v50 = vld [vmem:[%s15345_s12 + $0x768] sm:$0xff]  ;;  %4755 = vmatmul.f32.vlgmr.msrb.gmra.mxu0 %v12268_v53 }
 0x989   : > { %4835 = vmatpush.msra.mxu0 %v7487_v59  ;;  %v7486_v24 = vld [vmem:[%s15345_s12 + $0x6d0] sm:$0xff]  ;;  %v12630_v16 = vadd.f32 1.1283791, %v4080_v60  ;;  %v4104_v29 = vand.u32 2147483648, %v12344_v12  ;;  %v4444_v17 = vadd.f32 0.001143296, %v4443_v20  ;;  %v4120_v13 = vmul.f32 %v12526_v21, %v12196_v63  ;;  %4813 = vmatpush.msrb.mxu1 %v7470_v33  ;;  %v3875_v60 = vpop.f32.mrf.mxu3 }
 0x98a   : > { %v4196_v52 = vmul.f32 %v4195_v5, %v12366_v46  ;;  %v4409_v45 = vmul.f32 %v4408_v30, %v12430_v58  ;;  %v12638_v59 = vmul.f32 0.70710677, %v12593_v61  ;;  %v12644_v2 = vadd.f32 %v12457_v28, %v4096_v1  ;;  %4856 = vmatpush.msra.mxu2 %v7505_v50  ;;  %v7521_v5 = vld [vmem:[%s15345_s12 + $0x7e8] sm:$0xff]  ;;  %v7504_v20 = vld [vmem:[%s15345_s12 + $0x760] sm:$0xff]  ;;  %4801 = vmatmul.f32.vlgmr.msra.gmra.mxu3 %v12374_v6 }
 0x98b   : > { %4836 = vmatpush.msra.mxu0 %v7486_v24  ;;  %vm4099_vm15 = vweird.f32 %v12457_v28  ;;  %v4160_v63 = vmul.f32 %v4159_v51, %v12229_v62  ;;  %v12649_v21 = vmul.f32 0.5, %v12306_v26  ;;  %v7485_v1 = vld [vmem:[%s15345_s12 + $0x6c8] sm:$0xff]  ;;  %vm4098_vm1 = vweird.f32 %v12344_v12  ;;  %4879 = vmatpush.msrb.mxu3 %v7521_v5  ;;  %v7468_v30 = vld [vmem:[%s15345_s12 + $0x640] sm:$0xff]  ;;  %v7503_v5 = vld [vmem:[%s15345_s12 + $0x758] sm:$0xff] }
 0x98c   : > { %v4102_v62 = vand.u32 2147483647, %v12344_v12  ;;  %v12662_v26 = vadd.f32 1.0, %v4211_v56  ;;  %v4394_v51 = vmul.f32 %v4393_v22, %v12430_v58  ;;  %4814 = vmatpush.msrb.mxu1 %v7469_v25  ;;  %v12674_v42 = vpop.eup %8010  ;;  %v4386_v56 = vsel %vm12562_vm13, %v4385_v37, %v4381_v27  ;;  %4857 = vmatpush.msra.mxu2 %v7504_v20  ;;  %v7484_v50 = vld [vmem:[%s15345_s12 + $0x6c0] sm:$0xff]  ;;  %v7519_v25 = vld [vmem:[%s15345_s12 + $0x7d8] sm:$0xff]  ;;  %vm12694_vm2 = vmor %vm4098_vm1, %vm4099_vm15 }
 0x98d   : > { %v4105_v22 = vor.u32 1.1754944e-38, %v4104_v29  ;;  %v4410_v33 = vadd.f32 0.4994258, %v4409_v45  ;;  %v4445_v24 = vmul.f32 %v4444_v17, %v12546_v32  ;;  %4837 = vmatpush.msra.mxu0 %v7485_v1  ;;  %v12688_v11 = vpop.eup %8012  ;;  %v12698_v27 = vadd.f32 1.1283791, %v4120_v13  ;;  %4880 = vmatpush.msrb.mxu3 %v7520_v19  ;;  %v7467_v12 = vld [vmem:[%s15345_s12 + $0x638] sm:$0xff] }
 0x98e   : > { %v4197_v29 = vadd.f32 0.05243302, %v4196_v52  ;;  %v4470_v17 = vmul.f32 %v12638_v59, %v12638_v59  ;;  %v15454_v45 = vperm.slane %v11790_v7, 7  ;;  %4815 = vmatpush.msrb.mxu1 %v7468_v30  ;;  %v4101_v13 = vsel %vm12694_vm2, %v12457_v28, %v12644_v2  ;;  %4858 = vmatpush.msra.mxu2 %v7503_v5  ;;  %v7483_v7 = vld [vmem:[%s15345_s12 + $0x6b8] sm:$0xff]  ;;  %v7466_v30 = vld [vmem:[%s15345_s12 + $0x630] sm:$0xff]  ;;  %v7501_v5 = vld [vmem:[%s15345_s12 + $0x748] sm:$0xff] }
 0x98f   : > { %v4161_v20 = vadd.f32 1.1283791, %v4160_v63  ;;  %v4411_v48 = vmul.f32 %v4410_v33, %v12430_v58  ;;  %4838 = vmatpush.msra.mxu0 %v7484_v50  ;;  %v12723_v19 = vmul.f32 %v12674_v42, %v12544_v41  ;;  %8014 = vrcp.f32 %v12662_v26  ;;  %4881 = vmatpush.msrb.mxu3 %v7519_v25  ;;  %v7518_v63 = vld [vmem:[%s15345_s12 + $0x7d0] sm:$0xff]  ;;  %v7517_v53 = vld [vmem:[%s15345_s12 + $0x7c8] sm:$0xff] }
 0x990   : > { %v12704_v1 = vadd.f32 %v3875_v60, %v15454_v45  ;;  %v7502_v60 = vld [vmem:[%s15345_s12 + $0x750] sm:$0xff]  ;;  %v4395_v28 = vadd.f32 0.0036580483, %v4394_v51  ;;  %v12726_v2 = vmin.f32 %v4470_v17, 16.0  ;;  %vm4103_vm3 = vcmp.eq.f32.partialorder %v4102_v62, 8.507059e+37  ;;  %4816 = vmatpush.msrb.mxu1 %v7467_v12  ;;  %v7465_v45 = vld [vmem:[%s15345_s12 + $0x628] sm:$0xff]  ;;  %4778 = vmatmul.f32.vlgmr.msrb.gmra.mxu2 %v12350_v8 }
 0x991   : > { %v12737_v33 = vmul.f32 %v12688_v11, %v12566_v9  ;;  %v12739_v50 = vadd.f32 1.0, %v4411_v48  ;;  %v4446_v51 = vadd.f32 0.014752088, %v4445_v24  ;;  %v4106_v25 = vsel %vm4103_vm3, %v4105_v22, %v4101_v13  ;;  %4839 = vmatpush.msra.mxu0 %v7483_v7  ;;  %4859 = vmatpush.msra.mxu2 %v7502_v60  ;;  %v7481_v12 = vld [vmem:[%s15345_s12 + $0x6a8] sm:$0xff]  ;;  %v7516_v7 = vld [vmem:[%s15345_s12 + $0x7c0] sm:$0xff] }
 0x992   : > { %v4198_v62 = vmul.f32 %v4197_v29, %v12366_v46  ;;  %v4472_v37 = vmul.f32 2.1237322e-06, %v12726_v2  ;;  %v12751_v48 = vmul.f32 0.70710677, %v12704_v1  ;;  %v12757_v24 = vmul.f32 %v4386_v56, %v12490_v55  ;;  %4882 = vmatpush.msrb.mxu3 %v7518_v63  ;;  %4817 = vmatpush.msrb.mxu1 %v7466_v30  ;;  %v7500_v55 = vld [vmem:[%s15345_s12 + $0x740] sm:$0xff] }
 0x993   : > { %v4082_v17 = vmul.f32 %v12630_v16, %v12121_v44  ;;  %v4432_v29 = vmul.f32 2.1237322e-06, %v12546_v32  ;;  %v12773_v44 = vmul.f32 %v4161_v20, %v12191_v39  ;;  %v4175_v16 = vsub.f32 1.0, %v12723_v19  ;;  %4840 = vmatpush.msra.mxu0 %v7482_v35  ;;  %4860 = vmatpush.msra.mxu2 %v7501_v5  ;;  %v7480_v5 = vld [vmem:[%s15345_s12 + $0x6a0] sm:$0xff] }
 0x994   : > { %v12777_v56 = vmul.f32 0.5, %v12332_v47  ;;  %v4396_v13 = vmul.f32 %v4395_v28, %v12430_v58  ;;  %8016 = vrcp.f32 %v12739_v50  ;;  %v4473_v63 = vadd.f32 0.00028619796, %v4472_v37  ;;  %4883 = vmatpush.msrb.mxu3 %v7517_v53  ;;  %4818 = vmatpush.msrb.mxu1 %v7465_v45  ;;  %v7464_v47 = vld [vmem:[%s15345_s12 + $0x620] sm:$0xff] }
 0x995   : > { %v12783_v60 = vmul.f32 %v4106_v25, %v4082_v17  ;;  %v4483_v39 = vmul.f32 3.8918573e-05, %v12726_v2  ;;  %v12790_v20 = vpop.eup %8014  ;;  %v4199_v28 = vadd.f32 0.18741608, %v4198_v62  ;;  %v4447_v30 = vmul.f32 %v4446_v51, %v12546_v32  ;;  %4841 = vmatpush.msra.mxu0 %v7481_v12  ;;  %4861 = vmatpush.msra.mxu2 %v7500_v55  ;;  %v7499_v25 = vld [vmem:[%s15345_s12 + $0x738] sm:$0xff] }
 0x996   : > { %v4510_v35 = vmul.f32 %v12751_v48, %v12751_v48  ;;  %vm4178_vm4 = vweird.f32 %v12544_v41  ;;  %v4433_v37 = vadd.f32 0.00028619796, %v4432_v29  ;;  %v4474_v62 = vmul.f32 %v4473_v63, %v12726_v2  ;;  %4884 = vmatpush.msrb.mxu3 %v7516_v7  ;;  %v7515_v51 = vld [vmem:[%s15345_s12 + $0x7b8] sm:$0xff]  ;;  %4819 = vmatpush.msrb.mxu1 %v7464_v47 }
 0x997   : > { %v4484_v53 = vadd.f32 0.001143296, %v4483_v39  ;;  %v4176_v17 = vmul.f32 %v12674_v42, %v4175_v16  ;;  %v4182_v45 = vand.u32 2147483647, %v12544_v41  ;;  %v4397_v12 = vadd.f32 0.05243302, %v4396_v13  ;;  %4842 = vmatpush.msra.mxu0 %v7480_v5  ;;  %4862 = vmatpush.msra.mxu2 %v7499_v25 }
 0x998   : > { %v12810_v55 = vmin.f32 %v4510_v35, 16.0  ;;  %v4184_v7 = vand.u32 2147483648, %v12544_v41  ;;  %v4214_v8 = vmul.f32 %v12790_v20, %v12662_v26  ;;  %vm4179_vm5 = vweird.f32 %v12674_v42  ;;  %4885 = vmatpush.msrb.mxu3 %v7515_v51 }
 0x999   : > { %v4485_v63 = vmul.f32 %v4484_v53, %v12726_v2  ;;  %v4448_v16 = vadd.f32 0.112945676, %v4447_v30  ;;  %v4200_v47 = vmul.f32 %v4199_v28, %v12366_v46  ;;  %v4434_v35 = vmul.f32 %v4433_v37, %v12546_v32  ;;  %vm12841_vm7 = vmor %vm4178_vm4, %vm4179_vm5 }
 0x99a   : > { %v4512_v13 = vmul.f32 2.1237322e-06, %v12810_v55  ;;  %v4523_v39 = vmul.f32 3.8918573e-05, %v12810_v55  ;;  %v12821_v6 = vpop.eup %8016  ;;  %v4475_v52 = vadd.f32 0.0036580483, %v4474_v62  ;;  %v4177_v53 = vadd.f32 %v12674_v42, %v4176_v17 }
 0x99b   : > { %v4486_v22 = vadd.f32 0.014752088, %v4485_v63  ;;  %v4398_v5 = vmul.f32 %v4397_v12, %v12430_v58  ;;  %vm12827_vm6 = vcmp.eq.f32.partialorder %v4182_v45, 8.507059e+37  ;;  %v4185_v29 = vor.u32 1.1754944e-38, %v4184_v7 }
 0x99c   : > { %v4513_v25 = vadd.f32 0.00028619796, %v4512_v13  ;;  %v4524_v19 = vadd.f32 0.001143296, %v4523_v39  ;;  %v4215_v51 = vsub.f32 1.0, %v4214_v8  ;;  %v7388_v10 = vclamps-f32 %v12426_v18, 1.0 }
 0x99d   : > { %v4414_v46 = vmul.f32 %v12821_v6, %v12739_v50  ;;  %v4449_v28 = vmul.f32 %v4448_v16, %v12546_v32  ;;  %v4487_v37 = vmul.f32 %v4486_v22, %v12726_v2  ;;  %v4283_v62 = vmul.f32 3.8918573e-05, %v12018_v31 }
 0x99e   : > { %v4201_v45 = vadd.f32 1.1283791, %v4200_v47  ;;  %v4476_v18 = vmul.f32 %v4475_v52, %v12726_v2  ;;  %v4514_v12 = vmul.f32 %v4513_v25, %v12810_v55  ;;  %v4525_v7 = vmul.f32 %v4524_v19, %v12810_v55 }
 0x99f   : > { %v4181_v22 = vsel %vm12841_vm7, %v12674_v42, %v4177_v53  ;;  %v4399_v8 = vadd.f32 0.18741608, %v4398_v5  ;;  %v4435_v63 = vadd.f32 0.0036580483, %v4434_v35  ;;  %v4488_v16 = vadd.f32 0.112945676, %v4487_v37 }
 0x9a0   : > { %v4216_v41 = vmul.f32 %v12790_v20, %v4215_v51  ;;  %v4515_v13 = vadd.f32 0.0036580483, %v4514_v12  ;;  %v4526_v39 = vadd.f32 0.014752088, %v4525_v7  ;;  %v4558_v43 = vadd.f32 1.0, %v7388_v10 }
 0x9a1   : > { %v4415_v49 = vsub.f32 1.0, %v4414_v46  ;;  %v4450_v47 = vadd.f32 0.4994258, %v4449_v28  ;;  %v4489_v52 = vmul.f32 %v4488_v16, %v12726_v2  ;;  %v4284_v36 = vadd.f32 0.001143296, %v4283_v62 }
 0x9a2   : > { %v4186_v19 = vsel %vm12827_vm6, %v4185_v29, %v4181_v22  ;;  %vm4218_vm8 = vweird.f32 %v12662_v26  ;;  %v4477_v25 = vadd.f32 0.05243302, %v4476_v18  ;;  %v4527_v42 = vmul.f32 %v4526_v39, %v12810_v55 }
 0x9a3   : > { %vm4219_vm9 = vweird.f32 %v12790_v20  ;;  %v4222_v35 = vand.u32 2147483647, %v12662_v26  ;;  %v4224_v53 = vand.u32 2147483648, %v12662_v26  ;;  %v4516_v10 = vmul.f32 %v4515_v13, %v12810_v55 }
 0x9a4   : > { %v4217_v5 = vadd.f32 %v12790_v20, %v4216_v41  ;;  %v4490_v51 = vadd.f32 0.4994258, %v4489_v52  ;;  %v4528_v46 = vadd.f32 0.112945676, %v4527_v42  ;;  %v4574_v30 = vmul.f32 %v4558_v43, %v12006_v57  ;;  %vm12877_vm10 = vmor %vm4218_vm8, %vm4219_vm9  ;;  %v7514_v57 = vld [vmem:[%s15345_s12 + $0x7b0] sm:$0xff] }
 0x9a5   : > { %v12864_v29 = vmul.f32 %v4186_v19, %v12773_v44  ;;  %v4416_v28 = vmul.f32 %v12821_v6, %v4415_v49  ;;  %v4451_v37 = vmul.f32 %v4450_v47, %v12546_v32  ;;  %v4285_v62 = vmul.f32 %v4284_v36, %v12018_v31  ;;  %v7462_v43 = vld [vmem:[%s15345_s12 + $0x610] sm:$0xff]  ;;  %4886 = vmatpush.msrb.mxu3 %v7514_v57 }
 0x9a6   : > { %v4400_v17 = vmul.f32 %v4399_v8, %v12430_v58  ;;  %v4478_v18 = vmul.f32 %v4477_v25, %v12726_v2  ;;  %v4491_v12 = vmul.f32 %v4490_v51, %v12726_v2  ;;  %v4529_v7 = vmul.f32 %v4528_v46, %v12810_v55  ;;  %4735 = vmatmul.f32.gmra.mxu1 %v4574_v30 }
 0x9a7   : > { %vm12881_vm11 = vcmp.eq.f32.partialorder %v4222_v35, 8.507059e+37  ;;  %v4225_v36 = vor.u32 1.1754944e-38, %v4224_v53  ;;  %v4517_v49 = vadd.f32 0.05243302, %v4516_v10  ;;  %v4286_v58 = vadd.f32 0.014752088, %v4285_v62 }
 0x9a8   : > { %v4221_v44 = vsel %vm12877_vm10, %v12790_v20, %v4217_v5  ;;  %vm4418_vm12 = vweird.f32 %v12739_v50  ;;  %v12889_v22 = vadd.f32 1.0, %v4491_v12  ;;  %v4530_v26 = vadd.f32 0.4994258, %v4529_v7 }
 0x9a9   : > { %v4417_v8 = vadd.f32 %v12821_v6, %v4416_v28  ;;  %vm4419_vm13 = vweird.f32 %v12821_v6  ;;  %v12893_v16 = vadd.f32 1.0, %v4451_v37  ;;  %v4287_v41 = vmul.f32 %v4286_v58, %v12018_v31  ;;  %v7497_v58 = vld [vmem:[%s15345_s12 + $0x728] sm:$0xff] }
 0x9aa   : > { %v4422_v13 = vand.u32 2147483647, %v12739_v50  ;;  %v4424_v39 = vand.u32 2147483648, %v12739_v50  ;;  %v4479_v47 = vadd.f32 0.18741608, %v4478_v18  ;;  %8018 = vrcp.f32 %v12889_v22  ;;  %vm12908_vm14 = vmor %vm4418_vm12, %vm4419_vm13 }
 0x9ab   : > { %v4226_v20 = vsel %vm12881_vm11, %v4225_v36, %v4221_v44  ;;  %v4518_v52 = vmul.f32 %v4517_v49, %v12810_v55  ;;  %v4531_v19 = vmul.f32 %v4530_v26, %v12810_v55  ;;  %v4288_v25 = vadd.f32 0.112945676, %v4287_v41  ;;  %v7513_v44 = vld [vmem:[%s15345_s12 + $0x7a8] sm:$0xff] }
 0x9ac   : > { %v15463_v42 = vclamps-f32 %v12783_v60, 1.0  ;;  %v4202_v53 = vmul.f32 %v4201_v45, %v12326_v23  ;;  %v4401_v10 = vadd.f32 1.1283791, %v4400_v17  ;;  %v4436_v51 = vmul.f32 %v4435_v63, %v12546_v32  ;;  %v7479_v63 = vld [vmem:[%s15345_s12 + $0x698] sm:$0xff]  ;;  %v7461_v26 = vld [vmem:[%s15345_s12 + $0x608] sm:$0xff]  ;;  %4887 = vmatpush.msrb.mxu3 %v7513_v44 }
 0x9ad   : > { %v4421_v46 = vsel %vm12908_vm14, %v12821_v6, %v4417_v8  ;;  %8020 = vrcp.f32 %v12893_v16  ;;  %v12917_v30 = vadd.f32 1.0, %v4531_v19  ;;  %v4289_v60 = vmul.f32 %v4288_v25, %v12018_v31  ;;  %v7463_v6 = vld [vmem:[%s15345_s12 + $0x618] sm:$0xff]  ;;  %4843 = vmatpush.msra.mxu0 %v7479_v63 }
 0x9ae   : > { %v4554_v35 = vadd.f32 1.0, %v15463_v42  ;;  %v7386_v23 = vclamps-f32 %v12864_v29, 1.0  ;;  %v12921_v45 = vmul.f32 %v4226_v20, %v4202_v53  ;;  %v4425_v50 = vor.u32 1.1754944e-38, %v4424_v39  ;;  %v7498_v29 = vld [vmem:[%s15345_s12 + $0x730] sm:$0xff]  ;;  %4820 = vmatpush.msrb.mxu1 %v7463_v6  ;;  %v7477_v39 = vld [vmem:[%s15345_s12 + $0x688] sm:$0xff] }
 0x9af   : > { %v4480_v28 = vmul.f32 %v4479_v47, %v12726_v2  ;;  %vm4423_vm15 = vcmp.eq.f32.partialorder %v4422_v13, 8.507059e+37  ;;  %v4519_v37 = vadd.f32 0.18741608, %v4518_v52  ;;  %8022 = vrcp.f32 %v12917_v30  ;;  %4863 = vmatpush.msra.mxu2 %v7498_v29  ;;  %v7496_v47 = vld [vmem:[%s15345_s12 + $0x720] sm:$0xff] }
 0x9b0   : > { %v12934_v62 = vpop.eup %8018  ;;  %v12937_v2 = vmul.f32 %v4554_v35, %v12321_v3  ;;  %v15466_v17 = vsub.f32 1.0, %v12737_v33  ;;  %v4426_v12 = vsel %vm4423_vm15, %v4425_v50, %v4421_v46  ;;  %v4290_v7 = vadd.f32 0.4994258, %v4289_v60  ;;  %v7478_v3 = vld [vmem:[%s15345_s12 + $0x690] sm:$0xff]  ;;  %4821 = vmatpush.msrb.mxu1 %v7462_v43  ;;  %v7460_v35 = vld [vmem:[%s15345_s12 + $0x600] sm:$0xff]  ;;  %v7511_v46 = vld [vmem:[%s15345_s12 + $0x798] sm:$0xff] }
 0x9b1   : > { %v4402_v33 = vmul.f32 %v4401_v10, %v12379_v54  ;;  %v12954_v36 = vadd.f32 0.05243302, %v4436_v51  ;;  %v4494_v49 = vmul.f32 %v12934_v62, %v12889_v22  ;;  %v7390_v54 = vclamps-f32 %v12613_v38, 1.0  ;;  %4844 = vmatpush.msra.mxu0 %v7478_v3  ;;  %4864 = vmatpush.msra.mxu2 %v7497_v58  ;;  %v7495_v50 = vld [vmem:[%s15345_s12 + $0x718] sm:$0xff] }
 0x9b2   : > { %v12942_v18 = vmul.f32 %v12688_v11, %v15466_v17  ;;  %v7387_v8 = vclamps-f32 %v12921_v45, 1.0  ;;  %v4481_v41 = vadd.f32 1.1283791, %v4480_v28  ;;  %v4291_v13 = vmul.f32 %v4290_v7, %v12018_v31  ;;  %v7512_v31 = vld [vmem:[%s15345_s12 + $0x7a0] sm:$0xff]  ;;  %4822 = vmatpush.msrb.mxu1 %v7461_v26  ;;  %v7494_v17 = vld [vmem:[%s15345_s12 + $0x710] sm:$0xff] }
 0x9b3   : > { %v7391_v20 = vclamps-f32 %v12757_v24, 1.0  ;;  %v12977_v52 = vpop.eup %8020  ;;  %vm4139_vm1 = vweird.f32 %v12688_v11  ;;  %v4556_v38 = vadd.f32 1.0, %v7386_v23  ;;  %v4427_v19 = vmul.f32 %v4426_v12, %v4402_v33  ;;  %v7476_v24 = vld [vmem:[%s15345_s12 + $0x680] sm:$0xff]  ;;  %4845 = vmatpush.msra.mxu0 %v7477_v39  ;;  %4865 = vmatpush.msra.mxu2 %v7496_v47  ;;  %v7510_v12 = vld [vmem:[%s15345_s12 + $0x790] sm:$0xff]  ;;  %v7493_v33 = vld [vmem:[%s15345_s12 + $0x708] sm:$0xff] }
 0x9b4   : > { %v4495_v25 = vsub.f32 1.0, %v4494_v49  ;;  %v4560_v42 = vadd.f32 1.0, %v7390_v54  ;;  %v4504_v53 = vand.u32 2147483648, %v12889_v22  ;;  %v4520_v10 = vmul.f32 %v4519_v37, %v12810_v55  ;;  %4888 = vmatpush.msrb.mxu3 %v7512_v31  ;;  %4823 = vmatpush.msrb.mxu1 %v7460_v35  ;;  %v7509_v49 = vld [vmem:[%s15345_s12 + $0x788] sm:$0xff] }
 0x9b5   : > { %v12991_v5 = vadd.f32 1.0, %v4291_v13  ;;  %v4561_v51 = vadd.f32 1.0, %v7391_v20  ;;  %v12996_v60 = vpop.eup %8022  ;;  %vm4138_vm2 = vweird.f32 %v12566_v9  ;;  %vm4499_vm3 = vweird.f32 %v12934_v62  ;;  %4846 = vmatpush.msra.mxu0 %v7476_v24  ;;  %4866 = vmatpush.msra.mxu2 %v7495_v50  ;;  %v7508_v13 = vld [vmem:[%s15345_s12 + $0x780] sm:$0xff] }
 0x9b6   : > { %v4496_v23 = vmul.f32 %v12934_v62, %v4495_v25  ;;  %v4502_v45 = vand.u32 2147483647, %v12889_v22  ;;  %v4576_v55 = vmul.f32 %v4560_v42, %v12057_v14  ;;  %v4557_v28 = vadd.f32 1.0, %v7387_v8  ;;  %4889 = vmatpush.msrb.mxu3 %v7511_v46  ;;  %4824 = vmatmul.f32.vlgmr.msrb.gmra.mxu1 %v12937_v2  ;;  %vm13062_vm10 = vmor %vm4138_vm2, %vm4139_vm1 }
 0x9b7   : > { %v13008_v37 = vmul.f32 %v12977_v52, %v12893_v16  ;;  %v4534_v6 = vmul.f32 %v12996_v60, %v12917_v30  ;;  %8024 = vrcp.f32 %v12991_v5  ;;  %v4482_v63 = vmul.f32 %v4481_v41, %v12638_v59  ;;  %4867 = vmatpush.msra.mxu2 %v7494_v17  ;;  %v7492_v41 = vld [vmem:[%s15345_s12 + $0x700] sm:$0xff] }
 0x9b8   : > { %v4497_v14 = vadd.f32 %v12934_v62, %v4496_v23  ;;  %vm4498_vm4 = vweird.f32 %v12889_v22  ;;  %4781 = vmatmul.f32.gmra.mxu2 %v4576_v55  ;;  %v4577_v29 = vmul.f32 %v4561_v51, %v12237_v34  ;;  %v4505_v59 = vor.u32 1.1754944e-38, %v4504_v53  ;;  %4890 = vmatpush.msrb.mxu3 %v7510_v12 }
 0x9b9   : > { %vm4500_vm5 = vmor %vm4498_vm4, %vm4499_vm3  ;;  %v4521_v7 = vadd.f32 1.1283791, %v4520_v10  ;;  %v4535_v57 = vsub.f32 1.0, %v4534_v6  ;;  %v7392_v22 = vclamps-f32 %v4427_v19, 1.0  ;;  %vm4503_vm6 = vcmp.eq.f32.partialorder %v4502_v45, 8.507059e+37  ;;  %4868 = vmatpush.msra.mxu2 %v7493_v33 }
 0x9ba   : > { %v4501_v34 = vsel %vm4500_vm5, %v12934_v62, %v4497_v14  ;;  %v4542_v43 = vand.u32 2147483647, %v12917_v30  ;;  %v4544_v3 = vand.u32 2147483648, %v12917_v30  ;;  %4804 = vmatmul.f32.gmra.mxu3 %v4577_v29  ;;  %vm4539_vm7 = vweird.f32 %v12996_v60 }
 0x9bb   : > { %v4506_v58 = vsel %vm4503_vm6, %v4505_v59, %v4501_v34  ;;  %v4536_v2 = vmul.f32 %v12996_v60, %v4535_v57  ;;  %v4562_v62 = vadd.f32 1.0, %v7392_v22  ;;  %v4137_v44 = vadd.f32 %v12688_v11, %v12942_v18  ;;  %4891 = vmatpush.msrb.mxu3 %v7509_v49  ;;  %4869 = vmatpush.msra.mxu2 %v7492_v41  ;;  %v15471_v22 = vld [vmem:[#allocation4_spill] sm:$0xff]  ;;  %v15472_v49 = vld [vmem:[#allocation3_spill] sm:$0xff]  ;;  %v15474_v41 = vld [vmem:[#allocation5_spill] sm:$0xff] }
 0x9bc   : > { %v4572_v26 = vmul.f32 %v4556_v38, %v12464_v0  ;;  %v4438_v54 = vmul.f32 %v12954_v36, %v12546_v32  ;;  %v4507_v8 = vmul.f32 %v4506_v58, %v4482_v63  ;;  %v4455_v47 = vsub.f32 1.0, %v13008_v37 }
 0x9bd   : > { %v8025_v39 = vpop.eup %8024  ;;  %v4537_v20 = vadd.f32 %v12996_v60, %v4536_v2  ;;  %vm4538_vm8 = vweird.f32 %v12917_v30  ;;  %v4578_v0 = vmul.f32 %v4562_v62, %v12777_v56  ;;  %v15467_v18 = vand.u32 2147483648, %v12566_v9  ;;  %4892 = vmatpush.msrb.mxu3 %v7508_v13 }
 0x9be   : > { %v4573_v38 = vmul.f32 %v4557_v28, %v12649_v21  ;;  %vm4540_vm9 = vmor %vm4538_vm8, %vm4539_vm7  ;;  %v4545_v19 = vor.u32 1.1754944e-38, %v4544_v3  ;;  %v4294_v25 = vmul.f32 %v8025_v39, %v12991_v5  ;;  %v3892_v56 = vmul.f32 0.5, %v12593_v61 }
 0x9bf   : > { %v4145_v36 = vor.u32 1.1754944e-38, %v15467_v18  ;;  %v4522_v31 = vmul.f32 %v4521_v7, %v12751_v48  ;;  %v4541_v21 = vsel %vm4540_vm9, %v12996_v60, %v4537_v20  ;;  %vm4543_vm11 = vcmp.eq.f32.partialorder %v4542_v43, 8.507059e+37  ;;  %4827 = vmatmul.f32.gmra.mxu1 %v4578_v0  ;;  %v7542_v20 = vld [vmem:[%s15340_s7 + $0x3f0] sm:$0xff]  ;;  %v7541_v0 = vld [vmem:[%s15340_s7 + $0x3e8] sm:$0xff]  ;;  %v7540_v18 = vld [vmem:[%s15340_s7 + $0x3e0] sm:$0xff] }
 0x9c0   : > { %v4141_v42 = vsel %vm13062_vm10, %v12688_v11, %v4137_v44  ;;  %v4546_v35 = vsel %vm4543_vm11, %v4545_v19, %v4541_v21  ;;  %v4295_v24 = vsub.f32 1.0, %v4294_v25  ;;  %4870 = vmatmul.f32.vlgmr.msra.gmra.mxu2 %v4572_v26  ;;  %v7394_v53 = vclamps-f32 %v4507_v8, 1.0  ;;  %v15473_v44 = vld [vmem:[#allocation2_spill] sm:$0xff]  ;;  %v7538_v19 = vld [vmem:[%s15340_s7 + $0x3d0] sm:$0xff]  ;;  %v7537_v25 = vld [vmem:[%s15340_s7 + $0x3c8] sm:$0xff] }
 0x9c1   : > { %v4439_v10 = vadd.f32 0.18741608, %v4438_v54  ;;  %v4456_v51 = vmul.f32 %v12977_v52, %v4455_v47  ;;  %v4547_v46 = vmul.f32 %v4546_v35, %v4522_v31  ;;  %v4304_v61 = vand.u32 2147483648, %v12991_v5  ;;  %v7543_v47 = vld [vmem:[%s15340_s7 + $0x3f8] sm:$0xff] }
 0x9c2   : > { %v4296_v48 = vmul.f32 %v8025_v39, %v4295_v24  ;;  %vm4299_vm12 = vweird.f32 %v8025_v39  ;;  %v4302_v60 = vand.u32 2147483647, %v12991_v5  ;;  %4893 = vmatmul.f32.vlgmr.msrb.gmra.mxu3 %v4573_v38  ;;  %v4564_v23 = vadd.f32 1.0, %v7394_v53  ;;  %5012 = vmatpush.msrb.mxu2 %v7543_v47  ;;  %v7539_v38 = vld [vmem:[%s15340_s7 + $0x3d8] sm:$0xff]  ;;  %v7534_v24 = vld [vmem:[%s15340_s7 + $0x3b0] sm:$0xff]  ;;  %v7576_v47 = vld [vmem:[%s15340_s7 + $0x4e0] sm:$0xff] }
 0x9c3   : > { %v4282_v11 = vmul.f32 %v12308_v40, %v11958_v15  ;;  %v4122_v45 = vmul.f32 %v12698_v27, %v12162_v4  ;;  %v15470_v55 = vand.u32 2147483647, %v12566_v9  ;;  %v7395_v50 = vclamps-f32 %v4547_v46, 1.0  ;;  %v7535_v31 = vld [vmem:[%s15340_s7 + $0x3b8] sm:$0xff]  ;;  %v7948_v53 = vld [vmem:[%s15346_s13 + $0x1] ss:$0 sm:$0xff] }
 0x9c4   : > { %v4297_v37 = vadd.f32 %v8025_v39, %v4296_v48  ;;  %vm4298_vm14 = vweird.f32 %v12991_v5  ;;  %v4580_v6 = vmul.f32 %v4564_v23, %v3892_v56  ;;  %v4440_v63 = vmul.f32 %v4439_v10, %v12546_v32  ;;  %5013 = vmatpush.msrb.mxu2 %v7542_v20  ;;  %v7536_v56 = vld [vmem:[%s15340_s7 + $0x3c0] sm:$0xff]  ;;  %v7533_v10 = vld [vmem:[%s15340_s7 + $0x3a8] sm:$0xff]  ;;  %v7531_v48 = vld [vmem:[%s15340_s7 + $0x398] sm:$0xff] }
 0x9c5   : > { %vm4143_vm13 = vcmp.eq.f32.partialorder %v15470_v55, 8.507059e+37  ;;  %v3893_v14 = vmul.f32 0.5, %v12704_v1  ;;  %vm4300_vm15 = vmor %vm4298_vm14, %vm4299_vm12  ;;  %v4305_v29 = vor.u32 1.1754944e-38, %v4304_v61  ;;  %v4565_v17 = vadd.f32 1.0, %v7395_v50  ;;  %v7575_v20 = vld [vmem:[%s15340_s7 + $0x4d8] sm:$0xff] }
 0x9c6   : > { %v4146_v28 = vsel %vm4143_vm13, %v4145_v36, %v4141_v42  ;;  %v4457_v15 = vadd.f32 %v12977_v52, %v4456_v51  ;;  %vm4459_vm1 = vweird.f32 %v12977_v52  ;;  %v4301_v4 = vsel %vm4300_vm15, %v8025_v39, %v4297_v37  ;;  %5014 = vmatpush.msrb.mxu2 %v7541_v0  ;;  %v7532_v51 = vld [vmem:[%s15340_s7 + $0x3a0] sm:$0xff]  ;;  %v7559_v0 = vld [vmem:[%s15340_s7 + $0x468] sm:$0xff] }
 0x9c7   : > { %vm4303_vm2 = vcmp.eq.f32.partialorder %v4302_v60, 8.507059e+37  ;;  %v4464_v40 = vand.u32 2147483648, %v12893_v16  ;;  %v4581_v27 = vmul.f32 %v4565_v17, %v3893_v14  ;;  %v4147_v12 = vmul.f32 %v4146_v28, %v4122_v45  ;;  %v7530_v60 = vld [vmem:[%s15340_s7 + $0x390] sm:$0xff]  ;;  %v7529_v28 = vld [vmem:[%s15340_s7 + $0x388] sm:$0xff] }
 0x9c8   : > { %v4306_v9 = vsel %vm4303_vm2, %v4305_v29, %v4301_v4  ;;  %vm4458_vm3 = vweird.f32 %v12893_v16  ;;  %v4462_v32 = vand.u32 2147483647, %v12893_v16  ;;  %4873 = vmatmul.f32.gmra.mxu2 %v4580_v6  ;;  %v4441_v1 = vadd.f32 1.1283791, %v4440_v63  ;;  %v7528_v6 = vld [vmem:[%s15340_s7 + $0x380] sm:$0xff] }
 0x9c9   : > { %v4307_v5 = vmul.f32 %v4306_v9, %v4282_v11  ;;  %vm4460_vm4 = vmor %vm4458_vm3, %vm4459_vm1  ;;  %v4465_v57 = vor.u32 1.1754944e-38, %v4464_v40  ;;  %v3887_v34 = vmul.f32 0.5, %v15471_v22  ;;  %v7385_v43 = vclamps-f32 %v4147_v12, 1.0  ;;  %5015 = vmatpush.msrb.mxu2 %v7540_v18  ;;  %v7949_v22 = vld [vmem:[%s15347_s14 + $0x1] ss:$0 sm:$0xff]  ;;  %v8100_v18 = vld [vmem:[%s15336_s3 + $0x8] sm:$0xff] }
 0x9ca   : > { %v4461_v59 = vsel %vm4460_vm4, %v12977_v52, %v4457_v15  ;;  %4896 = vmatmul.f32.gmra.mxu3 %v4581_v27  ;;  %vm4463_vm5 = vcmp.eq.f32.partialorder %v4462_v32, 8.507059e+37  ;;  %v4442_v58 = vmul.f32 %v4441_v1, %v15472_v49  ;;  %v3883_v26 = vmul.f32 0.5, %v15473_v44  ;;  %v7579_v44 = vld [vmem:[%s15340_s7 + $0x4f8] sm:$0xff] }
 0x9cb   : > { %v7389_v7 = vclamps-f32 %v4307_v5, 1.0  ;;  %v4466_v33 = vsel %vm4463_vm5, %v4465_v57, %v4461_v59  ;;  %v4555_v62 = vadd.f32 1.0, %v7385_v43  ;;  %v3891_v13 = vmul.f32 0.5, %v15474_v41  ;;  %5016 = vmatpush.msrb.mxu2 %v7539_v38  ;;  %v8099_v41 = vld [vmem:[%s15336_s3 + $0x10] sm:$0xff] }
 0x9cc   : > { %v4467_v16 = vmul.f32 %v4466_v33, %v4442_v58  ;;  %v15475_v58 = vld [vmem:[#allocation7_spill] sm:$0xff]  ;;  %v7574_v38 = vld [vmem:[%s15340_s7 + $0x4d0] sm:$0xff] }
 0x9cd   : > { %v4559_v3 = vadd.f32 1.0, %v7389_v7  ;;  %v4571_v54 = vmul.f32 %v4555_v62, %v3883_v26  ;;  %5017 = vmatpush.msrb.mxu2 %v7538_v19  ;;  %v15476_v62 = vld [vmem:[#allocation6_spill] sm:$0xff] }
 0x9ce   : > { %v7393_v8 = vclamps-f32 %v4467_v16, 1.0  ;;  %v8097_v26 = vld [vmem:[%s15336_s3] sm:$0xff] }
 0x9cf   : > { %v4575_v2 = vmul.f32 %v4559_v3, %v3887_v34  ;;  %5018 = vmatpush.msrb.mxu2 %v7537_v25  ;;  %v7558_v19 = vld [vmem:[%s15340_s7 + $0x460] sm:$0xff]  ;;  %v7573_v25 = vld [vmem:[%s15340_s7 + $0x4c8] sm:$0xff] }
 0x9d0   : > { %v4563_v52 = vadd.f32 1.0, %v7393_v8  ;;  %v7578_v8 = vld [vmem:[%s15340_s7 + $0x4f0] sm:$0xff] }
 0x9d1   : > { %4758 = vmatmul.f32.gmra.mxu0 %v4575_v2  ;;  %5019 = vmatpush.msrb.mxu2 %v7536_v56  ;;  %v7557_v56 = vld [vmem:[%s15340_s7 + $0x458] sm:$0xff] }
 0x9d2   : > { %v4579_v39 = vmul.f32 %v4563_v52, %v3891_v13  ;;  %v7577_v52 = vld [vmem:[%s15340_s7 + $0x4e8] sm:$0xff]  ;;  %v7561_v13 = vld [vmem:[%s15340_s7 + $0x478] sm:$0xff] }
 0x9d3   : > { %5020 = vmatpush.msrb.mxu2 %v7535_v31  ;;  %v7572_v31 = vld [vmem:[%s15340_s7 + $0x4c0] sm:$0xff] }
 0x9d5   : > { %5021 = vmatpush.msrb.mxu2 %v7534_v24  ;;  %v8103_v24 = vld [vmem:[%s15336_s3 + $0x30] sm:$0xff] }
 0x9d7   : > { %5022 = vmatpush.msrb.mxu2 %v7533_v10  ;;  %v7554_v10 = vld [vmem:[%s15340_s7 + $0x440] sm:$0xff] }
 0x9d9   : > { %4847 = vmatmul.f32.vlgmr.msra.gmra.mxu0 %v4571_v54  ;;  %5023 = vmatpush.msrb.mxu2 %v7532_v51  ;;  %v8098_v54 = vld [vmem:[%s15336_s3 + $0x20] sm:$0xff]  ;;  %v7569_v51 = vld [vmem:[%s15340_s7 + $0x4a8] sm:$0xff] }
 0x9db   : > { %5024 = vmatpush.msrb.mxu2 %v7531_v48  ;;  %v7552_v48 = vld [vmem:[%s15340_s7 + $0x430] sm:$0xff] }
 0x9dd   : > { %5025 = vmatpush.msrb.mxu2 %v7530_v60  ;;  %v7567_v60 = vld [vmem:[%s15340_s7 + $0x498] sm:$0xff] }
 0x9df   : > { %5026 = vmatpush.msrb.mxu2 %v7529_v28  ;;  %v7549_v28 = vld [vmem:[%s15340_s7 + $0x418] sm:$0xff] }
 0x9e1   : > { %4850 = vmatmul.f32.gmra.mxu0 %v4579_v39  ;;  %5027 = vmatpush.msrb.mxu2 %v7528_v6  ;;  %v7560_v39 = vld [vmem:[%s15340_s7 + $0x470] sm:$0xff] }
 0x9e2   : > { %v7548_v6 = vld [vmem:[%s15340_s7 + $0x410] sm:$0xff] }
 0x9fb   : > { %v4733_v36 = vpop.f32.mrf.mxu1 }
 0x9fc   : > { %v4734_v46 = vadd.f32 %v7948_v53, %v4733_v36  ;;  %v8101_v36 = vld [vmem:[%s15336_s3 + $0x28] sm:$0xff] }
 0xa05   : > { %v4756_v42 = vpop.f32.mrf.mxu0 }
 0xa06   : > { %v4757_v23 = vadd.f32 %v4756_v42, %v4734_v46  ;;  %v7571_v42 = vld [vmem:[%s15340_s7 + $0x4b8] sm:$0xff] }
 0xa07   : > { %v7553_v46 = vld [vmem:[%s15340_s7 + $0x438] sm:$0xff] }
 0xa0d   : > { %v4802_v35 = vpop.f32.mrf.mxu3 }
 0xa13   : > { %v4779_v30 = vpop.f32.mrf.mxu2 }
 0xa14   : > { %v4780_v37 = vadd.f32 %v4779_v30, %v4757_v23  ;;  %v8102_v30 = vld [vmem:[%s15336_s3 + $0x18] sm:$0xff]  ;;  %v7551_v23 = vld [vmem:[%s15340_s7 + $0x428] sm:$0xff] }
 0xa16   : > { %v4803_v14 = vadd.f32 %v4802_v35, %v4780_v37  ;;  %v7555_v35 = vld [vmem:[%s15340_s7 + $0x448] sm:$0xff]  ;;  %v7564_v37 = vld [vmem:[%s15340_s7 + $0x480] sm:$0xff] }
 0xa23   : > { %v4736_v21 = vpop.f32.mrf.mxu1 }
 0xa24   : > { %v4737_v11 = vadd.f32 %v7948_v53, %v4736_v21  ;;  %v7556_v21 = vld [vmem:[%s15340_s7 + $0x450] sm:$0xff] }
 0xa25   : > { %v7570_v53 = vld [vmem:[%s15340_s7 + $0x4b0] sm:$0xff] }
 0xa33   : > { %v4825_v45 = vpop.f32.mrf.mxu1 }
 0xa34   : > { %v4826_v4 = vadd.f32 %v4825_v45, %v4803_v14  ;;  %v7566_v45 = vld [vmem:[%s15340_s7 + $0x490] sm:$0xff]  ;;  %v7546_v14 = vld [vmem:[%s15340_s7 + $0x400] sm:$0xff] }
 0xa3b   : > { %v4782_v61 = vpop.f32.mrf.mxu2 }
 0xa3c   : > { %v4828_v9 = vpop.f32.mrf.mxu1 }
 0xa3d   : > { %v4805_v50 = vpop.f32.mrf.mxu3 }
 0xa43   : > { %v4871_v17 = vpop.f32.mrf.mxu2 }
 0xa45   : > { %v4894_v27 = vpop.f32.mrf.mxu3 }
 0xa4b   : > { %v4874_v59 = vpop.f32.mrf.mxu2 }
 0xa4d   : > { %v4897_v43 = vpop.f32.mrf.mxu3 }
 0xa4e   : > { %v4759_v55 = vpop.f32.mrf.mxu0 }
 0xa4f   : > { %v4760_v63 = vadd.f32 %v4759_v55, %v4737_v11  ;;  %v8104_v11 = vld [vmem:[%s15336_s3 + $0x38] sm:$0xff]  ;;  %v7550_v55 = vld [vmem:[%s15340_s7 + $0x420] sm:$0xff] }
 0xa51   : > { %v4783_v29 = vadd.f32 %v4782_v61, %v4760_v63  ;;  %v7568_v61 = vld [vmem:[%s15340_s7 + $0x4a0] sm:$0xff]  ;;  %v7547_v63 = vld [vmem:[%s15340_s7 + $0x408] sm:$0xff] }
 0xa53   : > { %v4806_v40 = vadd.f32 %v4805_v50, %v4783_v29  ;;  %v7565_v50 = vld [vmem:[%s15340_s7 + $0x488] sm:$0xff]  ;;  %v7597_v29 = vld [vmem:[%s15340_s7 + $0x578] sm:$0xff] }
 0xa55   : > { %v4829_v32 = vadd.f32 %v4828_v9, %v4806_v40  ;;  %v7593_v40 = vld [vmem:[%s15340_s7 + $0x558] sm:$0xff]  ;;  %v7592_v9 = vld [vmem:[%s15340_s7 + $0x550] sm:$0xff] }
 0xa56   : > { %v4848_v15 = vpop.f32.mrf.mxu0 }
 0xa57   : > { %v4849_v12 = vadd.f32 %v4848_v15, %v4826_v4  ;;  %v7595_v15 = vld [vmem:[%s15340_s7 + $0x568] sm:$0xff]  ;;  %v7594_v4 = vld [vmem:[%s15340_s7 + $0x560] sm:$0xff] }
 0xa59   : > { %v4872_v5 = vadd.f32 %v4871_v17, %v4849_v12  ;;  %v7596_v17 = vld [vmem:[%s15340_s7 + $0x570] sm:$0xff]  ;;  %v7590_v12 = vld [vmem:[%s15340_s7 + $0x540] sm:$0xff] }
 0xa5b   : > { %v4895_v57 = vadd.f32 %v4894_v27, %v4872_v5  ;;  %v7591_v27 = vld [vmem:[%s15340_s7 + $0x548] sm:$0xff]  ;;  %v7588_v5 = vld [vmem:[%s15340_s7 + $0x530] sm:$0xff] }
 0xa5d   : > { %v4905_v33 = vmul.f32 %v7949_v22, %v4895_v57  ;;  %v7584_v57 = vld [vmem:[%s15340_s7 + $0x510] sm:$0xff] }
 0xa5e   : > { %v4851_v1 = vpop.f32.mrf.mxu0 }
 0xa5f   : > { %v4852_v7 = vadd.f32 %v4851_v1, %v4829_v32  ;;  %v13152_v16 = vadd.f32 %v4905_v33, %v15476_v62  ;;  %v7589_v32 = vld [vmem:[%s15340_s7 + $0x538] sm:$0xff]  ;;  %v7587_v1 = vld [vmem:[%s15340_s7 + $0x528] sm:$0xff] }
 0xa61   : > { %v4875_v34 = vadd.f32 %v4874_v59, %v4852_v7  ;;  %v7586_v59 = vld [vmem:[%s15340_s7 + $0x520] sm:$0xff]  ;;  %v7585_v7 = vld [vmem:[%s15340_s7 + $0x518] sm:$0xff] }
 0xa63   : > { %v4898_v3 = vadd.f32 %v4897_v43, %v4875_v34  ;;  %v7582_v34 = vld [vmem:[%s15340_s7 + $0x500] sm:$0xff] }
 0xa65   : > { %v4906_v49 = vmul.f32 %v7949_v22, %v4898_v3  ;;  %v7583_v22 = vld [vmem:[%s15340_s7 + $0x508] sm:$0xff] }
 0xa67   : > { %v13149_v2 = vadd.f32 %v4906_v49, %v15475_v58 }
 0xa69   : > { %4923 = vmatpush.msra.mxu1 %v13149_v2  ;;  %4963 = vmatpush.msrb.mxu0 %v13149_v2 }
 0xa6a   : > { %5049 = vmatpush.msra.mxu3 %v13149_v2  ;;  %5179 = vmatpush.msra.mxu2 %v13149_v2 }
 0xa6b   : > { %4924 = vmatpush.msra.mxu1 %v13152_v16  ;;  %4964 = vmatpush.msrb.mxu0 %v13152_v16 }
 0xa6c   : > { %5050 = vmatpush.msra.mxu3 %v13152_v16  ;;  %5180 = vmatpush.msra.mxu2 %v13152_v16 }
 0xa6d   : > { %7526 = vmatmul.msk.f32.vlgmr.msra.gmra.mxu1 %vm535_vm0, %v8097_v26  ;;  %7562 = vmatmul.msk.f32.vlgmr.msra.gmra.mxu3 %vm535_vm0, %v8098_v54  ;;  %v7614_v26 = vld [vmem:[%s15340_s7 + $0x5f0] sm:$0xff]  ;;  %v7633_v54 = vld [vmem:[%s15340_s7 + $0x678] sm:$0xff] }
 0xa6e   : > { %5075 = vmatpush.msra.mxu0 %v7579_v44  ;;  %5114 = vmatpush.msrb.mxu3 %v13149_v2  ;;  %v7615_v44 = vld [vmem:[%s15340_s7 + $0x5f8] sm:$0xff] }
 0xa6f   : > { %7544 = vmatmul.msk.f32.vlgmr.msrb.gmra.mxu0 %vm535_vm0, %v8099_v41  ;;  %4989 = vmatpush.msrb.mxu1 %v7561_v13  ;;  %v7613_v41 = vld [vmem:[%s15340_s7 + $0x5e8] sm:$0xff] }
 0xa70   : > { %5076 = vmatpush.msra.mxu0 %v7578_v8  ;;  %5115 = vmatpush.msrb.mxu3 %v13152_v16  ;;  %v7632_v8 = vld [vmem:[%s15340_s7 + $0x670] sm:$0xff]  ;;  %v7631_v13 = vld [vmem:[%s15340_s7 + $0x668] sm:$0xff] }
 0xa71   : > { %4990 = vmatpush.msrb.mxu1 %v7560_v39  ;;  %v7612_v39 = vld [vmem:[%s15340_s7 + $0x5e0] sm:$0xff] }
 0xa72   : > { %5077 = vmatpush.msra.mxu0 %v7577_v52  ;;  %5205 = vmatpush.msra.mxu3 %v7615_v44  ;;  %v8105_v52 = vld [vmem:[%s15336_s3 + $0x40] sm:$0xff] }
 0xa73   : > { %4991 = vmatpush.msrb.mxu1 %v7559_v0  ;;  %v7629_v0 = vld [vmem:[%s15340_s7 + $0x658] sm:$0xff]  ;;  %v7644_v44 = vld [vmem:[%s15340_s7 + $0x6c0] sm:$0xff] }
 0xa74   : > { %5078 = vmatpush.msra.mxu0 %v7576_v47  ;;  %5206 = vmatpush.msra.mxu3 %v7614_v26  ;;  %v7630_v47 = vld [vmem:[%s15340_s7 + $0x660] sm:$0xff] }
 0xa75   : > { %7527 = vmatmul.msk.f32.gmra.mxu1 %vm535_vm0, %v8100_v18  ;;  %7563 = vmatmul.msk.f32.gmra.mxu3 %vm535_vm0, %v8101_v36  ;;  %v8106_v36 = vld [vmem:[%s15336_s3 + $0x50] sm:$0xff]  ;;  %v7618_v26 = vld [vmem:[%s15340_s7 + $0x600] sm:$0xff] }
 0xa76   : > { %5079 = vmatpush.msra.mxu0 %v7575_v20  ;;  %4992 = vmatpush.msrb.mxu1 %v7558_v19  ;;  %v7611_v20 = vld [vmem:[%s15340_s7 + $0x5d8] sm:$0xff]  ;;  %v7628_v19 = vld [vmem:[%s15340_s7 + $0x650] sm:$0xff] }
 0xa77   : > { %7545 = vmatmul.msk.f32.gmra.mxu0 %vm535_vm0, %v8102_v30  ;;  %5207 = vmatpush.msra.mxu3 %v7613_v41  ;;  %v7609_v30 = vld [vmem:[%s15340_s7 + $0x5c8] sm:$0xff]  ;;  %v7640_v41 = vld [vmem:[%s15340_s7 + $0x6a0] sm:$0xff] }
 0xa78   : > { %5080 = vmatpush.msra.mxu0 %v7574_v38  ;;  %4993 = vmatpush.msrb.mxu1 %v7557_v56  ;;  %v7610_v38 = vld [vmem:[%s15340_s7 + $0x5d0] sm:$0xff]  ;;  %v13398_v56 = vld [vmem:[%s15335_s2 + $0x78] sm:$0xff] }
 0xa79   : > { %5208 = vmatpush.msra.mxu3 %v7612_v39  ;;  %v7639_v39 = vld [vmem:[%s15340_s7 + $0x698] sm:$0xff] }
 0xa7a   : > { %5081 = vmatpush.msra.mxu0 %v7573_v25  ;;  %4994 = vmatpush.msrb.mxu1 %v7556_v21  ;;  %v8107_v25 = vld [vmem:[%s15336_s3 + $0x48] sm:$0xff] }
 0xa7b   : > { %5209 = vmatpush.msra.mxu3 %v7611_v20  ;;  %v13410_v21 = vld [vmem:[%s15335_s2 + $0x68] sm:$0xff] }
 0xa7c   : > { %5082 = vmatpush.msra.mxu0 %v7572_v31  ;;  %4995 = vmatpush.msrb.mxu1 %v7555_v35  ;;  %v13404_v31 = vld [vmem:[%s15335_s2 + $0x70] sm:$0xff]  ;;  %v8111_v35 = vld [vmem:[%s15336_s3 + $0x58] sm:$0xff] }
 0xa7d   : > { %7580 = vmatmul.msk.f32.vlgmr.msrb.gmra.mxu3 %vm535_vm0, %v8103_v24  ;;  %v13420_v24 = vld [vmem:[%s15335_s2 + $0x60] sm:$0xff] }
 0xa7e   : > { %5083 = vmatpush.msra.mxu0 %v7571_v42  ;;  %4996 = vmatpush.msrb.mxu1 %v7554_v10  ;;  %v13432_v10 = vld [vmem:[%s15335_s2 + $0x50] sm:$0xff] }
 0xa7f   : > { %5210 = vmatpush.msra.mxu3 %v7610_v38  ;;  %v7636_v38 = vld [vmem:[%s15340_s7 + $0x680] sm:$0xff] }
 0xa80   : > { %5084 = vmatpush.msra.mxu0 %v7570_v53  ;;  %4997 = vmatpush.msrb.mxu1 %v7553_v46  ;;  %v13426_v53 = vld [vmem:[%s15335_s2 + $0x58] sm:$0xff]  ;;  %v8116_v46 = vld [vmem:[%s15336_s3 + $0x60] sm:$0xff] }
 0xa81   : > { %5211 = vmatpush.msra.mxu3 %v7609_v30 }
 0xa82   : > { %5085 = vmatpush.msra.mxu0 %v7569_v51  ;;  %4998 = vmatpush.msrb.mxu1 %v7552_v48  ;;  %v13438_v51 = vld [vmem:[%s15335_s2 + $0x48] sm:$0xff]  ;;  %v13454_v48 = vld [vmem:[%s15335_s2 + $0x38] sm:$0xff] }
 0xa84   : > { %5086 = vmatpush.msra.mxu0 %v7568_v61  ;;  %4999 = vmatpush.msrb.mxu1 %v7551_v23  ;;  %v13448_v61 = vld [vmem:[%s15335_s2 + $0x40] sm:$0xff]  ;;  %v13466_v23 = vld [vmem:[%s15335_s2 + $0x28] sm:$0xff] }
 0xa85   : > { %7581 = vmatmul.msk.f32.gmra.mxu3 %vm535_vm0, %v8104_v11  ;;  %v8121_v11 = vld [vmem:[%s15336_s3 + $0x68] sm:$0xff] }
 0xa86   : > { %5087 = vmatpush.msra.mxu0 %v7567_v60  ;;  %5000 = vmatpush.msrb.mxu1 %v7550_v55  ;;  %v13460_v60 = vld [vmem:[%s15335_s2 + $0x30] sm:$0xff]  ;;  %v13482_v55 = vld [vmem:[%s15335_s2 + $0x18] sm:$0xff] }
 0xa88   : > { %5088 = vmatpush.msra.mxu0 %v7566_v45  ;;  %5001 = vmatpush.msrb.mxu1 %v7549_v28  ;;  %v13476_v45 = vld [vmem:[%s15335_s2 + $0x20] sm:$0xff]  ;;  %v13494_v28 = vld [vmem:[%s15335_s2 + $0x8] sm:$0xff] }
 0xa8a   : > { %5089 = vmatpush.msra.mxu0 %v7565_v50  ;;  %5002 = vmatpush.msrb.mxu1 %v7548_v6  ;;  %v13488_v50 = vld [vmem:[%s15335_s2 + $0x10] sm:$0xff]  ;;  %v7608_v6 = vld [vmem:[%s15340_s7 + $0x5c0] sm:$0xff] }
 0xa8b   : > { %5212 = vmatpush.msra.mxu3 %v7608_v6 }
 0xa8c   : > { %5090 = vmatpush.msra.mxu0 %v7564_v37  ;;  %5003 = vmatpush.msrb.mxu1 %v7547_v63  ;;  %v13500_v37 = vld [vmem:[%s15335_s2] sm:$0xff]  ;;  %v7627_v63 = vld [vmem:[%s15340_s7 + $0x648] sm:$0xff] }
 0xa8e   : > { %5244 = vmatpush.msrb.mxu0 %v13149_v2  ;;  %5004 = vmatpush.msrb.mxu1 %v7546_v14  ;;  %v7607_v14 = vld [vmem:[%s15340_s7 + $0x5b8] sm:$0xff] }
 0xa8f   : > { %5213 = vmatpush.msra.mxu3 %v7607_v14 }
 0xa90   : > { %5245 = vmatpush.msrb.mxu0 %v13152_v16  ;;  %5140 = vmatpush.msra.mxu1 %v7597_v29  ;;  %v7626_v29 = vld [vmem:[%s15340_s7 + $0x640] sm:$0xff] }
 0xa92   : > { %5141 = vmatpush.msra.mxu1 %v7596_v17  ;;  %v7651_v17 = vld [vmem:[%s15340_s7 + $0x6f8] sm:$0xff] }
 0xa94   : > { %5142 = vmatpush.msra.mxu1 %v7595_v15  ;;  %v7606_v15 = vld [vmem:[%s15340_s7 + $0x5b0] sm:$0xff] }
 0xa95   : > { %5214 = vmatpush.msra.mxu3 %v7606_v15 }
 0xa96   : > { %5143 = vmatpush.msra.mxu1 %v7594_v4  ;;  %v7625_v4 = vld [vmem:[%s15340_s7 + $0x638] sm:$0xff] }
 0xa98   : > { %5144 = vmatpush.msra.mxu1 %v7593_v40  ;;  %v7650_v40 = vld [vmem:[%s15340_s7 + $0x6f0] sm:$0xff] }
 0xa9a   : > { %5145 = vmatpush.msra.mxu1 %v7592_v9  ;;  %v7649_v9 = vld [vmem:[%s15340_s7 + $0x6e8] sm:$0xff] }
 0xa9c   : > { %5146 = vmatpush.msra.mxu1 %v7591_v27  ;;  %v7605_v27 = vld [vmem:[%s15340_s7 + $0x5a8] sm:$0xff] }
 0xa9d   : > { %5215 = vmatpush.msra.mxu3 %v7605_v27  ;;  %v7774_v27 = vld [vmem:[%s15343_s10 + $0xbc0] sm:$0xff] }
 0xa9e   : > { %5147 = vmatpush.msra.mxu1 %v7590_v12  ;;  %v7624_v12 = vld [vmem:[%s15340_s7 + $0x630] sm:$0xff] }
 0xaa0   : > { %5148 = vmatpush.msra.mxu1 %v7589_v32  ;;  %v7604_v32 = vld [vmem:[%s15340_s7 + $0x5a0] sm:$0xff] }
 0xaa1   : > { %5216 = vmatpush.msra.mxu3 %v7604_v32  ;;  %v7776_v32 = vld [vmem:[%s15343_s10 + $0xbd0] sm:$0xff] }
 0xaa2   : > { %5149 = vmatpush.msra.mxu1 %v7588_v5  ;;  %v7623_v5 = vld [vmem:[%s15340_s7 + $0x628] sm:$0xff] }
 0xaa4   : > { %5150 = vmatpush.msra.mxu1 %v7587_v1  ;;  %v7648_v1 = vld [vmem:[%s15340_s7 + $0x6e0] sm:$0xff] }
 0xaa6   : > { %5151 = vmatpush.msra.mxu1 %v7586_v59  ;;  %v7603_v59 = vld [vmem:[%s15340_s7 + $0x598] sm:$0xff] }
 0xaa7   : > { %5217 = vmatpush.msra.mxu3 %v7603_v59  ;;  %v7767_v59 = vld [vmem:[%s15343_s10 + $0xb88] sm:$0xff] }
 0xaa8   : > { %5152 = vmatpush.msra.mxu1 %v7585_v7  ;;  %v7622_v7 = vld [vmem:[%s15340_s7 + $0x620] sm:$0xff] }
 0xaaa   : > { %5153 = vmatpush.msra.mxu1 %v7584_v57  ;;  %v7647_v57 = vld [vmem:[%s15340_s7 + $0x6d8] sm:$0xff] }
 0xaac   : > { %5154 = vmatpush.msra.mxu1 %v7583_v22  ;;  %v7602_v22 = vld [vmem:[%s15340_s7 + $0x590] sm:$0xff] }
 0xaad   : > { %5218 = vmatpush.msra.mxu3 %v7602_v22  ;;  %v7758_v22 = vld [vmem:[%s15343_s10 + $0xb40] sm:$0xff] }
 0xaae   : > { %5155 = vmatpush.msra.mxu1 %v7582_v34  ;;  %v7621_v34 = vld [vmem:[%s15340_s7 + $0x618] sm:$0xff] }
 0xaea   : > { %v4926_v43 = vpop.f32.mrf.mxu1 }
 0xaeb   : > { %5028 = vmatmul.f32.vlgmr.msrb.gmra.mxu2 %v4926_v43  ;;  %v7646_v43 = vld [vmem:[%s15340_s7 + $0x6d0] sm:$0xff] }
 0xaec   : > { %v4966_v3 = vpop.f32.mrf.mxu0  ;;  %5270 = vmatpush.msrb.mxu2 %v7633_v54  ;;  %v7643_v54 = vld [vmem:[%s15340_s7 + $0x6b8] sm:$0xff] }
 0xaed   : > { %5005 = vmatmul.f32.vlgmr.msrb.gmra.mxu1 %v4966_v3  ;;  %v7601_v3 = vld [vmem:[%s15340_s7 + $0x588] sm:$0xff] }
 0xaee   : > { %5271 = vmatpush.msrb.mxu2 %v7632_v8  ;;  %5335 = vmatpush.msrb.mxu1 %v7651_v17  ;;  %v7642_v8 = vld [vmem:[%s15340_s7 + $0x6b0] sm:$0xff] }
 0xaef   : > { %5219 = vmatpush.msra.mxu3 %v7601_v3  ;;  %v7761_v3 = vld [vmem:[%s15343_s10 + $0xb58] sm:$0xff] }
 0xaf0   : > { %v5052_v33 = vpop.f32.mrf.mxu3  ;;  %5272 = vmatpush.msrb.mxu2 %v7631_v13  ;;  %5336 = vmatpush.msrb.mxu1 %v7650_v40 }
 0xaf1   : > { %5091 = vmatmul.f32.vlgmr.msra.gmra.mxu0 %v5052_v33  ;;  %v7620_v33 = vld [vmem:[%s15340_s7 + $0x610] sm:$0xff] }
 0xaf2   : > { %5309 = vmatpush.msra.mxu0 %v13149_v2  ;;  %v4929_v49 = vpop.f32.mrf.mxu1  ;;  %5273 = vmatpush.msrb.mxu2 %v7630_v47  ;;  %v7638_v47 = vld [vmem:[%s15340_s7 + $0x690] sm:$0xff] }
 0xaf3   : > { %5031 = vmatmul.f32.gmra.mxu2 %v4929_v49  ;;  %5337 = vmatpush.msrb.mxu1 %v7649_v9  ;;  %v7645_v49 = vld [vmem:[%s15340_s7 + $0x6c8] sm:$0xff] }
 0xaf4   : > { %5310 = vmatpush.msra.mxu0 %v13152_v16  ;;  %v4969_v58 = vpop.f32.mrf.mxu0  ;;  %5274 = vmatpush.msrb.mxu2 %v7629_v0 }
 0xaf5   : > { %5008 = vmatmul.f32.gmra.mxu1 %v4969_v58  ;;  %v7600_v58 = vld [vmem:[%s15340_s7 + $0x580] sm:$0xff] }
 0xaf6   : > { %5275 = vmatpush.msrb.mxu2 %v7628_v19  ;;  %5338 = vmatpush.msrb.mxu1 %v7648_v1  ;;  %v7766_v1 = vld [vmem:[%s15343_s10 + $0xb80] sm:$0xff] }
 0xaf7   : > { %5220 = vmatpush.msra.mxu3 %v7600_v58  ;;  %v7752_v58 = vld [vmem:[%s15343_s10 + $0xb10] sm:$0xff] }
 0xaf8   : > { %v5055_v62 = vpop.f32.mrf.mxu3  ;;  %5276 = vmatpush.msrb.mxu2 %v7627_v63  ;;  %5339 = vmatpush.msrb.mxu1 %v7647_v57  ;;  %v7769_v57 = vld [vmem:[%s15343_s10 + $0xb98] sm:$0xff] }
 0xaf9   : > { %5094 = vmatmul.f32.gmra.mxu0 %v5055_v62  ;;  %v7619_v62 = vld [vmem:[%s15340_s7 + $0x608] sm:$0xff]  ;;  %5363 = vmatpush.msrb.mxu3 %v13398_v56 }
 0xafa   : > { %5277 = vmatpush.msrb.mxu2 %v7626_v29  ;;  %5340 = vmatpush.msrb.mxu1 %v7646_v43  ;;  %v7760_v43 = vld [vmem:[%s15343_s10 + $0xb50] sm:$0xff] }
 0xafb   : > { %7598 = vmatmul.msk.f32.vlgmr.msra.gmra.mxu2 %vm535_vm0, %v8105_v52  ;;  %5364 = vmatpush.msrb.mxu3 %v13404_v31  ;;  %v7641_v52 = vld [vmem:[%s15340_s7 + $0x6a8] sm:$0xff] }
 0xafc   : > { %5278 = vmatpush.msrb.mxu2 %v7625_v4  ;;  %5341 = vmatpush.msrb.mxu1 %v7645_v49  ;;  %v7751_v49 = vld [vmem:[%s15343_s10 + $0xb08] sm:$0xff] }
 0xafd   : > { %5365 = vmatpush.msrb.mxu3 %v13410_v21 }
 0xafe   : > { %5279 = vmatpush.msrb.mxu2 %v7624_v12  ;;  %5342 = vmatpush.msrb.mxu1 %v7644_v44  ;;  %v7775_v12 = vld [vmem:[%s15343_s10 + $0xbc8] sm:$0xff]  ;;  %v7742_v44 = vld [vmem:[%s15343_s10 + $0xac0] sm:$0xff] }
 0xaff   : > { %5366 = vmatpush.msrb.mxu3 %v13420_v24 }
 0xb00   : > { %v5117_v18 = vpop.f32.mrf.mxu3  ;;  %5280 = vmatpush.msrb.mxu2 %v7623_v5  ;;  %5343 = vmatpush.msrb.mxu1 %v7643_v54  ;;  %v7777_v5 = vld [vmem:[%s15343_s10 + $0xbd8] sm:$0xff]  ;;  %v7744_v54 = vld [vmem:[%s15343_s10 + $0xad0] sm:$0xff] }
 0xb01   : > { %5156 = vmatmul.f32.vlgmr.msra.gmra.mxu1 %v5117_v18  ;;  %7616 = vmatmul.msk.f32.vlgmr.msrb.gmra.mxu0 %vm535_vm0, %v8106_v36  ;;  %v7637_v18 = vld [vmem:[%s15340_s7 + $0x688] sm:$0xff] }
 0xb02   : > { %5390 = vmatpush.msrb.mxu0 %v13398_v56  ;;  %5281 = vmatpush.msrb.mxu2 %v7622_v7  ;;  %v7768_v7 = vld [vmem:[%s15343_s10 + $0xb90] sm:$0xff] }
 0xb03   : > { %7599 = vmatmul.msk.f32.gmra.mxu2 %vm535_vm0, %v8107_v25  ;;  %5344 = vmatpush.msrb.mxu1 %v7642_v8  ;;  %v7745_v8 = vld [vmem:[%s15343_s10 + $0xad8] sm:$0xff] }
 0xb04   : > { %5391 = vmatpush.msrb.mxu0 %v13404_v31  ;;  %5282 = vmatpush.msrb.mxu2 %v7621_v34  ;;  %v7759_v34 = vld [vmem:[%s15343_s10 + $0xb48] sm:$0xff] }
 0xb05   : > { %5345 = vmatpush.msrb.mxu1 %v7641_v52  ;;  %5367 = vmatpush.msrb.mxu3 %v13426_v53  ;;  %v7734_v52 = vld [vmem:[%s15343_s10 + $0xa80] sm:$0xff] }
 0xb06   : > { %5392 = vmatpush.msrb.mxu0 %v13410_v21  ;;  %5283 = vmatpush.msrb.mxu2 %v7620_v33  ;;  %v7750_v33 = vld [vmem:[%s15343_s10 + $0xb00] sm:$0xff] }
 0xb07   : > { %5346 = vmatpush.msrb.mxu1 %v7640_v41  ;;  %5368 = vmatpush.msrb.mxu3 %v13432_v10  ;;  %v7735_v41 = vld [vmem:[%s15343_s10 + $0xa88] sm:$0xff] }
 0xb08   : > { %v5120_v42 = vpop.f32.mrf.mxu3  ;;  %5393 = vmatpush.msrb.mxu0 %v13420_v24  ;;  %5284 = vmatpush.msrb.mxu2 %v7619_v62  ;;  %v7753_v62 = vld [vmem:[%s15343_s10 + $0xb18] sm:$0xff] }
 0xb09   : > { %5159 = vmatmul.f32.gmra.mxu1 %v5120_v42  ;;  %7617 = vmatmul.msk.f32.gmra.mxu0 %vm535_vm0, %v8111_v35 }
 0xb0a   : > { %5394 = vmatpush.msrb.mxu0 %v13426_v53  ;;  %5285 = vmatpush.msrb.mxu2 %v7618_v26  ;;  %v7743_v26 = vld [vmem:[%s15343_s10 + $0xac8] sm:$0xff] }
 0xb0b   : > { %5347 = vmatpush.msrb.mxu1 %v7639_v39  ;;  %5369 = vmatpush.msrb.mxu3 %v13438_v51  ;;  %v7737_v39 = vld [vmem:[%s15343_s10 + $0xa98] sm:$0xff] }
 0xb0c   : > { %5395 = vmatpush.msrb.mxu0 %v13432_v10  ;;  %5597 = vmatpush.msra.mxu2 %v7774_v27  ;;  %v7662_v27 = vld [vmem:[%s15343_s10 + $0x840] sm:$0xff] }
 0xb0d   : > { %5348 = vmatpush.msrb.mxu1 %v7638_v47  ;;  %5370 = vmatpush.msrb.mxu3 %v13448_v61  ;;  %v7726_v47 = vld [vmem:[%s15343_s10 + $0xa40] sm:$0xff] }
 0xb0e   : > { %5396 = vmatpush.msrb.mxu0 %v13438_v51  ;;  %5598 = vmatpush.msra.mxu2 %v7766_v1  ;;  %v7654_v1 = vld [vmem:[%s15343_s10 + $0x800] sm:$0xff] }
 0xb0f   : > { %5349 = vmatpush.msrb.mxu1 %v7637_v18  ;;  %5371 = vmatpush.msrb.mxu3 %v13454_v48  ;;  %v7729_v18 = vld [vmem:[%s15343_s10 + $0xa58] sm:$0xff] }
 0xb10   : > { %5397 = vmatpush.msrb.mxu0 %v13448_v61  ;;  %5599 = vmatpush.msra.mxu2 %v7758_v22  ;;  %v7778_v22 = vld [vmem:[%s15343_s10 + $0xbe0] sm:$0xff] }
 0xb11   : > { %7634 = vmatmul.msk.f32.vlgmr.msra.gmra.mxu0 %vm535_vm0, %v8116_v46  ;;  %5350 = vmatpush.msrb.mxu1 %v7636_v38  ;;  %v7719_v38 = vld [vmem:[%s15343_s10 + $0xa08] sm:$0xff] }
 0xb12   : > { %5398 = vmatpush.msrb.mxu0 %v13454_v48  ;;  %5372 = vmatpush.msrb.mxu3 %v13460_v60 }
 0xb13   : > { %5620 = vmatpush.msra.mxu1 %v7775_v12  ;;  %5600 = vmatpush.msra.mxu2 %v7750_v33  ;;  %v7663_v12 = vld [vmem:[%s15343_s10 + $0x848] sm:$0xff]  ;;  %v7770_v33 = vld [vmem:[%s15343_s10 + $0xba0] sm:$0xff] }
 0xb14   : > { %5399 = vmatpush.msrb.mxu0 %v13460_v60  ;;  %5373 = vmatpush.msrb.mxu3 %v13466_v23 }
 0xb15   : > { %5621 = vmatpush.msra.mxu1 %v7767_v59  ;;  %5601 = vmatpush.msra.mxu2 %v7742_v44  ;;  %v7655_v59 = vld [vmem:[%s15343_s10 + $0x808] sm:$0xff]  ;;  %v7762_v44 = vld [vmem:[%s15343_s10 + $0xb60] sm:$0xff] }
 0xb16   : > { %5400 = vmatpush.msrb.mxu0 %v13466_v23  ;;  %5374 = vmatpush.msrb.mxu3 %v13476_v45 }
 0xb17   : > { %5622 = vmatpush.msra.mxu1 %v7759_v34  ;;  %5602 = vmatpush.msra.mxu2 %v7734_v52  ;;  %v7779_v34 = vld [vmem:[%s15343_s10 + $0xbe8] sm:$0xff]  ;;  %v7754_v52 = vld [vmem:[%s15343_s10 + $0xb20] sm:$0xff] }
 0xb18   : > { %5401 = vmatpush.msrb.mxu0 %v13476_v45  ;;  %5375 = vmatpush.msrb.mxu3 %v13482_v55 }
 0xb19   : > { %7635 = vmatmul.msk.f32.gmra.mxu0 %vm535_vm0, %v8121_v11  ;;  %5623 = vmatpush.msra.mxu1 %v7751_v49  ;;  %v7771_v49 = vld [vmem:[%s15343_s10 + $0xba8] sm:$0xff] }
 0xb1a   : > { %5402 = vmatpush.msrb.mxu0 %v13482_v55  ;;  %5376 = vmatpush.msrb.mxu3 %v13488_v50  ;;  %v8127_v55 = vld [vmem:[%s9110_s16] sm:$0x7] }
 0xb1b   : > { %5624 = vmatpush.msra.mxu1 %v7743_v26  ;;  %5603 = vmatpush.msra.mxu2 %v7726_v47  ;;  %v7763_v26 = vld [vmem:[%s15343_s10 + $0xb68] sm:$0xff]  ;;  %v7746_v47 = vld [vmem:[%s15343_s10 + $0xae0] sm:$0xff] }
 0xb1c   : > { %5403 = vmatpush.msrb.mxu0 %v13488_v50  ;;  %5377 = vmatpush.msrb.mxu3 %v13494_v28  ;;  %v5360_v50 = vperm.slane %v8127_v55, 2  ;;  %v7697_v55 = vld [vmem:[%s15343_s10 + $0x958] sm:$0xff] }
 0xb1d   : > { %5625 = vmatpush.msra.mxu1 %v7735_v41  ;;  %v7755_v41 = vld [vmem:[%s15343_s10 + $0xb28] sm:$0xff] }
 0xb1e   : > { %5404 = vmatpush.msrb.mxu0 %v13494_v28  ;;  %5378 = vmatpush.msrb.mxu3 %v13500_v37 }
 0xb20   : > { %5405 = vmatpush.msrb.mxu0 %v13500_v37 }
 0xb22   : > { %5666 = vmatpush.msra.mxu0 %v7777_v5  ;;  %v7665_v5 = vld [vmem:[%s15343_s10 + $0x858] sm:$0xff] }
 0xb24   : > { %5667 = vmatpush.msra.mxu0 %v7769_v57  ;;  %v7657_v57 = vld [vmem:[%s15343_s10 + $0x818] sm:$0xff] }
 0xb26   : > { %5668 = vmatpush.msra.mxu0 %v7761_v3  ;;  %v7781_v3 = vld [vmem:[%s15343_s10 + $0xbf8] sm:$0xff] }
 0xb28   : > { %5669 = vmatpush.msra.mxu0 %v7753_v62  ;;  %v7773_v62 = vld [vmem:[%s15343_s10 + $0xbb8] sm:$0xff] }
 0xb2a   : > { %5670 = vmatpush.msra.mxu0 %v7745_v8  ;;  %v7765_v8 = vld [vmem:[%s15343_s10 + $0xb78] sm:$0xff] }
 0xb2c   : > { %5671 = vmatpush.msra.mxu0 %v7737_v39  ;;  %v7757_v39 = vld [vmem:[%s15343_s10 + $0xb38] sm:$0xff] }
 0xb2e   : > { %5672 = vmatpush.msra.mxu0 %v7729_v18  ;;  %v7749_v18 = vld [vmem:[%s15343_s10 + $0xaf8] sm:$0xff] }
 0xb6a   : > { %v5006_v13 = vpop.f32.mrf.mxu1 }
 0xb6e   : > { %v5029_v20 = vpop.f32.mrf.mxu2  ;;  %v5092_v0 = vpop.f32.mrf.mxu0 }
 0xb6f   : > { %v5030_v36 = vadd.f32 %v5029_v20, %v5006_v13  ;;  %v7736_v13 = vld [vmem:[%s15343_s10 + $0xa90] sm:$0xff]  ;;  %v7727_v20 = vld [vmem:[%s15343_s10 + $0xa48] sm:$0xff] }
 0xb70   : > { %5626 = vmatpush.msra.mxu1 %v7727_v20  ;;  %v7747_v20 = vld [vmem:[%s15343_s10 + $0xae8] sm:$0xff] }
 0xb71   : > { %v5098_v19 = vadd.f32 %v5092_v0, %v5030_v36  ;;  %v7728_v0 = vld [vmem:[%s15343_s10 + $0xa50] sm:$0xff]  ;;  %v7718_v36 = vld [vmem:[%s15343_s10 + $0xa00] sm:$0xff] }
 0xb72   : > { %v5009_v25 = vpop.f32.mrf.mxu1  ;;  %5604 = vmatpush.msra.mxu2 %v7718_v36  ;;  %5627 = vmatpush.msra.mxu1 %v7719_v38  ;;  %v7738_v36 = vld [vmem:[%s15343_s10 + $0xaa0] sm:$0xff]  ;;  %v7739_v38 = vld [vmem:[%s15343_s10 + $0xaa8] sm:$0xff] }
 0xb76   : > { %v5032_v30 = vpop.f32.mrf.mxu2  ;;  %v5095_v56 = vpop.f32.mrf.mxu0 }
 0xb77   : > { %v5033_v31 = vadd.f32 %v5032_v30, %v5009_v25  ;;  %v7721_v25 = vld [vmem:[%s15343_s10 + $0xa18] sm:$0xff]  ;;  %v7710_v30 = vld [vmem:[%s15343_s10 + $0x9c0] sm:$0xff] }
 0xb78   : > { %5673 = vmatpush.msra.mxu0 %v7721_v25  ;;  %5605 = vmatpush.msra.mxu2 %v7710_v30  ;;  %v7741_v25 = vld [vmem:[%s15343_s10 + $0xab8] sm:$0xff] }
 0xb79   : > { %v5099_v21 = vadd.f32 %v5095_v56, %v5033_v31  ;;  %v7711_v56 = vld [vmem:[%s15343_s10 + $0x9c8] sm:$0xff]  ;;  %v7712_v31 = vld [vmem:[%s15343_s10 + $0x9d0] sm:$0xff] }
 0xb7a   : > { %5628 = vmatpush.msra.mxu1 %v7711_v56  ;;  %v7730_v56 = vld [vmem:[%s15343_s10 + $0xa60] sm:$0xff] }
 0xb7e   : > { %v5182_v42 = vpop.f32.mrf.mxu2  ;;  %v5247_v35 = vpop.f32.mrf.mxu0 }
 0xb7f   : > { %5221 = vmatmul.f32.vlgmr.msra.gmra.mxu3 %v5182_v42  ;;  %5286 = vmatmul.f32.vlgmr.msrb.gmra.mxu2 %v5247_v35  ;;  %v5157_v46 = vpop.f32.mrf.mxu1  ;;  %v7702_v42 = vld [vmem:[%s15343_s10 + $0x980] sm:$0xff]  ;;  %v7703_v35 = vld [vmem:[%s15343_s10 + $0x988] sm:$0xff] }
 0xb80   : > { %v5163_v60 = vadd.f32 %v5157_v46, %v5098_v19  ;;  %5643 = vmatpush.msra.mxu3 %v7776_v32  ;;  %v7720_v19 = vld [vmem:[%s15343_s10 + $0xa10] sm:$0xff]  ;;  %5606 = vmatpush.msra.mxu2 %v7702_v42 }
 0xb81   : > { %5629 = vmatpush.msra.mxu1 %v7703_v35  ;;  %v7664_v32 = vld [vmem:[%s15343_s10 + $0x850] sm:$0xff]  ;;  %v7733_v35 = vld [vmem:[%s15343_s10 + $0xa78] sm:$0xff] }
 0xb82   : > { %5644 = vmatpush.msra.mxu3 %v7768_v7  ;;  %v7656_v7 = vld [vmem:[%s15343_s10 + $0x810] sm:$0xff] }
 0xb84   : > { %5645 = vmatpush.msra.mxu3 %v7760_v43  ;;  %v7780_v43 = vld [vmem:[%s15343_s10 + $0xbf0] sm:$0xff] }
 0xb86   : > { %v5185_v24 = vpop.f32.mrf.mxu2  ;;  %v5250_v53 = vpop.f32.mrf.mxu0  ;;  %5646 = vmatpush.msra.mxu3 %v7752_v58  ;;  %v7772_v58 = vld [vmem:[%s15343_s10 + $0xbb0] sm:$0xff] }
 0xb87   : > { %5224 = vmatmul.f32.gmra.mxu3 %v5185_v24  ;;  %5289 = vmatmul.f32.gmra.mxu2 %v5250_v53  ;;  %v5160_v48 = vpop.f32.mrf.mxu1  ;;  %v7704_v24 = vld [vmem:[%s15343_s10 + $0x990] sm:$0xff]  ;;  %v7705_v53 = vld [vmem:[%s15343_s10 + $0x998] sm:$0xff] }
 0xb88   : > { %v5164_v6 = vadd.f32 %v5160_v48, %v5099_v21  ;;  %5647 = vmatpush.msra.mxu3 %v7744_v54  ;;  %v7713_v21 = vld [vmem:[%s15343_s10 + $0x9d8] sm:$0xff]  ;;  %v7764_v54 = vld [vmem:[%s15343_s10 + $0xb70] sm:$0xff] }
 0xb89   : > { %5674 = vmatpush.msra.mxu0 %v7713_v21  ;;  %v7732_v21 = vld [vmem:[%s15343_s10 + $0xa70] sm:$0xff] }
 0xb8a   : > { %5648 = vmatpush.msra.mxu3 %v7736_v13  ;;  %v7756_v13 = vld [vmem:[%s15343_s10 + $0xb30] sm:$0xff] }
 0xb8b   : > { %5675 = vmatpush.msra.mxu0 %v7705_v53  ;;  %v7723_v53 = vld [vmem:[%s15343_s10 + $0xa28] sm:$0xff] }
 0xb8c   : > { %5649 = vmatpush.msra.mxu3 %v7728_v0  ;;  %v7748_v0 = vld [vmem:[%s15343_s10 + $0xaf0] sm:$0xff] }
 0xb8d   : > { %5676 = vmatpush.msra.mxu0 %v7697_v55  ;;  %v7707_v55 = vld [vmem:[%s15343_s10 + $0x9a8] sm:$0xff] }
 0xb8e   : > { %v5312_v10 = vpop.f32.mrf.mxu0  ;;  %5650 = vmatpush.msra.mxu3 %v7720_v19  ;;  %v7740_v19 = vld [vmem:[%s15343_s10 + $0xab0] sm:$0xff] }
 0xb8f   : > { %5351 = vmatmul.f32.vlgmr.msrb.gmra.mxu1 %v5312_v10 }
 0xb90   : > { %5651 = vmatpush.msra.mxu3 %v7712_v31  ;;  %v7731_v31 = vld [vmem:[%s15343_s10 + $0xa68] sm:$0xff] }
 0xb92   : > { %5652 = vmatpush.msra.mxu3 %v7704_v24  ;;  %v7722_v24 = vld [vmem:[%s15343_s10 + $0xa20] sm:$0xff] }
 0xb96   : > { %v5315_v51 = vpop.f32.mrf.mxu0 }
 0xb97   : > { %5354 = vmatmul.f32.gmra.mxu1 %v5315_v51 }
 0xc02   : > { %v5222_v61 = vpop.f32.mrf.mxu3  ;;  %v5287_v11 = vpop.f32.mrf.mxu2 }
 0xc03   : > { %v5228_v23 = vadd.f32 %v5222_v61, %v5163_v60 }
 0xc05   : > { %v5293_v45 = vadd.f32 %v5287_v11, %v5228_v23  ;;  %v7694_v23 = vld [vmem:[%s15343_s10 + $0x940] sm:$0xff]  ;;  %v7695_v11 = vld [vmem:[%s15343_s10 + $0x948] sm:$0xff] }
 0xc06   : > { %5607 = vmatpush.msra.mxu2 %v7694_v23  ;;  %5630 = vmatpush.msra.mxu1 %v7695_v11  ;;  %v7716_v23 = vld [vmem:[%s15343_s10 + $0x9f0] sm:$0xff]  ;;  %v7717_v11 = vld [vmem:[%s15343_s10 + $0x9f8] sm:$0xff] }
 0xc0a   : > { %v5225_v28 = vpop.f32.mrf.mxu3  ;;  %v5290_v17 = vpop.f32.mrf.mxu2 }
 0xc0b   : > { %v5229_v14 = vadd.f32 %v5225_v28, %v5164_v6  ;;  %v7687_v28 = vld [vmem:[%s15343_s10 + $0x908] sm:$0xff]  ;;  %v7689_v6 = vld [vmem:[%s15343_s10 + $0x918] sm:$0xff] }
 0xc0c   : > { %v5352_v37 = vpop.f32.mrf.mxu1  ;;  %5631 = vmatpush.msra.mxu1 %v7687_v28  ;;  %5677 = vmatpush.msra.mxu0 %v7689_v6  ;;  %v7709_v28 = vld [vmem:[%s15343_s10 + $0x9b8] sm:$0xff]  ;;  %v7699_v6 = vld [vmem:[%s15343_s10 + $0x968] sm:$0xff] }
 0xc0d   : > { %v5358_v63 = vadd.f32 %v5352_v37, %v5293_v45  ;;  %v5294_v15 = vadd.f32 %v5290_v17, %v5229_v14  ;;  %v7696_v45 = vld [vmem:[%s15343_s10 + $0x950] sm:$0xff]  ;;  %v7679_v14 = vld [vmem:[%s15343_s10 + $0x8c8] sm:$0xff]  ;;  %v7681_v17 = vld [vmem:[%s15343_s10 + $0x8d8] sm:$0xff] }
 0xc0e   : > { %5653 = vmatpush.msra.mxu3 %v7696_v45  ;;  %v7688_v37 = vld [vmem:[%s15343_s10 + $0x910] sm:$0xff]  ;;  %5632 = vmatpush.msra.mxu1 %v7679_v14  ;;  %v7706_v45 = vld [vmem:[%s15343_s10 + $0x9a0] sm:$0xff] }
 0xc0f   : > { %v13625_v29 = vadd.f32 %v5360_v50, %v5358_v63  ;;  %v7678_v63 = vld [vmem:[%s15343_s10 + $0x8c0] sm:$0xff]  ;;  %5678 = vmatpush.msra.mxu0 %v7681_v17  ;;  %v7700_v14 = vld [vmem:[%s15343_s10 + $0x970] sm:$0xff] }
 0xc10   : > { %5654 = vmatpush.msra.mxu3 %v7688_v37  ;;  %v7698_v37 = vld [vmem:[%s15343_s10 + $0x960] sm:$0xff] }
 0xc11   : > { %5379 = vmatmul.f32.vlgmr.msrb.gmra.mxu3 %v13625_v29 }
 0xc14   : > { %v5355_v4 = vpop.f32.mrf.mxu1 }
 0xc15   : > { %v5359_v40 = vadd.f32 %v5355_v4, %v5294_v15  ;;  %v7670_v15 = vld [vmem:[%s15343_s10 + $0x880] sm:$0xff]  ;;  %v7671_v4 = vld [vmem:[%s15343_s10 + $0x888] sm:$0xff] }
 0xc16   : > { %5633 = vmatpush.msra.mxu1 %v7671_v4  ;;  %v7690_v4 = vld [vmem:[%s15343_s10 + $0x920] sm:$0xff] }
 0xc17   : > { %v13628_v9 = vadd.f32 %v5360_v50, %v5359_v40  ;;  %v7686_v50 = vld [vmem:[%s15343_s10 + $0x900] sm:$0xff]  ;;  %v7672_v40 = vld [vmem:[%s15343_s10 + $0x890] sm:$0xff] }
 0xc18   : > { %5608 = vmatpush.msra.mxu2 %v7686_v50  ;;  %5634 = vmatpush.msra.mxu1 %v7663_v12  ;;  %v7708_v50 = vld [vmem:[%s15343_s10 + $0x9b0] sm:$0xff]  ;;  %v7693_v12 = vld [vmem:[%s15343_s10 + $0x938] sm:$0xff] }
 0xc19   : > { %5382 = vmatmul.f32.gmra.mxu3 %v13628_v9 }
 0xc1a   : > { %5609 = vmatpush.msra.mxu2 %v7678_v63  ;;  %5635 = vmatpush.msra.mxu1 %v7655_v59  ;;  %v7684_v59 = vld [vmem:[%s15343_s10 + $0x8f0] sm:$0xff] }
 0xc1c   : > { %5610 = vmatpush.msra.mxu2 %v7670_v15  ;;  %5712 = vmatpush.msrb.mxu1 %v7779_v34 }
 0xc1e   : > { %5611 = vmatpush.msra.mxu2 %v7662_v27  ;;  %5713 = vmatpush.msrb.mxu1 %v7771_v49  ;;  %v7692_v27 = vld [vmem:[%s15343_s10 + $0x930] sm:$0xff]  ;;  %v7667_v49 = vld [vmem:[%s15343_s10 + $0x868] sm:$0xff] }
 0xc20   : > { %5612 = vmatpush.msra.mxu2 %v7654_v1  ;;  %5714 = vmatpush.msrb.mxu1 %v7763_v26 }
 0xc22   : > { %5689 = vmatpush.msrb.mxu2 %v7778_v22  ;;  %5715 = vmatpush.msrb.mxu1 %v7755_v41  ;;  %v7675_v22 = vld [vmem:[%s15343_s10 + $0x8a8] sm:$0xff] }
 0xc24   : > { %5690 = vmatpush.msrb.mxu2 %v7770_v33  ;;  %5716 = vmatpush.msrb.mxu1 %v7747_v20  ;;  %v7666_v33 = vld [vmem:[%s15343_s10 + $0x860] sm:$0xff] }
 0xc26   : > { %5691 = vmatpush.msrb.mxu2 %v7762_v44  ;;  %5717 = vmatpush.msrb.mxu1 %v7739_v38  ;;  %v7669_v44 = vld [vmem:[%s15343_s10 + $0x878] sm:$0xff] }
 0xc28   : > { %5692 = vmatpush.msrb.mxu2 %v7754_v52  ;;  %5718 = vmatpush.msrb.mxu1 %v7731_v31 }
 0xc2a   : > { %5693 = vmatpush.msrb.mxu2 %v7746_v47  ;;  %5719 = vmatpush.msrb.mxu1 %v7723_v53  ;;  %v7950_v47 = vld [vmem:[%s15341_s8 + $0x2] ss:$0 sm:$0xff] }
 0xc2c   : > { %5694 = vmatpush.msrb.mxu2 %v7738_v36  ;;  %v7951_v36 = vld [vmem:[%s15342_s9 + $0x2] ss:$0 sm:$0xff] }
 0xc2e   : > { %5695 = vmatpush.msrb.mxu2 %v7730_v56 }
 0xc30   : > { %5696 = vmatpush.msrb.mxu2 %v7722_v24 }
 0xc94   : > { %v5380_v10 = vpop.f32.mrf.mxu3 }
 0xc95   : > { %v13752_v51 = vsub.f32 %v13625_v29, %v5380_v10  ;;  %v7680_v29 = vld [vmem:[%s15343_s10 + $0x8d0] sm:$0xff] }
 0xc96   : > { %5655 = vmatpush.msra.mxu3 %v7680_v29  ;;  %v7724_v10 = vld [vmem:[%s15343_s10 + $0xa30] sm:$0xff]  ;;  %v7701_v29 = vld [vmem:[%s15343_s10 + $0x978] sm:$0xff] }
 0xc97   : > { %v5388_v46 = vmul.f32 %v13752_v51, %v13752_v51 }
 0xc98   : > { %5656 = vmatpush.msra.mxu3 %v7672_v40  ;;  %v7691_v40 = vld [vmem:[%s15343_s10 + $0x928] sm:$0xff] }
 0xc99   : > { %5406 = vmatmul.f32.vlgmr.msrb.gmra.mxu0 %v5388_v46  ;;  %v7725_v46 = vld [vmem:[%s15343_s10 + $0xa38] sm:$0xff] }
 0xc9a   : > { %5657 = vmatpush.msra.mxu3 %v7664_v32  ;;  %v7682_v32 = vld [vmem:[%s15343_s10 + $0x8e0] sm:$0xff] }
 0xc9c   : > { %v5383_v61 = vpop.f32.mrf.mxu3  ;;  %5658 = vmatpush.msra.mxu3 %v7656_v7  ;;  %v7685_v7 = vld [vmem:[%s15343_s10 + $0x8f8] sm:$0xff] }
 0xc9d   : > { %v13757_v48 = vsub.f32 %v13628_v9, %v5383_v61  ;;  %v7673_v9 = vld [vmem:[%s15343_s10 + $0x898] sm:$0xff]  ;;  %v7714_v61 = vld [vmem:[%s15343_s10 + $0x9e0] sm:$0xff] }
 0xc9e   : > { %5679 = vmatpush.msra.mxu0 %v7673_v9  ;;  %5735 = vmatpush.msrb.mxu3 %v7780_v43  ;;  %v7676_v43 = vld [vmem:[%s15343_s10 + $0x8b0] sm:$0xff] }
 0xc9f   : > { %v5389_v60 = vmul.f32 %v13757_v48, %v13757_v48  ;;  %5697 = vmatpush.msrb.mxu2 %v7714_v61 }
 0xca0   : > { %5680 = vmatpush.msra.mxu0 %v7665_v5  ;;  %5736 = vmatpush.msrb.mxu3 %v7772_v58  ;;  %v7683_v5 = vld [vmem:[%s15343_s10 + $0x8e8] sm:$0xff] }
 0xca1   : > { %5409 = vmatmul.f32.gmra.mxu0 %v5389_v60  ;;  %v7715_v60 = vld [vmem:[%s15343_s10 + $0x9e8] sm:$0xff]  ;;  %5698 = vmatpush.msrb.mxu2 %v7706_v45 }
 0xca2   : > { %5681 = vmatpush.msra.mxu0 %v7657_v57  ;;  %5737 = vmatpush.msrb.mxu3 %v7764_v54  ;;  %v7674_v57 = vld [vmem:[%s15343_s10 + $0x8a0] sm:$0xff] }
 0xca3   : > { %5720 = vmatpush.msrb.mxu1 %v7715_v60  ;;  %5699 = vmatpush.msrb.mxu2 %v7698_v37  ;;  %v7658_v54 = vld [vmem:[%s15343_s10 + $0x820] sm:$0xff] }
 0xca4   : > { %5758 = vmatpush.msrb.mxu0 %v7781_v3  ;;  %5738 = vmatpush.msrb.mxu3 %v7756_v13  ;;  %v7677_v3 = vld [vmem:[%s15343_s10 + $0x8b8] sm:$0xff]  ;;  %v7660_v13 = vld [vmem:[%s15343_s10 + $0x830] sm:$0xff] }
 0xca5   : > { %5721 = vmatpush.msrb.mxu1 %v7707_v55  ;;  %5700 = vmatpush.msrb.mxu2 %v7690_v4  ;;  %v7830_v4 = vld [vmem:[%s15345_s12 + $0x8f8] sm:$0xff] }
 0xca6   : > { %5759 = vmatpush.msrb.mxu0 %v7773_v62  ;;  %5739 = vmatpush.msrb.mxu3 %v7748_v0  ;;  %v7668_v62 = vld [vmem:[%s15343_s10 + $0x870] sm:$0xff] }
 0xca7   : > { %5722 = vmatpush.msrb.mxu1 %v7699_v6  ;;  %5701 = vmatpush.msrb.mxu2 %v7682_v32 }
 0xca8   : > { %5760 = vmatpush.msrb.mxu0 %v7765_v8  ;;  %5740 = vmatpush.msrb.mxu3 %v7740_v19  ;;  %v7659_v8 = vld [vmem:[%s15343_s10 + $0x828] sm:$0xff] }
 0xca9   : > { %5723 = vmatpush.msrb.mxu1 %v7691_v40  ;;  %5702 = vmatpush.msrb.mxu2 %v7674_v57 }
 0xcaa   : > { %5761 = vmatpush.msrb.mxu0 %v7757_v39  ;;  %5741 = vmatpush.msrb.mxu3 %v7732_v21  ;;  %v7661_v39 = vld [vmem:[%s15343_s10 + $0x838] sm:$0xff] }
 0xcab   : > { %5724 = vmatpush.msrb.mxu1 %v7683_v5  ;;  %5703 = vmatpush.msrb.mxu2 %v7666_v33 }
 0xcac   : > { %5762 = vmatpush.msrb.mxu0 %v7749_v18  ;;  %5742 = vmatpush.msrb.mxu3 %v7724_v10 }
 0xcad   : > { %5725 = vmatpush.msrb.mxu1 %v7675_v22  ;;  %5704 = vmatpush.msrb.mxu2 %v7658_v54 }
 0xcae   : > { %5763 = vmatpush.msrb.mxu0 %v7741_v25  ;;  %5743 = vmatpush.msrb.mxu3 %v7716_v23 }
 0xcaf   : > { %5726 = vmatpush.msrb.mxu1 %v7667_v49 }
 0xcb0   : > { %5764 = vmatpush.msrb.mxu0 %v7733_v35  ;;  %5744 = vmatpush.msrb.mxu3 %v7708_v50  ;;  %v14047_v35 = vld [vmem:[%s15344_s11 + $0x10] sm:$0xff] }
 0xcb1   : > { %5727 = vmatpush.msrb.mxu1 %v7659_v8  ;;  %v5584_v24 = vperm.slane %v14047_v35, 3  ;;  %v5581_v23 = vperm.slane %v14047_v35, 0  ;;  %v5583_v45 = vperm.slane %v14047_v35, 2 }
 0xcb2   : > { %5765 = vmatpush.msrb.mxu0 %v7725_v46  ;;  %5745 = vmatpush.msrb.mxu3 %v7700_v14 }
 0xcb4   : > { %5766 = vmatpush.msrb.mxu0 %v7717_v11  ;;  %5746 = vmatpush.msrb.mxu3 %v7692_v27 }
 0xcb6   : > { %5767 = vmatpush.msrb.mxu0 %v7709_v28  ;;  %5747 = vmatpush.msrb.mxu3 %v7684_v59 }
 0xcb8   : > { %5768 = vmatpush.msrb.mxu0 %v7701_v29  ;;  %5748 = vmatpush.msrb.mxu3 %v7676_v43  ;;  %v7829_v43 = vld [vmem:[%s15345_s12 + $0x8f0] sm:$0xff] }
 0xcba   : > { %5769 = vmatpush.msrb.mxu0 %v7693_v12  ;;  %5749 = vmatpush.msrb.mxu3 %v7668_v62 }
 0xcbc   : > { %5770 = vmatpush.msrb.mxu0 %v7685_v7  ;;  %5750 = vmatpush.msrb.mxu3 %v7660_v13 }
 0xcbe   : > { %5771 = vmatpush.msrb.mxu0 %v7677_v3  ;;  %v7861_v3 = vld [vmem:[%s15345_s12 + $0x9f0] sm:$0xff] }
 0xcc0   : > { %5772 = vmatpush.msrb.mxu0 %v7669_v44  ;;  %v7828_v44 = vld [vmem:[%s15345_s12 + $0x8e8] sm:$0xff] }
 0xcc2   : > { %5773 = vmatpush.msrb.mxu0 %v7661_v39 }
 0xd16   : > { %v5407_v30 = vpop.f32.mrf.mxu0 }
 0xd17   : > { %v13914_v42 = vadd.f32 1e-06, %v5407_v30 }
 0xd19   : > { %8026 = vrsqrt.f32 %v13914_v42  ;;  %vm5419_vm6 = vweird.f32 %v13914_v42 }
 0xd1e   : > { %v5410_v63 = vpop.f32.mrf.mxu0 }
 0xd1f   : > { %v8027_v17 = vpop.eup %8026  ;;  %v13968_v15 = vadd.f32 1e-06, %v5410_v63 }
 0xd20   : > { %v5414_v9 = vmul.f32 %v8027_v17, %v13914_v42  ;;  %vm5420_vm0 = vweird.f32 %v8027_v17 }
 0xd21   : > { %8028 = vrsqrt.f32 %v13968_v15  ;;  %vm5421_vm7 = vmor %vm5419_vm6, %vm5420_vm0  ;;  %vm5429_vm9 = vweird.f32 %v13968_v15 }
 0xd22   : > { %v5415_v1 = vmul.f32 %v8027_v17, %v5414_v9 }
 0xd24   : > { %v5416_v34 = vmul.f32 0.5, %v5415_v1 }
 0xd26   : > { %v5417_v58 = vsub.f32 1.5, %v5416_v34  ;;  %v7862_v34 = vld [vmem:[%s15345_s12 + $0x9f8] sm:$0xff] }
 0xd27   : > { %v8029_v26 = vpop.eup %8028 }
 0xd28   : > { %v5418_v52 = vmul.f32 %v8027_v17, %v5417_v58  ;;  %v5424_v41 = vmul.f32 %v8029_v26, %v13968_v15  ;;  %vm5430_vm8 = vweird.f32 %v8029_v26 }
 0xd29   : > { %vm5431_vm10 = vmor %vm5429_vm9, %vm5430_vm8 }
 0xd2a   : > { %v5422_v20 = vsel %vm5421_vm7, %v8027_v17, %v5418_v52  ;;  %v5425_v0 = vmul.f32 %v8029_v26, %v5424_v41  ;;  %v7860_v52 = vld [vmem:[%s15345_s12 + $0x9e8] sm:$0xff] }
 0xd2b   : > { %v5433_v18 = vmul.f32 %v5422_v20, %v13752_v51 }
 0xd2c   : > { %v5426_v38 = vmul.f32 0.5, %v5425_v0 }
 0xd2d   : > { %v5440_v19 = vmul.f32 %v7950_v47, %v5433_v18 }
 0xd2e   : > { %v5427_v25 = vsub.f32 1.5, %v5426_v38 }
 0xd2f   : > { %v5447_v30 = vadd.f32 %v7951_v36, %v5440_v19 }
 0xd30   : > { %v5428_v56 = vmul.f32 %v8029_v26, %v5427_v25 }
 0xd31   : > { %5613 = vmatmul.f32.vlgmr.msra.gmra.mxu2 %v5447_v30  ;;  %5636 = vmatmul.f32.vlgmr.msra.gmra.mxu1 %v5447_v30 }
 0xd32   : > { %v5432_v31 = vsel %vm5431_vm10, %v8029_v26, %v5428_v56  ;;  %5659 = vmatmul.f32.vlgmr.msra.gmra.mxu3 %v5447_v30  ;;  %5682 = vmatmul.f32.vlgmr.msra.gmra.mxu0 %v5447_v30 }
 0xd33   : > { %v5434_v51 = vmul.f32 %v5432_v31, %v13757_v48  ;;  %v5582_v48 = vperm.slane %v14047_v35, 1  ;;  %6642 = vmatpush.msra.mxu1 %v7830_v4  ;;  %6688 = vmatpush.msra.mxu0 %v7862_v34 }
 0xd35   : > { %v5441_v21 = vmul.f32 %v7950_v47, %v5434_v51  ;;  %6643 = vmatpush.msra.mxu1 %v7829_v43  ;;  %6689 = vmatpush.msra.mxu0 %v7861_v3 }
 0xd37   : > { %v5448_v42 = vadd.f32 %v7951_v36, %v5441_v21  ;;  %6644 = vmatpush.msra.mxu1 %v7828_v44  ;;  %6690 = vmatpush.msra.mxu0 %v7860_v52 }
 0xd39   : > { %5616 = vmatmul.f32.gmra.mxu2 %v5448_v42  ;;  %5639 = vmatmul.f32.gmra.mxu1 %v5448_v42 }
 0xd3a   : > { %5662 = vmatmul.f32.gmra.mxu3 %v5448_v42  ;;  %5685 = vmatmul.f32.gmra.mxu0 %v5448_v42 }
 0xd41   : > { %5705 = vmatmul.f32.vlgmr.msrb.gmra.mxu2 %v5447_v30  ;;  %5728 = vmatmul.f32.vlgmr.msrb.gmra.mxu1 %v5447_v30 }
 0xd42   : > { %5751 = vmatmul.f32.vlgmr.msrb.gmra.mxu3 %v5447_v30  ;;  %5774 = vmatmul.f32.vlgmr.msrb.gmra.mxu0 %v5447_v30 }
 0xd49   : > { %5708 = vmatmul.f32.gmra.mxu2 %v5448_v42  ;;  %5731 = vmatmul.f32.gmra.mxu1 %v5448_v42 }
 0xd4a   : > { %5754 = vmatmul.f32.gmra.mxu3 %v5448_v42  ;;  %5777 = vmatmul.f32.gmra.mxu0 %v5448_v42 }
 0xdae   : > { %v5637_v53 = vpop.f32.mrf.mxu1 }
 0xdaf   : > { %v14051_v10 = vadd.f32 %v5637_v53, %v5582_v48  ;;  %v5683_v46 = vpop.f32.mrf.mxu0 }
 0xdb0   : > { %v14055_v61 = vadd.f32 %v5683_v46, %v5584_v24 }
 0xdb1   : > { %v14058_v60 = vmul.f32 0.70710677, %v14051_v10 }
 0xdb2   : > { %v14062_v11 = vmul.f32 0.70710677, %v14055_v61 }
 0xdb3   : > { %v5853_v55 = vmul.f32 %v14058_v60, %v14058_v60 }
 0xdb4   : > { %v5933_v50 = vmul.f32 %v14062_v11, %v14062_v11  ;;  %v5614_v28 = vpop.f32.mrf.mxu2 }
 0xdb5   : > { %v14069_v37 = vmin.f32 %v5853_v55, 16.0  ;;  %v14073_v6 = vadd.f32 %v5614_v28, %v5581_v23  ;;  %v5660_v63 = vpop.f32.mrf.mxu3 }
 0xdb6   : > { %v14075_v14 = vmin.f32 %v5933_v50, 16.0  ;;  %v14079_v29 = vadd.f32 %v5660_v63, %v5583_v45  ;;  %v5640_v8 = vpop.f32.mrf.mxu1 }
 0xdb7   : > { %v5855_v17 = vmul.f32 2.1237322e-06, %v14069_v37  ;;  %v5866_v15 = vmul.f32 3.8918573e-05, %v14069_v37  ;;  %v14089_v27 = vmul.f32 0.70710677, %v14073_v6  ;;  %v14126_v38 = vadd.f32 %v5640_v8, %v5582_v48 }
 0xdb8   : > { %v5935_v40 = vmul.f32 2.1237322e-06, %v14075_v14  ;;  %v5946_v9 = vmul.f32 3.8918573e-05, %v14075_v14  ;;  %v14094_v7 = vmul.f32 0.70710677, %v14079_v29 }
 0xdb9   : > { %v5856_v12 = vadd.f32 0.00028619796, %v5855_v17  ;;  %v5867_v32 = vadd.f32 0.001143296, %v5866_v15  ;;  %v5813_v59 = vmul.f32 %v14089_v27, %v14089_v27  ;;  %v14134_v55 = vmul.f32 0.70710677, %v14126_v38 }
 0xdba   : > { %v5936_v5 = vadd.f32 0.00028619796, %v5935_v40  ;;  %v5947_v1 = vadd.f32 0.001143296, %v5946_v9  ;;  %v5893_v62 = vmul.f32 %v14094_v7, %v14094_v7 }
 0xdbb   : > { %v5857_v57 = vmul.f32 %v5856_v12, %v14069_v37  ;;  %v5868_v22 = vmul.f32 %v5867_v32, %v14069_v37  ;;  %v14109_v58 = vmin.f32 %v5813_v59, 16.0 }
 0xdbc   : > { %v5937_v33 = vmul.f32 %v5936_v5, %v14075_v14  ;;  %v5948_v49 = vmul.f32 %v5947_v1, %v14075_v14  ;;  %v14122_v20 = vmin.f32 %v5893_v62, 16.0  ;;  %v5686_v5 = vpop.f32.mrf.mxu0 }
 0xdbd   : > { %v5858_v26 = vadd.f32 0.0036580483, %v5857_v57  ;;  %v5869_v54 = vadd.f32 0.014752088, %v5868_v22  ;;  %v5815_v13 = vmul.f32 2.1237322e-06, %v14109_v58  ;;  %v6173_v57 = vmul.f32 %v14134_v55, %v14134_v55 }
 0xdbe   : > { %v5949_v41 = vadd.f32 0.014752088, %v5948_v49  ;;  %v5826_v47 = vmul.f32 3.8918573e-05, %v14109_v58  ;;  %v5938_v18 = vadd.f32 0.0036580483, %v5937_v33  ;;  %v5687_v33 = vadd.f32 %v5686_v5, %v5584_v24 }
 0xdbf   : > { %v5870_v39 = vmul.f32 %v5869_v54, %v14069_v37  ;;  %v5859_v0 = vmul.f32 %v5858_v26, %v14069_v37  ;;  %v5816_v56 = vadd.f32 0.00028619796, %v5815_v13  ;;  %v5906_v21 = vmul.f32 3.8918573e-05, %v14122_v20 }
 0xdc0   : > { %v5950_v36 = vmul.f32 %v5949_v41, %v14075_v14  ;;  %v5827_v25 = vadd.f32 0.001143296, %v5826_v47  ;;  %v5939_v53 = vmul.f32 %v5938_v18, %v14075_v14  ;;  %v5895_v28 = vmul.f32 2.1237322e-06, %v14122_v20  ;;  %v7814_v41 = vld [vmem:[%s15345_s12 + $0x878] sm:$0xff]  ;;  %v7827_v47 = vld [vmem:[%s15345_s12 + $0x8e0] sm:$0xff] }
 0xdc1   : > { %v5871_v19 = vadd.f32 0.112945676, %v5870_v39  ;;  %v5860_v42 = vadd.f32 0.05243302, %v5859_v0  ;;  %v5817_v17 = vmul.f32 %v5816_v56, %v14109_v58  ;;  %v5907_v40 = vadd.f32 0.001143296, %v5906_v21  ;;  %6619 = vmatpush.msra.mxu2 %v7814_v41  ;;  %6645 = vmatpush.msra.mxu1 %v7827_v47 }
 0xdc2   : > { %v5951_v30 = vadd.f32 0.112945676, %v5950_v36  ;;  %v5828_v51 = vmul.f32 %v5827_v25, %v14109_v58  ;;  %v5940_v12 = vadd.f32 0.05243302, %v5939_v53  ;;  %v5896_v59 = vadd.f32 0.00028619796, %v5895_v28 }
 0xdc3   : > { %v5872_v31 = vmul.f32 %v5871_v19, %v14069_v37  ;;  %v5861_v9 = vmul.f32 %v5860_v42, %v14069_v37  ;;  %v5818_v34 = vadd.f32 0.0036580483, %v5817_v17  ;;  %v5908_v3 = vmul.f32 %v5907_v40, %v14122_v20  ;;  %v7846_v0 = vld [vmem:[%s15345_s12 + $0x978] sm:$0xff] }
 0xdc4   : > { %v5952_v46 = vmul.f32 %v5951_v30, %v14075_v14  ;;  %v5829_v50 = vadd.f32 0.014752088, %v5828_v51  ;;  %v5941_v62 = vmul.f32 %v5940_v12, %v14075_v14  ;;  %v5897_v44 = vmul.f32 %v5896_v59, %v14122_v20  ;;  %6665 = vmatpush.msra.mxu3 %v7846_v0 }
 0xdc5   : > { %v5873_v48 = vadd.f32 0.4994258, %v5872_v31  ;;  %v5862_v49 = vadd.f32 0.18741608, %v5861_v9  ;;  %v14155_v26 = vmin.f32 %v6173_v57, 16.0  ;;  %v5819_v54 = vmul.f32 %v5818_v34, %v14109_v58 }
 0xdc6   : > { %v5953_v63 = vadd.f32 0.4994258, %v5952_v46  ;;  %v5830_v4 = vmul.f32 %v5829_v50, %v14109_v58  ;;  %v5909_v52 = vadd.f32 0.014752088, %v5908_v3  ;;  %v14163_v24 = vmul.f32 0.5, %v14051_v10 }
 0xdc7   : > { %v5874_v15 = vmul.f32 %v5873_v48, %v14069_v37  ;;  %v14166_v13 = vmul.f32 0.5, %v14055_v61  ;;  %v14168_v39 = vmul.f32 0.70710677, %v5687_v33  ;;  %v5863_v18 = vmul.f32 %v5862_v49, %v14069_v37  ;;  %v7859_v61 = vld [vmem:[%s15345_s12 + $0x9e0] sm:$0xff] }
 0xdc8   : > { %v5954_v32 = vmul.f32 %v5953_v63, %v14075_v14  ;;  %v5831_v43 = vadd.f32 0.112945676, %v5830_v4  ;;  %v5942_v36 = vadd.f32 0.18741608, %v5941_v62  ;;  %v5910_v10 = vmul.f32 %v5909_v52, %v14122_v20  ;;  %6691 = vmatpush.msra.mxu0 %v7859_v61 }
 0xdc9   : > { %v14142_v1 = vadd.f32 1.0, %v5874_v15  ;;  %v5898_v30 = vadd.f32 0.0036580483, %v5897_v44  ;;  %v6175_v56 = vmul.f32 2.1237322e-06, %v14155_v26  ;;  %v14190_v21 = vmul.f32 0.5, %v14073_v6  ;;  %v5617_v6 = vpop.f32.mrf.mxu2 }
 0xdca   : > { %v14146_v22 = vadd.f32 1.0, %v5954_v32  ;;  %v5832_v8 = vmul.f32 %v5831_v43, %v14109_v58  ;;  %v6186_v31 = vmul.f32 3.8918573e-05, %v14155_v26  ;;  %v5820_v42 = vadd.f32 0.05243302, %v5819_v54 }
 0xdcb   : > { %8030 = vrcp.f32 %v14142_v1  ;;  %v14196_v48 = vmul.f32 0.5, %v14079_v29  ;;  %v5911_v50 = vadd.f32 0.112945676, %v5910_v10  ;;  %v6253_v28 = vmul.f32 %v14168_v39, %v14168_v39 }
 0xdcc   : > { %8032 = vrcp.f32 %v14146_v22  ;;  %v5833_v19 = vadd.f32 0.4994258, %v5832_v8  ;;  %v5864_v63 = vadd.f32 1.1283791, %v5863_v18  ;;  %v5943_v15 = vmul.f32 %v5942_v36, %v14075_v14 }
 0xdcd   : > { %v5899_v40 = vmul.f32 %v5898_v30, %v14122_v20  ;;  %v5912_v9 = vmul.f32 %v5911_v50, %v14122_v20  ;;  %v6176_v12 = vadd.f32 0.00028619796, %v6175_v56  ;;  %v6187_v32 = vadd.f32 0.001143296, %v6186_v31 }
 0xdce   : > { %v5834_v53 = vmul.f32 %v5833_v19, %v14109_v58  ;;  %v5821_v29 = vmul.f32 %v5820_v42, %v14109_v58  ;;  %v14208_v5 = vmul.f32 0.5, %v14126_v38  ;;  %v14210_v59 = vmul.f32 0.5, %v5687_v33 }
 0xdcf   : > { %v5913_v14 = vadd.f32 0.4994258, %v5912_v9  ;;  %v14212_v34 = vmin.f32 %v6253_v28, 16.0  ;;  %v14216_v43 = vadd.f32 %v5617_v6, %v5581_v23  ;;  %v14219_v3 = vmul.f32 %v5864_v63, %v14058_v60 }
 0xdd0   : > { %v14201_v4 = vadd.f32 1.0, %v5834_v53  ;;  %v5944_v62 = vadd.f32 1.1283791, %v5943_v15  ;;  %v6188_v44 = vmul.f32 %v6187_v32, %v14155_v26  ;;  %v5885_v38 = vand.u32 2147483647, %v14142_v1  ;;  %v7813_v32 = vld [vmem:[%s15345_s12 + $0x870] sm:$0xff] }
 0xdd1   : > { %v14181_v25 = vpop.eup %8030  ;;  %v5900_v33 = vadd.f32 0.05243302, %v5899_v40  ;;  %v5914_v54 = vmul.f32 %v5913_v14, %v14122_v20  ;;  %v6177_v8 = vmul.f32 %v6176_v12, %v14155_v26  ;;  %vm5881_vm11 = vweird.f32 %v14142_v1  ;;  %6620 = vmatpush.msra.mxu2 %v7813_v32 }
 0xdd2   : > { %v14185_v51 = vpop.eup %8032  ;;  %v5877_v37 = vmul.f32 %v14181_v25, %v14142_v1  ;;  %8034 = vrcp.f32 %v14201_v4  ;;  %v5887_v23 = vand.u32 2147483648, %v14142_v1  ;;  %v5822_v52 = vadd.f32 0.18741608, %v5821_v29  ;;  %v7845_v29 = vld [vmem:[%s15345_s12 + $0x970] sm:$0xff] }
 0xdd3   : > { %v5957_v46 = vmul.f32 %v14185_v51, %v14146_v22  ;;  %v6189_v41 = vadd.f32 0.014752088, %v6188_v44  ;;  %v5965_v47 = vand.u32 2147483647, %v14146_v22  ;;  %v14230_v0 = vadd.f32 1.0, %v5914_v54  ;;  %6666 = vmatpush.msra.mxu3 %v7845_v29 }
 0xdd4   : > { %v5878_v17 = vsub.f32 1.0, %v5877_v37  ;;  %v6255_v18 = vmul.f32 2.1237322e-06, %v14212_v34  ;;  %vm5882_vm12 = vweird.f32 %v14181_v25  ;;  %v5967_v10 = vand.u32 2147483648, %v14146_v22 }
 0xdd5   : > { %v5958_v57 = vsub.f32 1.0, %v5957_v46  ;;  %v6190_v61 = vmul.f32 %v6189_v41, %v14155_v26  ;;  %v5901_v56 = vmul.f32 %v5900_v33, %v14122_v20  ;;  %8036 = vrcp.f32 %v14230_v0  ;;  %vm14252_vm15 = vmor %vm5881_vm11, %vm5882_vm12  ;;  %v7843_v46 = vld [vmem:[%s15345_s12 + $0x960] sm:$0xff] }
 0xdd6   : > { %v5879_v49 = vmul.f32 %v14181_v25, %v5878_v17  ;;  %v6178_v31 = vadd.f32 0.0036580483, %v6177_v8  ;;  %vm14243_vm13 = vcmp.eq.f32.partialorder %v5885_v38, 8.507059e+37  ;;  %vm5961_vm14 = vweird.f32 %v14146_v22  ;;  %v7858_v8 = vld [vmem:[%s15345_s12 + $0x9d8] sm:$0xff] }
 0xdd7   : > { %v5959_v60 = vmul.f32 %v14185_v51, %v5958_v57  ;;  %v5823_v42 = vmul.f32 %v5822_v52, %v14109_v58  ;;  %v6266_v53 = vmul.f32 3.8918573e-05, %v14212_v34  ;;  %vm5962_vm1 = vweird.f32 %v14185_v51  ;;  %v7825_v52 = vld [vmem:[%s15345_s12 + $0x8d0] sm:$0xff]  ;;  %6692 = vmatpush.msra.mxu0 %v7858_v8  ;;  %v5663_v58 = vpop.f32.mrf.mxu3 }
 0xdd8   : > { %v14233_v36 = vpop.eup %8034  ;;  %v5880_v19 = vadd.f32 %v14181_v25, %v5879_v49  ;;  %v6191_v28 = vadd.f32 0.112945676, %v6190_v61  ;;  %v6256_v63 = vadd.f32 0.00028619796, %v6255_v18  ;;  %v5888_v15 = vor.u32 1.1754944e-38, %v5887_v23  ;;  %vm14281_vm3 = vmor %vm5961_vm14, %vm5962_vm1  ;;  %v7812_v23 = vld [vmem:[%s15345_s12 + $0x868] sm:$0xff] }
 0xdd9   : > { %v5837_v30 = vmul.f32 %v14233_v36, %v14201_v4  ;;  %v5960_v50 = vadd.f32 %v14185_v51, %v5959_v60  ;;  %vm14261_vm2 = vcmp.eq.f32.partialorder %v5965_v47, 8.507059e+37  ;;  %v5968_v6 = vor.u32 1.1754944e-38, %v5967_v10  ;;  %6621 = vmatpush.msra.mxu2 %v7812_v23  ;;  %v7844_v18 = vld [vmem:[%s15345_s12 + $0x968] sm:$0xff] }
 0xdda   : > { %v5884_v17 = vsel %vm14252_vm15, %v14181_v25, %v5880_v19  ;;  %v5902_v40 = vadd.f32 0.18741608, %v5901_v56  ;;  %v6179_v9 = vmul.f32 %v6178_v31, %v14155_v26  ;;  %v6192_v12 = vmul.f32 %v6191_v28, %v14155_v26  ;;  %v7826_v25 = vld [vmem:[%s15345_s12 + $0x8d8] sm:$0xff]  ;;  %v7857_v19 = vld [vmem:[%s15345_s12 + $0x9d0] sm:$0xff]  ;;  %6667 = vmatpush.msra.mxu3 %v7844_v18  ;;  %v7824_v31 = vld [vmem:[%s15345_s12 + $0x8c8] sm:$0xff] }
 0xddb   : > { %v5838_v1 = vsub.f32 1.0, %v5837_v30  ;;  %v5945_v57 = vmul.f32 %v5944_v62, %v14062_v11  ;;  %v5824_v49 = vadd.f32 1.1283791, %v5823_v42  ;;  %v6267_v44 = vadd.f32 0.001143296, %v6266_v53  ;;  %6646 = vmatpush.msra.mxu1 %v7826_v25  ;;  %v14288_v33 = vpop.eup %8036  ;;  %6693 = vmatpush.msra.mxu0 %v7857_v19 }
 0xddc   : > { %v14286_v38 = vmul.f32 0.70710677, %v14216_v43  ;;  %v5889_v11 = vsel %vm14243_vm13, %v5888_v15, %v5884_v17  ;;  %v5964_v22 = vsel %vm14281_vm3, %v14185_v51, %v5960_v50  ;;  %v6193_v62 = vadd.f32 0.4994258, %v6192_v12  ;;  %6668 = vmatpush.msra.mxu3 %v7843_v46 }
 0xddd   : > { %v6257_v54 = vmul.f32 %v6256_v63, %v14212_v34  ;;  %v5839_v41 = vmul.f32 %v14233_v36, %v5838_v1  ;;  %v5917_v51 = vmul.f32 %v14288_v33, %v14230_v0  ;;  %v6268_v60 = vmul.f32 %v6267_v44, %v14212_v34  ;;  %6647 = vmatpush.msra.mxu1 %v7825_v52 }
 0xdde   : > { %v14310_v47 = vmul.f32 0.5, %v14216_v43  ;;  %v5903_v10 = vmul.f32 %v5902_v40, %v14122_v20  ;;  %v6180_v61 = vadd.f32 0.05243302, %v6179_v9  ;;  %v6194_v30 = vmul.f32 %v6193_v62, %v14155_v26  ;;  %v7811_v43 = vld [vmem:[%s15345_s12 + $0x860] sm:$0xff] }
 0xddf   : > { %v6133_v56 = vmul.f32 %v14286_v38, %v14286_v38  ;;  %v5890_v37 = vmul.f32 %v5889_v11, %v14219_v3  ;;  %v5845_v20 = vand.u32 2147483647, %v14201_v4  ;;  %v5847_v42 = vand.u32 2147483648, %v14201_v4  ;;  %6622 = vmatpush.msra.mxu2 %v7811_v43  ;;  %6648 = vmatpush.msra.mxu1 %v7824_v31  ;;  %v7856_v3 = vld [vmem:[%s15345_s12 + $0x9c8] sm:$0xff] }
 0xde0   : > { %v6269_v53 = vadd.f32 0.014752088, %v6268_v60  ;;  %v5969_v50 = vsel %vm14261_vm2, %v5968_v6, %v5964_v22  ;;  %vm5842_vm4 = vweird.f32 %v14233_v36  ;;  %v6258_v28 = vadd.f32 0.0036580483, %v6257_v54  ;;  %6694 = vmatpush.msra.mxu0 %v7856_v3 }
 0xde1   : > { %v14337_v63 = vmin.f32 %v6133_v56, 16.0  ;;  %v5840_v17 = vadd.f32 %v14233_v36, %v5839_v41  ;;  %v5918_v15 = vsub.f32 1.0, %v5917_v51  ;;  %v14343_v1 = vadd.f32 1.0, %v6194_v30 }
 0xde2   : > { %v6270_v40 = vmul.f32 %v6269_v53, %v14212_v34  ;;  %v5825_v6 = vmul.f32 %v5824_v49, %v14089_v27  ;;  %vm5841_vm5 = vweird.f32 %v14201_v4  ;;  %v5904_v9 = vadd.f32 1.1283791, %v5903_v10  ;;  %v5729_v10 = vpop.f32.mrf.mxu1 }
 0xde3   : > { %v6181_v12 = vmul.f32 %v6180_v61, %v14155_v26  ;;  %v5970_v32 = vmul.f32 %v5969_v50, %v5945_v57  ;;  %vm14349_vm0 = vcmp.eq.f32.partialorder %v5845_v20, 8.507059e+37  ;;  %v5848_v29 = vor.u32 1.1754944e-38, %v5847_v42  ;;  %vm14355_vm6 = vmor %vm5841_vm5, %vm5842_vm4 }
 0xde4   : > { %v6271_v14 = vadd.f32 0.112945676, %v6270_v40  ;;  %v7784_v44 = vclamps-f32 %v5890_v37, 1.0  ;;  %v6259_v27 = vmul.f32 %v6258_v28, %v14212_v34  ;;  %v6146_v4 = vmul.f32 3.8918573e-05, %v14337_v63 }
 0xde5   : > { %v14363_v57 = vadd.f32 %v5663_v58, %v5583_v45  ;;  %v5844_v49 = vsel %vm14355_vm6, %v14233_v36, %v5840_v17  ;;  %v5919_v22 = vmul.f32 %v14288_v33, %v5918_v15  ;;  %8038 = vrcp.f32 %v14343_v1 }
 0xde6   : > { %v6272_v62 = vmul.f32 %v6271_v14, %v14212_v34  ;;  %v14372_v54 = vmul.f32 %v5904_v9, %v14094_v7  ;;  %v6182_v8 = vadd.f32 0.18741608, %v6181_v12  ;;  %v6135_v23 = vmul.f32 2.1237322e-06, %v14337_v63 }
 0xde7   : > { %v6147_v52 = vadd.f32 0.001143296, %v6146_v4  ;;  %v7786_v41 = vclamps-f32 %v5970_v32, 1.0  ;;  %v5925_v45 = vand.u32 2147483647, %v14230_v0  ;;  %v5927_v51 = vand.u32 2147483648, %v14230_v0 }
 0xde8   : > { %v6273_v60 = vadd.f32 0.4994258, %v6272_v62  ;;  %v5849_v36 = vsel %vm14349_vm0, %v5848_v29, %v5844_v49  ;;  %v14381_v19 = vmul.f32 0.70710677, %v14363_v57  ;;  %v5586_v7 = vperm.slane %v14047_v35, 5  ;;  %v7810_v49 = vld [vmem:[%s15345_s12 + $0x858] sm:$0xff] }
 0xde9   : > { %v6148_v18 = vmul.f32 %v6147_v52, %v14337_v63  ;;  %v6454_v61 = vadd.f32 1.0, %v7784_v44  ;;  %v5920_v30 = vadd.f32 %v14288_v33, %v5919_v22  ;;  %vm5922_vm7 = vweird.f32 %v14288_v33  ;;  %v7823_v22 = vld [vmem:[%s15345_s12 + $0x8c0] sm:$0xff]  ;;  %6623 = vmatpush.msra.mxu2 %v7810_v49 }
 0xdea   : > { %v6260_v56 = vadd.f32 0.05243302, %v6259_v27  ;;  %v6183_v43 = vmul.f32 %v6182_v8, %v14155_v26  ;;  %v6136_v31 = vadd.f32 0.00028619796, %v6135_v23  ;;  %v6213_v20 = vmul.f32 %v14381_v19, %v14381_v19  ;;  %6649 = vmatpush.msra.mxu1 %v7823_v22 }
 0xdeb   : > { %v6149_v37 = vadd.f32 0.014752088, %v6148_v18  ;;  %v14389_v42 = vpop.eup %8038  ;;  %v5850_v53 = vmul.f32 %v5849_v36, %v5825_v6  ;;  %vm5921_vm8 = vweird.f32 %v14230_v0  ;;  %v6274_v46 = vmul.f32 %v6273_v60, %v14212_v34 }
 0xdec   : > { %v14395_v50 = vadd.f32 %v5729_v10, %v5586_v7  ;;  %vm14397_vm9 = vmor %vm5921_vm8, %vm5922_vm7  ;;  %vm14401_vm10 = vcmp.eq.f32.partialorder %v5925_v45, 8.507059e+37  ;;  %v5928_v3 = vor.u32 1.1754944e-38, %v5927_v51  ;;  %v14406_v15 = vmin.f32 %v6213_v20, 16.0  ;;  %v7842_v45 = vld [vmem:[%s15345_s12 + $0x958] sm:$0xff]  ;;  %v7855_v51 = vld [vmem:[%s15345_s12 + $0x9c0] sm:$0xff] }
 0xded   : > { %v6150_v17 = vmul.f32 %v6149_v37, %v14337_v63  ;;  %v6456_v0 = vadd.f32 1.0, %v7786_v41  ;;  %v5924_v40 = vsel %vm14397_vm9, %v14288_v33, %v5920_v30  ;;  %v6261_v58 = vmul.f32 %v6260_v56, %v14212_v34  ;;  %v5775_v41 = vpop.f32.mrf.mxu0  ;;  %6669 = vmatpush.msra.mxu3 %v7842_v45  ;;  %6695 = vmatpush.msra.mxu0 %v7855_v51 }
 0xdee   : > { %v14413_v6 = vmul.f32 0.70710677, %v14395_v50  ;;  %v14416_v9 = vmul.f32 %v6454_v61, %v14163_v24  ;;  %v6184_v12 = vadd.f32 1.1283791, %v6183_v43  ;;  %v6197_v32 = vmul.f32 %v14389_v42, %v14343_v1 }
 0xdef   : > { %v6137_v25 = vmul.f32 %v6136_v31, %v14337_v63  ;;  %v7783_v29 = vclamps-f32 %v5850_v53, 1.0  ;;  %v14421_v14 = vadd.f32 1.0, %v6274_v46  ;;  %v6151_v44 = vadd.f32 0.112945676, %v6150_v17 }
 0xdf0   : > { %v6215_v33 = vmul.f32 2.1237322e-06, %v14406_v15  ;;  %v5929_v11 = vsel %vm14401_vm10, %v5928_v3, %v5924_v40  ;;  %v6226_v27 = vmul.f32 3.8918573e-05, %v14406_v15  ;;  %v6013_v24 = vmul.f32 %v14413_v6, %v14413_v6 }
 0xdf1   : > { %v5588_v4 = vperm.slane %v14047_v35, 7  ;;  %v14437_v62 = vmul.f32 %v6456_v0, %v14166_v13  ;;  %v6262_v8 = vadd.f32 0.18741608, %v6261_v58  ;;  %v6152_v23 = vmul.f32 %v6151_v44, %v14337_v63 }
 0xdf2   : > { %v6216_v52 = vadd.f32 0.00028619796, %v6215_v33  ;;  %v6198_v60 = vsub.f32 1.0, %v6197_v32  ;;  %v6138_v36 = vadd.f32 0.0036580483, %v6137_v25  ;;  %v14446_v13 = vmin.f32 %v6013_v24, 16.0 }
 0xdf3   : > { %v6227_v18 = vadd.f32 0.001143296, %v6226_v27  ;;  %v5930_v10 = vmul.f32 %v5929_v11, %v14372_v54  ;;  %8040 = vrcp.f32 %v14421_v14  ;;  %v6153_v61 = vadd.f32 0.4994258, %v6152_v23 }
 0xdf4   : > { %v6217_v30 = vmul.f32 %v6216_v52, %v14406_v15  ;;  %v6015_v43 = vmul.f32 2.1237322e-06, %v14446_v13  ;;  %v6026_v31 = vmul.f32 3.8918573e-05, %v14446_v13  ;;  %v14456_v37 = vadd.f32 %v5775_v41, %v5588_v4 }
 0xdf5   : > { %v6228_v56 = vmul.f32 %v6227_v18, %v14406_v15  ;;  %v14459_v20 = vmul.f32 %v6184_v12, %v14134_v55  ;;  %v6205_v54 = vand.u32 2147483647, %v14343_v1  ;;  %v6207_v53 = vand.u32 2147483648, %v14343_v1 }
 0xdf6   : > { %v6263_v46 = vmul.f32 %v6262_v8, %v14212_v34  ;;  %v6199_v28 = vmul.f32 %v14389_v42, %v6198_v60  ;;  %v6139_v26 = vmul.f32 %v6138_v36, %v14337_v63  ;;  %v6218_v3 = vadd.f32 0.0036580483, %v6217_v30 }
 0xdf7   : > { %v6229_v17 = vadd.f32 0.014752088, %v6228_v56  ;;  %vm6201_vm11 = vweird.f32 %v14343_v1  ;;  %v6154_v0 = vmul.f32 %v6153_v61, %v14337_v63  ;;  %v6016_v40 = vadd.f32 0.00028619796, %v6015_v43 }
 0xdf8   : > { %v6027_v58 = vadd.f32 0.001143296, %v6026_v31  ;;  %v6453_v55 = vadd.f32 1.0, %v7783_v29  ;;  %v7785_v12 = vclamps-f32 %v5930_v10, 1.0  ;;  %v14470_v25 = vmul.f32 0.70710677, %v14456_v37 }
 0xdf9   : > { %v6230_v32 = vmul.f32 %v6229_v17, %v14406_v15  ;;  %v14472_v34 = vpop.eup %8040  ;;  %vm14474_vm12 = vcmp.eq.f32.partialorder %v6205_v54, 8.507059e+37  ;;  %v6208_v33 = vor.u32 1.1754944e-38, %v6207_v53  ;;  %v6264_v11 = vadd.f32 1.1283791, %v6263_v46 }
 0xdfa   : > { %v6219_v27 = vmul.f32 %v6218_v3, %v14406_v15  ;;  %v6200_v24 = vadd.f32 %v14389_v42, %v6199_v28  ;;  %vm6202_vm13 = vweird.f32 %v14389_v42  ;;  %v6140_v29 = vadd.f32 0.05243302, %v6139_v26  ;;  %v5706_v26 = vpop.f32.mrf.mxu2 }
 0xdfb   : > { %v6028_v49 = vmul.f32 %v6027_v58, %v14446_v13  ;;  %v14482_v22 = vadd.f32 1.0, %v6154_v0  ;;  %v6231_v8 = vadd.f32 0.112945676, %v6230_v32  ;;  %v6017_v23 = vmul.f32 %v6016_v40, %v14446_v13  ;;  %vm14494_vm14 = vmor %vm6201_vm11, %vm6202_vm13 }
 0xdfc   : > { %v6093_v52 = vmul.f32 %v14470_v25, %v14470_v25  ;;  %v14488_v41 = vmul.f32 %v6453_v55, %v14190_v21  ;;  %v6455_v45 = vadd.f32 1.0, %v7785_v12  ;;  %v6277_v51 = vmul.f32 %v14472_v34, %v14421_v14 }
 0xdfd   : > { %v6029_v60 = vadd.f32 0.014752088, %v6028_v49  ;;  %v14499_v18 = vmul.f32 0.5, %v14363_v57  ;;  %v6220_v10 = vadd.f32 0.05243302, %v6219_v27  ;;  %v6232_v61 = vmul.f32 %v6231_v8, %v14406_v15 }
 0xdfe   : > { %v14502_v30 = vmin.f32 %v6093_v52, 16.0  ;;  %v6204_v21 = vsel %vm14494_vm14, %v14389_v42, %v6200_v24  ;;  %v14508_v56 = vmul.f32 %v6264_v11, %v14168_v39  ;;  %v6141_v1 = vmul.f32 %v6140_v29, %v14337_v63 }
 0xdff   : > { %v6030_v43 = vmul.f32 %v6029_v60, %v14446_v13  ;;  %8042 = vrcp.f32 %v14482_v22  ;;  %v6018_v57 = vadd.f32 0.0036580483, %v6017_v23  ;;  %v15363_v54 = vperm.slane %v14047_v35, 4 }
 0xe00   : > { %v6095_v31 = vmul.f32 2.1237322e-06, %v14502_v30  ;;  %v14516_v53 = vmul.f32 %v6455_v45, %v14196_v48  ;;  %v6278_v46 = vsub.f32 1.0, %v6277_v51  ;;  %v6233_v28 = vadd.f32 0.4994258, %v6232_v61 }
 0xe01   : > { %v6031_v42 = vadd.f32 0.112945676, %v6030_v43  ;;  %v6287_v39 = vand.u32 2147483648, %v14421_v14  ;;  %v6221_v3 = vmul.f32 %v6220_v10, %v14406_v15  ;;  %v6106_v0 = vmul.f32 3.8918573e-05, %v14502_v30 }
 0xe02   : > { %v6096_v17 = vadd.f32 0.00028619796, %v6095_v31  ;;  %v6209_v40 = vsel %vm14474_vm12, %v6208_v33, %v6204_v21  ;;  %v6285_v58 = vand.u32 2147483647, %v14421_v14  ;;  %v6142_v55 = vadd.f32 0.18741608, %v6141_v1 }
 0xe03   : > { %v6032_v48 = vmul.f32 %v6031_v42, %v14446_v13  ;;  %v6019_v12 = vmul.f32 %v6018_v57, %v14446_v13  ;;  %v6107_v11 = vadd.f32 0.001143296, %v6106_v0  ;;  %v14529_v27 = vadd.f32 %v5706_v26, %v15363_v54  ;;  %v7809_v21 = vld [vmem:[%s15345_s12 + $0x850] sm:$0xff]  ;;  %v7854_v42 = vld [vmem:[%s15345_s12 + $0x9b8] sm:$0xff]  ;;  %v5752_v0 = vpop.f32.mrf.mxu3 }
 0xe04   : > { %v6097_v32 = vmul.f32 %v6096_v17, %v14502_v30  ;;  %v6279_v24 = vmul.f32 %v14472_v34, %v6278_v46  ;;  %v6234_v29 = vmul.f32 %v6233_v28, %v14406_v15  ;;  %v14534_v44 = vmul.f32 0.5, %v14395_v50  ;;  %v5732_v46 = vpop.f32.mrf.mxu1  ;;  %6624 = vmatpush.msra.mxu2 %v7809_v21  ;;  %v7841_v28 = vld [vmem:[%s15345_s12 + $0x950] sm:$0xff]  ;;  %6696 = vmatpush.msra.mxu0 %v7854_v42 }
 0xe05   : > { %v6033_v33 = vadd.f32 0.4994258, %v6032_v48  ;;  %v14536_v49 = vpop.eup %8042  ;;  %v14539_v8 = vmul.f32 %v6209_v40, %v14459_v20  ;;  %vm6281_vm15 = vweird.f32 %v14421_v14  ;;  %v14542_v23 = vor.u32 1.1754944e-38, %v6287_v39  ;;  %6670 = vmatpush.msra.mxu3 %v7841_v28  ;;  %v7808_v40 = vld [vmem:[%s15345_s12 + $0x848] sm:$0xff]  ;;  %v7807_v14 = vld [vmem:[%s15345_s12 + $0x840] sm:$0xff] }
 0xe06   : > { %v6222_v52 = vadd.f32 0.18741608, %v6221_v3  ;;  %vm14544_vm1 = vcmp.eq.f32.partialorder %v6285_v58, 8.507059e+37  ;;  %v6143_v51 = vmul.f32 %v6142_v55, %v14337_v63  ;;  %v6167_v50 = vand.u32 2147483648, %v14482_v22  ;;  %v7822_v63 = vld [vmem:[%s15345_s12 + $0x8b8] sm:$0xff]  ;;  %v7821_v58 = vld [vmem:[%s15345_s12 + $0x8b0] sm:$0xff]  ;;  %6625 = vmatpush.msra.mxu2 %v7808_v40 }
 0xe07   : > { %v6034_v60 = vmul.f32 %v6033_v33, %v14446_v13  ;;  %v6098_v36 = vadd.f32 0.0036580483, %v6097_v32  ;;  %vm6282_vm2 = vweird.f32 %v14472_v34  ;;  %v6020_v20 = vadd.f32 0.05243302, %v6019_v12  ;;  %6650 = vmatpush.msra.mxu1 %v7822_v63  ;;  %v7853_v32 = vld [vmem:[%s15345_s12 + $0x9b0] sm:$0xff] }
 0xe08   : > { %v6108_v10 = vmul.f32 %v6107_v11, %v14502_v30  ;;  %v14554_v61 = vmul.f32 0.70710677, %v14529_v27  ;;  %v6280_v1 = vadd.f32 %v14472_v34, %v6279_v24  ;;  %v6157_v43 = vmul.f32 %v14536_v49, %v14482_v22  ;;  %vm14600_vm3 = vmor %vm6281_vm15, %vm6282_vm2  ;;  %6697 = vmatpush.msra.mxu0 %v7853_v32  ;;  %6626 = vmatpush.msra.mxu2 %v7807_v14 }
 0xe09   : > { %v14565_v57 = vadd.f32 1.0, %v6234_v29  ;;  %v14567_v31 = vadd.f32 1.0, %v6034_v60  ;;  %v6223_v26 = vmul.f32 %v6222_v52, %v14406_v15  ;;  %v15362_v17 = vperm.slane %v14047_v35, 6  ;;  %v7840_v15 = vld [vmem:[%s15345_s12 + $0x948] sm:$0xff]  ;;  %6651 = vmatpush.msra.mxu1 %v7821_v58 }
 0xe0a   : > { %v6109_v39 = vadd.f32 0.014752088, %v6108_v10  ;;  %v5973_v3 = vmul.f32 %v14554_v61, %v14554_v61  ;;  %v6144_v55 = vadd.f32 1.1283791, %v6143_v51  ;;  %v14590_v48 = vmul.f32 0.5, %v14456_v37  ;;  %6671 = vmatpush.msra.mxu3 %v7840_v15 }
 0xe0b   : > { %8044 = vrcp.f32 %v14567_v31  ;;  %v6099_v12 = vmul.f32 %v6098_v36, %v14502_v30  ;;  %v6165_v24 = vand.u32 2147483647, %v14482_v22  ;;  %v6021_v37 = vmul.f32 %v6020_v20, %v14446_v13  ;;  %v7839_v20 = vld [vmem:[%s15345_s12 + $0x940] sm:$0xff] }
 0xe0c   : > { %v6110_v29 = vmul.f32 %v6109_v39, %v14502_v30  ;;  %v14609_v33 = vadd.f32 %v5732_v46, %v5586_v7  ;;  %v6284_v52 = vsel %vm14600_vm3, %v14472_v34, %v6280_v1  ;;  %v6158_v51 = vsub.f32 1.0, %v6157_v43  ;;  %v7820_v7 = vld [vmem:[%s15345_s12 + $0x8a8] sm:$0xff]  ;;  %6672 = vmatpush.msra.mxu3 %v7839_v20 }
 0xe0d   : > { %v14617_v60 = vmin.f32 %v5973_v3, 16.0  ;;  %v14621_v36 = vadd.f32 %v5752_v0, %v15362_v17  ;;  %v7852_v34 = vld [vmem:[%s15345_s12 + $0x9a8] sm:$0xff]  ;;  %v14632_v10 = vor.u32 1.1754944e-38, %v6167_v50  ;;  %v6224_v21 = vadd.f32 1.1283791, %v6223_v26  ;;  %6652 = vmatpush.msra.mxu1 %v7820_v7 }
 0xe0e   : > { %8046 = vrcp.f32 %v14565_v57  ;;  %v6111_v63 = vadd.f32 0.112945676, %v6110_v29  ;;  %v14636_v1 = vmul.f32 %v6144_v55, %v14286_v38  ;;  %v6100_v43 = vadd.f32 0.05243302, %v6099_v12  ;;  %6698 = vmatpush.msra.mxu0 %v7852_v34 }
 0xe0f   : > { %v5975_v46 = vmul.f32 2.1237322e-06, %v14617_v60  ;;  %v5986_v28 = vmul.f32 3.8918573e-05, %v14617_v60  ;;  %v14643_v50 = vsel %vm14544_vm1, %v14542_v23, %v6284_v52  ;;  %v6022_v42 = vadd.f32 0.18741608, %v6021_v37 }
 0xe10   : > { %v6112_v26 = vmul.f32 %v6111_v63, %v14502_v30  ;;  %v14647_v39 = vmul.f32 0.70710677, %v14621_v36  ;;  %v6159_v38 = vmul.f32 %v14536_v49, %v6158_v51  ;;  %v14653_v58 = vmul.f32 0.70710677, %v14609_v33 }
 0xe11   : > { %v14649_v3 = vpop.eup %8044  ;;  %v5976_v0 = vadd.f32 0.00028619796, %v5975_v46  ;;  %v5987_v40 = vadd.f32 0.001143296, %v5986_v28  ;;  %v14656_v15 = vmul.f32 %v6224_v21, %v14381_v19  ;;  %v14661_v55 = vmul.f32 0.5, %v14529_v27  ;;  %v7837_v21 = vld [vmem:[%s15345_s12 + $0x930] sm:$0xff] }
 0xe12   : > { %v6037_v23 = vmul.f32 %v14649_v3, %v14567_v31  ;;  %v6113_v45 = vadd.f32 0.4994258, %v6112_v26  ;;  %v6101_v12 = vmul.f32 %v6100_v43, %v14502_v30  ;;  %v6053_v37 = vmul.f32 %v14647_v39, %v14647_v39 }
 0xe13   : > { %v5977_v32 = vmul.f32 %v5976_v0, %v14617_v60  ;;  %v5988_v11 = vmul.f32 %v5987_v40, %v14617_v60  ;;  %v6245_v19 = vand.u32 2147483647, %v14565_v57  ;;  %v6023_v14 = vmul.f32 %v6022_v42, %v14446_v13 }
 0xe14   : > { %v14668_v29 = vpop.eup %8046  ;;  %v6038_v52 = vsub.f32 1.0, %v6037_v23  ;;  %v6114_v51 = vmul.f32 %v6113_v45, %v14502_v30  ;;  %v14673_v20 = vmin.f32 %v6053_v37, 16.0  ;;  %v6333_v34 = vmul.f32 %v14653_v58, %v14653_v58 }
 0xe15   : > { %v5978_v27 = vadd.f32 0.0036580483, %v5977_v32  ;;  %v5989_v7 = vadd.f32 0.014752088, %v5988_v11  ;;  %v6045_v43 = vand.u32 2147483647, %v14567_v31  ;;  %v6237_v13 = vmul.f32 %v14668_v29, %v14565_v57 }
 0xe16   : > { %v6039_v63 = vmul.f32 %v14649_v3, %v6038_v52  ;;  %v14680_v46 = vadd.f32 1.0, %v6114_v51  ;;  %v6102_v28 = vadd.f32 0.18741608, %v6101_v12  ;;  %v6055_v26 = vmul.f32 2.1237322e-06, %v14673_v20 }
 0xe17   : > { %v5990_v42 = vmul.f32 %v5989_v7, %v14617_v60  ;;  %v14687_v0 = vadd.f32 %v14536_v49, %v6159_v38  ;;  %v6024_v40 = vadd.f32 1.1283791, %v6023_v14  ;;  %vm6042_vm4 = vweird.f32 %v14649_v3  ;;  %v7806_v14 = vld [vmem:[%s15345_s12 + $0x838] sm:$0xff] }
 0xe18   : > { %8048 = vrcp.f32 %v14680_v46  ;;  %vm6162_vm5 = vweird.f32 %v14536_v49  ;;  %v6040_v23 = vadd.f32 %v14649_v3, %v6039_v63  ;;  %v5979_v45 = vmul.f32 %v5978_v27, %v14617_v60  ;;  %6627 = vmatpush.msra.mxu2 %v7806_v14  ;;  %v7838_v63 = vld [vmem:[%s15345_s12 + $0x938] sm:$0xff] }
 0xe19   : > { %v5991_v32 = vadd.f32 0.112945676, %v5990_v42  ;;  %v14694_v12 = vmin.f32 %v6333_v34, 16.0  ;;  %vm6041_vm0 = vweird.f32 %v14567_v31  ;;  %v6047_v11 = vand.u32 2147483648, %v14567_v31  ;;  %v7819_v34 = vld [vmem:[%s15345_s12 + $0x8a0] sm:$0xff]  ;;  %6673 = vmatpush.msra.mxu3 %v7838_v63 }
 0xe1a   : > { %v6056_v38 = vadd.f32 0.00028619796, %v6055_v26  ;;  %v6066_v37 = vmul.f32 3.8918573e-05, %v14673_v20  ;;  %vm6161_vm6 = vweird.f32 %v14482_v22  ;;  %v6238_v52 = vsub.f32 1.0, %v6237_v13  ;;  %vm14723_vm8 = vmor %vm6041_vm0, %vm6042_vm4  ;;  %6653 = vmatpush.msra.mxu1 %v7819_v34 }
 0xe1b   : > { %vm14703_vm7 = vcmp.eq.f32.partialorder %v6045_v43, 8.507059e+37  ;;  %v6103_v27 = vmul.f32 %v6102_v28, %v14502_v30  ;;  %v5992_v7 = vmul.f32 %v5991_v32, %v14617_v60  ;;  %v7851_v43 = vld [vmem:[%s15345_s12 + $0x9a0] sm:$0xff]  ;;  %v6025_v13 = vmul.f32 %v6024_v40, %v14413_v6  ;;  %v7805_v32 = vld [vmem:[%s15345_s12 + $0x830] sm:$0xff]  ;;  %v7818_v6 = vld [vmem:[%s15345_s12 + $0x898] sm:$0xff]  ;;  %6674 = vmatpush.msra.mxu3 %v7837_v21 }
 0xe1c   : > { %v6057_v28 = vmul.f32 %v6056_v38, %v14673_v20  ;;  %v6067_v42 = vadd.f32 0.001143296, %v6066_v37  ;;  %v6335_v26 = vmul.f32 2.1237322e-06, %v14694_v12  ;;  %vm6241_vm9 = vweird.f32 %v14565_v57  ;;  %6699 = vmatpush.msra.mxu0 %v7851_v43  ;;  %6628 = vmatpush.msra.mxu2 %v7805_v32  ;;  %v7850_v43 = vld [vmem:[%s15345_s12 + $0x998] sm:$0xff]  ;;  %v7849_v32 = vld [vmem:[%s15345_s12 + $0x990] sm:$0xff]  ;;  %vm14816_vm13 = vmor %vm6161_vm6, %vm6162_vm5 }
 0xe1d   : > { %v6044_v31 = vsel %vm14723_vm8, %v14649_v3, %v6040_v23  ;;  %v5980_v40 = vadd.f32 0.05243302, %v5979_v45  ;;  %v5993_v38 = vadd.f32 0.4994258, %v5992_v7  ;;  %v6346_v37 = vmul.f32 3.8918573e-05, %v14694_v12  ;;  %6654 = vmatpush.msra.mxu1 %v7818_v6 }
 0xe1e   : > { %v14740_v14 = vpop.eup %8048  ;;  %v6048_v34 = vor.u32 1.1754944e-38, %v6047_v11  ;;  %v6058_v63 = vadd.f32 0.0036580483, %v6057_v28  ;;  %v6068_v17 = vmul.f32 %v6067_v42, %v14673_v20  ;;  %v6336_v54 = vadd.f32 0.00028619796, %v6335_v26  ;;  %v5778_v42 = vpop.f32.mrf.mxu0  ;;  %6700 = vmatpush.msra.mxu0 %v7850_v43  ;;  %v7836_v26 = vld [vmem:[%s15345_s12 + $0x928] sm:$0xff] }
 0xe1f   : > { %vm14748_vm10 = vcmp.eq.f32.partialorder %v6165_v24, 8.507059e+37  ;;  %v6239_v23 = vmul.f32 %v14668_v29, %v6238_v52  ;;  %v14753_v45 = vadd.f32 1.1283791, %v6103_v27  ;;  %v6117_v11 = vmul.f32 %v14740_v14, %v14680_v46  ;;  %v7804_v24 = vld [vmem:[%s15345_s12 + $0x828] sm:$0xff]  ;;  %v7817_v52 = vld [vmem:[%s15345_s12 + $0x890] sm:$0xff]  ;;  %6675 = vmatpush.msra.mxu3 %v7836_v26 }
 0xe20   : > { %v5994_v7 = vmul.f32 %v5993_v38, %v14617_v60  ;;  %v6049_v27 = vsel %vm14703_vm7, %v6048_v34, %v6044_v31  ;;  %v6059_v30 = vmul.f32 %v6058_v63, %v14673_v20  ;;  %v6069_v28 = vadd.f32 0.014752088, %v6068_v17  ;;  %6629 = vmatpush.msra.mxu2 %v7804_v24  ;;  %6655 = vmatpush.msra.mxu1 %v7817_v52  ;;  %v7803_v63 = vld [vmem:[%s15345_s12 + $0x820] sm:$0xff] }
 0xe21   : > { %v6337_v21 = vmul.f32 %v6336_v54, %v14694_v12  ;;  %v6118_v6 = vsub.f32 1.0, %v6117_v11  ;;  %v5981_v51 = vmul.f32 %v5980_v40, %v14617_v60  ;;  %v6347_v38 = vadd.f32 0.001143296, %v6346_v37  ;;  %6701 = vmatpush.msra.mxu0 %v7849_v32  ;;  %v7816_v40 = vld [vmem:[%s15345_s12 + $0x888] sm:$0xff]  ;;  %v7835_v24 = vld [vmem:[%s15345_s12 + $0x920] sm:$0xff]  ;;  %v7910_v37 = vld [vmem:[%s15345_s12 + $0xb78] sm:$0xff] }
 0xe22   : > { %v14778_v31 = vadd.f32 1.0, %v5994_v7  ;;  %vm6242_vm11 = vweird.f32 %v14668_v29  ;;  %v6125_v54 = vand.u32 2147483647, %v14680_v46  ;;  %v6070_v17 = vmul.f32 %v6069_v28, %v14673_v20  ;;  %6630 = vmatpush.msra.mxu2 %v7803_v63  ;;  %6656 = vmatpush.msra.mxu1 %v7816_v40  ;;  %v7926_v63 = vld [vmem:[%s15345_s12 + $0xbf8] sm:$0xff] }
 0xe23   : > { %v6338_v34 = vadd.f32 0.0036580483, %v6337_v21  ;;  %vm14791_vm12 = vcmp.eq.f32.partialorder %v6245_v19, 8.507059e+37  ;;  %v14795_v11 = vmul.f32 %v6049_v27, %v6025_v13  ;;  %v6119_v7 = vmul.f32 %v14740_v14, %v6118_v6  ;;  %v7848_v19 = vld [vmem:[%s15345_s12 + $0x988] sm:$0xff]  ;;  %v7802_v13 = vld [vmem:[%s15345_s12 + $0x818] sm:$0xff]  ;;  %6676 = vmatpush.msra.mxu3 %v7835_v24  ;;  %v7815_v21 = vld [vmem:[%s15345_s12 + $0x880] sm:$0xff] }
 0xe24   : > { %8050 = vrcp.f32 %v14778_v31  ;;  %v14801_v43 = vadd.f32 %v5778_v42, %v5588_v4  ;;  %v14821_v52 = vadd.f32 %v14668_v29, %v6239_v23  ;;  %vm6122_vm14 = vweird.f32 %v14740_v14  ;;  %6702 = vmatpush.msra.mxu0 %v7848_v19  ;;  %6631 = vmatpush.msra.mxu2 %v7802_v13  ;;  %v7847_v6 = vld [vmem:[%s15345_s12 + $0x980] sm:$0xff]  ;;  %vm14847_vm15 = vmor %vm6241_vm9, %vm6242_vm11 }
 0xe25   : > { %v6060_v27 = vadd.f32 0.05243302, %v6059_v30  ;;  %v6071_v28 = vadd.f32 0.112945676, %v6070_v17  ;;  %v6164_v22 = vsel %vm14816_vm13, %v14536_v49, %v14687_v0  ;;  %v15511_v42 = vand.u32 2147483648, %v14565_v57  ;;  %6657 = vmatpush.msra.mxu1 %v7815_v21  ;;  %v7834_v30 = vld [vmem:[%s15345_s12 + $0x918] sm:$0xff] }
 0xe26   : > { %v5982_v23 = vadd.f32 0.18741608, %v5981_v51  ;;  %v6348_v32 = vmul.f32 %v6347_v38, %v14694_v12  ;;  %v7894_v49 = vld [vmem:[%s15345_s12 + $0xaf8] sm:$0xff]  ;;  %v6120_v51 = vadd.f32 %v14740_v14, %v6119_v7  ;;  %vm6121_vm1 = vweird.f32 %v14680_v46  ;;  %6677 = vmatpush.msra.mxu3 %v7834_v30  ;;  %6703 = vmatpush.msra.mxu0 %v7847_v6  ;;  %v7801_v57 = vld [vmem:[%s15345_s12 + $0x810] sm:$0xff]  ;;  %v5709_v6 = vpop.f32.mrf.mxu2  ;;  %v7799_v0 = vld [vmem:[%s15345_s12 + $0x800] sm:$0xff] }
 0xe27   : > { %v6248_v26 = vor.u32 1.1754944e-38, %v15511_v42  ;;  %v6072_v38 = vmul.f32 %v6071_v28, %v14673_v20  ;;  %v6339_v17 = vmul.f32 %v6338_v34, %v14694_v12  ;;  %v7788_v40 = vclamps-f32 %v14795_v11, 1.0  ;;  %vm14864_vm2 = vmor %vm6121_vm1, %vm6122_vm14  ;;  %6734 = vmatpush.msrb.mxu1 %v7894_v49  ;;  %6632 = vmatpush.msra.mxu2 %v7801_v57  ;;  %v7893_v21 = vld [vmem:[%s15345_s12 + $0xaf0] sm:$0xff]  ;;  %v7800_v42 = vld [vmem:[%s15345_s12 + $0x808] sm:$0xff] }
 0xe28   : > { %v6127_v34 = vand.u32 2147483648, %v14680_v46  ;;  %v6349_v24 = vadd.f32 0.014752088, %v6348_v32  ;;  %v14870_v19 = vmul.f32 0.70710677, %v14801_v43  ;;  %6780 = vmatpush.msrb.mxu0 %v7926_v63  ;;  %v6169_v13 = vsel %vm14748_vm10, %v14632_v10, %v6164_v22  ;;  %v7833_v46 = vld [vmem:[%s15345_s12 + $0x910] sm:$0xff]  ;;  %6658 = vmatmul.f32.vlgmr.msra.gmra.mxu1 %v14416_v9 }
 0xe29   : > { %v6244_v11 = vsel %vm14847_vm15, %v14668_v29, %v14821_v52  ;;  %v6061_v4 = vmul.f32 %v6060_v27, %v14673_v20  ;;  %v6073_v28 = vadd.f32 0.4994258, %v6072_v38  ;;  %v7925_v10 = vld [vmem:[%s15345_s12 + $0xbf0] sm:$0xff]  ;;  %vm14892_vm3 = vcmp.eq.f32.partialorder %v6125_v54, 8.507059e+37  ;;  %6678 = vmatpush.msra.mxu3 %v7833_v46  ;;  %v7832_v9 = vld [vmem:[%s15345_s12 + $0x908] sm:$0xff]  ;;  %6735 = vmatpush.msrb.mxu1 %v7893_v21  ;;  %v7923_v46 = vld [vmem:[%s15345_s12 + $0xbe0] sm:$0xff] }
 0xe2a   : > { %v14890_v3 = vpop.eup %8050  ;;  %v5983_v52 = vmul.f32 %v5982_v23, %v14617_v60  ;;  %v6350_v27 = vmul.f32 %v6349_v24, %v14694_v12  ;;  %v6413_v22 = vmul.f32 %v14870_v19, %v14870_v19  ;;  %v7892_v54 = vld [vmem:[%s15345_s12 + $0xae8] sm:$0xff]  ;;  %v6124_v60 = vsel %vm14864_vm2, %v14740_v14, %v6120_v51  ;;  %6781 = vmatpush.msrb.mxu0 %v7925_v10  ;;  %v7831_v14 = vld [vmem:[%s15345_s12 + $0x900] sm:$0xff]  ;;  %v7877_v21 = vld [vmem:[%s15345_s12 + $0xa70] sm:$0xff] }
 0xe2b   : > { %v14914_v23 = vmul.f32 %v14890_v3, %v14778_v31  ;;  %v6074_v32 = vmul.f32 %v6073_v28, %v14673_v20  ;;  %v6340_v30 = vadd.f32 0.05243302, %v6339_v17  ;;  %v7924_v49 = vld [vmem:[%s15345_s12 + $0xbe8] sm:$0xff]  ;;  %v6458_v51 = vadd.f32 1.0, %v7788_v40  ;;  %6633 = vmatpush.msra.mxu2 %v7800_v42  ;;  %6679 = vmatpush.msra.mxu3 %v7832_v9  ;;  %v7878_v40 = vld [vmem:[%s15345_s12 + $0xa78] sm:$0xff]  ;;  %v7909_v42 = vld [vmem:[%s15345_s12 + $0xb70] sm:$0xff] }
 0xe2c   : > { %v6128_v38 = vor.u32 1.1754944e-38, %v6127_v34  ;;  %v6351_v63 = vadd.f32 0.112945676, %v6350_v27  ;;  %v14926_v57 = vmin.f32 %v6413_v22, 16.0  ;;  %v6249_v17 = vsel %vm14791_vm12, %v6248_v26, %v6244_v11  ;;  %6736 = vmatpush.msrb.mxu1 %v7892_v54  ;;  %6782 = vmatpush.msrb.mxu0 %v7924_v49  ;;  %v7891_v34 = vld [vmem:[%s15345_s12 + $0xae0] sm:$0xff]  ;;  %v7890_v10 = vld [vmem:[%s15345_s12 + $0xad8] sm:$0xff] }
 0xe2d   : > { %v6105_v7 = vmul.f32 %v14753_v45, %v14470_v25  ;;  %v6062_v24 = vadd.f32 0.18741608, %v6061_v4  ;;  %v14932_v28 = vadd.f32 1.0, %v6074_v32  ;;  %v15518_v11 = vperm.slane %v14047_v35, 4  ;;  %6634 = vmatpush.msra.mxu2 %v7799_v0  ;;  %6680 = vmatpush.msra.mxu3 %v7831_v14  ;;  %v7922_v9 = vld [vmem:[%s15345_s12 + $0xbd8] sm:$0xff]  ;;  %v7876_v32 = vld [vmem:[%s15345_s12 + $0xa68] sm:$0xff] }
 0xe2e   : > { %v6129_v25 = vsel %vm14892_vm3, %v6128_v38, %v6124_v60  ;;  %v6352_v45 = vmul.f32 %v6351_v63, %v14694_v12  ;;  %v6415_v26 = vmul.f32 2.1237322e-06, %v14926_v57  ;;  %v5984_v29 = vadd.f32 1.1283791, %v5983_v52  ;;  %6737 = vmatpush.msrb.mxu1 %v7891_v34  ;;  %6783 = vmatpush.msrb.mxu0 %v7923_v46  ;;  %v7908_v49 = vld [vmem:[%s15345_s12 + $0xb68] sm:$0xff]  ;;  %v7921_v63 = vld [vmem:[%s15345_s12 + $0xbd0] sm:$0xff] }
 0xe2f   : > { %v14949_v4 = vadd.f32 %v5709_v6, %v15518_v11  ;;  %v5998_v27 = vsub.f32 1.0, %v14914_v23  ;;  %8052 = vrcp.f32 %v14932_v28  ;;  %v6341_v22 = vmul.f32 %v6340_v30, %v14694_v12  ;;  %6711 = vmatpush.msrb.mxu2 %v7878_v40  ;;  %6757 = vmatpush.msrb.mxu3 %v7910_v37  ;;  %v7889_v30 = vld [vmem:[%s15345_s12 + $0xad0] sm:$0xff]  ;;  %v7907_v40 = vld [vmem:[%s15345_s12 + $0xb60] sm:$0xff]  ;;  %v7920_v34 = vld [vmem:[%s15345_s12 + $0xbc8] sm:$0xff] }
 0xe30   : > { %v14971_v54 = vmul.f32 %v14643_v50, %v14508_v56  ;;  %v14974_v52 = vmul.f32 %v6169_v13, %v14636_v1  ;;  %v6005_v60 = vand.u32 2147483647, %v14778_v31  ;;  %v6353_v23 = vadd.f32 0.4994258, %v6352_v45  ;;  %v5755_v13 = vpop.f32.mrf.mxu3  ;;  %6738 = vmatpush.msrb.mxu1 %v7890_v10  ;;  %6784 = vmatpush.msrb.mxu0 %v7922_v9  ;;  %v7874_v46 = vld [vmem:[%s15345_s12 + $0xa58] sm:$0xff] }
 0xe31   : > { %v14984_v6 = vmul.f32 %v6249_v17, %v14656_v15  ;;  %v14986_v56 = vmul.f32 %v6129_v25, %v6105_v7  ;;  %v6416_v1 = vadd.f32 0.00028619796, %v6415_v26  ;;  %v6426_v50 = vmul.f32 3.8918573e-05, %v14926_v57  ;;  %6712 = vmatpush.msrb.mxu2 %v7877_v21  ;;  %6758 = vmatpush.msrb.mxu3 %v7909_v42  ;;  %v7875_v17 = vld [vmem:[%s15345_s12 + $0xa60] sm:$0xff] }
 0xe32   : > { %v14993_v0 = vmul.f32 %v6458_v51, %v14534_v44  ;;  %v6063_v14 = vmul.f32 %v6062_v24, %v14673_v20  ;;  %v6354_v15 = vmul.f32 %v6353_v23, %v14694_v12  ;;  %v14998_v38 = vmul.f32 0.70710677, %v14949_v4  ;;  %v7888_v44 = vld [vmem:[%s15345_s12 + $0xac8] sm:$0xff]  ;;  %6739 = vmatpush.msrb.mxu1 %v7889_v30  ;;  %6785 = vmatpush.msrb.mxu0 %v7921_v63  ;;  %v7919_v42 = vld [vmem:[%s15345_s12 + $0xbc0] sm:$0xff]  ;;  %v7886_v30 = vld [vmem:[%s15345_s12 + $0xab8] sm:$0xff] }
 0xe33   : > { %v5999_v20 = vmul.f32 %v14890_v3, %v5998_v27  ;;  %v6342_v51 = vadd.f32 0.18741608, %v6341_v22  ;;  %v6417_v7 = vmul.f32 %v6416_v1, %v14926_v57  ;;  %v6427_v24 = vadd.f32 0.001143296, %v6426_v50  ;;  %6713 = vmatpush.msrb.mxu2 %v7876_v32  ;;  %6759 = vmatpush.msrb.mxu3 %v7908_v49  ;;  %v7906_v22 = vld [vmem:[%s15345_s12 + $0xb58] sm:$0xff]  ;;  %v7873_v32 = vld [vmem:[%s15345_s12 + $0xa50] sm:$0xff] }
 0xe34   : > { %v15018_v37 = vmul.f32 %v5984_v29, %v14554_v61  ;;  %v15020_v25 = vadd.f32 1.0, %v6354_v15  ;;  %v6293_v45 = vmul.f32 %v14998_v38, %v14998_v38  ;;  %v15519_v26 = vperm.slane %v14047_v35, 6  ;;  %v7887_v61 = vld [vmem:[%s15345_s12 + $0xac0] sm:$0xff]  ;;  %6740 = vmatpush.msrb.mxu1 %v7888_v44  ;;  %6786 = vmatpush.msrb.mxu0 %v7920_v34  ;;  %v7905_v50 = vld [vmem:[%s15345_s12 + $0xb50] sm:$0xff]  ;;  %v7872_v49 = vld [vmem:[%s15345_s12 + $0xa48] sm:$0xff] }
 0xe35   : > { %v15034_v21 = vpop.eup %8052  ;;  %v7790_v10 = vclamps-f32 %v14986_v56, 1.0  ;;  %v6007_v29 = vand.u32 2147483648, %v14778_v31  ;;  %v6418_v27 = vadd.f32 0.0036580483, %v6417_v7  ;;  %v6428_v35 = vmul.f32 %v6427_v24, %v14926_v57  ;;  %6714 = vmatpush.msrb.mxu2 %v7875_v17  ;;  %6760 = vmatpush.msrb.mxu3 %v7907_v40  ;;  %v7885_v7 = vld [vmem:[%s15345_s12 + $0xab0] sm:$0xff]  ;;  %v7904_v24 = vld [vmem:[%s15345_s12 + $0xb48] sm:$0xff] }
 0xe36   : > { %v15026_v11 = vadd.f32 %v5755_v13, %v15519_v26  ;;  %vm6001_vm4 = vweird.f32 %v14778_v31  ;;  %vm15046_vm5 = vcmp.eq.f32.partialorder %v6005_v60, 8.507059e+37  ;;  %v6077_v23 = vmul.f32 %v15034_v21, %v14932_v28  ;;  %6741 = vmatpush.msrb.mxu1 %v7887_v61  ;;  %v7918_v13 = vld [vmem:[%s15345_s12 + $0xbb8] sm:$0xff]  ;;  %6787 = vmatpush.msrb.mxu0 %v7919_v42  ;;  %v7917_v26 = vld [vmem:[%s15345_s12 + $0xbb0] sm:$0xff]  ;;  %v7871_v31 = vld [vmem:[%s15345_s12 + $0xa40] sm:$0xff] }
 0xe37   : > { %8054 = vrcp.f32 %v15020_v25  ;;  %v15060_v60 = vadd.f32 %v14890_v3, %v5999_v20  ;;  %vm6002_vm0 = vweird.f32 %v14890_v3  ;;  %v15063_v56 = vadd.f32 1.1283791, %v6063_v14  ;;  %6715 = vmatpush.msrb.mxu2 %v7874_v46  ;;  %6761 = vmatpush.msrb.mxu3 %v7906_v22 }
 0xe38   : > { %v6343_v1 = vmul.f32 %v6342_v51, %v14694_v12  ;;  %v6078_v15 = vsub.f32 1.0, %v6077_v23  ;;  %v6429_v63 = vadd.f32 0.014752088, %v6428_v35  ;;  %v15075_v14 = vmin.f32 %v6293_v45, 16.0  ;;  %6704 = vmatmul.f32.vlgmr.msra.gmra.mxu0 %v14437_v62  ;;  %vm15095_vm6 = vmor %vm6001_vm4, %vm6002_vm0  ;;  %6742 = vmatpush.msrb.mxu1 %v7886_v30  ;;  %v7903_v35 = vld [vmem:[%s15345_s12 + $0xb40] sm:$0xff] }
 0xe39   : > { %v15078_v12 = vmul.f32 0.70710677, %v15026_v11  ;;  %v15080_v17 = vadd.f32 1.0, %v7790_v10  ;;  %v6008_v44 = vor.u32 1.1754944e-38, %v6007_v29  ;;  %v6085_v20 = vand.u32 2147483647, %v14932_v28  ;;  %6716 = vmatpush.msrb.mxu2 %v7873_v32  ;;  %6762 = vmatpush.msrb.mxu3 %v7905_v50 }
 0xe3a   : > { %v6419_v51 = vmul.f32 %v6418_v27, %v14926_v57  ;;  %vm6081_vm7 = vweird.f32 %v14932_v28  ;;  %v6430_v62 = vmul.f32 %v6429_v63, %v14926_v57  ;;  %v6295_v34 = vmul.f32 2.1237322e-06, %v15075_v14  ;;  %6788 = vmatpush.msrb.mxu0 %v7918_v13  ;;  %v7884_v27 = vld [vmem:[%s15345_s12 + $0xaa8] sm:$0xff]  ;;  %6743 = vmatpush.msrb.mxu1 %v7885_v7  ;;  %v7870_v7 = vld [vmem:[%s15345_s12 + $0xa38] sm:$0xff] }
 0xe3b   : > { %v6306_v45 = vmul.f32 3.8918573e-05, %v15075_v14  ;;  %v6004_v46 = vsel %vm15095_vm6, %v14890_v3, %v15060_v60  ;;  %v6087_v61 = vand.u32 2147483648, %v14932_v28  ;;  %v15114_v10 = vadd.f32 1.1283791, %v6343_v1  ;;  %6717 = vmatpush.msrb.mxu2 %v7872_v49  ;;  %v7916_v3 = vld [vmem:[%s15345_s12 + $0xba8] sm:$0xff]  ;;  %6763 = vmatpush.msrb.mxu3 %v7904_v24 }
 0xe3c   : > { %v6373_v29 = vmul.f32 %v15078_v12, %v15078_v12  ;;  %v6079_v42 = vmul.f32 %v15034_v21, %v6078_v15  ;;  %v6431_v23 = vadd.f32 0.112945676, %v6430_v62  ;;  %v6296_v32 = vadd.f32 0.00028619796, %v6295_v34  ;;  %6789 = vmatpush.msrb.mxu0 %v7917_v26  ;;  %6744 = vmatpush.msrb.mxu1 %v7884_v27  ;;  %v7883_v24 = vld [vmem:[%s15345_s12 + $0xaa0] sm:$0xff] }
 0xe3d   : > { %v15127_v22 = vpop.eup %8054  ;;  %v6307_v30 = vadd.f32 0.001143296, %v6306_v45  ;;  %v6367_v1 = vand.u32 2147483648, %v15020_v25  ;;  %v6420_v50 = vadd.f32 0.05243302, %v6419_v51  ;;  %6718 = vmatpush.msrb.mxu2 %v7871_v31  ;;  %v7902_v51 = vld [vmem:[%s15345_s12 + $0xb38] sm:$0xff]  ;;  %v15150_v62 = vsel %vm15046_vm5, %v6008_v44, %v6004_v46  ;;  %6764 = vmatpush.msrb.mxu3 %v7903_v35 }
 0xe3e   : > { %v6357_v60 = vmul.f32 %v15127_v22, %v15020_v25  ;;  %v15133_v13 = vmin.f32 %v6373_v29, 16.0  ;;  %v6432_v49 = vmul.f32 %v6431_v23, %v14926_v57  ;;  %v6297_v63 = vmul.f32 %v6296_v32, %v15075_v14  ;;  %6790 = vmatpush.msrb.mxu0 %v7916_v3  ;;  %v7915_v26 = vld [vmem:[%s15345_s12 + $0xba0] sm:$0xff]  ;;  %v7869_v31 = vld [vmem:[%s15345_s12 + $0xa30] sm:$0xff]  ;;  %6635 = vmatmul.f32.vlgmr.msra.gmra.mxu2 %v14488_v41  ;;  %v7914_v23 = vld [vmem:[%s15345_s12 + $0xb98] sm:$0xff] }
 0xe3f   : > { %v6308_v15 = vmul.f32 %v6307_v30, %v15075_v14  ;;  %v7792_v40 = vclamps-f32 %v14539_v8, 1.0  ;;  %vm6082_vm8 = vweird.f32 %v15034_v21  ;;  %v7882_v8 = vld [vmem:[%s15345_s12 + $0xa98] sm:$0xff]  ;;  %v15164_v9 = vadd.f32 %v15034_v21, %v6079_v42  ;;  %6681 = vmatmul.f32.vlgmr.msra.gmra.mxu3 %v14516_v53  ;;  %6719 = vmatpush.msrb.mxu2 %v7870_v7  ;;  %v7901_v42 = vld [vmem:[%s15345_s12 + $0xb30] sm:$0xff]  ;;  %v7868_v30 = vld [vmem:[%s15345_s12 + $0xa28] sm:$0xff] }
 0xe40   : > { %v6358_v34 = vsub.f32 1.0, %v6357_v60  ;;  %v6375_v45 = vmul.f32 2.1237322e-06, %v15133_v13  ;;  %v6433_v44 = vadd.f32 0.4994258, %v6432_v49  ;;  %vm6362_vm9 = vweird.f32 %v15127_v22  ;;  %6745 = vmatpush.msrb.mxu1 %v7883_v24  ;;  %6765 = vmatpush.msrb.mxu3 %v7902_v51  ;;  %v7881_v60 = vld [vmem:[%s15345_s12 + $0xa90] sm:$0xff]  ;;  %vm15191_vm11 = vmor %vm6081_vm7, %vm6082_vm8 }
 0xe41   : > { %v6298_v46 = vadd.f32 0.0036580483, %v6297_v63  ;;  %v6309_v29 = vadd.f32 0.014752088, %v6308_v15  ;;  %v6386_v3 = vmul.f32 3.8918573e-05, %v15133_v13  ;;  %vm6361_vm10 = vweird.f32 %v15020_v25  ;;  %6791 = vmatpush.msrb.mxu0 %v7915_v26  ;;  %6720 = vmatpush.msrb.mxu2 %v7869_v31 }
 0xe42   : > { %v6359_v27 = vmul.f32 %v15127_v22, %v6358_v34  ;;  %v6376_v35 = vadd.f32 0.00028619796, %v6375_v45  ;;  %v6365_v41 = vand.u32 2147483647, %v15020_v25  ;;  %v6434_v53 = vmul.f32 %v6433_v44, %v14926_v57  ;;  %6746 = vmatpush.msrb.mxu1 %v7882_v8  ;;  %v7900_v51 = vld [vmem:[%s15345_s12 + $0xb28] sm:$0xff]  ;;  %v7913_v34 = vld [vmem:[%s15345_s12 + $0xb90] sm:$0xff]  ;;  %vm15211_vm12 = vmor %vm6361_vm10, %vm6362_vm9  ;;  %6766 = vmatpush.msrb.mxu3 %v7901_v42 }
 0xe43   : > { %v6310_v32 = vmul.f32 %v6309_v29, %v15075_v14  ;;  %v6368_v15 = vor.u32 1.1754944e-38, %v6367_v1  ;;  %v6421_v7 = vmul.f32 %v6420_v50, %v14926_v57  ;;  %v6387_v24 = vadd.f32 0.001143296, %v6386_v3  ;;  %6792 = vmatpush.msrb.mxu0 %v7914_v23  ;;  %v7867_v8 = vld [vmem:[%s15345_s12 + $0xa20] sm:$0xff]  ;;  %6721 = vmatpush.msrb.mxu2 %v7868_v30  ;;  %v7898_v42 = vld [vmem:[%s15345_s12 + $0xb18] sm:$0xff] }
 0xe44   : > { %v6360_v63 = vadd.f32 %v15127_v22, %v6359_v27  ;;  %v6084_v45 = vsel %vm15191_vm11, %v15034_v21, %v15164_v9  ;;  %v15215_v50 = vadd.f32 1.0, %v6434_v53  ;;  %v6299_v26 = vmul.f32 %v6298_v46, %v15075_v14  ;;  %v7880_v21 = vld [vmem:[%s15345_s12 + $0xa88] sm:$0xff]  ;;  %6747 = vmatpush.msrb.mxu1 %v7881_v60  ;;  %v7899_v29 = vld [vmem:[%s15345_s12 + $0xb20] sm:$0xff]  ;;  %6767 = vmatpush.msrb.mxu3 %v7900_v51 }
 0xe45   : > { %v6311_v31 = vadd.f32 0.112945676, %v6310_v32  ;;  %v6377_v9 = vmul.f32 %v6376_v35, %v15133_v13  ;;  %v6388_v44 = vmul.f32 %v6387_v24, %v15133_v13  ;;  %v6462_v46 = vadd.f32 1.0, %v7792_v40  ;;  %v7912_v27 = vld [vmem:[%s15345_s12 + $0xb88] sm:$0xff]  ;;  %6793 = vmatpush.msrb.mxu0 %v7913_v34  ;;  %v7866_v40 = vld [vmem:[%s15345_s12 + $0xa18] sm:$0xff]  ;;  %v7879_v35 = vld [vmem:[%s15345_s12 + $0xa80] sm:$0xff]  ;;  %6722 = vmatpush.msrb.mxu2 %v7867_v8 }
 0xe46   : > { %v6364_v25 = vsel %vm15211_vm12, %v15127_v22, %v6360_v63  ;;  %vm6086_vm13 = vcmp.eq.f32.partialorder %v6085_v20, 8.507059e+37  ;;  %v6088_v22 = vor.u32 1.1754944e-38, %v6087_v61  ;;  %vm6366_vm14 = vcmp.eq.f32.partialorder %v6365_v41, 8.507059e+37  ;;  %6748 = vmatpush.msrb.mxu1 %v7880_v21  ;;  %6768 = vmatpush.msrb.mxu3 %v7899_v29  ;;  %v7896_v34 = vld [vmem:[%s15345_s12 + $0xb08] sm:$0xff]  ;;  %v7863_v8 = vld [vmem:[%s15345_s12 + $0xa00] sm:$0xff] }
 0xe47   : > { %8056 = vrcp.f32 %v15215_v50  ;;  %v6010_v3 = vmul.f32 %v15150_v62, %v15018_v37  ;;  %v6345_v28 = vmul.f32 %v15114_v10, %v14653_v58  ;;  %v6369_v20 = vsel %vm6366_vm14, %v6368_v15, %v6364_v25  ;;  %6794 = vmatpush.msrb.mxu0 %v7912_v27  ;;  %v7911_v58 = vld [vmem:[%s15345_s12 + $0xb80] sm:$0xff]  ;;  %v7865_v37 = vld [vmem:[%s15345_s12 + $0xa10] sm:$0xff]  ;;  %6723 = vmatpush.msrb.mxu2 %v7866_v40 }
 0xe48   : > { %v6422_v61 = vadd.f32 0.18741608, %v6421_v7  ;;  %v6089_v23 = vsel %vm6086_vm13, %v6088_v22, %v6084_v45  ;;  %v6312_v41 = vmul.f32 %v6311_v31, %v15075_v14  ;;  %v6389_v53 = vadd.f32 0.014752088, %v6388_v44  ;;  %6749 = vmatpush.msrb.mxu1 %v7879_v35  ;;  %6769 = vmatpush.msrb.mxu3 %v7898_v42 }
 0xe49   : > { %v6478_v32 = vmul.f32 %v6462_v46, %v14208_v5  ;;  %v6065_v10 = vmul.f32 %v15063_v56, %v14647_v39  ;;  %v6300_v62 = vadd.f32 0.05243302, %v6299_v26  ;;  %v6378_v30 = vadd.f32 0.0036580483, %v6377_v9  ;;  %v7897_v5 = vld [vmem:[%s15345_s12 + $0xb10] sm:$0xff]  ;;  %v7864_v39 = vld [vmem:[%s15345_s12 + $0xa08] sm:$0xff]  ;;  %6795 = vmatpush.msrb.mxu0 %v7911_v58  ;;  %6724 = vmatpush.msrb.mxu2 %v7865_v37 }
 0xe4a   : > { %v7794_v60 = vclamps-f32 %v14971_v54, 1.0  ;;  %v6370_v49 = vmul.f32 %v6369_v20, %v6345_v28  ;;  %v6313_v63 = vadd.f32 0.4994258, %v6312_v41  ;;  %v6390_v15 = vmul.f32 %v6389_v53, %v15133_v13  ;;  %6770 = vmatpush.msrb.mxu3 %v7897_v5 }
 0xe4b   : > { %6661 = vmatmul.f32.gmra.mxu1 %v6478_v32  ;;  %v7791_v7 = vclamps-f32 %v14974_v52, 1.0  ;;  %v7787_v56 = vclamps-f32 %v6010_v3, 1.0  ;;  %v6090_v54 = vmul.f32 %v6089_v23, %v6065_v10  ;;  %v7793_v51 = vclamps-f32 %v14984_v6, 1.0  ;;  %6725 = vmatpush.msrb.mxu2 %v7864_v39 }
 0xe4c   : > { %v6464_v24 = vadd.f32 1.0, %v7794_v60  ;;  %v6423_v1 = vmul.f32 %v6422_v61, %v14926_v57  ;;  %v6314_v52 = vmul.f32 %v6313_v63, %v15075_v14  ;;  %v6391_v26 = vadd.f32 0.112945676, %v6390_v15  ;;  %v7895_v57 = vld [vmem:[%s15345_s12 + $0xb00] sm:$0xff]  ;;  %6771 = vmatpush.msrb.mxu3 %v7896_v34 }
 0xe4d   : > { %v8057_v45 = vpop.eup %8056  ;;  %v6461_v31 = vadd.f32 1.0, %v7791_v7  ;;  %v6301_v21 = vmul.f32 %v6300_v62, %v15075_v14  ;;  %v6379_v25 = vmul.f32 %v6378_v30, %v15133_v13  ;;  %v7796_v27 = vclamps-f32 %v6370_v49, 1.0  ;;  %6726 = vmatpush.msrb.mxu2 %v7863_v8 }
 0xe4e   : > { %v6437_v6 = vmul.f32 %v8057_v45, %v15215_v50  ;;  %v6480_v9 = vmul.f32 %v6464_v24, %v14210_v59  ;;  %v15288_v44 = vadd.f32 1.0, %v6314_v52  ;;  %v6392_v46 = vmul.f32 %v6391_v26, %v15133_v13  ;;  %6772 = vmatpush.msrb.mxu3 %v7895_v57 }
 0xe4f   : > { %v6477_v29 = vmul.f32 %v6461_v31, %v14310_v47  ;;  %v6457_v22 = vadd.f32 1.0, %v7787_v56  ;;  %v7789_v40 = vclamps-f32 %v6090_v54, 1.0  ;;  %v6463_v3 = vadd.f32 1.0, %v7793_v51 }
 0xe50   : > { %v6438_v35 = vsub.f32 1.0, %v6437_v6  ;;  %6707 = vmatmul.f32.gmra.mxu0 %v6480_v9  ;;  %v6424_v59 = vadd.f32 1.1283791, %v6423_v1  ;;  %v6445_v28 = vand.u32 2147483647, %v15215_v50  ;;  %v6447_v20 = vand.u32 2147483648, %v15215_v50 }
 0xe51   : > { %8058 = vrcp.f32 %v15288_v44  ;;  %6638 = vmatmul.f32.gmra.mxu2 %v6477_v29  ;;  %vm6442_vm15 = vweird.f32 %v8057_v45  ;;  %v6393_v47 = vadd.f32 0.4994258, %v6392_v46  ;;  %v6479_v42 = vmul.f32 %v6463_v3, %v14499_v18 }
 0xe52   : > { %v6439_v61 = vmul.f32 %v8057_v45, %v6438_v35  ;;  %v6476_v23 = vmul.f32 %v15080_v17, %v14590_v48  ;;  %v6302_v41 = vadd.f32 0.18741608, %v6301_v21  ;;  %v6380_v53 = vadd.f32 0.05243302, %v6379_v25 }
 0xe53   : > { %6750 = vmatmul.f32.vlgmr.msrb.gmra.mxu1 %v14993_v0  ;;  %v6466_v32 = vadd.f32 1.0, %v7796_v27  ;;  %v6459_v58 = vadd.f32 1.0, %v7789_v40  ;;  %vm6441_vm1 = vweird.f32 %v15215_v50  ;;  %v6394_v10 = vmul.f32 %v6393_v47, %v15133_v13  ;;  %6684 = vmatmul.f32.gmra.mxu3 %v6479_v42 }
 0xe54   : > { %v6440_v37 = vadd.f32 %v8057_v45, %v6439_v61  ;;  %v6473_v62 = vmul.f32 %v6457_v22, %v14661_v55  ;;  %v5787_v30 = vmul.f32 0.5, %v14621_v36  ;;  %v5794_v18 = vmul.f32 0.5, %v14609_v33  ;;  %vm6443_vm2 = vmor %vm6441_vm1, %vm6442_vm15 }
 0xe55   : > { %v6448_v48 = vor.u32 1.1754944e-38, %v6447_v20  ;;  %v6425_v17 = vmul.f32 %v6424_v59, %v14870_v19  ;;  %vm6446_vm3 = vcmp.eq.f32.partialorder %v6445_v28, 8.507059e+37  ;;  %v6395_v60 = vadd.f32 1.0, %v6394_v10 }
 0xe56   : > { %v6444_v0 = vsel %vm6443_vm2, %v8057_v45, %v6440_v37  ;;  %v6303_v50 = vmul.f32 %v6302_v41, %v15075_v14  ;;  %v6381_v63 = vmul.f32 %v6380_v53, %v15133_v13  ;;  %v6482_v15 = vmul.f32 %v6466_v32, %v5794_v18 }
 0xe57   : > { %v8059_v5 = vpop.eup %8058  ;;  %v6449_v49 = vsel %vm6446_vm3, %v6448_v48, %v6444_v0  ;;  %v6475_v55 = vmul.f32 %v6459_v58, %v5787_v30  ;;  %8060 = vrcp.f32 %v6395_v60  ;;  %v5796_v19 = vmul.f32 0.5, %v14801_v43 }
 0xe58   : > { %v6450_v7 = vmul.f32 %v6449_v49, %v6425_v17  ;;  %v6317_v36 = vmul.f32 %v8059_v5, %v15288_v44  ;;  %6796 = vmatmul.f32.vlgmr.msrb.gmra.mxu0 %v6476_v23  ;;  %v6304_v56 = vadd.f32 1.1283791, %v6303_v50  ;;  %v6327_v54 = vand.u32 2147483648, %v15288_v44 }
 0xe59   : > { %6727 = vmatmul.f32.vlgmr.msrb.gmra.mxu2 %v6473_v62  ;;  %v6382_v24 = vadd.f32 0.18741608, %v6381_v63  ;;  %vm6322_vm4 = vweird.f32 %v8059_v5  ;;  %v6325_v51 = vand.u32 2147483647, %v15288_v44  ;;  %vm6321_vm5 = vweird.f32 %v15288_v44 }
 0xe5a   : > { %v6318_v33 = vsub.f32 1.0, %v6317_v36  ;;  %v7798_v39 = vclamps-f32 %v6450_v7, 1.0  ;;  %vm6323_vm0 = vmor %vm6321_vm5, %vm6322_vm4  ;;  %v6328_v26 = vor.u32 1.1754944e-38, %v6327_v54  ;;  %v6305_v8 = vmul.f32 %v6304_v56, %v14998_v38 }
 0xe5b   : > { %6753 = vmatmul.f32.gmra.mxu1 %v6482_v15  ;;  %6773 = vmatmul.f32.vlgmr.msrb.gmra.mxu3 %v6475_v55  ;;  %v6383_v43 = vmul.f32 %v6382_v24, %v15133_v13  ;;  %vm6326_vm6 = vcmp.eq.f32.partialorder %v6325_v51, 8.507059e+37  ;;  %v6407_v57 = vand.u32 2147483648, %v6395_v60  ;;  %v6405_v27 = vand.u32 2147483647, %v6395_v60  ;;  %v7953_v15 = vld [vmem:[%s15347_s14 + $0x2] ss:$0 sm:$0xff] }
 0xe5c   : > { %v6319_v14 = vmul.f32 %v8059_v5, %v6318_v33  ;;  %v6468_v34 = vadd.f32 1.0, %v7798_v39  ;;  %vm6401_vm8 = vweird.f32 %v6395_v60  ;;  %v5793_v40 = vmul.f32 0.5, %v14949_v4  ;;  %v7952_v4 = vld [vmem:[%s15346_s13 + $0x2] ss:$0 sm:$0xff] }
 0xe5d   : > { %v8061_v45 = vpop.eup %8060  ;;  %v6384_v46 = vadd.f32 1.1283791, %v6383_v43  ;;  %v6408_v13 = vor.u32 1.1754944e-38, %v6407_v57  ;;  %vm6406_vm10 = vcmp.eq.f32.partialorder %v6405_v27, 8.507059e+37  ;;  %v5795_v47 = vmul.f32 0.5, %v15026_v11 }
 0xe5e   : > { %v6320_v1 = vadd.f32 %v8059_v5, %v6319_v14  ;;  %v6484_v52 = vmul.f32 %v6468_v34, %v5796_v19  ;;  %v6397_v31 = vmul.f32 %v8061_v45, %v6395_v60  ;;  %vm6402_vm7 = vweird.f32 %v8061_v45 }
 0xe5f   : > { %vm6403_vm9 = vmor %vm6401_vm8, %vm6402_vm7  ;;  %v6385_v38 = vmul.f32 %v6384_v46, %v15078_v12 }
 0xe60   : > { %v6324_v6 = vsel %vm6323_vm0, %v8059_v5, %v6320_v1  ;;  %6799 = vmatmul.f32.gmra.mxu0 %v6484_v52  ;;  %v6398_v25 = vsub.f32 1.0, %v6397_v31 }
 0xe61   : > { %v6329_v21 = vsel %vm6326_vm6, %v6328_v26, %v6324_v6 }
 0xe62   : > { %v6330_v9 = vmul.f32 %v6329_v21, %v6305_v8  ;;  %v6399_v29 = vmul.f32 %v8061_v45, %v6398_v25 }
 0xe64   : > { %v7795_v44 = vclamps-f32 %v6330_v9, 1.0  ;;  %v6400_v22 = vadd.f32 %v8061_v45, %v6399_v29 }
 0xe66   : > { %v6465_v35 = vadd.f32 1.0, %v7795_v44  ;;  %v6404_v3 = vsel %vm6403_vm9, %v8061_v45, %v6400_v22 }
 0xe67   : > { %v6409_v59 = vsel %vm6406_vm10, %v6408_v13, %v6404_v3 }
 0xe68   : > { %v6481_v28 = vmul.f32 %v6465_v35, %v5793_v40  ;;  %v6410_v20 = vmul.f32 %v6409_v59, %v6385_v38 }
 0xe6a   : > { %6730 = vmatmul.f32.gmra.mxu2 %v6481_v28  ;;  %v7797_v61 = vclamps-f32 %v6410_v20, 1.0 }
 0xe6c   : > { %v6467_v42 = vadd.f32 1.0, %v7797_v61 }
 0xe6e   : > { %v6483_v23 = vmul.f32 %v6467_v42, %v5795_v47 }
 0xe70   : > { %6776 = vmatmul.f32.gmra.mxu3 %v6483_v23 }
 0xea5   : > { %v6659_v41 = vpop.f32.mrf.mxu1 }
 0xeb5   : > { %v6705_v12 = vpop.f32.mrf.mxu0 }
 0xec1   : > { %v6636_v53 = vpop.f32.mrf.mxu2 }
 0xec2   : > { %v6682_v32 = vpop.f32.mrf.mxu3  ;;  %v6637_v58 = vadd.f32 %v7952_v4, %v6636_v53 }
 0xec4   : > { %v6660_v37 = vadd.f32 %v6659_v41, %v6637_v58 }
 0xec6   : > { %v6683_v30 = vadd.f32 %v6682_v32, %v6660_v37 }
 0xec8   : > { %v6662_v10 = vpop.f32.mrf.mxu1  ;;  %v6706_v11 = vadd.f32 %v6705_v12, %v6683_v30 }
 0xecd   : > { %v6708_v48 = vpop.f32.mrf.mxu0 }
 0xed0   : > { %v6751_v60 = vpop.f32.mrf.mxu1 }
 0xed4   : > { %v6639_v62 = vpop.f32.mrf.mxu2 }
 0xed5   : > { %v6640_v49 = vadd.f32 %v7952_v4, %v6639_v62  ;;  %v6797_v55 = vpop.f32.mrf.mxu0 }
 0xed6   : > { %v6685_v18 = vpop.f32.mrf.mxu3 }
 0xed7   : > { %v6663_v36 = vadd.f32 %v6662_v10, %v6640_v49 }
 0xed8   : > { %v6754_v14 = vpop.f32.mrf.mxu1 }
 0xed9   : > { %v6686_v19 = vadd.f32 %v6685_v18, %v6663_v36 }
 0xedb   : > { %v6709_v56 = vadd.f32 %v6708_v48, %v6686_v19 }
 0xedc   : > { %v6728_v17 = vpop.f32.mrf.mxu2 }
 0xedd   : > { %v6729_v0 = vadd.f32 %v6728_v17, %v6706_v11  ;;  %v6800_v1 = vpop.f32.mrf.mxu0 }
 0xede   : > { %v6774_v50 = vpop.f32.mrf.mxu3 }
 0xedf   : > { %v6752_v5 = vadd.f32 %v6751_v60, %v6729_v0 }
 0xee1   : > { %v6775_v63 = vadd.f32 %v6774_v50, %v6752_v5 }
 0xee3   : > { %v6798_v7 = vadd.f32 %v6797_v55, %v6775_v63 }
 0xee5   : > { %v6808_v33 = vmul.f32 %v7953_v15, %v6798_v7 }
 0xee7   : > { %v6810_v39 = vadd.f32 %v6808_v33, %v13152_v16 }
 0xee9   : > { %6812 = vst [vmem:[%s511_s21] sm:$0xff] %v6810_v39 }
 0xeed   : > { %v6731_v54 = vpop.f32.mrf.mxu2 }
 0xeee   : > { %v6732_v24 = vadd.f32 %v6731_v54, %v6709_v56 }
 0xef0   : > { %v6755_v51 = vadd.f32 %v6754_v14, %v6732_v24 }
 0xef3   : > { %v6777_v34 = vpop.f32.mrf.mxu3 }
 0xef4   : > { %v6778_v45 = vadd.f32 %v6777_v34, %v6755_v51 }
 0xef6   : > { %v6801_v52 = vadd.f32 %v6800_v1, %v6778_v45 }
 0xef8   : > { %v6809_v26 = vmul.f32 %v7953_v15, %v6801_v52 }
 0xefa   : > { %v6811_v43 = vadd.f32 %v6809_v26, %v13149_v2 }
 0xefc   : > { %6813 = vst [vmem:[%s511_s21 + $0x8] sm:$0xff] %v6811_v43 }
 0xefd PF: > { %s25_s18 = sadd.s32 1, %s8134_s18  }
 0xefe   : > { %p22_p4 = scmp.ge.s32.totalorder %s25_s18, 4  }
 0xf00   :  { %24 = sbr.rel (!%p22_p4) target bundleno = 1 (0x1), region = 152 }

</bundles_post_ra>
